<compile_context>
chip_gen: v6e
topology: v6e:2x2x1
jax: 0.10.0
libtpu: 0.0.40
codegen_flags: <defaults>
</compile_context>

<pallas_src>
import functools
import math

import jax
import jax.numpy as jnp
from jax.experimental import pallas as pl
from jax.experimental.pallas import tpu as pltpu  # noqa: F401  (kept for CompilerParams if grids return)


CPAD = 128    # every Pallas-side channel axis is padded to one full lane tile
KALIGN = 128  # contraction-dim alignment (one lane tile; bump to 256 on v6e/v7x if desired)


def _round_up(a, b):
    return ((a + b - 1) // b) * b


# ----------------------------------------------------------------------------
# Pallas kernel: fused matmul + bias + activation  (the conv hot path)
# Single invocation, whole operands in VMEM (everything here is < 0.6 MB).
# ----------------------------------------------------------------------------
def _matmul_bias_act_kernel(x_ref, w_ref, b_ref, o_ref, *, act):
    # x_ref: (Mp, Kp) bf16, w_ref: (Kp, N) bf16, b_ref: (1, N) f32.
    acc = jnp.dot(x_ref[...], w_ref[...], preferred_element_type=jnp.float32)
    acc = acc + b_ref[...]
    if act == "relu":
        acc = jnp.maximum(acc, 0.0)
    elif act == "sigmoid":
        # Single EUP op; exact [0, 1] range, no clamp needed.
        acc = 0.5 * jnp.tanh(0.5 * acc) + 0.5
    o_ref[...] = acc.astype(o_ref.dtype)


def matmul_bias_act(x, w, b, act="none"):
    """x: (M, Kp) bf16, w: (Kp, N) bf16, b: (1, N) f32 -> act(x @ w + b)[:M]."""
    M, _ = x.shape
    N = w.shape[1]
    Mp = _round_up(M, 16)                    # bf16 sublane pack; minimal zero rows
    if Mp != M:
        x = jnp.pad(x, ((0, Mp - M), (0, 0)))
    out = pl.pallas_call(
        functools.partial(_matmul_bias_act_kernel, act=act),
        out_shape=jax.ShapeDtypeStruct((Mp, N), jnp.float32),
    )(x, w, b)
    return out[:M] if Mp != M else out


# ----------------------------------------------------------------------------
# Pallas kernel: 2x2 max-pool with in-window argmax indices (int32)
# Input is the free host reshape (B*Hp, 2, Wp, 2*C): dim1 = dh, lane half = dw.
# ----------------------------------------------------------------------------
def _maxpool_kernel(x_ref, val_ref, idx_ref):
    C = val_ref.shape[-1]
    best = x_ref[:, 0, :, 0:C]                       # window position p = 0
    idx = jnp.zeros(best.shape, dtype=jnp.int32)
    for dh in range(2):
        for dw in range(2):
            p = dh * 2 + dw                          # row-major, like PyTorch
            if p == 0:
                continue
            v = x_ref[:, dh, :, dw * C:(dw + 1) * C]
            upd = v > best                           # strict '>': earliest wins
            best = jnp.where(upd, v, best)
            idx = jnp.where(upd, p, idx)
    val_ref[...] = best
    idx_ref[...] = idx


def maxpool2x2(x):
    """x: (B, H, W, CPAD), even H/W -> (pooled (B,Hp,Wp,CPAD), idx (B*Hp,Wp,CPAD) i32)."""
    B, H, W, C = x.shape
    Hp, Wp = H // 2, W // 2
    xr = x.reshape(B * Hp, 2, Wp, 2 * C)             # pure reshape: no copy
    val, idx = pl.pallas_call(
        _maxpool_kernel,
        out_shape=(jax.ShapeDtypeStruct((B * Hp, Wp, C), jnp.float32),
                   jax.ShapeDtypeStruct((B * Hp, Wp, C), jnp.int32)),
    )(xr)
    return val.reshape(B, Hp, Wp, C), idx


# ----------------------------------------------------------------------------
# Pallas kernel: max-unpool (place values back into their 2x2 window slot)
# Output is (B*Hp, 2, Wp, 2*C) which host-reshapes (free) to (B, 2Hp, 2Wp, C).
# ----------------------------------------------------------------------------
def _maxunpool_kernel(v_ref, idx_ref, o_ref):
    C = v_ref.shape[-1]
    v = v_ref[...]
    idx = idx_ref[...]
    for dh in range(2):
        for dw in range(2):
            p = dh * 2 + dw
            o_ref[:, dh, :, dw * C:(dw + 1) * C] = jnp.where(idx == p, v, 0.0)


def maxunpool2x2(val, idx):
    """val: (B, Hp, Wp, CPAD), idx: (B*Hp, Wp, CPAD) int32 -> (B, 2Hp, 2Wp, CPAD)."""
    B, Hp, Wp, C = val.shape
    out = pl.pallas_call(
        _maxunpool_kernel,
        out_shape=jax.ShapeDtypeStruct((B * Hp, 2, Wp, 2 * C), jnp.float32),
    )(val.reshape(B * Hp, Wp, C), idx)
    return out.reshape(B, 2 * Hp, 2 * Wp, C)         # pure reshape: no copy


# ----------------------------------------------------------------------------
# Convolution wrappers (bf16 im2col glue + the Pallas matmul kernel)
# ----------------------------------------------------------------------------
def _im2col(x, k, cin, kpad):
    """x: (B, H, W, C>=cin) NHWC -> ((B*Ho*Wo, kpad) bf16, (B, Ho, Wo))."""
    B, H, W, _ = x.shape
    Ho, Wo = H - k + 1, W - k + 1
    xs = x[..., :cin].astype(jnp.bfloat16)           # drop lane pad, cast early
    cols = [xs[:, kh:kh + Ho, kw:kw + Wo, :]
            for kh in range(k) for kw in range(k)]
    patches = jnp.stack(cols, axis=3)                # (B, Ho, Wo, k*k, cin)
    patches = patches.reshape(B * Ho * Wo, k * k * cin)
    kdim = k * k * cin
    if kpad > kdim:
        patches = jnp.pad(patches, ((0, 0), (0, kpad - kdim)))
    return patches, (B, Ho, Wo)


def conv2d(x, layer, act):
    """x: NHWC (channels possibly lane-padded); layer: prepared conv params."""
    cols, (B, Ho, Wo) = _im2col(x, layer["k"], layer["cin"], layer["w"].shape[0])
    out = matmul_bias_act(cols, layer["w"], layer["b"], act=act)   # (M, CPAD)
    return out.reshape(B, Ho, Wo, CPAD)


def conv_transpose2d(x, layer, act):
    """ConvTranspose2d (stride 1) as conv of a (K-1)-zero-padded input."""
    k = layer["k"]
    xpad = jnp.pad(x, ((0, 0), (k - 1, k - 1), (k - 1, k - 1), (0, 0)))
    return conv2d(xpad, layer, act)


def deconv1x1(x, layer, act):
    """ConvTranspose2d on a 1x1 spatial map: a single dense matmul.

    x: (B, 1, 1, CPAD) -> (B, K, K, CPAD).  out[b,i,j,co] = sum_ci x[b,ci]*w[ci,co,i,j] + b[co].
    """
    B = x.shape[0]
    K = layer["k"]
    x2 = x.reshape(B, CPAD).astype(jnp.bfloat16)
    out = matmul_bias_act(x2, layer["w"], layer["b"], act=act)     # (B, K*K*CPAD)
    return out.reshape(B, K, K, CPAD)


# ----------------------------------------------------------------------------
# One-time parameter preparation (hoisted out of the forward pass)
# ----------------------------------------------------------------------------
def _prep_conv(w, b):
    """w: (Cout, Cin, K, K) PyTorch Conv2d layout -> prepared matmul operands."""
    Cout, Cin, K, _ = w.shape
    kdim = K * K * Cin
    kpad = _round_up(kdim, KALIGN)
    wmat = jnp.transpose(w, (2, 3, 1, 0)).reshape(kdim, Cout)      # (kh,kw,ci) x co
    wmat = jnp.pad(wmat, ((0, kpad - kdim), (0, CPAD - Cout))).astype(jnp.bfloat16)
    bias = jnp.pad(b, (0, CPAD - Cout)).reshape(1, CPAD).astype(jnp.float32)
    return {"w": wmat, "b": bias, "k": K, "cin": Cin}


def _prep_deconv(w, b):
    """w: (Cin, Cout, K, K) ConvTranspose2d -> equivalent Conv2d (flip + swap) prep."""
    w_conv = jnp.flip(jnp.transpose(w, (1, 0, 2, 3)), axis=(2, 3))
    return _prep_conv(w_conv, b)


def _prep_deconv1x1(w, b):
    """w: (Cin, Cout, K, K) ConvTranspose2d applied to a 1x1 spatial map."""
    Cin, Cout, K, _ = w.shape
    wt = jnp.transpose(w, (0, 2, 3, 1))                            # (Cin, K, K, Cout)
    wt = jnp.pad(wt, ((0, CPAD - Cin), (0, 0), (0, 0), (0, CPAD - Cout)))
    wmat = wt.reshape(CPAD, K * K * CPAD).astype(jnp.bfloat16)
    bias = jnp.tile(jnp.pad(b, (0, CPAD - Cout)), K * K).reshape(1, K * K * CPAD)
    return {"w": wmat, "b": bias.astype(jnp.float32), "k": K}


def prepare_params(p):
    return {
        "c1": _prep_conv(p["w1"], p["b1"]),
        "c2": _prep_conv(p["w2"], p["b2"]),
        "c3": _prep_conv(p["w3"], p["b3"]),
        "d1": _prep_deconv1x1(p["dw1"], p["db1"]),
        "d2": _prep_deconv(p["dw2"], p["db2"]),
        "d3": _prep_deconv(p["dw3"], p["db3"]),
    }


# ----------------------------------------------------------------------------
# Parameter init (deterministic, xavier_uniform like the PyTorch module)
# ----------------------------------------------------------------------------
def _xavier_uniform(key, shape, fan_in, fan_out):
    bound = math.sqrt(6.0 / (fan_in + fan_out))
    return jax.random.uniform(key, shape, jnp.float32, -bound, bound)


def _bias(key, n, fan_in):
    b = 1.0 / math.sqrt(fan_in)
    return jax.random.uniform(key, (n,), jnp.float32, -b, b)


def init_params(key):
    ks = jax.random.split(key, 12)
    p = {}
    # conv weights: (Cout, Cin, K, K)
    p["w1"] = _xavier_uniform(ks[0], (16, 3, 4, 4), 3 * 16, 16 * 16)
    p["b1"] = _bias(ks[1], 16, 3 * 16)
    p["w2"] = _xavier_uniform(ks[2], (32, 16, 5, 5), 16 * 25, 32 * 25)
    p["b2"] = _bias(ks[3], 32, 16 * 25)
    p["w3"] = _xavier_uniform(ks[4], (64, 32, 3, 3), 32 * 9, 64 * 9)
    p["b3"] = _bias(ks[5], 64, 32 * 9)
    # deconv weights: (Cin, Cout, K, K)
    p["dw1"] = _xavier_uniform(ks[6], (64, 32, 3, 3), 32 * 9, 64 * 9)
    p["db1"] = _bias(ks[7], 32, 32 * 9)
    p["dw2"] = _xavier_uniform(ks[8], (32, 16, 5, 5), 16 * 25, 32 * 25)
    p["db2"] = _bias(ks[9], 16, 16 * 25)
    p["dw3"] = _xavier_uniform(ks[10], (16, 21, 4, 4), 21 * 16, 16 * 16)
    p["db3"] = _bias(ks[11], 21, 21 * 16)
    return p


# ----------------------------------------------------------------------------
# Full forward pass (matches conv_deconv.forward)
# ----------------------------------------------------------------------------
def forward(prep, x_nchw):
    x = jnp.transpose(x_nchw, (0, 2, 3, 1))                       # NCHW -> NHWC
    out = conv2d(x, prep["c1"], act="relu")                       # conv1 + ReLU
    out, idx1 = maxpool2x2(out)                                   # maxpool1
    out = conv2d(out, prep["c2"], act="relu")                     # conv2 + ReLU
    out, idx2 = maxpool2x2(out)                                   # maxpool2
    out = conv2d(out, prep["c3"], act="relu")                     # conv3 + ReLU (B,1,1,CPAD)
    out = deconv1x1(out, prep["d1"], act="relu")                  # deconv1 + ReLU (1x1 special case)
    out = maxunpool2x2(out, idx2)                                 # maxunpool1
    out = conv_transpose2d(out, prep["d2"], act="relu")           # deconv2 + ReLU
    out = maxunpool2x2(out, idx1)                                 # maxunpool2
    out = conv_transpose2d(out, prep["d3"], act="sigmoid")        # deconv3 + Sigmoid
    out = out[..., :21]                                           # drop lane padding
    return jnp.transpose(out, (0, 3, 1, 2))                       # NHWC -> NCHW


if __name__ == "__main__":
    key = jax.random.PRNGKey(0)
    pkey, xkey = jax.random.split(key)
    params = init_params(pkey)
    prep = prepare_params(params)                                 # one-time weight prep
    # Spatial size 23 keeps both pool stages even: 23 -> 20 -> 10 -> 6 -> 3 -> 1
    # and back up through the deconv/unpool chain to 23.
    x = jax.random.normal(xkey, (2, 3, 23, 23), jnp.float32)      # NCHW like PyTorch
    fwd = jax.jit(functools.partial(forward, prep))
    out = jax.block_until_ready(fwd(x))
    assert out.shape == (2, 21, 23, 23), out.shape
    assert bool(jnp.all(jnp.isfinite(out)))
    assert bool(jnp.all((out >= 0.0) & (out <= 1.0)))             # sigmoid output range
    print("KERNEL_OK")
</pallas_src>

<mosaic_0001>
module attributes {stable_mosaic.version = 11 : i64} {
  func.func @_matmul_bias_act_kernel(%arg0: memref<800x128xbf16, #tpu.memory_space<vmem>>, %arg1: memref<128x128xbf16, #tpu.memory_space<vmem>>, %arg2: memref<1x128xf32, #tpu.memory_space<vmem>>, %arg3: memref<800x128xf32, #tpu.memory_space<vmem>>) attributes {dimension_semantics = [], scalar_prefetch = 0 : i64, scratch_operands = 0 : i64, tpu.core_type = #tpu.core_type<tc>} {
    %c0 = arith.constant 0 : index
    %c0_0 = arith.constant 0 : index
    %0 = vector.load %arg0[%c0, %c0_0] : memref<800x128xbf16, #tpu.memory_space<vmem>>, vector<800x128xbf16>
    %c0_1 = arith.constant 0 : index
    %c0_2 = arith.constant 0 : index
    %1 = vector.load %arg1[%c0_1, %c0_2] : memref<128x128xbf16, #tpu.memory_space<vmem>>, vector<128x128xbf16>
    %cst = arith.constant dense<0.000000e+00> : vector<800x128xf32>
    %2 = tpu.matmul %0, %1, %cst {dimension_numbers = #tpu.dot_dimension_numbers<[1], [0], [0], [1], [0, 0, 1, 1], [], []>} : vector<800x128xbf16>, vector<128x128xbf16>, vector<800x128xf32> -> vector<800x128xf32>
    %c0_3 = arith.constant 0 : index
    %c0_4 = arith.constant 0 : index
    %3 = vector.load %arg2[%c0_3, %c0_4] : memref<1x128xf32, #tpu.memory_space<vmem>>, vector<1x128xf32>
    %4 = vector.broadcast %3 : vector<1x128xf32> to vector<800x128xf32>
    %5 = arith.addf %2, %4 : vector<800x128xf32>
    %cst_5 = arith.constant 0.000000e+00 : f32
    %6 = vector.broadcast %cst_5 : f32 to vector<800x128xf32>
    %7 = arith.maximumf %5, %6 : vector<800x128xf32>
    %c0_6 = arith.constant 0 : index
    %c0_7 = arith.constant 0 : index
    %8 = vector.load %arg3[%c0_6, %c0_7] : memref<800x128xf32, #tpu.memory_space<vmem>>, vector<800x128xf32>
    tpu.vector_store %arg3[%c0_6, %c0_7], %7 {strides = array<i32>} : memref<800x128xf32, #tpu.memory_space<vmem>>, vector<800x128xf32>,
    return
  }
}

module attributes {stable_mosaic.version = 11 : i64} {
  func.func @_maxpool_kernel(%arg0: memref<20x2x10x256xf32, #tpu.memory_space<vmem>>, %arg1: memref<20x10x128xf32, #tpu.memory_space<vmem>>, %arg2: memref<20x10x128xi32, #tpu.memory_space<vmem>>) attributes {dimension_semantics = [], scalar_prefetch = 0 : i64, scratch_operands = 0 : i64, tpu.core_type = #tpu.core_type<tc>} {
    %c0 = arith.constant 0 : index
    %c0_0 = arith.constant 0 : index
    %c0_1 = arith.constant 0 : index
    %c0_2 = arith.constant 0 : index
    %0 = vector.load %arg0[%c0, %c0_0, %c0_1, %c0_2] : memref<20x2x10x256xf32, #tpu.memory_space<vmem>>, vector<20x1x10x128xf32>
    %1 = vector.shape_cast %0 : vector<20x1x10x128xf32> to vector<20x10x128xf32>
    %c0_i32 = arith.constant 0 : i32
    %2 = vector.broadcast %c0_i32 : i32 to vector<20x10x128xi32>
    %c0_3 = arith.constant 0 : index
    %c0_4 = arith.constant 0 : index
    %c0_5 = arith.constant 0 : index
    %c128 = arith.constant 128 : index
    %3 = vector.load %arg0[%c0_3, %c0_4, %c0_5, %c128] : memref<20x2x10x256xf32, #tpu.memory_space<vmem>>, vector<20x1x10x128xf32>
    %4 = vector.shape_cast %3 : vector<20x1x10x128xf32> to vector<20x10x128xf32>
    %5 = arith.cmpf ogt, %4, %1 : vector<20x10x128xf32>
    %6 = arith.select %5, %4, %1 : vector<20x10x128xi1>, vector<20x10x128xf32>
    %c1_i32 = arith.constant 1 : i32
    %7 = vector.broadcast %c1_i32 : i32 to vector<20x10x128xi32>
    %8 = arith.select %5, %7, %2 : vector<20x10x128xi1>, vector<20x10x128xi32>
    %c0_6 = arith.constant 0 : index
    %c1 = arith.constant 1 : index
    %c0_7 = arith.constant 0 : index
    %c0_8 = arith.constant 0 : index
    %9 = vector.load %arg0[%c0_6, %c1, %c0_7, %c0_8] : memref<20x2x10x256xf32, #tpu.memory_space<vmem>>, vector<20x1x10x128xf32>
    %10 = vector.shape_cast %9 : vector<20x1x10x128xf32> to vector<20x10x128xf32>
    %11 = arith.cmpf ogt, %10, %6 : vector<20x10x128xf32>
    %12 = arith.select %11, %10, %6 : vector<20x10x128xi1>, vector<20x10x128xf32>
    %c2_i32 = arith.constant 2 : i32
    %13 = vector.broadcast %c2_i32 : i32 to vector<20x10x128xi32>
    %14 = arith.select %11, %13, %8 : vector<20x10x128xi1>, vector<20x10x128xi32>
    %c0_9 = arith.constant 0 : index
    %c1_10 = arith.constant 1 : index
    %c0_11 = arith.constant 0 : index
    %c128_12 = arith.constant 128 : index
    %15 = vector.load %arg0[%c0_9, %c1_10, %c0_11, %c128_12] : memref<20x2x10x256xf32, #tpu.memory_space<vmem>>, vector<20x1x10x128xf32>
    %16 = vector.shape_cast %15 : vector<20x1x10x128xf32> to vector<20x10x128xf32>
    %17 = arith.cmpf ogt, %16, %12 : vector<20x10x128xf32>
    %18 = arith.select %17, %16, %12 : vector<20x10x128xi1>, vector<20x10x128xf32>
    %c3_i32 = arith.constant 3 : i32
    %19 = vector.broadcast %c3_i32 : i32 to vector<20x10x128xi32>
    %20 = arith.select %17, %19, %14 : vector<20x10x128xi1>, vector<20x10x128xi32>
    %c0_13 = arith.constant 0 : index
    %c0_14 = arith.constant 0 : index
    %c0_15 = arith.constant 0 : index
    %21 = vector.load %arg1[%c0_13, %c0_14, %c0_15] : memref<20x10x128xf32, #tpu.memory_space<vmem>>, vector<20x10x128xf32>
    tpu.vector_store %arg1[%c0_13, %c0_14, %c0_15], %18 {strides = array<i32>} : memref<20x10x128xf32, #tpu.memory_space<vmem>>, vector<20x10x128xf32>,
    %c0_16 = arith.constant 0 : index
    %c0_17 = arith.constant 0 : index
    %c0_18 = arith.constant 0 : index
    %22 = vector.load %arg2[%c0_16, %c0_17, %c0_18] : memref<20x10x128xi32, #tpu.memory_space<vmem>>, vector<20x10x128xi32>
    tpu.vector_store %arg2[%c0_16, %c0_17, %c0_18], %20 {strides = array<i32>} : memref<20x10x128xi32, #tpu.memory_space<vmem>>, vector<20x10x128xi32>,
    return
  }
}

module attributes {stable_mosaic.version = 11 : i64} {
  func.func @_matmul_bias_act_kernel(%arg0: memref<80x512xbf16, #tpu.memory_space<vmem>>, %arg1: memref<512x128xbf16, #tpu.memory_space<vmem>>, %arg2: memref<1x128xf32, #tpu.memory_space<vmem>>, %arg3: memref<80x128xf32, #tpu.memory_space<vmem>>) attributes {dimension_semantics = [], scalar_prefetch = 0 : i64, scratch_operands = 0 : i64, tpu.core_type = #tpu.core_type<tc>} {
    %c0 = arith.constant 0 : index
    %c0_0 = arith.constant 0 : index
    %0 = vector.load %arg0[%c0, %c0_0] : memref<80x512xbf16, #tpu.memory_space<vmem>>, vector<80x512xbf16>
    %c0_1 = arith.constant 0 : index
    %c0_2 = arith.constant 0 : index
    %1 = vector.load %arg1[%c0_1, %c0_2] : memref<512x128xbf16, #tpu.memory_space<vmem>>, vector<512x128xbf16>
    %cst = arith.constant dense<0.000000e+00> : vector<80x128xf32>
    %2 = tpu.matmul %0, %1, %cst {dimension_numbers = #tpu.dot_dimension_numbers<[1], [0], [0], [1], [0, 0, 1, 1], [], []>} : vector<80x512xbf16>, vector<512x128xbf16>, vector<80x128xf32> -> vector<80x128xf32>
    %c0_3 = arith.constant 0 : index
    %c0_4 = arith.constant 0 : index
    %3 = vector.load %arg2[%c0_3, %c0_4] : memref<1x128xf32, #tpu.memory_space<vmem>>, vector<1x128xf32>
    %4 = vector.broadcast %3 : vector<1x128xf32> to vector<80x128xf32>
    %5 = arith.addf %2, %4 : vector<80x128xf32>
    %cst_5 = arith.constant 0.000000e+00 : f32
    %6 = vector.broadcast %cst_5 : f32 to vector<80x128xf32>
    %7 = arith.maximumf %5, %6 : vector<80x128xf32>
    %c0_6 = arith.constant 0 : index
    %c0_7 = arith.constant 0 : index
    %8 = vector.load %arg3[%c0_6, %c0_7] : memref<80x128xf32, #tpu.memory_space<vmem>>, vector<80x128xf32>
    tpu.vector_store %arg3[%c0_6, %c0_7], %7 {strides = array<i32>} : memref<80x128xf32, #tpu.memory_space<vmem>>, vector<80x128xf32>,
    return
  }
}

module attributes {stable_mosaic.version = 11 : i64} {
  func.func @_maxpool_kernel(%arg0: memref<6x2x3x256xf32, #tpu.memory_space<vmem>>, %arg1: memref<6x3x128xf32, #tpu.memory_space<vmem>>, %arg2: memref<6x3x128xi32, #tpu.memory_space<vmem>>) attributes {dimension_semantics = [], scalar_prefetch = 0 : i64, scratch_operands = 0 : i64, tpu.core_type = #tpu.core_type<tc>} {
    %c0 = arith.constant 0 : index
    %c0_0 = arith.constant 0 : index
    %c0_1 = arith.constant 0 : index
    %c0_2 = arith.constant 0 : index
    %0 = vector.load %arg0[%c0, %c0_0, %c0_1, %c0_2] : memref<6x2x3x256xf32, #tpu.memory_space<vmem>>, vector<6x1x3x128xf32>
    %1 = vector.shape_cast %0 : vector<6x1x3x128xf32> to vector<6x3x128xf32>
    %c0_i32 = arith.constant 0 : i32
    %2 = vector.broadcast %c0_i32 : i32 to vector<6x3x128xi32>
    %c0_3 = arith.constant 0 : index
    %c0_4 = arith.constant 0 : index
    %c0_5 = arith.constant 0 : index
    %c128 = arith.constant 128 : index
    %3 = vector.load %arg0[%c0_3, %c0_4, %c0_5, %c128] : memref<6x2x3x256xf32, #tpu.memory_space<vmem>>, vector<6x1x3x128xf32>
    %4 = vector.shape_cast %3 : vector<6x1x3x128xf32> to vector<6x3x128xf32>
    %5 = arith.cmpf ogt, %4, %1 : vector<6x3x128xf32>
    %6 = arith.select %5, %4, %1 : vector<6x3x128xi1>, vector<6x3x128xf32>
    %c1_i32 = arith.constant 1 : i32
    %7 = vector.broadcast %c1_i32 : i32 to vector<6x3x128xi32>
    %8 = arith.select %5, %7, %2 : vector<6x3x128xi1>, vector<6x3x128xi32>
    %c0_6 = arith.constant 0 : index
    %c1 = arith.constant 1 : index
    %c0_7 = arith.constant 0 : index
    %c0_8 = arith.constant 0 : index
    %9 = vector.load %arg0[%c0_6, %c1, %c0_7, %c0_8] : memref<6x2x3x256xf32, #tpu.memory_space<vmem>>, vector<6x1x3x128xf32>
    %10 = vector.shape_cast %9 : vector<6x1x3x128xf32> to vector<6x3x128xf32>
    %11 = arith.cmpf ogt, %10, %6 : vector<6x3x128xf32>
    %12 = arith.select %11, %10, %6 : vector<6x3x128xi1>, vector<6x3x128xf32>
    %c2_i32 = arith.constant 2 : i32
    %13 = vector.broadcast %c2_i32 : i32 to vector<6x3x128xi32>
    %14 = arith.select %11, %13, %8 : vector<6x3x128xi1>, vector<6x3x128xi32>
    %c0_9 = arith.constant 0 : index
    %c1_10 = arith.constant 1 : index
    %c0_11 = arith.constant 0 : index
    %c128_12 = arith.constant 128 : index
    %15 = vector.load %arg0[%c0_9, %c1_10, %c0_11, %c128_12] : memref<6x2x3x256xf32, #tpu.memory_space<vmem>>, vector<6x1x3x128xf32>
    %16 = vector.shape_cast %15 : vector<6x1x3x128xf32> to vector<6x3x128xf32>
    %17 = arith.cmpf ogt, %16, %12 : vector<6x3x128xf32>
    %18 = arith.select %17, %16, %12 : vector<6x3x128xi1>, vector<6x3x128xf32>
    %c3_i32 = arith.constant 3 : i32
    %19 = vector.broadcast %c3_i32 : i32 to vector<6x3x128xi32>
    %20 = arith.select %17, %19, %14 : vector<6x3x128xi1>, vector<6x3x128xi32>
    %c0_13 = arith.constant 0 : index
    %c0_14 = arith.constant 0 : index
    %c0_15 = arith.constant 0 : index
    %21 = vector.load %arg1[%c0_13, %c0_14, %c0_15] : memref<6x3x128xf32, #tpu.memory_space<vmem>>, vector<6x3x128xf32>
    tpu.vector_store %arg1[%c0_13, %c0_14, %c0_15], %18 {strides = array<i32>} : memref<6x3x128xf32, #tpu.memory_space<vmem>>, vector<6x3x128xf32>,
    %c0_16 = arith.constant 0 : index
    %c0_17 = arith.constant 0 : index
    %c0_18 = arith.constant 0 : index
    %22 = vector.load %arg2[%c0_16, %c0_17, %c0_18] : memref<6x3x128xi32, #tpu.memory_space<vmem>>, vector<6x3x128xi32>
    tpu.vector_store %arg2[%c0_16, %c0_17, %c0_18], %20 {strides = array<i32>} : memref<6x3x128xi32, #tpu.memory_space<vmem>>, vector<6x3x128xi32>,
    return
  }
}

module attributes {stable_mosaic.version = 11 : i64} {
  func.func @_matmul_bias_act_kernel(%arg0: memref<16x128xbf16, #tpu.memory_space<vmem>>, %arg1: memref<128x1152xbf16, #tpu.memory_space<vmem>>, %arg2: memref<1x1152xf32, #tpu.memory_space<vmem>>, %arg3: memref<16x1152xf32, #tpu.memory_space<vmem>>) attributes {dimension_semantics = [], scalar_prefetch = 0 : i64, scratch_operands = 0 : i64, tpu.core_type = #tpu.core_type<tc>} {
    %c0 = arith.constant 0 : index
    %c0_0 = arith.constant 0 : index
    %0 = vector.load %arg0[%c0, %c0_0] : memref<16x128xbf16, #tpu.memory_space<vmem>>, vector<16x128xbf16>
    %c0_1 = arith.constant 0 : index
    %c0_2 = arith.constant 0 : index
    %1 = vector.load %arg1[%c0_1, %c0_2] : memref<128x1152xbf16, #tpu.memory_space<vmem>>, vector<128x1152xbf16>
    %cst = arith.constant dense<0.000000e+00> : vector<16x1152xf32>
    %2 = tpu.matmul %0, %1, %cst {dimension_numbers = #tpu.dot_dimension_numbers<[1], [0], [0], [1], [0, 0, 1, 1], [], []>} : vector<16x128xbf16>, vector<128x1152xbf16>, vector<16x1152xf32> -> vector<16x1152xf32>
    %c0_3 = arith.constant 0 : index
    %c0_4 = arith.constant 0 : index
    %3 = vector.load %arg2[%c0_3, %c0_4] : memref<1x1152xf32, #tpu.memory_space<vmem>>, vector<1x1152xf32>
    %4 = vector.broadcast %3 : vector<1x1152xf32> to vector<16x1152xf32>
    %5 = arith.addf %2, %4 : vector<16x1152xf32>
    %cst_5 = arith.constant 0.000000e+00 : f32
    %6 = vector.broadcast %cst_5 : f32 to vector<16x1152xf32>
    %7 = arith.maximumf %5, %6 : vector<16x1152xf32>
    %c0_6 = arith.constant 0 : index
    %c0_7 = arith.constant 0 : index
    %8 = vector.load %arg3[%c0_6, %c0_7] : memref<16x1152xf32, #tpu.memory_space<vmem>>, vector<16x1152xf32>
    tpu.vector_store %arg3[%c0_6, %c0_7], %7 {strides = array<i32>} : memref<16x1152xf32, #tpu.memory_space<vmem>>, vector<16x1152xf32>,
    return
  }
}

module attributes {stable_mosaic.version = 11 : i64} {
  func.func @_maxunpool_kernel(%arg0: memref<6x3x128xf32, #tpu.memory_space<vmem>>, %arg1: memref<6x3x128xi32, #tpu.memory_space<vmem>>, %arg2: memref<6x2x3x256xf32, #tpu.memory_space<vmem>>) attributes {dimension_semantics = [], scalar_prefetch = 0 : i64, scratch_operands = 0 : i64, tpu.core_type = #tpu.core_type<tc>} {
    %c0 = arith.constant 0 : index
    %c0_0 = arith.constant 0 : index
    %c0_1 = arith.constant 0 : index
    %0 = vector.load %arg0[%c0, %c0_0, %c0_1] : memref<6x3x128xf32, #tpu.memory_space<vmem>>, vector<6x3x128xf32>
    %c0_2 = arith.constant 0 : index
    %c0_3 = arith.constant 0 : index
    %c0_4 = arith.constant 0 : index
    %1 = vector.load %arg1[%c0_2, %c0_3, %c0_4] : memref<6x3x128xi32, #tpu.memory_space<vmem>>, vector<6x3x128xi32>
    %c0_i32 = arith.constant 0 : i32
    %2 = vector.broadcast %c0_i32 : i32 to vector<6x3x128xi32>
    %3 = arith.cmpi eq, %1, %2 : vector<6x3x128xi32>
    %cst = arith.constant 0.000000e+00 : f32
    %4 = vector.broadcast %cst : f32 to vector<6x3x128xf32>
    %5 = arith.select %3, %0, %4 : vector<6x3x128xi1>, vector<6x3x128xf32>
    %c0_5 = arith.constant 0 : index
    %c0_6 = arith.constant 0 : index
    %c0_7 = arith.constant 0 : index
    %c0_8 = arith.constant 0 : index
    %6 = vector.load %arg2[%c0_5, %c0_6, %c0_7, %c0_8] : memref<6x2x3x256xf32, #tpu.memory_space<vmem>>, vector<6x1x3x128xf32>
    %7 = vector.shape_cast %6 : vector<6x1x3x128xf32> to vector<6x3x128xf32>
    %8 = vector.shape_cast %5 : vector<6x3x128xf32> to vector<6x1x3x128xf32>
    tpu.vector_store %arg2[%c0_5, %c0_6, %c0_7, %c0_8], %8 {strides = array<i32>} : memref<6x2x3x256xf32, #tpu.memory_space<vmem>>, vector<6x1x3x128xf32>,
    %c1_i32 = arith.constant 1 : i32
    %9 = vector.broadcast %c1_i32 : i32 to vector<6x3x128xi32>
    %10 = arith.cmpi eq, %1, %9 : vector<6x3x128xi32>
    %cst_9 = arith.constant 0.000000e+00 : f32
    %11 = vector.broadcast %cst_9 : f32 to vector<6x3x128xf32>
    %12 = arith.select %10, %0, %11 : vector<6x3x128xi1>, vector<6x3x128xf32>
    %c0_10 = arith.constant 0 : index
    %c0_11 = arith.constant 0 : index
    %c0_12 = arith.constant 0 : index
    %c128 = arith.constant 128 : index
    %13 = vector.load %arg2[%c0_10, %c0_11, %c0_12, %c128] : memref<6x2x3x256xf32, #tpu.memory_space<vmem>>, vector<6x1x3x128xf32>
    %14 = vector.shape_cast %13 : vector<6x1x3x128xf32> to vector<6x3x128xf32>
    %15 = vector.shape_cast %12 : vector<6x3x128xf32> to vector<6x1x3x128xf32>
    tpu.vector_store %arg2[%c0_10, %c0_11, %c0_12, %c128], %15 {strides = array<i32>} : memref<6x2x3x256xf32, #tpu.memory_space<vmem>>, vector<6x1x3x128xf32>,
    %c2_i32 = arith.constant 2 : i32
    %16 = vector.broadcast %c2_i32 : i32 to vector<6x3x128xi32>
    %17 = arith.cmpi eq, %1, %16 : vector<6x3x128xi32>
    %cst_13 = arith.constant 0.000000e+00 : f32
    %18 = vector.broadcast %cst_13 : f32 to vector<6x3x128xf32>
    %19 = arith.select %17, %0, %18 : vector<6x3x128xi1>, vector<6x3x128xf32>
    %c0_14 = arith.constant 0 : index
    %c1 = arith.constant 1 : index
    %c0_15 = arith.constant 0 : index
    %c0_16 = arith.constant 0 : index
    %20 = vector.load %arg2[%c0_14, %c1, %c0_15, %c0_16] : memref<6x2x3x256xf32, #tpu.memory_space<vmem>>, vector<6x1x3x128xf32>
    %21 = vector.shape_cast %20 : vector<6x1x3x128xf32> to vector<6x3x128xf32>
    %22 = vector.shape_cast %19 : vector<6x3x128xf32> to vector<6x1x3x128xf32>
    tpu.vector_store %arg2[%c0_14, %c1, %c0_15, %c0_16], %22 {strides = array<i32>} : memref<6x2x3x256xf32, #tpu.memory_space<vmem>>, vector<6x1x3x128xf32>,
    %c3_i32 = arith.constant 3 : i32
    %23 = vector.broadcast %c3_i32 : i32 to vector<6x3x128xi32>
    %24 = arith.cmpi eq, %1, %23 : vector<6x3x128xi32>
    %cst_17 = arith.constant 0.000000e+00 : f32
    %25 = vector.broadcast %cst_17 : f32 to vector<6x3x128xf32>
    %26 = arith.select %24, %0, %25 : vector<6x3x128xi1>, vector<6x3x128xf32>
    %c0_18 = arith.constant 0 : index
    %c1_19 = arith.constant 1 : index
    %c0_20 = arith.constant 0 : index
    %c128_21 = arith.constant 128 : index
    %27 = vector.load %arg2[%c0_18, %c1_19, %c0_20, %c128_21] : memref<6x2x3x256xf32, #tpu.memory_space<vmem>>, vector<6x1x3x128xf32>
    %28 = vector.shape_cast %27 : vector<6x1x3x128xf32> to vector<6x3x128xf32>
    %29 = vector.shape_cast %26 : vector<6x3x128xf32> to vector<6x1x3x128xf32>
    tpu.vector_store %arg2[%c0_18, %c1_19, %c0_20, %c128_21], %29 {strides = array<i32>} : memref<6x2x3x256xf32, #tpu.memory_space<vmem>>, vector<6x1x3x128xf32>,
    return
  }
}

module attributes {stable_mosaic.version = 11 : i64} {
  func.func @_matmul_bias_act_kernel(%arg0: memref<16x384xbf16, #tpu.memory_space<vmem>>, %arg1: memref<384x128xbf16, #tpu.memory_space<vmem>>, %arg2: memref<1x128xf32, #tpu.memory_space<vmem>>, %arg3: memref<16x128xf32, #tpu.memory_space<vmem>>) attributes {dimension_semantics = [], scalar_prefetch = 0 : i64, scratch_operands = 0 : i64, tpu.core_type = #tpu.core_type<tc>} {
    %c0 = arith.constant 0 : index
    %c0_0 = arith.constant 0 : index
    %0 = vector.load %arg0[%c0, %c0_0] : memref<16x384xbf16, #tpu.memory_space<vmem>>, vector<16x384xbf16>
    %c0_1 = arith.constant 0 : index
    %c0_2 = arith.constant 0 : index
    %1 = vector.load %arg1[%c0_1, %c0_2] : memref<384x128xbf16, #tpu.memory_space<vmem>>, vector<384x128xbf16>
    %cst = arith.constant dense<0.000000e+00> : vector<16x128xf32>
    %2 = tpu.matmul %0, %1, %cst {dimension_numbers = #tpu.dot_dimension_numbers<[1], [0], [0], [1], [0, 0, 1, 1], [], []>} : vector<16x384xbf16>, vector<384x128xbf16>, vector<16x128xf32> -> vector<16x128xf32>
    %c0_3 = arith.constant 0 : index
    %c0_4 = arith.constant 0 : index
    %3 = vector.load %arg2[%c0_3, %c0_4] : memref<1x128xf32, #tpu.memory_space<vmem>>, vector<1x128xf32>
    %4 = vector.broadcast %3 : vector<1x128xf32> to vector<16x128xf32>
    %5 = arith.addf %2, %4 : vector<16x128xf32>
    %cst_5 = arith.constant 0.000000e+00 : f32
    %6 = vector.broadcast %cst_5 : f32 to vector<16x128xf32>
    %7 = arith.maximumf %5, %6 : vector<16x128xf32>
    %c0_6 = arith.constant 0 : index
    %c0_7 = arith.constant 0 : index
    %8 = vector.load %arg3[%c0_6, %c0_7] : memref<16x128xf32, #tpu.memory_space<vmem>>, vector<16x128xf32>
    tpu.vector_store %arg3[%c0_6, %c0_7], %7 {strides = array<i32>} : memref<16x128xf32, #tpu.memory_space<vmem>>, vector<16x128xf32>,
    return
  }
}

module attributes {stable_mosaic.version = 11 : i64} {
  func.func @_matmul_bias_act_kernel(%arg0: memref<208x896xbf16, #tpu.memory_space<vmem>>, %arg1: memref<896x128xbf16, #tpu.memory_space<vmem>>, %arg2: memref<1x128xf32, #tpu.memory_space<vmem>>, %arg3: memref<208x128xf32, #tpu.memory_space<vmem>>) attributes {dimension_semantics = [], scalar_prefetch = 0 : i64, scratch_operands = 0 : i64, tpu.core_type = #tpu.core_type<tc>} {
    %c0 = arith.constant 0 : index
    %c0_0 = arith.constant 0 : index
    %0 = vector.load %arg0[%c0, %c0_0] : memref<208x896xbf16, #tpu.memory_space<vmem>>, vector<208x896xbf16>
    %c0_1 = arith.constant 0 : index
    %c0_2 = arith.constant 0 : index
    %1 = vector.load %arg1[%c0_1, %c0_2] : memref<896x128xbf16, #tpu.memory_space<vmem>>, vector<896x128xbf16>
    %cst = arith.constant dense<0.000000e+00> : vector<208x128xf32>
    %2 = tpu.matmul %0, %1, %cst {dimension_numbers = #tpu.dot_dimension_numbers<[1], [0], [0], [1], [0, 0, 1, 1], [], []>} : vector<208x896xbf16>, vector<896x128xbf16>, vector<208x128xf32> -> vector<208x128xf32>
    %c0_3 = arith.constant 0 : index
    %c0_4 = arith.constant 0 : index
    %3 = vector.load %arg2[%c0_3, %c0_4] : memref<1x128xf32, #tpu.memory_space<vmem>>, vector<1x128xf32>
    %4 = vector.broadcast %3 : vector<1x128xf32> to vector<208x128xf32>
    %5 = arith.addf %2, %4 : vector<208x128xf32>
    %cst_5 = arith.constant 0.000000e+00 : f32
    %6 = vector.broadcast %cst_5 : f32 to vector<208x128xf32>
    %7 = arith.maximumf %5, %6 : vector<208x128xf32>
    %c0_6 = arith.constant 0 : index
    %c0_7 = arith.constant 0 : index
    %8 = vector.load %arg3[%c0_6, %c0_7] : memref<208x128xf32, #tpu.memory_space<vmem>>, vector<208x128xf32>
    tpu.vector_store %arg3[%c0_6, %c0_7], %7 {strides = array<i32>} : memref<208x128xf32, #tpu.memory_space<vmem>>, vector<208x128xf32>,
    return
  }
}

module attributes {stable_mosaic.version = 11 : i64} {
  func.func @_maxunpool_kernel(%arg0: memref<20x10x128xf32, #tpu.memory_space<vmem>>, %arg1: memref<20x10x128xi32, #tpu.memory_space<vmem>>, %arg2: memref<20x2x10x256xf32, #tpu.memory_space<vmem>>) attributes {dimension_semantics = [], scalar_prefetch = 0 : i64, scratch_operands = 0 : i64, tpu.core_type = #tpu.core_type<tc>} {
    %c0 = arith.constant 0 : index
    %c0_0 = arith.constant 0 : index
    %c0_1 = arith.constant 0 : index
    %0 = vector.load %arg0[%c0, %c0_0, %c0_1] : memref<20x10x128xf32, #tpu.memory_space<vmem>>, vector<20x10x128xf32>
    %c0_2 = arith.constant 0 : index
    %c0_3 = arith.constant 0 : index
    %c0_4 = arith.constant 0 : index
    %1 = vector.load %arg1[%c0_2, %c0_3, %c0_4] : memref<20x10x128xi32, #tpu.memory_space<vmem>>, vector<20x10x128xi32>
    %c0_i32 = arith.constant 0 : i32
    %2 = vector.broadcast %c0_i32 : i32 to vector<20x10x128xi32>
    %3 = arith.cmpi eq, %1, %2 : vector<20x10x128xi32>
    %cst = arith.constant 0.000000e+00 : f32
    %4 = vector.broadcast %cst : f32 to vector<20x10x128xf32>
    %5 = arith.select %3, %0, %4 : vector<20x10x128xi1>, vector<20x10x128xf32>
    %c0_5 = arith.constant 0 : index
    %c0_6 = arith.constant 0 : index
    %c0_7 = arith.constant 0 : index
    %c0_8 = arith.constant 0 : index
    %6 = vector.load %arg2[%c0_5, %c0_6, %c0_7, %c0_8] : memref<20x2x10x256xf32, #tpu.memory_space<vmem>>, vector<20x1x10x128xf32>
    %7 = vector.shape_cast %6 : vector<20x1x10x128xf32> to vector<20x10x128xf32>
    %8 = vector.shape_cast %5 : vector<20x10x128xf32> to vector<20x1x10x128xf32>
    tpu.vector_store %arg2[%c0_5, %c0_6, %c0_7, %c0_8], %8 {strides = array<i32>} : memref<20x2x10x256xf32, #tpu.memory_space<vmem>>, vector<20x1x10x128xf32>,
    %c1_i32 = arith.constant 1 : i32
    %9 = vector.broadcast %c1_i32 : i32 to vector<20x10x128xi32>
    %10 = arith.cmpi eq, %1, %9 : vector<20x10x128xi32>
    %cst_9 = arith.constant 0.000000e+00 : f32
    %11 = vector.broadcast %cst_9 : f32 to vector<20x10x128xf32>
    %12 = arith.select %10, %0, %11 : vector<20x10x128xi1>, vector<20x10x128xf32>
    %c0_10 = arith.constant 0 : index
    %c0_11 = arith.constant 0 : index
    %c0_12 = arith.constant 0 : index
    %c128 = arith.constant 128 : index
    %13 = vector.load %arg2[%c0_10, %c0_11, %c0_12, %c128] : memref<20x2x10x256xf32, #tpu.memory_space<vmem>>, vector<20x1x10x128xf32>
    %14 = vector.shape_cast %13 : vector<20x1x10x128xf32> to vector<20x10x128xf32>
    %15 = vector.shape_cast %12 : vector<20x10x128xf32> to vector<20x1x10x128xf32>
    tpu.vector_store %arg2[%c0_10, %c0_11, %c0_12, %c128], %15 {strides = array<i32>} : memref<20x2x10x256xf32, #tpu.memory_space<vmem>>, vector<20x1x10x128xf32>,
    %c2_i32 = arith.constant 2 : i32
    %16 = vector.broadcast %c2_i32 : i32 to vector<20x10x128xi32>
    %17 = arith.cmpi eq, %1, %16 : vector<20x10x128xi32>
    %cst_13 = arith.constant 0.000000e+00 : f32
    %18 = vector.broadcast %cst_13 : f32 to vector<20x10x128xf32>
    %19 = arith.select %17, %0, %18 : vector<20x10x128xi1>, vector<20x10x128xf32>
    %c0_14 = arith.constant 0 : index
    %c1 = arith.constant 1 : index
    %c0_15 = arith.constant 0 : index
    %c0_16 = arith.constant 0 : index
    %20 = vector.load %arg2[%c0_14, %c1, %c0_15, %c0_16] : memref<20x2x10x256xf32, #tpu.memory_space<vmem>>, vector<20x1x10x128xf32>
    %21 = vector.shape_cast %20 : vector<20x1x10x128xf32> to vector<20x10x128xf32>
    %22 = vector.shape_cast %19 : vector<20x10x128xf32> to vector<20x1x10x128xf32>
    tpu.vector_store %arg2[%c0_14, %c1, %c0_15, %c0_16], %22 {strides = array<i32>} : memref<20x2x10x256xf32, #tpu.memory_space<vmem>>, vector<20x1x10x128xf32>,
    %c3_i32 = arith.constant 3 : i32
    %23 = vector.broadcast %c3_i32 : i32 to vector<20x10x128xi32>
    %24 = arith.cmpi eq, %1, %23 : vector<20x10x128xi32>
    %cst_17 = arith.constant 0.000000e+00 : f32
    %25 = vector.broadcast %cst_17 : f32 to vector<20x10x128xf32>
    %26 = arith.select %24, %0, %25 : vector<20x10x128xi1>, vector<20x10x128xf32>
    %c0_18 = arith.constant 0 : index
    %c1_19 = arith.constant 1 : index
    %c0_20 = arith.constant 0 : index
    %c128_21 = arith.constant 128 : index
    %27 = vector.load %arg2[%c0_18, %c1_19, %c0_20, %c128_21] : memref<20x2x10x256xf32, #tpu.memory_space<vmem>>, vector<20x1x10x128xf32>
    %28 = vector.shape_cast %27 : vector<20x1x10x128xf32> to vector<20x10x128xf32>
    %29 = vector.shape_cast %26 : vector<20x10x128xf32> to vector<20x1x10x128xf32>
    tpu.vector_store %arg2[%c0_18, %c1_19, %c0_20, %c128_21], %29 {strides = array<i32>} : memref<20x2x10x256xf32, #tpu.memory_space<vmem>>, vector<20x1x10x128xf32>,
    return
  }
}

module attributes {stable_mosaic.version = 11 : i64} {
  func.func @_matmul_bias_act_kernel(%arg0: memref<1072x256xbf16, #tpu.memory_space<vmem>>, %arg1: memref<256x128xbf16, #tpu.memory_space<vmem>>, %arg2: memref<1x128xf32, #tpu.memory_space<vmem>>, %arg3: memref<1072x128xf32, #tpu.memory_space<vmem>>) attributes {dimension_semantics = [], scalar_prefetch = 0 : i64, scratch_operands = 0 : i64, tpu.core_type = #tpu.core_type<tc>} {
    %c0 = arith.constant 0 : index
    %c0_0 = arith.constant 0 : index
    %0 = vector.load %arg0[%c0, %c0_0] : memref<1072x256xbf16, #tpu.memory_space<vmem>>, vector<1072x256xbf16>
    %c0_1 = arith.constant 0 : index
    %c0_2 = arith.constant 0 : index
    %1 = vector.load %arg1[%c0_1, %c0_2] : memref<256x128xbf16, #tpu.memory_space<vmem>>, vector<256x128xbf16>
    %cst = arith.constant dense<0.000000e+00> : vector<1072x128xf32>
    %2 = tpu.matmul %0, %1, %cst {dimension_numbers = #tpu.dot_dimension_numbers<[1], [0], [0], [1], [0, 0, 1, 1], [], []>} : vector<1072x256xbf16>, vector<256x128xbf16>, vector<1072x128xf32> -> vector<1072x128xf32>
    %c0_3 = arith.constant 0 : index
    %c0_4 = arith.constant 0 : index
    %3 = vector.load %arg2[%c0_3, %c0_4] : memref<1x128xf32, #tpu.memory_space<vmem>>, vector<1x128xf32>
    %4 = vector.broadcast %3 : vector<1x128xf32> to vector<1072x128xf32>
    %5 = arith.addf %2, %4 : vector<1072x128xf32>
    %cst_5 = arith.constant 5.000000e-01 : f32
    %6 = vector.broadcast %cst_5 : f32 to vector<1072x128xf32>
    %7 = arith.mulf %6, %5 : vector<1072x128xf32>
    %8 = math.tanh %7 : vector<1072x128xf32>
    %cst_6 = arith.constant 5.000000e-01 : f32
    %9 = vector.broadcast %cst_6 : f32 to vector<1072x128xf32>
    %10 = arith.mulf %9, %8 : vector<1072x128xf32>
    %cst_7 = arith.constant 5.000000e-01 : f32
    %11 = vector.broadcast %cst_7 : f32 to vector<1072x128xf32>
    %12 = arith.addf %10, %11 : vector<1072x128xf32>
    %c0_8 = arith.constant 0 : index
    %c0_9 = arith.constant 0 : index
    %13 = vector.load %arg3[%c0_8, %c0_9] : memref<1072x128xf32, #tpu.memory_space<vmem>>, vector<1072x128xf32>
    tpu.vector_store %arg3[%c0_8, %c0_9], %12 {strides = array<i32>} : memref<1072x128xf32, #tpu.memory_space<vmem>>, vector<1072x128xf32>,
    return
  }
}

</mosaic_0001>

<bundles_post_ra>
// kernel: forward.11
= control target key start
LH: loop header
LB: loop body
LE: loop exit
PB: predicated region body
PF: predicated region fallthrough
CT: control target
= control target key end

     0   :  { %v3146_v13 = vmov 0   ;;  %s3134_s0 = inlined_call_operand.vmem [shape: f32[20,2,10,256], index: 0, kind: input, shape index: {}]   ;;  %s3135_s1 = inlined_call_operand.vmem [shape: f32[20,10,128], index: 1, kind: output, shape index: {0}]   ;;  %s3136_s2 = inlined_call_operand.vmem [shape: s32[20,10,128], index: 2, kind: output, shape index: {1}]  }
   0x1   :  { %v10_v0 = vld [vmem:[%s3134_s0] sm:$0xff]  ;;  %v50_v1 = vld [vmem:[%s3134_s0 + $0x8] sm:$0xff]  ;;  %v11_v3 = vld [vmem:[%s3134_s0 + $0x10] sm:$0x3] }
   0x2   :  { %v725_v2 = vld [vmem:[%s3134_s0 + $0x20] sm:$0xff]  ;;  %vm90_vm0 = vcmp.gt.f32.partialorder %v50_v1, %v10_v0  ;;  %v51_v4 = vld [vmem:[%s3134_s0 + $0x18] sm:$0x3]  ;;  %v738_v6 = vld [vmem:[%s3134_s0 + $0x28] sm:$0xff] }
   0x3   :  { %v733_v5 = vsel %vm90_vm0, %v50_v1, %v10_v0  ;;  %vm91_vm1 = vcmp.gt.f32.partialorder %v51_v4, %v11_v3  ;;  %v743_v7 = vld [vmem:[%s3134_s0 + $0x30] sm:$0x3]  ;;  %v748_v8 = vld [vmem:[%s3134_s0 + $0x40] sm:$0xff]  ;;  %v757_v10 = vld [vmem:[%s3134_s0 + $0x38] sm:$0x3]  ;;  %v770_v14 = vsel %vm90_vm0, 1, %v3146_v13 }
   0x4   :  { %vm251_vm2 = vcmp.gt.f32.partialorder %v725_v2, %v733_v5  ;;  %v752_v9 = vsel %vm91_vm1, %v51_v4, %v11_v3  ;;  %v762_v11 = vld [vmem:[%s3134_s0 + $0x48] sm:$0xff]  ;;  %v767_v12 = vld [vmem:[%s3134_s0 + $0x60] sm:$0xff]  ;;  %v773_v15 = vsel %vm91_vm1, 1, %v3146_v13  ;;  %v789_v17 = vld [vmem:[%s3134_s0 + $0x50] sm:$0x3] }
   0x5   :  { %v780_v16 = vsel %vm251_vm2, %v725_v2, %v733_v5  ;;  %vm252_vm3 = vcmp.gt.f32.partialorder %v743_v7, %v752_v9  ;;  %vm92_vm4 = vcmp.gt.f32.partialorder %v762_v11, %v748_v8  ;;  %v794_v18 = vld [vmem:[%s3134_s0 + $0x58] sm:$0x3]  ;;  %v799_v19 = vld [vmem:[%s3134_s0 + $0x70] sm:$0x3]  ;;  %v820_v22 = vld [vmem:[%s3134_s0 + $0x68] sm:$0xff] }
   0x6   :  { %vm411_vm5 = vcmp.gt.f32.partialorder %v738_v6, %v780_v16  ;;  %v808_v20 = vsel %vm252_vm3, %v743_v7, %v752_v9  ;;  %v815_v21 = vsel %vm92_vm4, %v762_v11, %v748_v8  ;;  %vm93_vm6 = vcmp.gt.f32.partialorder %v794_v18, %v789_v17  ;;  %v827_v23 = vld [vmem:[%s3134_s0 + $0x80] sm:$0xff]  ;;  %v832_v24 = vld [vmem:[%s3134_s0 + $0x88] sm:$0xff]  ;;  %v853_v27 = vld [vmem:[%s3134_s0 + $0x78] sm:$0x3] }
   0x7   :  { %v451_v25 = vsel %vm411_vm5, %v738_v6, %v780_v16  ;;  %vm412_vm7 = vcmp.gt.f32.partialorder %v757_v10, %v808_v20  ;;  %vm253_vm8 = vcmp.gt.f32.partialorder %v767_v12, %v815_v21  ;;  %v848_v26 = vsel %vm93_vm6, %v794_v18, %v789_v17  ;;  %v858_v28 = vld [vmem:[%s3134_s0 + $0xa0] sm:$0xff]  ;;  %v863_v29 = vld [vmem:[%s3134_s0 + $0x90] sm:$0x3]  ;;  %v887_v32 = vld [vmem:[%s3134_s0 + $0xa8] sm:$0xff] }
   0x8   :  { %531 = vst [vmem:[%s3135_s1] sm:$0xff] %v451_v25  ;;  %v452_v30 = vsel %vm412_vm7, %v757_v10, %v808_v20  ;;  %v878_v31 = vsel %vm253_vm8, %v767_v12, %v815_v21  ;;  %vm254_vm9 = vcmp.gt.f32.partialorder %v799_v19, %v848_v26  ;;  %vm94_vm10 = vcmp.gt.f32.partialorder %v832_v24, %v827_v23  ;;  %v892_v33 = vld [vmem:[%s3134_s0 + $0x98] sm:$0x3]  ;;  %v897_v34 = vld [vmem:[%s3134_s0 + $0xb0] sm:$0x3]  ;;  %v928_v38 = vld [vmem:[%s3134_s0 + $0xc0] sm:$0xff] }
   0x9   :  { %532 = vst [vmem:[%s3135_s1 + $0x8] sm:$0x3] %v452_v30  ;;  %vm413_vm11 = vcmp.gt.f32.partialorder %v820_v22, %v878_v31  ;;  %v909_v35 = vsel %vm254_vm9, %v799_v19, %v848_v26  ;;  %v916_v36 = vsel %vm94_vm10, %v832_v24, %v827_v23  ;;  %vm95_vm12 = vcmp.gt.f32.partialorder %v892_v33, %v863_v29  ;;  %v923_v37 = vld [vmem:[%s3134_s0 + $0xb8] sm:$0x3]  ;;  %v933_v39 = vld [vmem:[%s3134_s0 + $0xc8] sm:$0xff]  ;;  %v954_v42 = vld [vmem:[%s3134_s0 + $0xe0] sm:$0xff] }
   0xa   :  { %v453_v40 = vsel %vm413_vm11, %v820_v22, %v878_v31  ;;  %vm3137_vm13 = vcmp.gt.f32.partialorder %v853_v27, %v909_v35  ;;  %vm255_vm14 = vcmp.gt.f32.partialorder %v858_v28, %v916_v36  ;;  %v949_v41 = vsel %vm95_vm12, %v892_v33, %v863_v29  ;;  %v959_v43 = vld [vmem:[%s3134_s0 + $0xd0] sm:$0x3]  ;;  %v964_v44 = vld [vmem:[%s3134_s0 + $0xd8] sm:$0x3]  ;;  %v993_v48 = vld [vmem:[%s3134_s0 + $0x100] sm:$0xff] }
   0xb   :  { %533 = vst [vmem:[%s3135_s1 + $0x10] sm:$0xff] %v453_v40  ;;  %v454_v45 = vsel %vm3137_vm13, %v853_v27, %v909_v35  ;;  %v979_v46 = vsel %vm255_vm14, %v858_v28, %v916_v36  ;;  %vm3139_vm15 = vcmp.gt.f32.partialorder %v897_v34, %v949_v41  ;;  %vm3138_vm0 = vcmp.gt.f32.partialorder %v933_v39, %v928_v38  ;;  %v988_v47 = vld [vmem:[%s3134_s0 + $0xf0] sm:$0x3]  ;;  %v1017_v51 = vld [vmem:[%s3134_s0 + $0xe8] sm:$0xff]  ;;  %v1024_v52 = vld [vmem:[%s3134_s0 + $0xf8] sm:$0x3] }
   0xc   :  { %534 = vst [vmem:[%s3135_s1 + $0x18] sm:$0x3] %v454_v45  ;;  %vm3141_vm1 = vcmp.gt.f32.partialorder %v887_v32, %v979_v46  ;;  %v1005_v49 = vsel %vm3139_vm15, %v897_v34, %v949_v41  ;;  %v1012_v50 = vsel %vm3138_vm0, %v933_v39, %v928_v38  ;;  %vm3140_vm13 = vcmp.gt.f32.partialorder %v964_v44, %v959_v43  ;;  %v1029_v53 = vld [vmem:[%s3134_s0 + $0x108] sm:$0xff]  ;;  %v1050_v56 = vld [vmem:[%s3134_s0 + $0x120] sm:$0xff]  ;;  %v1055_v57 = vld [vmem:[%s3134_s0 + $0x110] sm:$0x3] }
   0xd   :  { %3417 = vst [vmem:[#allocation2_spill] sm:$0xff] %v1024_v52  ;;  %v455_v54 = vsel %vm3141_vm1, %v887_v32, %v979_v46  ;;  %vm3143_vm0 = vcmp.gt.f32.partialorder %v923_v37, %v1005_v49  ;;  %vm3142_vm15 = vcmp.gt.f32.partialorder %v954_v42, %v1012_v50  ;;  %v1045_v55 = vsel %vm3140_vm13, %v964_v44, %v959_v43  ;;  %v1060_v58 = vld [vmem:[%s3134_s0 + $0x118] sm:$0x3]  ;;  %v1084_v61 = vld [vmem:[%s3134_s0 + $0x130] sm:$0x3]  ;;  %v1089_v62 = vld [vmem:[%s3134_s0 + $0x140] sm:$0xff] }
   0xe   :  { %3418 = vst [vmem:[#allocation3_spill] sm:$0xff] %v1055_v57  ;;  %3419 = vst [vmem:[#allocation4_spill] sm:$0xff] %v1060_v58  ;;  %v456_v59 = vsel %vm3143_vm0, %v923_v37, %v1005_v49  ;;  %v1075_v60 = vsel %vm3142_vm15, %v954_v42, %v1012_v50  ;;  %vm3144_vm13 = vcmp.gt.f32.partialorder %v988_v47, %v1045_v55  ;;  %v1094_v63 = vld [vmem:[%s3134_s0 + $0x148] sm:$0xff]  ;;  %v1125_v4 = vld [vmem:[%s3134_s0 + $0x150] sm:$0x3]  ;;  %v332_v2 = vsel %vm252_vm3, 2, %v773_v15 }
   0xf   :  { %535 = vst [vmem:[%s3135_s1 + $0x20] sm:$0xff] %v455_v54  ;;  %vm3145_vm1 = vcmp.gt.f32.partialorder %v1029_v53, %v993_v48  ;;  %3420 = vst [vmem:[#allocation5_spill] sm:$0xff] %v1084_v61  ;;  %vm3149_vm15 = vcmp.gt.f32.partialorder %v1017_v51, %v1075_v60  ;;  %v1106_v0 = vsel %vm3144_vm13, %v988_v47, %v1045_v55  ;;  %v1118_v3 = vld [vmem:[%s3134_s0 + $0x128] sm:$0xff]  ;;  %v1146_v40 = vld [vmem:[%s3134_s0 + $0x138] sm:$0x3]  ;;  %v492_v6 = vsel %vm412_vm7, 3, %v332_v2 }
  0x10   :  { %3421 = vst [vmem:[#allocation6_spill] sm:$0xff] %v1089_v62  ;;  %3422 = vst [vmem:[#allocation7_spill] sm:$0xff] %v1094_v63  ;;  %v1113_v1 = vsel %vm3145_vm1, %v1029_v53, %v993_v48  ;;  %vm3148_vm0 = vcmp.gt.f32.partialorder %v1060_v58, %v1055_v57  ;;  %v457_v25 = vsel %vm3149_vm15, %v1017_v51, %v1075_v60  ;;  %v1151_v45 = vld [vmem:[%s3134_s0 + $0x160] sm:$0xff]  ;;  %v1156_v54 = vld [vmem:[%s3134_s0 + $0x158] sm:$0x3] }
  0x11   :  { %536 = vst [vmem:[%s3135_s1 + $0x28] sm:$0x3] %v456_v59  ;;  %3423 = vst [vmem:[#allocation8_spill] sm:$0xff] %v1106_v0  ;;  %vm3152_vm13 = vcmp.gt.f32.partialorder %v1024_v52, %v1106_v0  ;;  %vm3155_vm1 = vcmp.gt.f32.partialorder %v1050_v56, %v1113_v1  ;;  %v1141_v30 = vsel %vm3148_vm0, %v1060_v58, %v1055_v57 }
  0x12   :  { %3424 = vst [vmem:[#allocation9_spill] sm:$0xff] %v1113_v1  ;;  %3425 = vst [vmem:[#allocation10_spill] sm:$0xff] %v1118_v3  ;;  %v458_v59 = vsel %vm3152_vm13, %v1024_v52, %v1106_v0  ;;  %v1171_v13 = vsel %vm3155_vm1, %v1050_v56, %v1113_v1  ;;  %vm3160_vm0 = vcmp.gt.f32.partialorder %v1084_v61, %v1141_v30  ;;  %v1185_v0 = vld [vmem:[%s3134_s0 + $0x180] sm:$0xff]  ;;  %v1190_v52 = vld [vmem:[%s3134_s0 + $0x188] sm:$0xff] }
  0x13   :  { %3426 = vst [vmem:[#allocation11_spill] sm:$0xff] %v1125_v4  ;;  %3427 = vst [vmem:[#allocation12_spill] sm:$0xff] %v1141_v30  ;;  %vm3159_vm15 = vcmp.gt.f32.partialorder %v1094_v63, %v1089_v62  ;;  %vm3167_vm13 = vcmp.gt.f32.partialorder %v1118_v3, %v1171_v13  ;;  %v1202_v57 = vsel %vm3160_vm0, %v1084_v61, %v1141_v30  ;;  %v1221_v30 = vld [vmem:[%s3134_s0 + $0x190] sm:$0x3]  ;;  %v1226_v61 = vld [vmem:[%s3134_s0 + $0x198] sm:$0x3] }
  0x14   :  { %3428 = vst [vmem:[#allocation13_spill] sm:$0xff] %v1146_v40  ;;  %3429 = vst [vmem:[#allocation14_spill] sm:$0xff] %v1151_v45  ;;  %v1209_v58 = vsel %vm3159_vm15, %v1094_v63, %v1089_v62  ;;  %vm3166_vm1 = vcmp.gt.f32.partialorder %v1156_v54, %v1125_v4  ;;  %v459_v62 = vsel %vm3167_vm13, %v1118_v3, %v1171_v13  ;;  %v1247_v1 = vld [vmem:[%s3134_s0 + $0x178] sm:$0x3] }
  0x15   :  { %3430 = vst [vmem:[#allocation15_spill] sm:$0xff] %v1156_v54  ;;  %537 = vst [vmem:[%s3135_s1 + $0x30] sm:$0xff] %v457_v25  ;;  %v1180_v25 = vld [vmem:[%s3134_s0 + $0x170] sm:$0x3]  ;;  %vm3173_vm15 = vcmp.gt.f32.partialorder %v1146_v40, %v1202_v57  ;;  %vm3170_vm0 = vcmp.gt.f32.partialorder %v1151_v45, %v1209_v58  ;;  %v1242_v63 = vsel %vm3166_vm1, %v1156_v54, %v1125_v4  ;;  %v1343_v3 = vld [vmem:[%s3134_s0 + $0x1b8] sm:$0x3] }
  0x16   :  { %3431 = vst [vmem:[#allocation16_spill] sm:$0xff] %v1171_v13  ;;  %3432 = vst [vmem:[#allocation17_spill] sm:$0xff] %v1180_v25  ;;  %v1252_v13 = vld [vmem:[%s3134_s0 + $0x1a0] sm:$0xff]  ;;  %v460_v4 = vsel %vm3173_vm15, %v1146_v40, %v1202_v57  ;;  %v1267_v54 = vsel %vm3170_vm0, %v1151_v45, %v1209_v58  ;;  %vm3177_vm1 = vcmp.gt.f32.partialorder %v1180_v25, %v1242_v63  ;;  %v3608_v33 = vld [vmem:[#allocation3_spill] sm:$0xff] }
  0x17   :  { %3433 = vst [vmem:[#allocation18_spill] sm:$0xff] %v1185_v0  ;;  %3434 = vst [vmem:[#allocation19_spill] sm:$0xff] %v1190_v52  ;;  %vm3178_vm13 = vcmp.gt.f32.partialorder %v1190_v52, %v1185_v0  ;;  %v1298_v45 = vsel %vm3177_vm1, %v1180_v25, %v1242_v63  ;;  %vm3184_vm15 = vcmp.gt.f32.partialorder %v1226_v61, %v1221_v30  ;;  %v1322_v25 = vld [vmem:[%s3134_s0 + $0x1d8] sm:$0x3] }
  0x18   :  { %538 = vst [vmem:[%s3135_s1 + $0x38] sm:$0x3] %v458_v59  ;;  %3435 = vst [vmem:[#allocation20_spill] sm:$0xff] %v1202_v57  ;;  %v1214_v59 = vld [vmem:[%s3134_s0 + $0x168] sm:$0xff]  ;;  %v1281_v57 = vld [vmem:[%s3134_s0 + $0x1c0] sm:$0xff]  ;;  %v1305_v40 = vsel %vm3178_vm13, %v1190_v52, %v1185_v0  ;;  %vm3188_vm1 = vcmp.gt.f32.partialorder %v1247_v1, %v1298_v45  ;;  %v1338_v52 = vsel %vm3184_vm15, %v1226_v61, %v1221_v30 }
  0x19   :  { %3436 = vst [vmem:[#allocation21_spill] sm:$0xff] %v1209_v58  ;;  %3437 = vst [vmem:[#allocation22_spill] sm:$0xff] %v1214_v59  ;;  %v1286_v58 = vld [vmem:[%s3134_s0 + $0x1c8] sm:$0xff]  ;;  %vm3185_vm0 = vcmp.gt.f32.partialorder %v1214_v59, %v1267_v54  ;;  %vm3191_vm13 = vcmp.gt.f32.partialorder %v1252_v13, %v1305_v40  ;;  %vm3595_vm3 = vcmp.gt.f32.partialorder %v853_v27, %v909_v35  ;;  %v3605_v29 = vld [vmem:[#allocation9_spill] sm:$0xff] }
  0x1a   :  { %3438 = vst [vmem:[#allocation23_spill] sm:$0xff] %v1221_v30  ;;  %3439 = vst [vmem:[#allocation24_spill] sm:$0xff] %v1226_v61  ;;  %v461_v0 = vsel %vm3185_vm0, %v1214_v59, %v1267_v54  ;;  %v462_v30 = vsel %vm3188_vm1, %v1247_v1, %v1298_v45  ;;  %v1363_v61 = vsel %vm3191_vm13, %v1252_v13, %v1305_v40  ;;  %v1439_v59 = vld [vmem:[%s3134_s0 + $0x1f8] sm:$0x3]  ;;  %v3610_v35 = vld [vmem:[#allocation2_spill] sm:$0xff] }
  0x1b   :  { %3440 = vst [vmem:[#allocation25_spill] sm:$0xff] %v1242_v63  ;;  %3441 = vst [vmem:[#allocation26_spill] sm:$0xff] %v1247_v1  ;;  %v1317_v63 = vld [vmem:[%s3134_s0 + $0x1d0] sm:$0x3]  ;;  %vm3195_vm0 = vcmp.gt.f32.partialorder %v1286_v58, %v1281_v57  ;;  %v1382_v1 = vld [vmem:[%s3134_s0 + $0x208] sm:$0xff]  ;;  %vm3599_vm7 = vcmp.gt.f32.partialorder %v923_v37, %v1005_v49 }
  0x1c   :  { %3442 = vst [vmem:[#allocation27_spill] sm:$0xff] %v1252_v13  ;;  %539 = vst [vmem:[%s3135_s1 + $0x40] sm:$0xff] %v459_v62  ;;  %v1276_v62 = vld [vmem:[%s3134_s0 + $0x1b0] sm:$0x3]  ;;  %v1401_v13 = vsel %vm3195_vm0, %v1286_v58, %v1281_v57  ;;  %vm3202_vm13 = vcmp.gt.f32.partialorder %v1322_v25, %v1317_v63  ;;  %v3622_v49 = vld [vmem:[#allocation13_spill] sm:$0xff] }
  0x1d   :  { %3443 = vst [vmem:[#allocation28_spill] sm:$0xff] %v1267_v54  ;;  %3444 = vst [vmem:[#allocation29_spill] sm:$0xff] %v1276_v62  ;;  %v1348_v54 = vld [vmem:[%s3134_s0 + $0x1e0] sm:$0xff]  ;;  %vm3196_vm15 = vcmp.gt.f32.partialorder %v1276_v62, %v1338_v52  ;;  %v3611_v36 = vld [vmem:[#allocation8_spill] sm:$0xff] }
  0x1e   :  { %3445 = vst [vmem:[#allocation30_spill] sm:$0xff] %v1281_v57  ;;  %3446 = vst [vmem:[#allocation31_spill] sm:$0xff] %v1286_v58  ;;  %v1434_v58 = vsel %vm3202_vm13, %v1322_v25, %v1317_v63  ;;  %v3632_v2 = vld [vmem:[#allocation18_spill] sm:$0xff] }
  0x1f   :  { %540 = vst [vmem:[%s3135_s1 + $0x48] sm:$0x3] %v460_v4  ;;  %3447 = vst [vmem:[#allocation32_spill] sm:$0xff] %v1298_v45  ;;  %v1310_v4 = vld [vmem:[%s3134_s0 + $0x1a8] sm:$0xff]  ;;  %v1377_v45 = vld [vmem:[%s3134_s0 + $0x200] sm:$0xff] }
  0x20   :  { %3448 = vst [vmem:[#allocation33_spill] sm:$0xff] %v1305_v40  ;;  %3449 = vst [vmem:[#allocation34_spill] sm:$0xff] %v1310_v4  ;;  %vm3203_vm1 = vcmp.gt.f32.partialorder %v1310_v4, %v1363_v61  ;;  %v1394_v40 = vsel %vm3196_vm15, %v1276_v62, %v1338_v52  ;;  %v1418_v62 = vld [vmem:[%s3134_s0 + $0x218] sm:$0x3]  ;;  %vm3206_vm15 = vcmp.gt.f32.partialorder %v1348_v54, %v1401_v13 }
  0x21   :  { %3450 = vst [vmem:[#allocation35_spill] sm:$0xff] %v1317_v63  ;;  %3451 = vst [vmem:[#allocation36_spill] sm:$0xff] %v1322_v25  ;;  %v463_v57 = vsel %vm3203_vm1, %v1310_v4, %v1363_v61  ;;  %vm3209_vm0 = vcmp.gt.f32.partialorder %v1343_v3, %v1394_v40  ;;  %v1459_v25 = vsel %vm3206_vm15, %v1348_v54, %v1401_v13  ;;  %v1535_v4 = vld [vmem:[%s3134_s0 + $0x238] sm:$0x3] }
  0x22   :  { %3452 = vst [vmem:[#allocation37_spill] sm:$0xff] %v1338_v52  ;;  %3453 = vst [vmem:[#allocation38_spill] sm:$0xff] %v1343_v3  ;;  %v1413_v52 = vld [vmem:[%s3134_s0 + $0x210] sm:$0x3]  ;;  %v464_v63 = vsel %vm3209_vm0, %v1343_v3, %v1394_v40  ;;  %vm3214_vm1 = vcmp.gt.f32.partialorder %v1382_v1, %v1377_v45 }
  0x23   :  { %3454 = vst [vmem:[#allocation39_spill] sm:$0xff] %v1348_v54  ;;  %541 = vst [vmem:[%s3135_s1 + $0x50] sm:$0xff] %v461_v0  ;;  %v1372_v0 = vld [vmem:[%s3134_s0 + $0x1f0] sm:$0x3]  ;;  %v1497_v3 = vsel %vm3214_vm1, %v1382_v1, %v1377_v45  ;;  %vm3220_vm0 = vcmp.gt.f32.partialorder %v1418_v62, %v1413_v52 }
  0x24   :  { %3455 = vst [vmem:[#allocation40_spill] sm:$0xff] %v1363_v61  ;;  %3456 = vst [vmem:[#allocation41_spill] sm:$0xff] %v1372_v0  ;;  %v1444_v61 = vld [vmem:[%s3134_s0 + $0x220] sm:$0xff]  ;;  %vm3213_vm13 = vcmp.gt.f32.partialorder %v1372_v0, %v1434_v58 }
  0x25   :  { %3457 = vst [vmem:[#allocation42_spill] sm:$0xff] %v1377_v45  ;;  %3458 = vst [vmem:[#allocation43_spill] sm:$0xff] %v1382_v1  ;;  %v1490_v54 = vsel %vm3213_vm13, %v1372_v0, %v1434_v58  ;;  %v1514_v0 = vld [vmem:[%s3134_s0 + $0x258] sm:$0x3]  ;;  %vm3227_vm1 = vcmp.gt.f32.partialorder %v1444_v61, %v1497_v3  ;;  %v1530_v1 = vsel %vm3220_vm0, %v1418_v62, %v1413_v52 }
  0x26   :  { %542 = vst [vmem:[%s3135_s1 + $0x58] sm:$0x3] %v462_v30  ;;  %3459 = vst [vmem:[#allocation44_spill] sm:$0xff] %v1394_v40  ;;  %v1406_v30 = vld [vmem:[%s3134_s0 + $0x1e8] sm:$0xff]  ;;  %v1473_v40 = vld [vmem:[%s3134_s0 + $0x240] sm:$0xff]  ;;  %vm3224_vm13 = vcmp.gt.f32.partialorder %v1439_v59, %v1490_v54 }
  0x27   :  { %3460 = vst [vmem:[#allocation45_spill] sm:$0xff] %v1401_v13  ;;  %3461 = vst [vmem:[#allocation46_spill] sm:$0xff] %v1406_v30  ;;  %v1478_v13 = vld [vmem:[%s3134_s0 + $0x248] sm:$0xff]  ;;  %vm3221_vm15 = vcmp.gt.f32.partialorder %v1406_v30, %v1459_v25 }
  0x28   :  { %3462 = vst [vmem:[#allocation47_spill] sm:$0xff] %v1413_v52  ;;  %3463 = vst [vmem:[#allocation48_spill] sm:$0xff] %v1418_v62  ;;  %v465_v45 = vsel %vm3221_vm15, %v1406_v30, %v1459_v25  ;;  %v466_v52 = vsel %vm3224_vm13, %v1439_v59, %v1490_v54  ;;  %v1555_v62 = vsel %vm3227_vm1, %v1444_v61, %v1497_v3  ;;  %v1631_v30 = vld [vmem:[%s3134_s0 + $0x278] sm:$0x3] }
  0x29   :  { %3464 = vst [vmem:[#allocation49_spill] sm:$0xff] %v1434_v58  ;;  %3465 = vst [vmem:[#allocation50_spill] sm:$0xff] %v1439_v59  ;;  %v1509_v58 = vld [vmem:[%s3134_s0 + $0x250] sm:$0x3]  ;;  %vm3231_vm15 = vcmp.gt.f32.partialorder %v1478_v13, %v1473_v40  ;;  %v1574_v59 = vld [vmem:[%s3134_s0 + $0x288] sm:$0xff] }
  0x2a   :  { %3466 = vst [vmem:[#allocation51_spill] sm:$0xff] %v1444_v61  ;;  %543 = vst [vmem:[%s3135_s1 + $0x60] sm:$0xff] %v463_v57  ;;  %v1468_v57 = vld [vmem:[%s3134_s0 + $0x230] sm:$0x3]  ;;  %v1593_v61 = vsel %vm3231_vm15, %v1478_v13, %v1473_v40  ;;  %vm3238_vm1 = vcmp.gt.f32.partialorder %v1514_v0, %v1509_v58 }
  0x2b   :  { %3467 = vst [vmem:[#allocation52_spill] sm:$0xff] %v1459_v25  ;;  %3468 = vst [vmem:[#allocation53_spill] sm:$0xff] %v1468_v57  ;;  %v1540_v25 = vld [vmem:[%s3134_s0 + $0x260] sm:$0xff]  ;;  %vm3232_vm0 = vcmp.gt.f32.partialorder %v1468_v57, %v1530_v1 }
  0x2c   :  { %3469 = vst [vmem:[#allocation54_spill] sm:$0xff] %v1473_v40  ;;  %3470 = vst [vmem:[#allocation55_spill] sm:$0xff] %v1478_v13  ;;  %v1626_v13 = vsel %vm3238_vm1, %v1514_v0, %v1509_v58 }
  0x2d   :  { %544 = vst [vmem:[%s3135_s1 + $0x68] sm:$0x3] %v464_v63  ;;  %3471 = vst [vmem:[#allocation56_spill] sm:$0xff] %v1490_v54  ;;  %v1502_v63 = vld [vmem:[%s3134_s0 + $0x228] sm:$0xff]  ;;  %v1569_v54 = vld [vmem:[%s3134_s0 + $0x280] sm:$0xff] }
  0x2e   :  { %3472 = vst [vmem:[#allocation57_spill] sm:$0xff] %v1497_v3  ;;  %3473 = vst [vmem:[#allocation58_spill] sm:$0xff] %v1502_v63  ;;  %vm3239_vm13 = vcmp.gt.f32.partialorder %v1502_v63, %v1555_v62  ;;  %v1586_v3 = vsel %vm3232_vm0, %v1468_v57, %v1530_v1  ;;  %v1610_v57 = vld [vmem:[%s3134_s0 + $0x298] sm:$0x3]  ;;  %vm3242_vm0 = vcmp.gt.f32.partialorder %v1540_v25, %v1593_v61 }
  0x2f   :  { %3474 = vst [vmem:[#allocation59_spill] sm:$0xff] %v1509_v58  ;;  %3475 = vst [vmem:[#allocation60_spill] sm:$0xff] %v1514_v0  ;;  %v467_v40 = vsel %vm3239_vm13, %v1502_v63, %v1555_v62  ;;  %vm3245_vm15 = vcmp.gt.f32.partialorder %v1535_v4, %v1586_v3  ;;  %v1651_v0 = vsel %vm3242_vm0, %v1540_v25, %v1593_v61  ;;  %v1727_v63 = vld [vmem:[%s3134_s0 + $0x2b8] sm:$0x3] }
  0x30   :  { %3476 = vst [vmem:[#allocation61_spill] sm:$0xff] %v1530_v1  ;;  %3477 = vst [vmem:[#allocation62_spill] sm:$0xff] %v1535_v4  ;;  %v1605_v1 = vld [vmem:[%s3134_s0 + $0x290] sm:$0x3]  ;;  %v468_v58 = vsel %vm3245_vm15, %v1535_v4, %v1586_v3  ;;  %vm3250_vm13 = vcmp.gt.f32.partialorder %v1574_v59, %v1569_v54 }
  0x31   :  { %3478 = vst [vmem:[#allocation63_spill] sm:$0xff] %v1540_v25  ;;  %545 = vst [vmem:[%s3135_s1 + $0x70] sm:$0xff] %v465_v45  ;;  %v1564_v45 = vld [vmem:[%s3134_s0 + $0x270] sm:$0x3]  ;;  %v1689_v4 = vsel %vm3250_vm13, %v1574_v59, %v1569_v54  ;;  %vm3256_vm15 = vcmp.gt.f32.partialorder %v1610_v57, %v1605_v1 }
  0x32   :  { %3479 = vst [vmem:[#allocation64_spill] sm:$0xff] %v1555_v62  ;;  %3480 = vst [vmem:[#allocation65_spill] sm:$0xff] %v1564_v45  ;;  %v1636_v62 = vld [vmem:[%s3134_s0 + $0x2a0] sm:$0xff]  ;;  %vm3249_vm1 = vcmp.gt.f32.partialorder %v1564_v45, %v1626_v13 }
  0x33   :  { %3481 = vst [vmem:[#allocation66_spill] sm:$0xff] %v1569_v54  ;;  %3482 = vst [vmem:[#allocation67_spill] sm:$0xff] %v1574_v59  ;;  %v1682_v25 = vsel %vm3249_vm1, %v1564_v45, %v1626_v13  ;;  %v1706_v45 = vld [vmem:[%s3134_s0 + $0x2d8] sm:$0x3]  ;;  %vm3263_vm13 = vcmp.gt.f32.partialorder %v1636_v62, %v1689_v4  ;;  %v1722_v59 = vsel %vm3256_vm15, %v1610_v57, %v1605_v1 }
  0x34   :  { %546 = vst [vmem:[%s3135_s1 + $0x78] sm:$0x3] %v466_v52  ;;  %3483 = vst [vmem:[#allocation68_spill] sm:$0xff] %v1586_v3  ;;  %v1598_v52 = vld [vmem:[%s3134_s0 + $0x268] sm:$0xff]  ;;  %v1665_v3 = vld [vmem:[%s3134_s0 + $0x2c0] sm:$0xff]  ;;  %vm3260_vm1 = vcmp.gt.f32.partialorder %v1631_v30, %v1682_v25 }
  0x35   :  { %3484 = vst [vmem:[#allocation69_spill] sm:$0xff] %v1593_v61  ;;  %3485 = vst [vmem:[#allocation70_spill] sm:$0xff] %v1598_v52  ;;  %v1670_v61 = vld [vmem:[%s3134_s0 + $0x2c8] sm:$0xff]  ;;  %vm3257_vm0 = vcmp.gt.f32.partialorder %v1598_v52, %v1651_v0 }
  0x36   :  { %3486 = vst [vmem:[#allocation71_spill] sm:$0xff] %v1605_v1  ;;  %3487 = vst [vmem:[#allocation72_spill] sm:$0xff] %v1610_v57  ;;  %v469_v54 = vsel %vm3257_vm0, %v1598_v52, %v1651_v0  ;;  %v470_v1 = vsel %vm3260_vm1, %v1631_v30, %v1682_v25  ;;  %v1747_v57 = vsel %vm3263_vm13, %v1636_v62, %v1689_v4  ;;  %v1823_v52 = vld [vmem:[%s3134_s0 + $0x2f8] sm:$0x3] }
  0x37   :  { %3488 = vst [vmem:[#allocation73_spill] sm:$0xff] %v1626_v13  ;;  %3489 = vst [vmem:[#allocation74_spill] sm:$0xff] %v1631_v30  ;;  %v1701_v13 = vld [vmem:[%s3134_s0 + $0x2d0] sm:$0x3]  ;;  %vm3267_vm0 = vcmp.gt.f32.partialorder %v1670_v61, %v1665_v3  ;;  %v1766_v30 = vld [vmem:[%s3134_s0 + $0x308] sm:$0xff] }
  0x38   :  { %3490 = vst [vmem:[#allocation75_spill] sm:$0xff] %v1636_v62  ;;  %547 = vst [vmem:[%s3135_s1 + $0x80] sm:$0xff] %v467_v40  ;;  %v1660_v40 = vld [vmem:[%s3134_s0 + $0x2b0] sm:$0x3]  ;;  %v1785_v62 = vsel %vm3267_vm0, %v1670_v61, %v1665_v3  ;;  %vm3274_vm13 = vcmp.gt.f32.partialorder %v1706_v45, %v1701_v13 }
  0x39   :  { %3491 = vst [vmem:[#allocation76_spill] sm:$0xff] %v1651_v0  ;;  %3492 = vst [vmem:[#allocation77_spill] sm:$0xff] %v1660_v40  ;;  %v1732_v0 = vld [vmem:[%s3134_s0 + $0x2e0] sm:$0xff]  ;;  %vm3268_vm15 = vcmp.gt.f32.partialorder %v1660_v40, %v1722_v59 }
  0x3a   :  { %3493 = vst [vmem:[#allocation78_spill] sm:$0xff] %v1665_v3  ;;  %3494 = vst [vmem:[#allocation79_spill] sm:$0xff] %v1670_v61  ;;  %v1818_v61 = vsel %vm3274_vm13, %v1706_v45, %v1701_v13 }
  0x3b   :  { %548 = vst [vmem:[%s3135_s1 + $0x88] sm:$0x3] %v468_v58  ;;  %3495 = vst [vmem:[#allocation80_spill] sm:$0xff] %v1682_v25  ;;  %v1694_v58 = vld [vmem:[%s3134_s0 + $0x2a8] sm:$0xff]  ;;  %v1761_v25 = vld [vmem:[%s3134_s0 + $0x300] sm:$0xff] }
  0x3c   :  { %3496 = vst [vmem:[#allocation81_spill] sm:$0xff] %v1689_v4  ;;  %3497 = vst [vmem:[#allocation82_spill] sm:$0xff] %v1694_v58  ;;  %vm3275_vm1 = vcmp.gt.f32.partialorder %v1694_v58, %v1747_v57  ;;  %v1778_v4 = vsel %vm3268_vm15, %v1660_v40, %v1722_v59  ;;  %v1802_v40 = vld [vmem:[%s3134_s0 + $0x318] sm:$0x3]  ;;  %vm3278_vm15 = vcmp.gt.f32.partialorder %v1732_v0, %v1785_v62 }
  0x3d   :  { %3498 = vst [vmem:[#allocation83_spill] sm:$0xff] %v1701_v13  ;;  %3499 = vst [vmem:[#allocation84_spill] sm:$0xff] %v1706_v45  ;;  %v471_v3 = vsel %vm3275_vm1, %v1694_v58, %v1747_v57  ;;  %vm3281_vm0 = vcmp.gt.f32.partialorder %v1727_v63, %v1778_v4  ;;  %v1843_v45 = vsel %vm3278_vm15, %v1732_v0, %v1785_v62  ;;  %v1919_v58 = vld [vmem:[%s3134_s0 + $0x338] sm:$0x3] }
  0x3e   :  { %3500 = vst [vmem:[#allocation85_spill] sm:$0xff] %v1722_v59  ;;  %3501 = vst [vmem:[#allocation86_spill] sm:$0xff] %v1727_v63  ;;  %v1797_v59 = vld [vmem:[%s3134_s0 + $0x310] sm:$0x3]  ;;  %v472_v13 = vsel %vm3281_vm0, %v1727_v63, %v1778_v4  ;;  %vm3286_vm1 = vcmp.gt.f32.partialorder %v1766_v30, %v1761_v25 }
  0x3f   :  { %3502 = vst [vmem:[#allocation87_spill] sm:$0xff] %v1732_v0  ;;  %549 = vst [vmem:[%s3135_s1 + $0x90] sm:$0xff] %v469_v54  ;;  %v1756_v54 = vld [vmem:[%s3134_s0 + $0x2f0] sm:$0x3]  ;;  %v1881_v63 = vsel %vm3286_vm1, %v1766_v30, %v1761_v25  ;;  %vm3292_vm0 = vcmp.gt.f32.partialorder %v1802_v40, %v1797_v59 }
  0x40   :  { %3503 = vst [vmem:[#allocation88_spill] sm:$0xff] %v1747_v57  ;;  %3504 = vst [vmem:[#allocation89_spill] sm:$0xff] %v1756_v54  ;;  %v1828_v57 = vld [vmem:[%s3134_s0 + $0x320] sm:$0xff]  ;;  %vm3285_vm13 = vcmp.gt.f32.partialorder %v1756_v54, %v1818_v61 }
  0x41   :  { %3505 = vst [vmem:[#allocation90_spill] sm:$0xff] %v1761_v25  ;;  %3506 = vst [vmem:[#allocation91_spill] sm:$0xff] %v1766_v30  ;;  %v1874_v0 = vsel %vm3285_vm13, %v1756_v54, %v1818_v61  ;;  %v1898_v54 = vld [vmem:[%s3134_s0 + $0x358] sm:$0x3]  ;;  %vm3299_vm1 = vcmp.gt.f32.partialorder %v1828_v57, %v1881_v63  ;;  %v1914_v30 = vsel %vm3292_vm0, %v1802_v40, %v1797_v59 }
  0x42   :  { %550 = vst [vmem:[%s3135_s1 + $0x98] sm:$0x3] %v470_v1  ;;  %3507 = vst [vmem:[#allocation92_spill] sm:$0xff] %v1778_v4  ;;  %v1790_v1 = vld [vmem:[%s3134_s0 + $0x2e8] sm:$0xff]  ;;  %v1857_v4 = vld [vmem:[%s3134_s0 + $0x340] sm:$0xff]  ;;  %vm3296_vm13 = vcmp.gt.f32.partialorder %v1823_v52, %v1874_v0 }
  0x43   :  { %3508 = vst [vmem:[#allocation93_spill] sm:$0xff] %v1785_v62  ;;  %3509 = vst [vmem:[#allocation94_spill] sm:$0xff] %v1790_v1  ;;  %v1862_v62 = vld [vmem:[%s3134_s0 + $0x348] sm:$0xff]  ;;  %vm3293_vm15 = vcmp.gt.f32.partialorder %v1790_v1, %v1843_v45 }
  0x44   :  { %3510 = vst [vmem:[#allocation95_spill] sm:$0xff] %v1797_v59  ;;  %3511 = vst [vmem:[#allocation96_spill] sm:$0xff] %v1802_v40  ;;  %v473_v25 = vsel %vm3293_vm15, %v1790_v1, %v1843_v45  ;;  %v474_v59 = vsel %vm3296_vm13, %v1823_v52, %v1874_v0  ;;  %v1939_v40 = vsel %vm3299_vm1, %v1828_v57, %v1881_v63  ;;  %v2015_v1 = vld [vmem:[%s3134_s0 + $0x378] sm:$0x3] }
  0x45   :  { %3512 = vst [vmem:[#allocation97_spill] sm:$0xff] %v1818_v61  ;;  %3513 = vst [vmem:[#allocation98_spill] sm:$0xff] %v1823_v52  ;;  %v1893_v61 = vld [vmem:[%s3134_s0 + $0x350] sm:$0x3]  ;;  %vm3303_vm15 = vcmp.gt.f32.partialorder %v1862_v62, %v1857_v4  ;;  %v1958_v52 = vld [vmem:[%s3134_s0 + $0x388] sm:$0xff] }
  0x46   :  { %3514 = vst [vmem:[#allocation99_spill] sm:$0xff] %v1828_v57  ;;  %551 = vst [vmem:[%s3135_s1 + $0xa0] sm:$0xff] %v471_v3  ;;  %v1852_v3 = vld [vmem:[%s3134_s0 + $0x330] sm:$0x3]  ;;  %v1977_v57 = vsel %vm3303_vm15, %v1862_v62, %v1857_v4  ;;  %vm3310_vm1 = vcmp.gt.f32.partialorder %v1898_v54, %v1893_v61 }
  0x47   :  { %3515 = vst [vmem:[#allocation100_spill] sm:$0xff] %v1843_v45  ;;  %3516 = vst [vmem:[#allocation101_spill] sm:$0xff] %v1852_v3  ;;  %v1924_v45 = vld [vmem:[%s3134_s0 + $0x360] sm:$0xff]  ;;  %vm3304_vm0 = vcmp.gt.f32.partialorder %v1852_v3, %v1914_v30 }
  0x48   :  { %3517 = vst [vmem:[#allocation102_spill] sm:$0xff] %v1857_v4  ;;  %3518 = vst [vmem:[#allocation103_spill] sm:$0xff] %v1862_v62  ;;  %v2010_v62 = vsel %vm3310_vm1, %v1898_v54, %v1893_v61 }
  0x49   :  { %552 = vst [vmem:[%s3135_s1 + $0xa8] sm:$0x3] %v472_v13  ;;  %3519 = vst [vmem:[#allocation104_spill] sm:$0xff] %v1874_v0  ;;  %v1886_v13 = vld [vmem:[%s3134_s0 + $0x328] sm:$0xff]  ;;  %v1953_v0 = vld [vmem:[%s3134_s0 + $0x380] sm:$0xff] }
  0x4a   :  { %3520 = vst [vmem:[#allocation105_spill] sm:$0xff] %v1881_v63  ;;  %3521 = vst [vmem:[#allocation106_spill] sm:$0xff] %v1886_v13  ;;  %vm3311_vm13 = vcmp.gt.f32.partialorder %v1886_v13, %v1939_v40  ;;  %v1970_v63 = vsel %vm3304_vm0, %v1852_v3, %v1914_v30  ;;  %v1994_v3 = vld [vmem:[%s3134_s0 + $0x398] sm:$0x3]  ;;  %vm3314_vm0 = vcmp.gt.f32.partialorder %v1924_v45, %v1977_v57 }
  0x4b   :  { %3522 = vst [vmem:[#allocation107_spill] sm:$0xff] %v1893_v61  ;;  %3523 = vst [vmem:[#allocation108_spill] sm:$0xff] %v1898_v54  ;;  %v475_v4 = vsel %vm3311_vm13, %v1886_v13, %v1939_v40  ;;  %vm3317_vm15 = vcmp.gt.f32.partialorder %v1919_v58, %v1970_v63  ;;  %v2035_v54 = vsel %vm3314_vm0, %v1924_v45, %v1977_v57  ;;  %v2111_v13 = vld [vmem:[%s3134_s0 + $0x3b8] sm:$0x3] }
  0x4c   :  { %3524 = vst [vmem:[#allocation109_spill] sm:$0xff] %v1914_v30  ;;  %3525 = vst [vmem:[#allocation110_spill] sm:$0xff] %v1919_v58  ;;  %v1989_v30 = vld [vmem:[%s3134_s0 + $0x390] sm:$0x3]  ;;  %v476_v61 = vsel %vm3317_vm15, %v1919_v58, %v1970_v63  ;;  %vm3322_vm13 = vcmp.gt.f32.partialorder %v1958_v52, %v1953_v0 }
  0x4d   :  { %3526 = vst [vmem:[#allocation111_spill] sm:$0xff] %v1924_v45  ;;  %553 = vst [vmem:[%s3135_s1 + $0xb0] sm:$0xff] %v473_v25  ;;  %v1948_v25 = vld [vmem:[%s3134_s0 + $0x370] sm:$0x3]  ;;  %v2073_v58 = vsel %vm3322_vm13, %v1958_v52, %v1953_v0  ;;  %vm3328_vm15 = vcmp.gt.f32.partialorder %v1994_v3, %v1989_v30 }
  0x4e   :  { %3527 = vst [vmem:[#allocation112_spill] sm:$0xff] %v1939_v40  ;;  %3528 = vst [vmem:[#allocation113_spill] sm:$0xff] %v1948_v25  ;;  %v2020_v40 = vld [vmem:[%s3134_s0 + $0x3a0] sm:$0xff]  ;;  %vm3321_vm1 = vcmp.gt.f32.partialorder %v1948_v25, %v2010_v62 }
  0x4f   :  { %3529 = vst [vmem:[#allocation114_spill] sm:$0xff] %v1953_v0  ;;  %3530 = vst [vmem:[#allocation115_spill] sm:$0xff] %v1958_v52  ;;  %v2066_v45 = vsel %vm3321_vm1, %v1948_v25, %v2010_v62  ;;  %v2090_v25 = vld [vmem:[%s3134_s0 + $0x3d8] sm:$0x3]  ;;  %vm3335_vm13 = vcmp.gt.f32.partialorder %v2020_v40, %v2073_v58  ;;  %v2106_v52 = vsel %vm3328_vm15, %v1994_v3, %v1989_v30 }
  0x50   :  { %554 = vst [vmem:[%s3135_s1 + $0xb8] sm:$0x3] %v474_v59  ;;  %3531 = vst [vmem:[#allocation116_spill] sm:$0xff] %v1970_v63  ;;  %v1982_v59 = vld [vmem:[%s3134_s0 + $0x368] sm:$0xff]  ;;  %v2049_v63 = vld [vmem:[%s3134_s0 + $0x3c0] sm:$0xff]  ;;  %vm3332_vm1 = vcmp.gt.f32.partialorder %v2015_v1, %v2066_v45 }
  0x51   :  { %3532 = vst [vmem:[#allocation117_spill] sm:$0xff] %v1977_v57  ;;  %3533 = vst [vmem:[#allocation118_spill] sm:$0xff] %v1982_v59  ;;  %v2054_v57 = vld [vmem:[%s3134_s0 + $0x3c8] sm:$0xff]  ;;  %vm3329_vm0 = vcmp.gt.f32.partialorder %v1982_v59, %v2035_v54 }
  0x52   :  { %3534 = vst [vmem:[#allocation119_spill] sm:$0xff] %v1989_v30  ;;  %3535 = vst [vmem:[#allocation120_spill] sm:$0xff] %v1994_v3  ;;  %v477_v0 = vsel %vm3329_vm0, %v1982_v59, %v2035_v54  ;;  %v478_v30 = vsel %vm3332_vm1, %v2015_v1, %v2066_v45  ;;  %v2131_v3 = vsel %vm3335_vm13, %v2020_v40, %v2073_v58  ;;  %v2207_v59 = vld [vmem:[%s3134_s0 + $0x3f8] sm:$0x3] }
  0x53   :  { %3536 = vst [vmem:[#allocation121_spill] sm:$0xff] %v2010_v62  ;;  %3537 = vst [vmem:[#allocation122_spill] sm:$0xff] %v2015_v1  ;;  %v2085_v62 = vld [vmem:[%s3134_s0 + $0x3d0] sm:$0x3]  ;;  %vm3339_vm0 = vcmp.gt.f32.partialorder %v2054_v57, %v2049_v63  ;;  %v2150_v1 = vld [vmem:[%s3134_s0 + $0x408] sm:$0xff] }
  0x54   :  { %3538 = vst [vmem:[#allocation123_spill] sm:$0xff] %v2020_v40  ;;  %555 = vst [vmem:[%s3135_s1 + $0xc0] sm:$0xff] %v475_v4  ;;  %v2044_v4 = vld [vmem:[%s3134_s0 + $0x3b0] sm:$0x3]  ;;  %v2169_v40 = vsel %vm3339_vm0, %v2054_v57, %v2049_v63  ;;  %vm3346_vm13 = vcmp.gt.f32.partialorder %v2090_v25, %v2085_v62 }
  0x55   :  { %3539 = vst [vmem:[#allocation124_spill] sm:$0xff] %v2035_v54  ;;  %3540 = vst [vmem:[#allocation125_spill] sm:$0xff] %v2044_v4  ;;  %v2116_v54 = vld [vmem:[%s3134_s0 + $0x3e0] sm:$0xff]  ;;  %vm3340_vm15 = vcmp.gt.f32.partialorder %v2044_v4, %v2106_v52 }
  0x56   :  { %3541 = vst [vmem:[#allocation126_spill] sm:$0xff] %v2049_v63  ;;  %3542 = vst [vmem:[#allocation127_spill] sm:$0xff] %v2054_v57  ;;  %v2202_v57 = vsel %vm3346_vm13, %v2090_v25, %v2085_v62 }
  0x57   :  { %556 = vst [vmem:[%s3135_s1 + $0xc8] sm:$0x3] %v476_v61  ;;  %3543 = vst [vmem:[#allocation128_spill] sm:$0xff] %v2066_v45  ;;  %v2078_v61 = vld [vmem:[%s3134_s0 + $0x3a8] sm:$0xff]  ;;  %v2145_v45 = vld [vmem:[%s3134_s0 + $0x400] sm:$0xff] }
  0x58   :  { %3544 = vst [vmem:[#allocation129_spill] sm:$0xff] %v2073_v58  ;;  %3545 = vst [vmem:[#allocation130_spill] sm:$0xff] %v2078_v61  ;;  %vm3347_vm1 = vcmp.gt.f32.partialorder %v2078_v61, %v2131_v3  ;;  %v2162_v58 = vsel %vm3340_vm15, %v2044_v4, %v2106_v52  ;;  %v2186_v4 = vld [vmem:[%s3134_s0 + $0x418] sm:$0x3]  ;;  %vm3350_vm15 = vcmp.gt.f32.partialorder %v2116_v54, %v2169_v40 }
  0x59   :  { %3546 = vst [vmem:[#allocation131_spill] sm:$0xff] %v2085_v62  ;;  %3547 = vst [vmem:[#allocation132_spill] sm:$0xff] %v2090_v25  ;;  %v479_v63 = vsel %vm3347_vm1, %v2078_v61, %v2131_v3  ;;  %vm3353_vm0 = vcmp.gt.f32.partialorder %v2111_v13, %v2162_v58  ;;  %v2227_v25 = vsel %vm3350_vm15, %v2116_v54, %v2169_v40  ;;  %v2303_v61 = vld [vmem:[%s3134_s0 + $0x438] sm:$0x3] }
  0x5a   :  { %3548 = vst [vmem:[#allocation133_spill] sm:$0xff] %v2106_v52  ;;  %3549 = vst [vmem:[#allocation134_spill] sm:$0xff] %v2111_v13  ;;  %v2181_v52 = vld [vmem:[%s3134_s0 + $0x410] sm:$0x3]  ;;  %v480_v62 = vsel %vm3353_vm0, %v2111_v13, %v2162_v58  ;;  %vm3358_vm1 = vcmp.gt.f32.partialorder %v2150_v1, %v2145_v45 }
  0x5b   :  { %3550 = vst [vmem:[#allocation135_spill] sm:$0xff] %v2116_v54  ;;  %557 = vst [vmem:[%s3135_s1 + $0xd0] sm:$0xff] %v477_v0  ;;  %v2140_v0 = vld [vmem:[%s3134_s0 + $0x3f0] sm:$0x3]  ;;  %v2265_v13 = vsel %vm3358_vm1, %v2150_v1, %v2145_v45  ;;  %vm3364_vm0 = vcmp.gt.f32.partialorder %v2186_v4, %v2181_v52 }
  0x5c   :  { %3551 = vst [vmem:[#allocation136_spill] sm:$0xff] %v2131_v3  ;;  %3552 = vst [vmem:[#allocation137_spill] sm:$0xff] %v2140_v0  ;;  %v2212_v3 = vld [vmem:[%s3134_s0 + $0x420] sm:$0xff]  ;;  %vm3357_vm13 = vcmp.gt.f32.partialorder %v2140_v0, %v2202_v57 }
  0x5d   :  { %3553 = vst [vmem:[#allocation138_spill] sm:$0xff] %v2145_v45  ;;  %3554 = vst [vmem:[#allocation139_spill] sm:$0xff] %v2150_v1  ;;  %v2258_v54 = vsel %vm3357_vm13, %v2140_v0, %v2202_v57  ;;  %v2282_v0 = vld [vmem:[%s3134_s0 + $0x458] sm:$0x3]  ;;  %vm3371_vm1 = vcmp.gt.f32.partialorder %v2212_v3, %v2265_v13  ;;  %v2298_v1 = vsel %vm3364_vm0, %v2186_v4, %v2181_v52 }
  0x5e   :  { %558 = vst [vmem:[%s3135_s1 + $0xd8] sm:$0x3] %v478_v30  ;;  %3555 = vst [vmem:[#allocation140_spill] sm:$0xff] %v2162_v58  ;;  %v2174_v30 = vld [vmem:[%s3134_s0 + $0x3e8] sm:$0xff]  ;;  %v2241_v58 = vld [vmem:[%s3134_s0 + $0x440] sm:$0xff]  ;;  %vm3368_vm13 = vcmp.gt.f32.partialorder %v2207_v59, %v2258_v54 }
  0x5f   :  { %3556 = vst [vmem:[#allocation141_spill] sm:$0xff] %v2169_v40  ;;  %3557 = vst [vmem:[#allocation142_spill] sm:$0xff] %v2174_v30  ;;  %v2246_v40 = vld [vmem:[%s3134_s0 + $0x448] sm:$0xff]  ;;  %vm3365_vm15 = vcmp.gt.f32.partialorder %v2174_v30, %v2227_v25 }
  0x60   :  { %3558 = vst [vmem:[#allocation143_spill] sm:$0xff] %v2181_v52  ;;  %3559 = vst [vmem:[#allocation144_spill] sm:$0xff] %v2186_v4  ;;  %v481_v45 = vsel %vm3365_vm15, %v2174_v30, %v2227_v25  ;;  %v482_v52 = vsel %vm3368_vm13, %v2207_v59, %v2258_v54  ;;  %v2323_v4 = vsel %vm3371_vm1, %v2212_v3, %v2265_v13  ;;  %v2399_v30 = vld [vmem:[%s3134_s0 + $0x478] sm:$0x3] }
  0x61   :  { %3560 = vst [vmem:[#allocation145_spill] sm:$0xff] %v2202_v57  ;;  %3561 = vst [vmem:[#allocation146_spill] sm:$0xff] %v2207_v59  ;;  %v2277_v57 = vld [vmem:[%s3134_s0 + $0x450] sm:$0x3]  ;;  %vm3375_vm15 = vcmp.gt.f32.partialorder %v2246_v40, %v2241_v58  ;;  %v2342_v59 = vld [vmem:[%s3134_s0 + $0x488] sm:$0xff] }
  0x62   :  { %3562 = vst [vmem:[#allocation147_spill] sm:$0xff] %v2212_v3  ;;  %559 = vst [vmem:[%s3135_s1 + $0xe0] sm:$0xff] %v479_v63  ;;  %v2236_v63 = vld [vmem:[%s3134_s0 + $0x430] sm:$0x3]  ;;  %v2361_v3 = vsel %vm3375_vm15, %v2246_v40, %v2241_v58  ;;  %vm3382_vm1 = vcmp.gt.f32.partialorder %v2282_v0, %v2277_v57 }
  0x63   :  { %3563 = vst [vmem:[#allocation148_spill] sm:$0xff] %v2227_v25  ;;  %3564 = vst [vmem:[#allocation149_spill] sm:$0xff] %v2236_v63  ;;  %v2308_v25 = vld [vmem:[%s3134_s0 + $0x460] sm:$0xff]  ;;  %vm3376_vm0 = vcmp.gt.f32.partialorder %v2236_v63, %v2298_v1 }
  0x64   :  { %3565 = vst [vmem:[#allocation150_spill] sm:$0xff] %v2241_v58  ;;  %3566 = vst [vmem:[#allocation151_spill] sm:$0xff] %v2246_v40  ;;  %v2394_v40 = vsel %vm3382_vm1, %v2282_v0, %v2277_v57 }
  0x65   :  { %560 = vst [vmem:[%s3135_s1 + $0xe8] sm:$0x3] %v480_v62  ;;  %3567 = vst [vmem:[#allocation152_spill] sm:$0xff] %v2258_v54  ;;  %v2270_v62 = vld [vmem:[%s3134_s0 + $0x428] sm:$0xff]  ;;  %v2337_v54 = vld [vmem:[%s3134_s0 + $0x480] sm:$0xff] }
  0x66   :  { %3568 = vst [vmem:[#allocation153_spill] sm:$0xff] %v2265_v13  ;;  %3569 = vst [vmem:[#allocation154_spill] sm:$0xff] %v2270_v62  ;;  %vm3383_vm13 = vcmp.gt.f32.partialorder %v2270_v62, %v2323_v4  ;;  %v2354_v13 = vsel %vm3376_vm0, %v2236_v63, %v2298_v1  ;;  %v2378_v63 = vld [vmem:[%s3134_s0 + $0x498] sm:$0x3]  ;;  %vm3386_vm0 = vcmp.gt.f32.partialorder %v2308_v25, %v2361_v3 }
  0x67   :  { %3570 = vst [vmem:[#allocation155_spill] sm:$0xff] %v2277_v57  ;;  %3571 = vst [vmem:[#allocation156_spill] sm:$0xff] %v2282_v0  ;;  %v483_v58 = vsel %vm3383_vm13, %v2270_v62, %v2323_v4  ;;  %vm3389_vm15 = vcmp.gt.f32.partialorder %v2303_v61, %v2354_v13  ;;  %v2419_v0 = vsel %vm3386_vm0, %v2308_v25, %v2361_v3  ;;  %v2495_v62 = vld [vmem:[%s3134_s0 + $0x4b8] sm:$0x3] }
  0x68   :  { %3572 = vst [vmem:[#allocation157_spill] sm:$0xff] %v2298_v1  ;;  %3573 = vst [vmem:[#allocation158_spill] sm:$0xff] %v2303_v61  ;;  %v2373_v1 = vld [vmem:[%s3134_s0 + $0x490] sm:$0x3]  ;;  %v484_v57 = vsel %vm3389_vm15, %v2303_v61, %v2354_v13  ;;  %vm3394_vm13 = vcmp.gt.f32.partialorder %v2342_v59, %v2337_v54 }
  0x69   :  { %3574 = vst [vmem:[#allocation159_spill] sm:$0xff] %v2308_v25  ;;  %561 = vst [vmem:[%s3135_s1 + $0xf0] sm:$0xff] %v481_v45  ;;  %v2332_v45 = vld [vmem:[%s3134_s0 + $0x470] sm:$0x3]  ;;  %v2457_v61 = vsel %vm3394_vm13, %v2342_v59, %v2337_v54  ;;  %vm3400_vm15 = vcmp.gt.f32.partialorder %v2378_v63, %v2373_v1 }
  0x6a   :  { %3575 = vst [vmem:[#allocation160_spill] sm:$0xff] %v2323_v4  ;;  %3576 = vst [vmem:[#allocation161_spill] sm:$0xff] %v2332_v45  ;;  %v2404_v4 = vld [vmem:[%s3134_s0 + $0x4a0] sm:$0xff]  ;;  %vm3393_vm1 = vcmp.gt.f32.partialorder %v2332_v45, %v2394_v40 }
  0x6b   :  { %3577 = vst [vmem:[#allocation162_spill] sm:$0xff] %v2337_v54  ;;  %3578 = vst [vmem:[#allocation163_spill] sm:$0xff] %v2342_v59  ;;  %v2450_v25 = vsel %vm3393_vm1, %v2332_v45, %v2394_v40  ;;  %v2474_v45 = vld [vmem:[%s3134_s0 + $0x4d8] sm:$0x3]  ;;  %vm3405_vm13 = vcmp.gt.f32.partialorder %v2404_v4, %v2457_v61  ;;  %v2490_v59 = vsel %vm3400_vm15, %v2378_v63, %v2373_v1 }
  0x6c   :  { %562 = vst [vmem:[%s3135_s1 + $0xf8] sm:$0x3] %v482_v52  ;;  %3579 = vst [vmem:[#allocation164_spill] sm:$0xff] %v2354_v13  ;;  %v2366_v52 = vld [vmem:[%s3134_s0 + $0x468] sm:$0xff]  ;;  %v2433_v13 = vld [vmem:[%s3134_s0 + $0x4c0] sm:$0xff]  ;;  %vm3402_vm1 = vcmp.gt.f32.partialorder %v2399_v30, %v2450_v25 }
  0x6d   :  { %3580 = vst [vmem:[#allocation165_spill] sm:$0xff] %v2361_v3  ;;  %3581 = vst [vmem:[#allocation166_spill] sm:$0xff] %v2373_v1  ;;  %v2438_v3 = vld [vmem:[%s3134_s0 + $0x4c8] sm:$0xff]  ;;  %vm3401_vm0 = vcmp.gt.f32.partialorder %v2366_v52, %v2419_v0  ;;  %v486_v1 = vsel %vm3402_vm1, %v2399_v30, %v2450_v25 }
  0x6e   :  { %3582 = vst [vmem:[#allocation167_spill] sm:$0xff] %v2378_v63  ;;  %3583 = vst [vmem:[#allocation168_spill] sm:$0xff] %v2394_v40  ;;  %v2469_v40 = vld [vmem:[%s3134_s0 + $0x4d0] sm:$0x3]  ;;  %v485_v54 = vsel %vm3401_vm0, %v2366_v52, %v2419_v0  ;;  %v2515_v63 = vsel %vm3405_vm13, %v2404_v4, %v2457_v61  ;;  %vm3408_vm0 = vcmp.gt.f32.partialorder %v2438_v3, %v2433_v13 }
  0x6f   :  { %3584 = vst [vmem:[#allocation169_spill] sm:$0xff] %v2399_v30  ;;  %563 = vst [vmem:[%s3135_s1 + $0x100] sm:$0xff] %v483_v58  ;;  %v2428_v58 = vld [vmem:[%s3134_s0 + $0x4b0] sm:$0x3]  ;;  %v2543_v30 = vsel %vm3408_vm0, %v2438_v3, %v2433_v13  ;;  %vm3413_vm13 = vcmp.gt.f32.partialorder %v2474_v45, %v2469_v40 }
  0x70   :  { %3585 = vst [vmem:[#allocation170_spill] sm:$0xff] %v2419_v0  ;;  %3586 = vst [vmem:[#allocation171_spill] sm:$0xff] %v2428_v58  ;;  %v2500_v0 = vld [vmem:[%s3134_s0 + $0x4e0] sm:$0xff]  ;;  %vm3407_vm15 = vcmp.gt.f32.partialorder %v2428_v58, %v2490_v59 }
  0x71   :  { %3587 = vst [vmem:[#allocation172_spill] sm:$0xff] %v2433_v13  ;;  %3588 = vst [vmem:[#allocation173_spill] sm:$0xff] %v2438_v3  ;;  %vm289_vm0 = vcmp.gt.f32.partialorder %v2500_v0, %v2543_v30  ;;  %v2566_v13 = vsel %vm3413_vm13, %v2474_v45, %v2469_v40  ;;  %v2571_v3 = vld [vmem:[%s3134_s0 + $0x4f8] sm:$0x3] }
  0x72   :  { %564 = vst [vmem:[%s3135_s1 + $0x108] sm:$0x3] %v484_v57  ;;  %3589 = vst [vmem:[#allocation174_spill] sm:$0xff] %v2450_v25  ;;  %v2462_v57 = vld [vmem:[%s3134_s0 + $0x4a8] sm:$0xff]  ;;  %v2536_v25 = vsel %vm3407_vm15, %v2428_v58, %v2490_v59 }
  0x73   :  { %3590 = vst [vmem:[#allocation175_spill] sm:$0xff] %v2469_v40  ;;  %3591 = vst [vmem:[#allocation176_spill] sm:$0xff] %v2474_v45  ;;  %vm447_vm1 = vcmp.gt.f32.partialorder %v2462_v57, %v2515_v63  ;;  %vm3414_vm15 = vcmp.gt.f32.partialorder %v2495_v62, %v2536_v25  ;;  %v2586_v40 = vsel %vm289_vm0, %v2500_v0, %v2543_v30 }
  0x74   :  { %3592 = vst [vmem:[#allocation177_spill] sm:$0xff] %v2490_v59  ;;  %565 = vst [vmem:[%s3135_s1 + $0x110] sm:$0xff] %v485_v54  ;;  %v2524_v54 = vld [vmem:[%s3134_s0 + $0x4f0] sm:$0x3]  ;;  %v487_v59 = vsel %vm447_vm1, %v2462_v57, %v2515_v63  ;;  %v488_v58 = vsel %vm3414_vm15, %v2495_v62, %v2536_v25 }
  0x75   :  { %566 = vst [vmem:[%s3135_s1 + $0x118] sm:$0x3] %v486_v1  ;;  %3593 = vst [vmem:[#allocation178_spill] sm:$0xff] %v2543_v30  ;;  %v2548_v1 = vld [vmem:[%s3134_s0 + $0x4e8] sm:$0xff]  ;;  %vm290_vm13 = vcmp.gt.f32.partialorder %v2524_v54, %v2566_v13 }
  0x76   :  { %567 = vst [vmem:[%s3135_s1 + $0x120] sm:$0xff] %v487_v59  ;;  %v331_v59 = vsel %vm251_vm2, 2, %v770_v14  ;;  %568 = vst [vmem:[%s3135_s1 + $0x128] sm:$0x3] %v488_v58  ;;  %vm449_vm15 = vcmp.gt.f32.partialorder %v2548_v1, %v2586_v40  ;;  %v2604_v45 = vsel %vm290_vm13, %v2524_v54, %v2566_v13  ;;  %v3594_v14 = vmov 0  }
  0x77   :  { %v491_v30 = vsel %vm411_vm5, 3, %v331_v59  ;;  %v489_v5 = vsel %vm449_vm15, %v2548_v1, %v2586_v40  ;;  %vm450_vm2 = vcmp.gt.f32.partialorder %v2571_v3, %v2604_v45  ;;  %v172_v7 = vsel %vm92_vm4, 1, %v3594_v14  ;;  %572 = vst [vmem:[%s3136_s2 + $0x8] sm:$0x3] %v492_v6  ;;  %v3631_v59 = vld [vmem:[#allocation19_spill] sm:$0xff]  ;;  %v3634_v6 = vld [vmem:[#allocation22_spill] sm:$0xff] }
  0x78   :  { %571 = vst [vmem:[%s3136_s2] sm:$0xff] %v491_v30  ;;  %569 = vst [vmem:[%s3135_s1 + $0x130] sm:$0xff] %v489_v5  ;;  %v490_v9 = vsel %vm450_vm2, %v2571_v3, %v2604_v45  ;;  %v333_v10 = vsel %vm253_vm8, 2, %v172_v7  ;;  %v173_v8 = vsel %vm93_vm6, 1, %v3594_v14  ;;  %v174_v11 = vsel %vm94_vm10, 1, %v3594_v14  ;;  %v3629_v30 = vld [vmem:[#allocation11_spill] sm:$0xff]  ;;  %v3635_v7 = vld [vmem:[#allocation28_spill] sm:$0xff] }
  0x79   :  { %570 = vst [vmem:[%s3135_s1 + $0x138] sm:$0x3] %v490_v9  ;;  %v493_v15 = vsel %vm413_vm11, 3, %v333_v10  ;;  %v334_v12 = vsel %vm254_vm9, 2, %v173_v8  ;;  %v335_v16 = vsel %vm255_vm14, 2, %v174_v11  ;;  %v175_v17 = vsel %vm95_vm12, 1, %v3594_v14 }
  0x7a   :  { %573 = vst [vmem:[%s3136_s2 + $0x10] sm:$0xff] %v493_v15  ;;  %v494_v18 = vsel %vm3595_vm3, 3, %v334_v12  ;;  %vm3596_vm4 = vcmp.gt.f32.partialorder %v887_v32, %v979_v46  ;;  %vm3597_vm5 = vcmp.gt.f32.partialorder %v897_v34, %v949_v41  ;;  %vm3598_vm6 = vcmp.gt.f32.partialorder %v933_v39, %v928_v38  ;;  %v3607_v32 = vld [vmem:[#allocation4_spill] sm:$0xff]  ;;  %v3613_v38 = vld [vmem:[#allocation10_spill] sm:$0xff]  ;;  %v3619_v46 = vld [vmem:[#allocation7_spill] sm:$0xff] }
  0x7b   :  { %v495_v19 = vsel %vm3596_vm4, 3, %v335_v16  ;;  %v336_v20 = vsel %vm3597_vm5, 2, %v175_v17  ;;  %v176_v21 = vsel %vm3598_vm6, 1, %v3594_v14  ;;  %574 = vst [vmem:[%s3136_s2 + $0x18] sm:$0x3] %v494_v18  ;;  %vm3600_vm8 = vcmp.gt.f32.partialorder %v954_v42, %v1012_v50  ;;  %v3614_v39 = vld [vmem:[#allocation16_spill] sm:$0xff] }
  0x7c   :  { %575 = vst [vmem:[%s3136_s2 + $0x20] sm:$0xff] %v495_v19  ;;  %v496_v22 = vsel %vm3599_vm7, 3, %v336_v20  ;;  %v337_v23 = vsel %vm3600_vm8, 2, %v176_v21  ;;  %vm3601_vm9 = vcmp.gt.f32.partialorder %v964_v44, %v959_v43  ;;  %vm3602_vm10 = vcmp.gt.f32.partialorder %v1029_v53, %v993_v48  ;;  %v3616_v42 = vld [vmem:[#allocation5_spill] sm:$0xff]  ;;  %v3617_v43 = vld [vmem:[#allocation12_spill] sm:$0xff]  ;;  %v3625_v53 = vld [vmem:[#allocation14_spill] sm:$0xff] }
  0x7d   :  { %v177_v24 = vsel %vm3601_vm9, 1, %v3594_v14  ;;  %v178_v26 = vsel %vm3602_vm10, 1, %v3594_v14  ;;  %576 = vst [vmem:[%s3136_s2 + $0x28] sm:$0x3] %v496_v22  ;;  %vm3603_vm11 = vcmp.gt.f32.partialorder %v1017_v51, %v1075_v60  ;;  %vm3604_vm12 = vcmp.gt.f32.partialorder %v988_v47, %v1045_v55  ;;  %v3620_v47 = vld [vmem:[#allocation6_spill] sm:$0xff]  ;;  %v3623_v50 = vld [vmem:[#allocation20_spill] sm:$0xff] }
  0x7e   :  { %v497_v27 = vsel %vm3603_vm11, 3, %v337_v23  ;;  %v338_v28 = vsel %vm3604_vm12, 2, %v177_v24  ;;  %vm3606_vm14 = vcmp.gt.f32.partialorder %v1050_v56, %v3605_v29  ;;  %vm3609_vm3 = vcmp.gt.f32.partialorder %v3607_v32, %v3608_v33  ;;  %v3626_v55 = vld [vmem:[#allocation21_spill] sm:$0xff]  ;;  %v3628_v60 = vld [vmem:[#allocation15_spill] sm:$0xff]  ;;  %v3643_v17 = vld [vmem:[#allocation24_spill] sm:$0xff] }
  0x7f   :  { %v339_v31 = vsel %vm3606_vm14, 2, %v178_v26  ;;  %v179_v34 = vsel %vm3609_vm3, 1, %v3594_v14  ;;  %577 = vst [vmem:[%s3136_s2 + $0x30] sm:$0xff] %v497_v27  ;;  %vm3612_vm4 = vcmp.gt.f32.partialorder %v3610_v35, %v3611_v36  ;;  %vm3615_vm5 = vcmp.gt.f32.partialorder %v3613_v38, %v3614_v39  ;;  %v3637_v10 = vld [vmem:[#allocation17_spill] sm:$0xff]  ;;  %v3640_v15 = vld [vmem:[#allocation27_spill] sm:$0xff]  ;;  %v3646_v20 = vld [vmem:[#allocation26_spill] sm:$0xff] }
  0x80   :  { %v498_v37 = vsel %vm3612_vm4, 3, %v338_v28  ;;  %v499_v41 = vsel %vm3615_vm5, 3, %v339_v31  ;;  %vm3618_vm6 = vcmp.gt.f32.partialorder %v3616_v42, %v3617_v43  ;;  %vm3621_vm7 = vcmp.gt.f32.partialorder %v3619_v46, %v3620_v47  ;;  %v3638_v8 = vld [vmem:[#allocation25_spill] sm:$0xff]  ;;  %v3644_v18 = vld [vmem:[#allocation23_spill] sm:$0xff]  ;;  %v3647_v21 = vld [vmem:[#allocation32_spill] sm:$0xff] }
  0x81   :  { %v340_v44 = vsel %vm3618_vm6, 2, %v179_v34  ;;  %v180_v48 = vsel %vm3621_vm7, 1, %v3594_v14  ;;  %578 = vst [vmem:[%s3136_s2 + $0x38] sm:$0x3] %v498_v37  ;;  %579 = vst [vmem:[%s3136_s2 + $0x40] sm:$0xff] %v499_v41  ;;  %vm3624_vm8 = vcmp.gt.f32.partialorder %v3622_v49, %v3623_v50  ;;  %vm3627_vm9 = vcmp.gt.f32.partialorder %v3625_v53, %v3626_v55  ;;  %v3641_v12 = vld [vmem:[#allocation33_spill] sm:$0xff] }
  0x82   :  { %v500_v51 = vsel %vm3624_vm8, 3, %v340_v44  ;;  %v341_v56 = vsel %vm3627_vm9, 2, %v180_v48  ;;  %vm3630_vm10 = vcmp.gt.f32.partialorder %v3628_v60, %v3629_v30  ;;  %vm3633_vm11 = vcmp.gt.f32.partialorder %v3631_v59, %v3632_v2  ;;  %v3649_v23 = vld [vmem:[#allocation34_spill] sm:$0xff]  ;;  %v3650_v24 = vld [vmem:[#allocation40_spill] sm:$0xff]  ;;  %v3652_v27 = vld [vmem:[#allocation29_spill] sm:$0xff] }
  0x83   :  { %v181_v58 = vsel %vm3630_vm10, 1, %v3594_v14  ;;  %v182_v5 = vsel %vm3633_vm11, 1, %v3594_v14  ;;  %580 = vst [vmem:[%s3136_s2 + $0x48] sm:$0x3] %v500_v51  ;;  %vm3636_vm12 = vcmp.gt.f32.partialorder %v3634_v6, %v3635_v7  ;;  %vm3639_vm14 = vcmp.gt.f32.partialorder %v3637_v10, %v3638_v8  ;;  %v3653_v28 = vld [vmem:[#allocation37_spill] sm:$0xff]  ;;  %v3655_v31 = vld [vmem:[#allocation31_spill] sm:$0xff] }
  0x84   :  { %v501_v9 = vsel %vm3636_vm12, 3, %v341_v56  ;;  %v342_v11 = vsel %vm3639_vm14, 2, %v181_v58  ;;  %vm3642_vm3 = vcmp.gt.f32.partialorder %v3640_v15, %v3641_v12  ;;  %vm3645_vm4 = vcmp.gt.f32.partialorder %v3643_v17, %v3644_v18  ;;  %v3656_v32 = vld [vmem:[#allocation30_spill] sm:$0xff]  ;;  %v3659_v35 = vld [vmem:[#allocation44_spill] sm:$0xff]  ;;  %v3661_v37 = vld [vmem:[#allocation39_spill] sm:$0xff] }
  0x85   :  { %v343_v16 = vsel %vm3642_vm3, 2, %v182_v5  ;;  %v183_v19 = vsel %vm3645_vm4, 1, %v3594_v14  ;;  %581 = vst [vmem:[%s3136_s2 + $0x50] sm:$0xff] %v501_v9  ;;  %vm3648_vm5 = vcmp.gt.f32.partialorder %v3646_v20, %v3647_v21  ;;  %vm3651_vm6 = vcmp.gt.f32.partialorder %v3649_v23, %v3650_v24  ;;  %v3658_v34 = vld [vmem:[#allocation38_spill] sm:$0xff]  ;;  %v3662_v38 = vld [vmem:[#allocation45_spill] sm:$0xff]  ;;  %v3664_v41 = vld [vmem:[#allocation36_spill] sm:$0xff] }
  0x86   :  { %v502_v22 = vsel %vm3648_vm5, 3, %v342_v11  ;;  %v503_v26 = vsel %vm3651_vm6, 3, %v343_v16  ;;  %vm3654_vm7 = vcmp.gt.f32.partialorder %v3652_v27, %v3653_v28  ;;  %vm3657_vm8 = vcmp.gt.f32.partialorder %v3655_v31, %v3656_v32  ;;  %v3665_v42 = vld [vmem:[#allocation35_spill] sm:$0xff]  ;;  %v3668_v46 = vld [vmem:[#allocation42_spill] sm:$0xff]  ;;  %v3671_v49 = vld [vmem:[#allocation52_spill] sm:$0xff] }
  0x87   :  { %v344_v29 = vsel %vm3654_vm7, 2, %v183_v19  ;;  %v184_v33 = vsel %vm3657_vm8, 1, %v3594_v14  ;;  %582 = vst [vmem:[%s3136_s2 + $0x58] sm:$0x3] %v502_v22  ;;  %583 = vst [vmem:[%s3136_s2 + $0x60] sm:$0xff] %v503_v26  ;;  %vm3660_vm9 = vcmp.gt.f32.partialorder %v3658_v34, %v3659_v35  ;;  %vm3663_vm10 = vcmp.gt.f32.partialorder %v3661_v37, %v3662_v38  ;;  %v3667_v44 = vld [vmem:[#allocation43_spill] sm:$0xff] }
  0x88   :  { %v504_v36 = vsel %vm3660_vm9, 3, %v344_v29  ;;  %v345_v39 = vsel %vm3663_vm10, 2, %v184_v33  ;;  %vm3666_vm11 = vcmp.gt.f32.partialorder %v3664_v41, %v3665_v42  ;;  %vm3669_vm12 = vcmp.gt.f32.partialorder %v3667_v44, %v3668_v46  ;;  %v3670_v48 = vld [vmem:[#allocation46_spill] sm:$0xff]  ;;  %v3673_v51 = vld [vmem:[#allocation41_spill] sm:$0xff]  ;;  %v3676_v56 = vld [vmem:[#allocation51_spill] sm:$0xff] }
  0x89   :  { %v185_v43 = vsel %vm3666_vm11, 1, %v3594_v14  ;;  %v186_v47 = vsel %vm3669_vm12, 1, %v3594_v14  ;;  %584 = vst [vmem:[%s3136_s2 + $0x68] sm:$0x3] %v504_v36  ;;  %vm3672_vm14 = vcmp.gt.f32.partialorder %v3670_v48, %v3671_v49  ;;  %v3674_v53 = vld [vmem:[#allocation49_spill] sm:$0xff]  ;;  %v3679_v58 = vld [vmem:[#allocation48_spill] sm:$0xff] }
  0x8a   :  { %v505_v50 = vsel %vm3672_vm14, 3, %v345_v39  ;;  %vm3675_vm3 = vcmp.gt.f32.partialorder %v3673_v51, %v3674_v53  ;;  %v3677_v60 = vld [vmem:[#allocation57_spill] sm:$0xff]  ;;  %v3680_v59 = vld [vmem:[#allocation47_spill] sm:$0xff]  ;;  %v3682_v5 = vld [vmem:[#allocation50_spill] sm:$0xff] }
  0x8b   :  { %v346_v55 = vsel %vm3675_vm3, 2, %v185_v43  ;;  %vm3678_vm4 = vcmp.gt.f32.partialorder %v3676_v56, %v3677_v60  ;;  %vm3681_vm5 = vcmp.gt.f32.partialorder %v3679_v58, %v3680_v59  ;;  %585 = vst [vmem:[%s3136_s2 + $0x70] sm:$0xff] %v505_v50  ;;  %v3683_v6 = vld [vmem:[#allocation56_spill] sm:$0xff]  ;;  %v3685_v9 = vld [vmem:[#allocation58_spill] sm:$0xff]  ;;  %v3688_v11 = vld [vmem:[#allocation53_spill] sm:$0xff] }
  0x8c   :  { %v347_v30 = vsel %vm3678_vm4, 2, %v186_v47  ;;  %v187_v2 = vsel %vm3681_vm5, 1, %v3594_v14  ;;  %vm3684_vm6 = vcmp.gt.f32.partialorder %v3682_v5, %v3683_v6  ;;  %v3686_v10 = vld [vmem:[#allocation64_spill] sm:$0xff]  ;;  %v3689_v15 = vld [vmem:[#allocation61_spill] sm:$0xff]  ;;  %v3691_v16 = vld [vmem:[#allocation55_spill] sm:$0xff] }
  0x8d   :  { %v506_v7 = vsel %vm3684_vm6, 3, %v346_v55  ;;  %vm3687_vm7 = vcmp.gt.f32.partialorder %v3685_v9, %v3686_v10  ;;  %vm3690_vm8 = vcmp.gt.f32.partialorder %v3688_v11, %v3689_v15  ;;  %v3692_v17 = vld [vmem:[#allocation54_spill] sm:$0xff]  ;;  %v3695_v20 = vld [vmem:[#allocation68_spill] sm:$0xff]  ;;  %v3697_v22 = vld [vmem:[#allocation63_spill] sm:$0xff] }
  0x8e   :  { %v507_v8 = vsel %vm3687_vm7, 3, %v347_v30  ;;  %v348_v12 = vsel %vm3690_vm8, 2, %v187_v2  ;;  %vm3693_vm9 = vcmp.gt.f32.partialorder %v3691_v16, %v3692_v17  ;;  %586 = vst [vmem:[%s3136_s2 + $0x78] sm:$0x3] %v506_v7  ;;  %v3694_v19 = vld [vmem:[#allocation62_spill] sm:$0xff]  ;;  %v3698_v23 = vld [vmem:[#allocation69_spill] sm:$0xff] }
  0x8f   :  { %v188_v18 = vsel %vm3693_vm9, 1, %v3594_v14  ;;  %587 = vst [vmem:[%s3136_s2 + $0x80] sm:$0xff] %v507_v8  ;;  %vm3696_vm10 = vcmp.gt.f32.partialorder %v3694_v19, %v3695_v20  ;;  %vm3699_vm11 = vcmp.gt.f32.partialorder %v3697_v22, %v3698_v23  ;;  %v3700_v26 = vld [vmem:[#allocation60_spill] sm:$0xff]  ;;  %v3701_v27 = vld [vmem:[#allocation59_spill] sm:$0xff]  ;;  %v3704_v31 = vld [vmem:[#allocation66_spill] sm:$0xff] }
  0x90   :  { %v508_v21 = vsel %vm3696_vm10, 3, %v348_v12  ;;  %v349_v24 = vsel %vm3699_vm11, 2, %v188_v18  ;;  %vm3702_vm12 = vcmp.gt.f32.partialorder %v3700_v26, %v3701_v27  ;;  %v3703_v29 = vld [vmem:[#allocation67_spill] sm:$0xff]  ;;  %v3706_v33 = vld [vmem:[#allocation70_spill] sm:$0xff]  ;;  %v3707_v34 = vld [vmem:[#allocation76_spill] sm:$0xff] }
  0x91   :  { %v189_v28 = vsel %vm3702_vm12, 1, %v3594_v14  ;;  %vm3705_vm14 = vcmp.gt.f32.partialorder %v3703_v29, %v3704_v31  ;;  %588 = vst [vmem:[%s3136_s2 + $0x88] sm:$0x3] %v508_v21  ;;  %vm3708_vm3 = vcmp.gt.f32.partialorder %v3706_v33, %v3707_v34  ;;  %v3709_v36 = vld [vmem:[#allocation65_spill] sm:$0xff]  ;;  %v3712_v39 = vld [vmem:[#allocation75_spill] sm:$0xff]  ;;  %v3715_v43 = vld [vmem:[#allocation72_spill] sm:$0xff] }
  0x92   :  { %v190_v32 = vsel %vm3705_vm14, 1, %v3594_v14  ;;  %v509_v35 = vsel %vm3708_vm3, 3, %v349_v24  ;;  %v3710_v37 = vld [vmem:[#allocation73_spill] sm:$0xff]  ;;  %v3716_v44 = vld [vmem:[#allocation71_spill] sm:$0xff]  ;;  %v3718_v47 = vld [vmem:[#allocation74_spill] sm:$0xff] }
  0x93   :  { %vm3711_vm4 = vcmp.gt.f32.partialorder %v3709_v36, %v3710_v37  ;;  %v3713_v41 = vld [vmem:[#allocation81_spill] sm:$0xff]  ;;  %vm3717_vm6 = vcmp.gt.f32.partialorder %v3715_v43, %v3716_v44  ;;  %589 = vst [vmem:[%s3136_s2 + $0x90] sm:$0xff] %v509_v35  ;;  %v3719_v48 = vld [vmem:[#allocation80_spill] sm:$0xff]  ;;  %v3721_v50 = vld [vmem:[#allocation82_spill] sm:$0xff] }
  0x94   :  { %v350_v38 = vsel %vm3711_vm4, 2, %v189_v28  ;;  %vm3714_vm5 = vcmp.gt.f32.partialorder %v3712_v39, %v3713_v41  ;;  %v191_v46 = vsel %vm3717_vm6, 1, %v3594_v14  ;;  %vm3720_vm7 = vcmp.gt.f32.partialorder %v3718_v47, %v3719_v48  ;;  %v3722_v51 = vld [vmem:[#allocation88_spill] sm:$0xff]  ;;  %v3724_v55 = vld [vmem:[#allocation77_spill] sm:$0xff]  ;;  %v3727_v30 = vld [vmem:[#allocation79_spill] sm:$0xff] }
  0x95   :  { %v351_v42 = vsel %vm3714_vm5, 2, %v190_v32  ;;  %v510_v49 = vsel %vm3720_vm7, 3, %v350_v38  ;;  %vm3723_vm8 = vcmp.gt.f32.partialorder %v3721_v50, %v3722_v51  ;;  %v3725_v56 = vld [vmem:[#allocation85_spill] sm:$0xff]  ;;  %v3728_v58 = vld [vmem:[#allocation78_spill] sm:$0xff]  ;;  %v3731_v5 = vld [vmem:[#allocation92_spill] sm:$0xff] }
  0x96   :  { %v511_v53 = vsel %vm3723_vm8, 3, %v351_v42  ;;  %vm3726_vm9 = vcmp.gt.f32.partialorder %v3724_v55, %v3725_v56  ;;  %vm3729_vm10 = vcmp.gt.f32.partialorder %v3727_v30, %v3728_v58  ;;  %590 = vst [vmem:[%s3136_s2 + $0x98] sm:$0x3] %v510_v49  ;;  %v3730_v2 = vld [vmem:[#allocation86_spill] sm:$0xff]  ;;  %v3733_v7 = vld [vmem:[#allocation87_spill] sm:$0xff]  ;;  %v3734_v9 = vld [vmem:[#allocation93_spill] sm:$0xff] }
  0x97   :  { %v352_v60 = vsel %vm3726_vm9, 2, %v191_v46  ;;  %v192_v59 = vsel %vm3729_vm10, 1, %v3594_v14  ;;  %591 = vst [vmem:[%s3136_s2 + $0xa0] sm:$0xff] %v511_v53  ;;  %vm3732_vm11 = vcmp.gt.f32.partialorder %v3730_v2, %v3731_v5  ;;  %vm3735_vm12 = vcmp.gt.f32.partialorder %v3733_v7, %v3734_v9  ;;  %v3736_v8 = vld [vmem:[#allocation84_spill] sm:$0xff]  ;;  %v3737_v11 = vld [vmem:[#allocation83_spill] sm:$0xff]  ;;  %v3740_v16 = vld [vmem:[#allocation90_spill] sm:$0xff] }
  0x98   :  { %v512_v6 = vsel %vm3732_vm11, 3, %v352_v60  ;;  %v353_v10 = vsel %vm3735_vm12, 2, %v192_v59  ;;  %vm3738_vm14 = vcmp.gt.f32.partialorder %v3736_v8, %v3737_v11  ;;  %v3739_v12 = vld [vmem:[#allocation91_spill] sm:$0xff]  ;;  %v3742_v18 = vld [vmem:[#allocation94_spill] sm:$0xff]  ;;  %v3743_v19 = vld [vmem:[#allocation100_spill] sm:$0xff] }
  0x99   :  { %v193_v15 = vsel %vm3738_vm14, 1, %v3594_v14  ;;  %vm3741_vm3 = vcmp.gt.f32.partialorder %v3739_v12, %v3740_v16  ;;  %592 = vst [vmem:[%s3136_s2 + $0xa8] sm:$0x3] %v512_v6  ;;  %vm3744_vm4 = vcmp.gt.f32.partialorder %v3742_v18, %v3743_v19  ;;  %v3745_v21 = vld [vmem:[#allocation89_spill] sm:$0xff]  ;;  %v3748_v24 = vld [vmem:[#allocation99_spill] sm:$0xff]  ;;  %v3751_v28 = vld [vmem:[#allocation96_spill] sm:$0xff] }
  0x9a   :  { %v194_v17 = vsel %vm3741_vm3, 1, %v3594_v14  ;;  %v513_v20 = vsel %vm3744_vm4, 3, %v353_v10  ;;  %v3746_v22 = vld [vmem:[#allocation97_spill] sm:$0xff]  ;;  %v3752_v29 = vld [vmem:[#allocation95_spill] sm:$0xff]  ;;  %v3754_v32 = vld [vmem:[#allocation98_spill] sm:$0xff] }
  0x9b   :  { %vm3747_vm5 = vcmp.gt.f32.partialorder %v3745_v21, %v3746_v22  ;;  %v3749_v26 = vld [vmem:[#allocation105_spill] sm:$0xff]  ;;  %vm3753_vm7 = vcmp.gt.f32.partialorder %v3751_v28, %v3752_v29  ;;  %593 = vst [vmem:[%s3136_s2 + $0xb0] sm:$0xff] %v513_v20  ;;  %v3755_v33 = vld [vmem:[#allocation104_spill] sm:$0xff]  ;;  %v3757_v35 = vld [vmem:[#allocation106_spill] sm:$0xff] }
  0x9c   :  { %v354_v23 = vsel %vm3747_vm5, 2, %v193_v15  ;;  %vm3750_vm6 = vcmp.gt.f32.partialorder %v3748_v24, %v3749_v26  ;;  %v195_v31 = vsel %vm3753_vm7, 1, %v3594_v14  ;;  %vm3756_vm8 = vcmp.gt.f32.partialorder %v3754_v32, %v3755_v33  ;;  %v3758_v36 = vld [vmem:[#allocation112_spill] sm:$0xff]  ;;  %v3760_v38 = vld [vmem:[#allocation101_spill] sm:$0xff]  ;;  %v3763_v42 = vld [vmem:[#allocation103_spill] sm:$0xff] }
  0x9d   :  { %v355_v27 = vsel %vm3750_vm6, 2, %v194_v17  ;;  %v514_v34 = vsel %vm3756_vm8, 3, %v354_v23  ;;  %vm3759_vm9 = vcmp.gt.f32.partialorder %v3757_v35, %v3758_v36  ;;  %v3761_v39 = vld [vmem:[#allocation109_spill] sm:$0xff]  ;;  %v3764_v43 = vld [vmem:[#allocation102_spill] sm:$0xff]  ;;  %v3767_v47 = vld [vmem:[#allocation116_spill] sm:$0xff] }
  0x9e   :  { %v515_v37 = vsel %vm3759_vm9, 3, %v355_v27  ;;  %vm3762_vm10 = vcmp.gt.f32.partialorder %v3760_v38, %v3761_v39  ;;  %vm3765_vm11 = vcmp.gt.f32.partialorder %v3763_v42, %v3764_v43  ;;  %594 = vst [vmem:[%s3136_s2 + $0xb8] sm:$0x3] %v514_v34  ;;  %v3766_v46 = vld [vmem:[#allocation110_spill] sm:$0xff]  ;;  %v3769_v49 = vld [vmem:[#allocation111_spill] sm:$0xff]  ;;  %v3770_v50 = vld [vmem:[#allocation117_spill] sm:$0xff] }
  0x9f   :  { %v356_v41 = vsel %vm3762_vm10, 2, %v195_v31  ;;  %v196_v44 = vsel %vm3765_vm11, 1, %v3594_v14  ;;  %595 = vst [vmem:[%s3136_s2 + $0xc0] sm:$0xff] %v515_v37  ;;  %vm3768_vm12 = vcmp.gt.f32.partialorder %v3766_v46, %v3767_v47  ;;  %vm3771_vm14 = vcmp.gt.f32.partialorder %v3769_v49, %v3770_v50  ;;  %v3772_v53 = vld [vmem:[#allocation108_spill] sm:$0xff]  ;;  %v3773_v55 = vld [vmem:[#allocation107_spill] sm:$0xff]  ;;  %v3776_v30 = vld [vmem:[#allocation114_spill] sm:$0xff] }
  0xa0   :  { %v516_v48 = vsel %vm3768_vm12, 3, %v356_v41  ;;  %v357_v51 = vsel %vm3771_vm14, 2, %v196_v44  ;;  %vm3774_vm3 = vcmp.gt.f32.partialorder %v3772_v53, %v3773_v55  ;;  %v3775_v60 = vld [vmem:[#allocation115_spill] sm:$0xff]  ;;  %v3778_v59 = vld [vmem:[#allocation118_spill] sm:$0xff]  ;;  %v3779_v2 = vld [vmem:[#allocation124_spill] sm:$0xff] }
  0xa1   :  { %v197_v56 = vsel %vm3774_vm3, 1, %v3594_v14  ;;  %vm3777_vm4 = vcmp.gt.f32.partialorder %v3775_v60, %v3776_v30  ;;  %596 = vst [vmem:[%s3136_s2 + $0xc8] sm:$0x3] %v516_v48  ;;  %vm3780_vm5 = vcmp.gt.f32.partialorder %v3778_v59, %v3779_v2  ;;  %v3781_v6 = vld [vmem:[#allocation113_spill] sm:$0xff]  ;;  %v3784_v10 = vld [vmem:[#allocation123_spill] sm:$0xff]  ;;  %v3787_v15 = vld [vmem:[#allocation120_spill] sm:$0xff] }
  0xa2   :  { %v198_v58 = vsel %vm3777_vm4, 1, %v3594_v14  ;;  %v517_v5 = vsel %vm3780_vm5, 3, %v357_v51  ;;  %v3782_v7 = vld [vmem:[#allocation121_spill] sm:$0xff]  ;;  %v3788_v12 = vld [vmem:[#allocation119_spill] sm:$0xff]  ;;  %v3790_v17 = vld [vmem:[#allocation122_spill] sm:$0xff] }
  0xa3   :  { %vm3783_vm6 = vcmp.gt.f32.partialorder %v3781_v6, %v3782_v7  ;;  %v3785_v8 = vld [vmem:[#allocation129_spill] sm:$0xff]  ;;  %vm3789_vm8 = vcmp.gt.f32.partialorder %v3787_v15, %v3788_v12  ;;  %597 = vst [vmem:[%s3136_s2 + $0xd0] sm:$0xff] %v517_v5  ;;  %v3791_v18 = vld [vmem:[#allocation128_spill] sm:$0xff]  ;;  %v3793_v20 = vld [vmem:[#allocation130_spill] sm:$0xff] }
  0xa4   :  { %v358_v9 = vsel %vm3783_vm6, 2, %v197_v56  ;;  %vm3786_vm7 = vcmp.gt.f32.partialorder %v3784_v10, %v3785_v8  ;;  %v199_v16 = vsel %vm3789_vm8, 1, %v3594_v14  ;;  %vm3792_vm9 = vcmp.gt.f32.partialorder %v3790_v17, %v3791_v18  ;;  %v3794_v21 = vld [vmem:[#allocation136_spill] sm:$0xff]  ;;  %v3796_v23 = vld [vmem:[#allocation125_spill] sm:$0xff]  ;;  %v3799_v27 = vld [vmem:[#allocation127_spill] sm:$0xff] }
  0xa5   :  { %v359_v11 = vsel %vm3786_vm7, 2, %v198_v58  ;;  %v518_v19 = vsel %vm3792_vm9, 3, %v358_v9  ;;  %vm3795_vm10 = vcmp.gt.f32.partialorder %v3793_v20, %v3794_v21  ;;  %v3797_v24 = vld [vmem:[#allocation133_spill] sm:$0xff]  ;;  %v3800_v28 = vld [vmem:[#allocation126_spill] sm:$0xff]  ;;  %v3803_v32 = vld [vmem:[#allocation140_spill] sm:$0xff] }
  0xa6   :  { %v519_v22 = vsel %vm3795_vm10, 3, %v359_v11  ;;  %vm3798_vm11 = vcmp.gt.f32.partialorder %v3796_v23, %v3797_v24  ;;  %vm3801_vm12 = vcmp.gt.f32.partialorder %v3799_v27, %v3800_v28  ;;  %598 = vst [vmem:[%s3136_s2 + $0xd8] sm:$0x3] %v518_v19  ;;  %v3802_v31 = vld [vmem:[#allocation134_spill] sm:$0xff]  ;;  %v3805_v34 = vld [vmem:[#allocation135_spill] sm:$0xff]  ;;  %v3806_v35 = vld [vmem:[#allocation141_spill] sm:$0xff] }
  0xa7   :  { %v360_v26 = vsel %vm3798_vm11, 2, %v199_v16  ;;  %v200_v29 = vsel %vm3801_vm12, 1, %v3594_v14  ;;  %599 = vst [vmem:[%s3136_s2 + $0xe0] sm:$0xff] %v519_v22  ;;  %vm3804_vm14 = vcmp.gt.f32.partialorder %v3802_v31, %v3803_v32  ;;  %vm3807_vm3 = vcmp.gt.f32.partialorder %v3805_v34, %v3806_v35  ;;  %v3808_v37 = vld [vmem:[#allocation132_spill] sm:$0xff]  ;;  %v3809_v38 = vld [vmem:[#allocation131_spill] sm:$0xff]  ;;  %v3812_v42 = vld [vmem:[#allocation138_spill] sm:$0xff] }
  0xa8   :  { %v520_v33 = vsel %vm3804_vm14, 3, %v360_v26  ;;  %v361_v36 = vsel %vm3807_vm3, 2, %v200_v29  ;;  %vm3810_vm4 = vcmp.gt.f32.partialorder %v3808_v37, %v3809_v38  ;;  %v3811_v41 = vld [vmem:[#allocation139_spill] sm:$0xff]  ;;  %v3814_v44 = vld [vmem:[#allocation142_spill] sm:$0xff]  ;;  %v3815_v46 = vld [vmem:[#allocation148_spill] sm:$0xff] }
  0xa9   :  { %v201_v39 = vsel %vm3810_vm4, 1, %v3594_v14  ;;  %vm3813_vm5 = vcmp.gt.f32.partialorder %v3811_v41, %v3812_v42  ;;  %600 = vst [vmem:[%s3136_s2 + $0xe8] sm:$0x3] %v520_v33  ;;  %vm3816_vm6 = vcmp.gt.f32.partialorder %v3814_v44, %v3815_v46  ;;  %v3817_v48 = vld [vmem:[#allocation137_spill] sm:$0xff]  ;;  %v3820_v51 = vld [vmem:[#allocation147_spill] sm:$0xff]  ;;  %v3823_v56 = vld [vmem:[#allocation144_spill] sm:$0xff] }
  0xaa   :  { %v202_v43 = vsel %vm3813_vm5, 1, %v3594_v14  ;;  %v521_v47 = vsel %vm3816_vm6, 3, %v361_v36  ;;  %v3818_v49 = vld [vmem:[#allocation145_spill] sm:$0xff]  ;;  %v3824_v60 = vld [vmem:[#allocation143_spill] sm:$0xff]  ;;  %v3826_v58 = vld [vmem:[#allocation146_spill] sm:$0xff] }
  0xab   :  { %vm3819_vm7 = vcmp.gt.f32.partialorder %v3817_v48, %v3818_v49  ;;  %v3821_v53 = vld [vmem:[#allocation153_spill] sm:$0xff]  ;;  %vm3825_vm9 = vcmp.gt.f32.partialorder %v3823_v56, %v3824_v60  ;;  %601 = vst [vmem:[%s3136_s2 + $0xf0] sm:$0xff] %v521_v47  ;;  %v3827_v59 = vld [vmem:[#allocation152_spill] sm:$0xff]  ;;  %v3829_v5 = vld [vmem:[#allocation154_spill] sm:$0xff] }
  0xac   :  { %v362_v50 = vsel %vm3819_vm7, 2, %v201_v39  ;;  %vm3822_vm8 = vcmp.gt.f32.partialorder %v3820_v51, %v3821_v53  ;;  %v203_v30 = vsel %vm3825_vm9, 1, %v3594_v14  ;;  %vm3828_vm10 = vcmp.gt.f32.partialorder %v3826_v58, %v3827_v59  ;;  %v3830_v6 = vld [vmem:[#allocation160_spill] sm:$0xff]  ;;  %v3832_v9 = vld [vmem:[#allocation149_spill] sm:$0xff]  ;;  %v3835_v11 = vld [vmem:[#allocation151_spill] sm:$0xff] }
  0xad   :  { %v363_v55 = vsel %vm3822_vm8, 2, %v202_v43  ;;  %v522_v2 = vsel %vm3828_vm10, 3, %v362_v50  ;;  %vm3831_vm11 = vcmp.gt.f32.partialorder %v3829_v5, %v3830_v6  ;;  %v3833_v10 = vld [vmem:[#allocation157_spill] sm:$0xff]  ;;  %v3836_v15 = vld [vmem:[#allocation150_spill] sm:$0xff]  ;;  %v3839_v17 = vld [vmem:[#allocation164_spill] sm:$0xff]  ;;  %vm3855_vm9 = vcmp.gt.f32.partialorder %v2404_v4, %v2457_v61 }
  0xae   :  { %v523_v7 = vsel %vm3831_vm11, 3, %v363_v55  ;;  %vm3834_vm12 = vcmp.gt.f32.partialorder %v3832_v9, %v3833_v10  ;;  %vm3837_vm14 = vcmp.gt.f32.partialorder %v3835_v11, %v3836_v15  ;;  %602 = vst [vmem:[%s3136_s2 + $0xf8] sm:$0x3] %v522_v2  ;;  %v3838_v16 = vld [vmem:[#allocation158_spill] sm:$0xff]  ;;  %v3841_v19 = vld [vmem:[#allocation159_spill] sm:$0xff]  ;;  %v3842_v20 = vld [vmem:[#allocation165_spill] sm:$0xff] }
  0xaf   :  { %v364_v8 = vsel %vm3834_vm12, 2, %v203_v30  ;;  %v204_v12 = vsel %vm3837_vm14, 1, %v3594_v14  ;;  %603 = vst [vmem:[%s3136_s2 + $0x100] sm:$0xff] %v523_v7  ;;  %vm3840_vm3 = vcmp.gt.f32.partialorder %v3838_v16, %v3839_v17  ;;  %vm3843_vm4 = vcmp.gt.f32.partialorder %v3841_v19, %v3842_v20  ;;  %v3844_v22 = vld [vmem:[#allocation156_spill] sm:$0xff]  ;;  %v3845_v23 = vld [vmem:[#allocation155_spill] sm:$0xff]  ;;  %v3848_v27 = vld [vmem:[#allocation162_spill] sm:$0xff] }
  0xb0   :  { %v524_v18 = vsel %vm3840_vm3, 3, %v364_v8  ;;  %v365_v21 = vsel %vm3843_vm4, 2, %v204_v12  ;;  %vm3846_vm5 = vcmp.gt.f32.partialorder %v3844_v22, %v3845_v23  ;;  %v3847_v26 = vld [vmem:[#allocation163_spill] sm:$0xff]  ;;  %v3850_v29 = vld [vmem:[#allocation170_spill] sm:$0xff]  ;;  %v3852_v32 = vld [vmem:[#allocation161_spill] sm:$0xff] }
  0xb1   :  { %v205_v24 = vsel %vm3846_vm5, 1, %v3594_v14  ;;  %vm3849_vm6 = vcmp.gt.f32.partialorder %v3847_v26, %v3848_v27  ;;  %604 = vst [vmem:[%s3136_s2 + $0x108] sm:$0x3] %v524_v18  ;;  %vm3851_vm7 = vcmp.gt.f32.partialorder %v2366_v52, %v3850_v29  ;;  %v3853_v33 = vld [vmem:[#allocation168_spill] sm:$0xff]  ;;  %v3856_v36 = vld [vmem:[#allocation167_spill] sm:$0xff]  ;;  %v3857_v37 = vld [vmem:[#allocation166_spill] sm:$0xff] }
  0xb2   :  { %v206_v28 = vsel %vm3849_vm6, 1, %v3594_v14  ;;  %v525_v31 = vsel %vm3851_vm7, 3, %v365_v21  ;;  %vm3854_vm8 = vcmp.gt.f32.partialorder %v3852_v32, %v3853_v33  ;;  %vm3858_vm10 = vcmp.gt.f32.partialorder %v3856_v36, %v3857_v37  ;;  %v3859_v39 = vld [vmem:[#allocation169_spill] sm:$0xff]  ;;  %v3860_v52 = vld [vmem:[#allocation174_spill] sm:$0xff]  ;;  %v3862_v43 = vld [vmem:[#allocation171_spill] sm:$0xff] }
  0xb3   :  { %v366_v34 = vsel %vm3854_vm8, 2, %v205_v24  ;;  %v367_v35 = vsel %vm3855_vm9, 2, %v206_v28  ;;  %v207_v38 = vsel %vm3858_vm10, 1, %v3594_v14  ;;  %605 = vst [vmem:[%s3136_s2 + $0x110] sm:$0xff] %v525_v31  ;;  %vm3861_vm11 = vcmp.gt.f32.partialorder %v3859_v39, %v3860_v52  ;;  %v3863_v4 = vld [vmem:[#allocation177_spill] sm:$0xff]  ;;  %v3866_v46 = vld [vmem:[#allocation172_spill] sm:$0xff] }
  0xb4   :  { %v526_v41 = vsel %vm3861_vm11, 3, %v366_v34  ;;  %v527_v42 = vsel %vm447_vm1, 3, %v367_v35  ;;  %vm3864_vm12 = vcmp.gt.f32.partialorder %v3862_v43, %v3863_v4  ;;  %v3865_v44 = vld [vmem:[#allocation173_spill] sm:$0xff]  ;;  %vm3868_vm1 = vcmp.gt.f32.partialorder %v2495_v62, %v2536_v25  ;;  %v3870_v49 = vld [vmem:[#allocation176_spill] sm:$0xff]  ;;  %v3871_v50 = vld [vmem:[#allocation175_spill] sm:$0xff] }
  0xb5   :  { %v368_v61 = vsel %vm3864_vm12, 2, %v207_v38  ;;  %vm3867_vm14 = vcmp.gt.f32.partialorder %v3865_v44, %v3866_v46  ;;  %606 = vst [vmem:[%s3136_s2 + $0x118] sm:$0x3] %v526_v41  ;;  %607 = vst [vmem:[%s3136_s2 + $0x120] sm:$0xff] %v527_v42  ;;  %vm3872_vm3 = vcmp.gt.f32.partialorder %v3870_v49, %v3871_v50 }
  0xb6   :  { %v208_v47 = vsel %vm3867_vm14, 1, %v3594_v14  ;;  %v528_v63 = vsel %vm3868_vm1, 3, %v368_v61  ;;  %v209_v51 = vsel %vm3872_vm3, 1, %v3594_v14 }
  0xb7   :  { %v369_v48 = vsel %vm289_vm0, 2, %v208_v47  ;;  %608 = vst [vmem:[%s3136_s2 + $0x128] sm:$0x3] %v528_v63  ;;  %v370_v25 = vsel %vm290_vm13, 2, %v209_v51 }
  0xb8   :  { %v529_v53 = vsel %vm449_vm15, 3, %v369_v48  ;;  %v530_v0 = vsel %vm450_vm2, 3, %v370_v25 }
  0xb9   :  { %609 = vst [vmem:[%s3136_s2 + $0x130] sm:$0xff] %v529_v53  ;;  %610 = vst [vmem:[%s3136_s2 + $0x138] sm:$0x3] %v530_v0 }

// kernel: forward.10
= control target key start
LH: loop header
LB: loop body
LE: loop exit
PB: predicated region body
PF: predicated region fallthrough
CT: control target
= control target key end

     0   :  { %s2029_s1 = inlined_call_operand.vmem [shape: bf16[128,128], index: 1, kind: input, shape index: {}]   ;;  %s2030_s0 = inlined_call_operand.vmem [shape: bf16[800,128], index: 0, kind: input, shape index: {}]   ;;  %s2031_s2 = inlined_call_operand.vmem [shape: f32[1,128], index: 2, kind: input, shape index: {}]   ;;  %s2032_s3 = inlined_call_operand.vmem [shape: f32[800,128], index: 3, kind: output, shape index: {}]  }
   0x1   :  { %v1372_v0 = vld [vmem:[%s2029_s1 + $0x38] sm:$0xff]   ;;  %v1373_v1 = vld [vmem:[%s2029_s1 + $0x30] sm:$0xff]   ;;  %v1374_v2 = vld [vmem:[%s2029_s1 + $0x28] sm:$0xff]  }
   0x2   :  { %1240 = vmatprep.subr.bf16.mxu0 %v1372_v0  ;;  %1356 = vmatprep.subr.bf16.mxu1 %v1372_v0  ;;  %v1375_v3 = vld [vmem:[%s2029_s1 + $0x20] sm:$0xff]   ;;  %v1382_v5 = vld [vmem:[%s2030_s0 + $0xd0] sm:$0xff]   ;;  %v1376_v6 = vld [vmem:[%s2029_s1 + $0x18] sm:$0xff]  }
   0x3   :  { %1241 = vmatpush3.bf16.msra.mxu0 %v1372_v0  ;;  %1364 = vmatpush3.bf16.msra.mxu1 %v1372_v0  ;;  %v1380_v4 = vld [vmem:[%s2030_s0] sm:$0xff]   ;;  %v1377_v7 = vld [vmem:[%s2029_s1 + $0x10] sm:$0xff]   ;;  %v1378_v8 = vld [vmem:[%s2029_s1 + $0x8] sm:$0xff]  }
   0x4   :  { %1242 = vmatprep.subr.bf16.mxu0 %v1373_v1  ;;  %1357 = vmatprep.subr.bf16.mxu1 %v1373_v1  ;;  %v1379_v9 = vld [vmem:[%s2029_s1] sm:$0xff]   ;;  %v1381_v10 = vld [vmem:[%s2030_s0 + $0x8] sm:$0xff]   ;;  %v1383_v11 = vld [vmem:[%s2030_s0 + $0xd8] sm:$0xff]  }
   0x5   :  { %1256 = vmatprep.mubr.bf16.mxu0 %v1380_v4  ;;  %1308 = vmatprep.mubr.bf16.mxu1 %v1382_v5  ;;  %v1384_v12 = vld [vmem:[%s2030_s0 + $0x10] sm:$0xff]   ;;  %v1386_v13 = vld [vmem:[%s2030_s0 + $0xe0] sm:$0xff]   ;;  %v1385_v14 = vld [vmem:[%s2030_s0 + $0x18] sm:$0xff]  }
   0x6   :  { %v1387_v15 = vld [vmem:[%s2030_s0 + $0xe8] sm:$0xff]   ;;  %v1388_v16 = vld [vmem:[%s2030_s0 + $0x20] sm:$0xff]   ;;  %v1390_v17 = vld [vmem:[%s2030_s0 + $0xf0] sm:$0xff]  }
   0x7   :  { %1243 = vmatpush3.bf16.msra.mxu0 %v1373_v1  ;;  %1365 = vmatpush3.bf16.msra.mxu1 %v1373_v1  ;;  %v1389_v18 = vld [vmem:[%s2030_s0 + $0x28] sm:$0xff]   ;;  %v1391_v19 = vld [vmem:[%s2030_s0 + $0xf8] sm:$0xff]   ;;  %v1392_v20 = vld [vmem:[%s2030_s0 + $0x30] sm:$0xff]  }
   0x8   :  { %1244 = vmatprep.subr.bf16.mxu0 %v1374_v2  ;;  %1358 = vmatprep.subr.bf16.mxu1 %v1374_v2  ;;  %v1394_v21 = vld [vmem:[%s2030_s0 + $0x100] sm:$0xff]   ;;  %v1393_v22 = vld [vmem:[%s2030_s0 + $0x38] sm:$0xff]   ;;  %v1395_v23 = vld [vmem:[%s2030_s0 + $0x108] sm:$0xff]  }
   0x9   :  { %v1396_v24 = vld [vmem:[%s2030_s0 + $0x40] sm:$0xff]   ;;  %v1398_v25 = vld [vmem:[%s2030_s0 + $0x110] sm:$0xff]   ;;  %v1397_v26 = vld [vmem:[%s2030_s0 + $0x48] sm:$0xff]  }
   0xa   :  { %v1399_v27 = vld [vmem:[%s2030_s0 + $0x118] sm:$0xff]   ;;  %v1400_v28 = vld [vmem:[%s2030_s0 + $0x50] sm:$0xff]   ;;  %v1402_v29 = vld [vmem:[%s2030_s0 + $0x120] sm:$0xff]  }
   0xb   :  { %1245 = vmatpush3.bf16.msra.mxu0 %v1374_v2  ;;  %1366 = vmatpush3.bf16.msra.mxu1 %v1374_v2  ;;  %v1401_v30 = vld [vmem:[%s2030_s0 + $0x58] sm:$0xff]   ;;  %v1403_v31 = vld [vmem:[%s2030_s0 + $0x128] sm:$0xff]   ;;  %v1404_v32 = vld [vmem:[%s2030_s0 + $0x60] sm:$0xff]  }
   0xc   :  { %1246 = vmatprep.subr.bf16.mxu0 %v1375_v3  ;;  %1359 = vmatprep.subr.bf16.mxu1 %v1375_v3  ;;  %v1406_v33 = vld [vmem:[%s2030_s0 + $0x130] sm:$0xff]   ;;  %v1405_v34 = vld [vmem:[%s2030_s0 + $0x68] sm:$0xff]   ;;  %v1407_v35 = vld [vmem:[%s2030_s0 + $0x138] sm:$0xff]  }
   0xd   :  { %v1408_v36 = vld [vmem:[%s2030_s0 + $0x70] sm:$0xff]   ;;  %v1410_v37 = vld [vmem:[%s2030_s0 + $0x140] sm:$0xff]   ;;  %v1409_v38 = vld [vmem:[%s2030_s0 + $0x78] sm:$0xff]  }
   0xe   :  { %v1411_v39 = vld [vmem:[%s2030_s0 + $0x148] sm:$0xff]   ;;  %v1412_v40 = vld [vmem:[%s2030_s0 + $0x80] sm:$0xff]   ;;  %v1414_v41 = vld [vmem:[%s2030_s0 + $0x150] sm:$0xff]  }
   0xf   :  { %1247 = vmatpush3.bf16.msra.mxu0 %v1375_v3  ;;  %1367 = vmatpush3.bf16.msra.mxu1 %v1375_v3  ;;  %v1413_v42 = vld [vmem:[%s2030_s0 + $0x88] sm:$0xff]   ;;  %v1415_v43 = vld [vmem:[%s2030_s0 + $0x158] sm:$0xff]   ;;  %v1416_v44 = vld [vmem:[%s2030_s0 + $0x90] sm:$0xff]  }
  0x10   :  { %1248 = vmatprep.subr.bf16.mxu0 %v1376_v6  ;;  %1360 = vmatprep.subr.bf16.mxu1 %v1376_v6  ;;  %v1418_v45 = vld [vmem:[%s2030_s0 + $0x160] sm:$0xff]   ;;  %v1417_v46 = vld [vmem:[%s2030_s0 + $0x98] sm:$0xff]   ;;  %v1419_v47 = vld [vmem:[%s2030_s0 + $0x168] sm:$0xff]  }
  0x11   :  { %v1420_v48 = vld [vmem:[%s2030_s0 + $0xa0] sm:$0xff]   ;;  %v1422_v49 = vld [vmem:[%s2030_s0 + $0x170] sm:$0xff]   ;;  %v1421_v50 = vld [vmem:[%s2030_s0 + $0xa8] sm:$0xff]  }
  0x12   :  { %v1423_v51 = vld [vmem:[%s2030_s0 + $0x178] sm:$0xff]   ;;  %v1424_v52 = vld [vmem:[%s2030_s0 + $0xb0] sm:$0xff]   ;;  %v1426_v53 = vld [vmem:[%s2030_s0 + $0x180] sm:$0xff]  }
  0x13   :  { %1249 = vmatpush3.bf16.msra.mxu0 %v1376_v6  ;;  %1368 = vmatpush3.bf16.msra.mxu1 %v1376_v6  ;;  %v1425_v54 = vld [vmem:[%s2030_s0 + $0xb8] sm:$0xff]   ;;  %v1427_v55 = vld [vmem:[%s2030_s0 + $0x188] sm:$0xff]   ;;  %v1428_v56 = vld [vmem:[%s2030_s0 + $0xc0] sm:$0xff]  }
  0x14   :  { %1250 = vmatprep.subr.bf16.mxu0 %v1377_v7  ;;  %1361 = vmatprep.subr.bf16.mxu1 %v1377_v7  ;;  %v1429_v57 = vld [vmem:[%s2030_s0 + $0xc8] sm:$0xff]   ;;  %v1627_v58 = vld [vmem:[%s2031_s2] ss:$0 sm:$0xff] }
  0x17   :  { %1251 = vmatpush3.bf16.msra.mxu0 %v1377_v7  ;;  %1369 = vmatpush3.bf16.msra.mxu1 %v1377_v7 }
  0x18   :  { %1252 = vmatprep.subr.bf16.mxu0 %v1378_v8  ;;  %1362 = vmatprep.subr.bf16.mxu1 %v1378_v8 }
  0x1b   :  { %1253 = vmatpush3.bf16.msra.mxu0 %v1378_v8  ;;  %1370 = vmatpush3.bf16.msra.mxu1 %v1378_v8 }
  0x1c   :  { %1254 = vmatprep.subr.bf16.mxu0 %v1379_v9  ;;  %1363 = vmatprep.subr.bf16.mxu1 %v1379_v9 }
  0x1f   :  { %1255 = vmatpush3.bf16.msra.mxu0 %v1379_v9  ;;  %1371 = vmatpush3.bf16.msra.mxu1 %v1379_v9 }
  0x22   :  { %1257 = vmatmul.mubr.bf16.vlgmr.msra.gmra.mxu0 %v1381_v10  ;;  %1309 = vmatmul.mubr.bf16.vlgmr.msra.gmra.mxu1 %v1383_v11 }
  0x23   :  { %1260 = vmatprep.mubr.bf16.mxu0 %v1384_v12  ;;  %1312 = vmatprep.mubr.bf16.mxu1 %v1386_v13 }
  0x2a   :  { %1261 = vmatmul.mubr.bf16.gmra.mxu0 %v1385_v14  ;;  %1313 = vmatmul.mubr.bf16.gmra.mxu1 %v1387_v15 }
  0x2b   :  { %1264 = vmatprep.mubr.bf16.mxu0 %v1388_v16  ;;  %1316 = vmatprep.mubr.bf16.mxu1 %v1390_v17 }
  0x32   :  { %1265 = vmatmul.mubr.bf16.gmra.mxu0 %v1389_v18  ;;  %1317 = vmatmul.mubr.bf16.gmra.mxu1 %v1391_v19 }
  0x33   :  { %1268 = vmatprep.mubr.bf16.mxu0 %v1392_v20  ;;  %1320 = vmatprep.mubr.bf16.mxu1 %v1394_v21 }
  0x3a   :  { %1269 = vmatmul.mubr.bf16.gmra.mxu0 %v1393_v22  ;;  %1321 = vmatmul.mubr.bf16.gmra.mxu1 %v1395_v23 }
  0x3b   :  { %1272 = vmatprep.mubr.bf16.mxu0 %v1396_v24  ;;  %1324 = vmatprep.mubr.bf16.mxu1 %v1398_v25 }
  0x42   :  { %1273 = vmatmul.mubr.bf16.gmra.mxu0 %v1397_v26  ;;  %1325 = vmatmul.mubr.bf16.gmra.mxu1 %v1399_v27 }
  0x43   :  { %1276 = vmatprep.mubr.bf16.mxu0 %v1400_v28  ;;  %1328 = vmatprep.mubr.bf16.mxu1 %v1402_v29 }
  0x4a   :  { %1277 = vmatmul.mubr.bf16.gmra.mxu0 %v1401_v30  ;;  %1329 = vmatmul.mubr.bf16.gmra.mxu1 %v1403_v31 }
  0x4b   :  { %1280 = vmatprep.mubr.bf16.mxu0 %v1404_v32  ;;  %1332 = vmatprep.mubr.bf16.mxu1 %v1406_v33 }
  0x52   :  { %1281 = vmatmul.mubr.bf16.gmra.mxu0 %v1405_v34  ;;  %1333 = vmatmul.mubr.bf16.gmra.mxu1 %v1407_v35 }
  0x53   :  { %1284 = vmatprep.mubr.bf16.mxu0 %v1408_v36  ;;  %1336 = vmatprep.mubr.bf16.mxu1 %v1410_v37 }
  0x5a   :  { %1285 = vmatmul.mubr.bf16.gmra.mxu0 %v1409_v38  ;;  %1337 = vmatmul.mubr.bf16.gmra.mxu1 %v1411_v39 }
  0x5b   :  { %1288 = vmatprep.mubr.bf16.mxu0 %v1412_v40  ;;  %1340 = vmatprep.mubr.bf16.mxu1 %v1414_v41 }
  0x62   :  { %1289 = vmatmul.mubr.bf16.gmra.mxu0 %v1413_v42  ;;  %1341 = vmatmul.mubr.bf16.gmra.mxu1 %v1415_v43 }
  0x63   :  { %1292 = vmatprep.mubr.bf16.mxu0 %v1416_v44  ;;  %1344 = vmatprep.mubr.bf16.mxu1 %v1418_v45 }
  0x6a   :  { %1293 = vmatmul.mubr.bf16.gmra.mxu0 %v1417_v46  ;;  %1345 = vmatmul.mubr.bf16.gmra.mxu1 %v1419_v47 }
  0x6b   :  { %1296 = vmatprep.mubr.bf16.mxu0 %v1420_v48  ;;  %1348 = vmatprep.mubr.bf16.mxu1 %v1422_v49 }
  0x72   :  { %1297 = vmatmul.mubr.bf16.gmra.mxu0 %v1421_v50  ;;  %1349 = vmatmul.mubr.bf16.gmra.mxu1 %v1423_v51 }
  0x73   :  { %1300 = vmatprep.mubr.bf16.mxu0 %v1424_v52  ;;  %1352 = vmatprep.mubr.bf16.mxu1 %v1426_v53 }
  0x7a   :  { %1301 = vmatmul.mubr.bf16.gmra.mxu0 %v1425_v54  ;;  %1353 = vmatmul.mubr.bf16.gmra.mxu1 %v1427_v55 }
  0x7b   :  { %1304 = vmatprep.mubr.bf16.mxu0 %v1428_v56 }
  0x82   :  { %1305 = vmatmul.mubr.bf16.gmra.mxu0 %v1429_v57 }
  0xe2   :  { %v1258_v59 = vpop.f32.mrf.mxu0  ;;  %v1310_v60 = vpop.f32.mrf.mxu1 }
  0xe3   :  { %v529_v61 = vadd.f32 %v1258_v59, %v1627_v58  ;;  %v737_v62 = vadd.f32 %v1310_v60, %v1627_v58 }
  0xe4   :  { %v520_v63 = vpop.f32.mrf.mxu0  ;;  %v728_v0 = vpop.f32.mrf.mxu1 }
  0xe5   :  { %v921_v1 = vmax.f32 %v529_v61, 0.0  ;;  %v521_v2 = vadd.f32 %v1627_v58, %v520_v63  ;;  %v973_v3 = vmax.f32 %v737_v62, 0.0  ;;  %v729_v4 = vadd.f32 %v1627_v58, %v728_v0 }
  0xe6   :  { %v1259_v5 = vpop.f32.mrf.mxu0  ;;  %v1311_v6 = vpop.f32.mrf.mxu1 }
  0xe7   :  { %1021 = vst [vmem:[%s2032_s3 + $0x10] sm:$0xff] %v921_v1  ;;  %v919_v7 = vmax.f32 %v521_v2, 0.0  ;;  %1073 = vst [vmem:[%s2032_s3 + $0x1b0] sm:$0xff] %v973_v3  ;;  %v532_v8 = vadd.f32 %v1259_v5, %v1627_v58  ;;  %v971_v9 = vmax.f32 %v729_v4, 0.0  ;;  %v740_v10 = vadd.f32 %v1311_v6, %v1627_v58 }
  0xe8   :  { %v523_v11 = vpop.f32.mrf.mxu0  ;;  %v731_v12 = vpop.f32.mrf.mxu1 }
  0xe9   :  { %1019 = vst [vmem:[%s2032_s3] sm:$0xff] %v919_v7  ;;  %v922_v13 = vmax.f32 %v532_v8, 0.0  ;;  %1071 = vst [vmem:[%s2032_s3 + $0x1a0] sm:$0xff] %v971_v9  ;;  %v524_v14 = vadd.f32 %v1627_v58, %v523_v11  ;;  %v974_v15 = vmax.f32 %v740_v10, 0.0  ;;  %v732_v16 = vadd.f32 %v1627_v58, %v731_v12 }
  0xea   :  { %v1262_v17 = vpop.f32.mrf.mxu0  ;;  %v1314_v18 = vpop.f32.mrf.mxu1 }
  0xeb   :  { %1022 = vst [vmem:[%s2032_s3 + $0x18] sm:$0xff] %v922_v13  ;;  %v920_v19 = vmax.f32 %v524_v14, 0.0  ;;  %1074 = vst [vmem:[%s2032_s3 + $0x1b8] sm:$0xff] %v974_v15  ;;  %v545_v20 = vadd.f32 %v1262_v17, %v1627_v58  ;;  %v972_v21 = vmax.f32 %v732_v16, 0.0  ;;  %v753_v22 = vadd.f32 %v1314_v18, %v1627_v58 }
  0xec   :  { %v536_v23 = vpop.f32.mrf.mxu0  ;;  %v744_v24 = vpop.f32.mrf.mxu1 }
  0xed   :  { %1020 = vst [vmem:[%s2032_s3 + $0x8] sm:$0xff] %v920_v19  ;;  %v925_v25 = vmax.f32 %v545_v20, 0.0  ;;  %1072 = vst [vmem:[%s2032_s3 + $0x1a8] sm:$0xff] %v972_v21  ;;  %v537_v26 = vadd.f32 %v1627_v58, %v536_v23  ;;  %v977_v27 = vmax.f32 %v753_v22, 0.0  ;;  %v745_v28 = vadd.f32 %v1627_v58, %v744_v24 }
  0xee   :  { %v1263_v29 = vpop.f32.mrf.mxu0  ;;  %v1315_v30 = vpop.f32.mrf.mxu1 }
  0xef   :  { %1025 = vst [vmem:[%s2032_s3 + $0x30] sm:$0xff] %v925_v25  ;;  %v923_v31 = vmax.f32 %v537_v26, 0.0  ;;  %1077 = vst [vmem:[%s2032_s3 + $0x1d0] sm:$0xff] %v977_v27  ;;  %v548_v32 = vadd.f32 %v1263_v29, %v1627_v58  ;;  %v975_v33 = vmax.f32 %v745_v28, 0.0  ;;  %v756_v34 = vadd.f32 %v1315_v30, %v1627_v58 }
  0xf0   :  { %v539_v35 = vpop.f32.mrf.mxu0  ;;  %v747_v36 = vpop.f32.mrf.mxu1 }
  0xf1   :  { %1023 = vst [vmem:[%s2032_s3 + $0x20] sm:$0xff] %v923_v31  ;;  %v926_v37 = vmax.f32 %v548_v32, 0.0  ;;  %1075 = vst [vmem:[%s2032_s3 + $0x1c0] sm:$0xff] %v975_v33  ;;  %v540_v38 = vadd.f32 %v1627_v58, %v539_v35  ;;  %v978_v39 = vmax.f32 %v756_v34, 0.0  ;;  %v748_v40 = vadd.f32 %v1627_v58, %v747_v36 }
  0xf2   :  { %v1266_v41 = vpop.f32.mrf.mxu0  ;;  %v1318_v42 = vpop.f32.mrf.mxu1 }
  0xf3   :  { %1026 = vst [vmem:[%s2032_s3 + $0x38] sm:$0xff] %v926_v37  ;;  %v924_v43 = vmax.f32 %v540_v38, 0.0  ;;  %1078 = vst [vmem:[%s2032_s3 + $0x1d8] sm:$0xff] %v978_v39  ;;  %v561_v44 = vadd.f32 %v1266_v41, %v1627_v58  ;;  %v976_v45 = vmax.f32 %v748_v40, 0.0  ;;  %v769_v46 = vadd.f32 %v1318_v42, %v1627_v58 }
  0xf4   :  { %v552_v47 = vpop.f32.mrf.mxu0  ;;  %v760_v48 = vpop.f32.mrf.mxu1 }
  0xf5   :  { %1024 = vst [vmem:[%s2032_s3 + $0x28] sm:$0xff] %v924_v43  ;;  %v929_v49 = vmax.f32 %v561_v44, 0.0  ;;  %1076 = vst [vmem:[%s2032_s3 + $0x1c8] sm:$0xff] %v976_v45  ;;  %v553_v50 = vadd.f32 %v1627_v58, %v552_v47  ;;  %v981_v51 = vmax.f32 %v769_v46, 0.0  ;;  %v761_v52 = vadd.f32 %v1627_v58, %v760_v48 }
  0xf6   :  { %v1267_v53 = vpop.f32.mrf.mxu0  ;;  %v1319_v54 = vpop.f32.mrf.mxu1 }
  0xf7   :  { %1029 = vst [vmem:[%s2032_s3 + $0x50] sm:$0xff] %v929_v49  ;;  %v927_v55 = vmax.f32 %v553_v50, 0.0  ;;  %1081 = vst [vmem:[%s2032_s3 + $0x1f0] sm:$0xff] %v981_v51  ;;  %v564_v56 = vadd.f32 %v1267_v53, %v1627_v58  ;;  %v979_v57 = vmax.f32 %v761_v52, 0.0  ;;  %v772_v59 = vadd.f32 %v1319_v54, %v1627_v58 }
  0xf8   :  { %v555_v60 = vpop.f32.mrf.mxu0  ;;  %v763_v61 = vpop.f32.mrf.mxu1 }
  0xf9   :  { %1027 = vst [vmem:[%s2032_s3 + $0x40] sm:$0xff] %v927_v55  ;;  %v930_v62 = vmax.f32 %v564_v56, 0.0  ;;  %1079 = vst [vmem:[%s2032_s3 + $0x1e0] sm:$0xff] %v979_v57  ;;  %v556_v63 = vadd.f32 %v1627_v58, %v555_v60  ;;  %v982_v0 = vmax.f32 %v772_v59, 0.0  ;;  %v764_v1 = vadd.f32 %v1627_v58, %v763_v61 }
  0xfa   :  { %v1270_v2 = vpop.f32.mrf.mxu0  ;;  %v1322_v3 = vpop.f32.mrf.mxu1 }
  0xfb   :  { %1030 = vst [vmem:[%s2032_s3 + $0x58] sm:$0xff] %v930_v62  ;;  %v928_v4 = vmax.f32 %v556_v63, 0.0  ;;  %1082 = vst [vmem:[%s2032_s3 + $0x1f8] sm:$0xff] %v982_v0  ;;  %v577_v5 = vadd.f32 %v1270_v2, %v1627_v58  ;;  %v980_v6 = vmax.f32 %v764_v1, 0.0  ;;  %v785_v7 = vadd.f32 %v1322_v3, %v1627_v58 }
  0xfc   :  { %v568_v8 = vpop.f32.mrf.mxu0  ;;  %v776_v9 = vpop.f32.mrf.mxu1 }
  0xfd   :  { %1028 = vst [vmem:[%s2032_s3 + $0x48] sm:$0xff] %v928_v4  ;;  %v933_v10 = vmax.f32 %v577_v5, 0.0  ;;  %1080 = vst [vmem:[%s2032_s3 + $0x1e8] sm:$0xff] %v980_v6  ;;  %v569_v11 = vadd.f32 %v1627_v58, %v568_v8  ;;  %v985_v12 = vmax.f32 %v785_v7, 0.0  ;;  %v777_v13 = vadd.f32 %v1627_v58, %v776_v9 }
  0xfe   :  { %v1271_v14 = vpop.f32.mrf.mxu0  ;;  %v1323_v15 = vpop.f32.mrf.mxu1 }
  0xff   :  { %1033 = vst [vmem:[%s2032_s3 + $0x70] sm:$0xff] %v933_v10  ;;  %v931_v16 = vmax.f32 %v569_v11, 0.0  ;;  %1085 = vst [vmem:[%s2032_s3 + $0x210] sm:$0xff] %v985_v12  ;;  %v580_v17 = vadd.f32 %v1271_v14, %v1627_v58  ;;  %v983_v18 = vmax.f32 %v777_v13, 0.0  ;;  %v788_v19 = vadd.f32 %v1323_v15, %v1627_v58 }
 0x100   :  { %v571_v20 = vpop.f32.mrf.mxu0  ;;  %v779_v21 = vpop.f32.mrf.mxu1 }
 0x101   :  { %1031 = vst [vmem:[%s2032_s3 + $0x60] sm:$0xff] %v931_v16  ;;  %v934_v22 = vmax.f32 %v580_v17, 0.0  ;;  %1083 = vst [vmem:[%s2032_s3 + $0x200] sm:$0xff] %v983_v18  ;;  %v572_v23 = vadd.f32 %v1627_v58, %v571_v20  ;;  %v986_v24 = vmax.f32 %v788_v19, 0.0  ;;  %v780_v25 = vadd.f32 %v1627_v58, %v779_v21 }
 0x102   :  { %v1274_v26 = vpop.f32.mrf.mxu0  ;;  %v1326_v27 = vpop.f32.mrf.mxu1 }
 0x103   :  { %1034 = vst [vmem:[%s2032_s3 + $0x78] sm:$0xff] %v934_v22  ;;  %v932_v28 = vmax.f32 %v572_v23, 0.0  ;;  %1086 = vst [vmem:[%s2032_s3 + $0x218] sm:$0xff] %v986_v24  ;;  %v593_v29 = vadd.f32 %v1274_v26, %v1627_v58  ;;  %v984_v30 = vmax.f32 %v780_v25, 0.0  ;;  %v801_v31 = vadd.f32 %v1326_v27, %v1627_v58 }
 0x104   :  { %v584_v32 = vpop.f32.mrf.mxu0  ;;  %v792_v33 = vpop.f32.mrf.mxu1 }
 0x105   :  { %1032 = vst [vmem:[%s2032_s3 + $0x68] sm:$0xff] %v932_v28  ;;  %v937_v34 = vmax.f32 %v593_v29, 0.0  ;;  %1084 = vst [vmem:[%s2032_s3 + $0x208] sm:$0xff] %v984_v30  ;;  %v585_v35 = vadd.f32 %v1627_v58, %v584_v32  ;;  %v989_v36 = vmax.f32 %v801_v31, 0.0  ;;  %v793_v37 = vadd.f32 %v1627_v58, %v792_v33 }
 0x106   :  { %v1275_v38 = vpop.f32.mrf.mxu0  ;;  %v1327_v39 = vpop.f32.mrf.mxu1 }
 0x107   :  { %1037 = vst [vmem:[%s2032_s3 + $0x90] sm:$0xff] %v937_v34  ;;  %v935_v40 = vmax.f32 %v585_v35, 0.0  ;;  %1089 = vst [vmem:[%s2032_s3 + $0x230] sm:$0xff] %v989_v36  ;;  %v596_v41 = vadd.f32 %v1275_v38, %v1627_v58  ;;  %v987_v42 = vmax.f32 %v793_v37, 0.0  ;;  %v804_v43 = vadd.f32 %v1327_v39, %v1627_v58 }
 0x108   :  { %v587_v44 = vpop.f32.mrf.mxu0  ;;  %v795_v45 = vpop.f32.mrf.mxu1 }
 0x109   :  { %1035 = vst [vmem:[%s2032_s3 + $0x80] sm:$0xff] %v935_v40  ;;  %v938_v46 = vmax.f32 %v596_v41, 0.0  ;;  %1087 = vst [vmem:[%s2032_s3 + $0x220] sm:$0xff] %v987_v42  ;;  %v588_v47 = vadd.f32 %v1627_v58, %v587_v44  ;;  %v990_v48 = vmax.f32 %v804_v43, 0.0  ;;  %v796_v49 = vadd.f32 %v1627_v58, %v795_v45 }
 0x10a   :  { %v1278_v50 = vpop.f32.mrf.mxu0  ;;  %v1330_v51 = vpop.f32.mrf.mxu1 }
 0x10b   :  { %1038 = vst [vmem:[%s2032_s3 + $0x98] sm:$0xff] %v938_v46  ;;  %v936_v52 = vmax.f32 %v588_v47, 0.0  ;;  %1090 = vst [vmem:[%s2032_s3 + $0x238] sm:$0xff] %v990_v48  ;;  %v609_v53 = vadd.f32 %v1278_v50, %v1627_v58  ;;  %v988_v54 = vmax.f32 %v796_v49, 0.0  ;;  %v817_v55 = vadd.f32 %v1330_v51, %v1627_v58 }
 0x10c   :  { %v600_v56 = vpop.f32.mrf.mxu0  ;;  %v808_v57 = vpop.f32.mrf.mxu1 }
 0x10d   :  { %1036 = vst [vmem:[%s2032_s3 + $0x88] sm:$0xff] %v936_v52  ;;  %v941_v59 = vmax.f32 %v609_v53, 0.0  ;;  %1088 = vst [vmem:[%s2032_s3 + $0x228] sm:$0xff] %v988_v54  ;;  %v601_v60 = vadd.f32 %v1627_v58, %v600_v56  ;;  %v993_v61 = vmax.f32 %v817_v55, 0.0  ;;  %v809_v62 = vadd.f32 %v1627_v58, %v808_v57 }
 0x10e   :  { %v1279_v63 = vpop.f32.mrf.mxu0  ;;  %v1331_v0 = vpop.f32.mrf.mxu1 }
 0x10f   :  { %1041 = vst [vmem:[%s2032_s3 + $0xb0] sm:$0xff] %v941_v59  ;;  %v939_v1 = vmax.f32 %v601_v60, 0.0  ;;  %1093 = vst [vmem:[%s2032_s3 + $0x250] sm:$0xff] %v993_v61  ;;  %v612_v2 = vadd.f32 %v1279_v63, %v1627_v58  ;;  %v991_v3 = vmax.f32 %v809_v62, 0.0  ;;  %v820_v4 = vadd.f32 %v1331_v0, %v1627_v58 }
 0x110   :  { %v603_v5 = vpop.f32.mrf.mxu0  ;;  %v811_v6 = vpop.f32.mrf.mxu1 }
 0x111   :  { %1039 = vst [vmem:[%s2032_s3 + $0xa0] sm:$0xff] %v939_v1  ;;  %v942_v7 = vmax.f32 %v612_v2, 0.0  ;;  %1091 = vst [vmem:[%s2032_s3 + $0x240] sm:$0xff] %v991_v3  ;;  %v604_v8 = vadd.f32 %v1627_v58, %v603_v5  ;;  %v994_v9 = vmax.f32 %v820_v4, 0.0  ;;  %v812_v10 = vadd.f32 %v1627_v58, %v811_v6 }
 0x112   :  { %v1282_v11 = vpop.f32.mrf.mxu0  ;;  %v1334_v12 = vpop.f32.mrf.mxu1 }
 0x113   :  { %1042 = vst [vmem:[%s2032_s3 + $0xb8] sm:$0xff] %v942_v7  ;;  %v940_v13 = vmax.f32 %v604_v8, 0.0  ;;  %1094 = vst [vmem:[%s2032_s3 + $0x258] sm:$0xff] %v994_v9  ;;  %v625_v14 = vadd.f32 %v1282_v11, %v1627_v58  ;;  %v992_v15 = vmax.f32 %v812_v10, 0.0  ;;  %v833_v16 = vadd.f32 %v1334_v12, %v1627_v58 }
 0x114   :  { %v616_v17 = vpop.f32.mrf.mxu0  ;;  %v824_v18 = vpop.f32.mrf.mxu1 }
 0x115   :  { %1040 = vst [vmem:[%s2032_s3 + $0xa8] sm:$0xff] %v940_v13  ;;  %v945_v19 = vmax.f32 %v625_v14, 0.0  ;;  %1092 = vst [vmem:[%s2032_s3 + $0x248] sm:$0xff] %v992_v15  ;;  %v617_v20 = vadd.f32 %v1627_v58, %v616_v17  ;;  %v997_v21 = vmax.f32 %v833_v16, 0.0  ;;  %v825_v22 = vadd.f32 %v1627_v58, %v824_v18 }
 0x116   :  { %v1283_v23 = vpop.f32.mrf.mxu0  ;;  %v1335_v24 = vpop.f32.mrf.mxu1 }
 0x117   :  { %1045 = vst [vmem:[%s2032_s3 + $0xd0] sm:$0xff] %v945_v19  ;;  %v943_v25 = vmax.f32 %v617_v20, 0.0  ;;  %1097 = vst [vmem:[%s2032_s3 + $0x270] sm:$0xff] %v997_v21  ;;  %v628_v26 = vadd.f32 %v1283_v23, %v1627_v58  ;;  %v995_v27 = vmax.f32 %v825_v22, 0.0  ;;  %v836_v28 = vadd.f32 %v1335_v24, %v1627_v58 }
 0x118   :  { %v619_v29 = vpop.f32.mrf.mxu0  ;;  %v827_v30 = vpop.f32.mrf.mxu1 }
 0x119   :  { %1043 = vst [vmem:[%s2032_s3 + $0xc0] sm:$0xff] %v943_v25  ;;  %v946_v31 = vmax.f32 %v628_v26, 0.0  ;;  %1095 = vst [vmem:[%s2032_s3 + $0x260] sm:$0xff] %v995_v27  ;;  %v620_v32 = vadd.f32 %v1627_v58, %v619_v29  ;;  %v998_v33 = vmax.f32 %v836_v28, 0.0  ;;  %v828_v34 = vadd.f32 %v1627_v58, %v827_v30 }
 0x11a   :  { %v1286_v35 = vpop.f32.mrf.mxu0  ;;  %v1338_v36 = vpop.f32.mrf.mxu1 }
 0x11b   :  { %1046 = vst [vmem:[%s2032_s3 + $0xd8] sm:$0xff] %v946_v31  ;;  %v944_v37 = vmax.f32 %v620_v32, 0.0  ;;  %1098 = vst [vmem:[%s2032_s3 + $0x278] sm:$0xff] %v998_v33  ;;  %v641_v38 = vadd.f32 %v1286_v35, %v1627_v58  ;;  %v996_v39 = vmax.f32 %v828_v34, 0.0  ;;  %v849_v40 = vadd.f32 %v1338_v36, %v1627_v58 }
 0x11c   :  { %v632_v41 = vpop.f32.mrf.mxu0  ;;  %v840_v42 = vpop.f32.mrf.mxu1 }
 0x11d   :  { %1044 = vst [vmem:[%s2032_s3 + $0xc8] sm:$0xff] %v944_v37  ;;  %v949_v43 = vmax.f32 %v641_v38, 0.0  ;;  %1096 = vst [vmem:[%s2032_s3 + $0x268] sm:$0xff] %v996_v39  ;;  %v633_v44 = vadd.f32 %v1627_v58, %v632_v41  ;;  %v1001_v45 = vmax.f32 %v849_v40, 0.0  ;;  %v841_v46 = vadd.f32 %v1627_v58, %v840_v42 }
 0x11e   :  { %v1287_v47 = vpop.f32.mrf.mxu0  ;;  %v1339_v48 = vpop.f32.mrf.mxu1 }
 0x11f   :  { %1049 = vst [vmem:[%s2032_s3 + $0xf0] sm:$0xff] %v949_v43  ;;  %v947_v49 = vmax.f32 %v633_v44, 0.0  ;;  %1101 = vst [vmem:[%s2032_s3 + $0x290] sm:$0xff] %v1001_v45  ;;  %v644_v50 = vadd.f32 %v1287_v47, %v1627_v58  ;;  %v999_v51 = vmax.f32 %v841_v46, 0.0  ;;  %v852_v52 = vadd.f32 %v1339_v48, %v1627_v58 }
 0x120   :  { %v635_v53 = vpop.f32.mrf.mxu0  ;;  %v843_v54 = vpop.f32.mrf.mxu1 }
 0x121   :  { %1047 = vst [vmem:[%s2032_s3 + $0xe0] sm:$0xff] %v947_v49  ;;  %v950_v55 = vmax.f32 %v644_v50, 0.0  ;;  %1099 = vst [vmem:[%s2032_s3 + $0x280] sm:$0xff] %v999_v51  ;;  %v636_v56 = vadd.f32 %v1627_v58, %v635_v53  ;;  %v1002_v57 = vmax.f32 %v852_v52, 0.0  ;;  %v844_v59 = vadd.f32 %v1627_v58, %v843_v54 }
 0x122   :  { %v1290_v60 = vpop.f32.mrf.mxu0  ;;  %v1342_v61 = vpop.f32.mrf.mxu1 }
 0x123   :  { %1050 = vst [vmem:[%s2032_s3 + $0xf8] sm:$0xff] %v950_v55  ;;  %v948_v62 = vmax.f32 %v636_v56, 0.0  ;;  %1102 = vst [vmem:[%s2032_s3 + $0x298] sm:$0xff] %v1002_v57  ;;  %v657_v63 = vadd.f32 %v1290_v60, %v1627_v58  ;;  %v1000_v0 = vmax.f32 %v844_v59, 0.0  ;;  %v865_v1 = vadd.f32 %v1342_v61, %v1627_v58 }
 0x124   :  { %v648_v2 = vpop.f32.mrf.mxu0  ;;  %v856_v3 = vpop.f32.mrf.mxu1 }
 0x125   :  { %1048 = vst [vmem:[%s2032_s3 + $0xe8] sm:$0xff] %v948_v62  ;;  %v953_v4 = vmax.f32 %v657_v63, 0.0  ;;  %1100 = vst [vmem:[%s2032_s3 + $0x288] sm:$0xff] %v1000_v0  ;;  %v649_v5 = vadd.f32 %v1627_v58, %v648_v2  ;;  %v1005_v6 = vmax.f32 %v865_v1, 0.0  ;;  %v857_v7 = vadd.f32 %v1627_v58, %v856_v3 }
 0x126   :  { %v1291_v8 = vpop.f32.mrf.mxu0  ;;  %v1343_v9 = vpop.f32.mrf.mxu1 }
 0x127   :  { %1053 = vst [vmem:[%s2032_s3 + $0x110] sm:$0xff] %v953_v4  ;;  %v951_v10 = vmax.f32 %v649_v5, 0.0  ;;  %1105 = vst [vmem:[%s2032_s3 + $0x2b0] sm:$0xff] %v1005_v6  ;;  %v660_v11 = vadd.f32 %v1291_v8, %v1627_v58  ;;  %v1003_v12 = vmax.f32 %v857_v7, 0.0  ;;  %v868_v13 = vadd.f32 %v1343_v9, %v1627_v58 }
 0x128   :  { %v651_v14 = vpop.f32.mrf.mxu0  ;;  %v859_v15 = vpop.f32.mrf.mxu1 }
 0x129   :  { %1051 = vst [vmem:[%s2032_s3 + $0x100] sm:$0xff] %v951_v10  ;;  %v954_v16 = vmax.f32 %v660_v11, 0.0  ;;  %1103 = vst [vmem:[%s2032_s3 + $0x2a0] sm:$0xff] %v1003_v12  ;;  %v652_v17 = vadd.f32 %v1627_v58, %v651_v14  ;;  %v1006_v18 = vmax.f32 %v868_v13, 0.0  ;;  %v860_v19 = vadd.f32 %v1627_v58, %v859_v15 }
 0x12a   :  { %v1294_v20 = vpop.f32.mrf.mxu0  ;;  %v1346_v21 = vpop.f32.mrf.mxu1 }
 0x12b   :  { %1054 = vst [vmem:[%s2032_s3 + $0x118] sm:$0xff] %v954_v16  ;;  %v952_v22 = vmax.f32 %v652_v17, 0.0  ;;  %1106 = vst [vmem:[%s2032_s3 + $0x2b8] sm:$0xff] %v1006_v18  ;;  %v673_v23 = vadd.f32 %v1294_v20, %v1627_v58  ;;  %v1004_v24 = vmax.f32 %v860_v19, 0.0  ;;  %v881_v25 = vadd.f32 %v1346_v21, %v1627_v58 }
 0x12c   :  { %v664_v26 = vpop.f32.mrf.mxu0  ;;  %v872_v27 = vpop.f32.mrf.mxu1 }
 0x12d   :  { %1052 = vst [vmem:[%s2032_s3 + $0x108] sm:$0xff] %v952_v22  ;;  %v957_v28 = vmax.f32 %v673_v23, 0.0  ;;  %1104 = vst [vmem:[%s2032_s3 + $0x2a8] sm:$0xff] %v1004_v24  ;;  %v665_v29 = vadd.f32 %v1627_v58, %v664_v26  ;;  %v1009_v30 = vmax.f32 %v881_v25, 0.0  ;;  %v873_v31 = vadd.f32 %v1627_v58, %v872_v27 }
 0x12e   :  { %v1295_v32 = vpop.f32.mrf.mxu0  ;;  %v1347_v33 = vpop.f32.mrf.mxu1 }
 0x12f   :  { %1057 = vst [vmem:[%s2032_s3 + $0x130] sm:$0xff] %v957_v28  ;;  %v955_v34 = vmax.f32 %v665_v29, 0.0  ;;  %1109 = vst [vmem:[%s2032_s3 + $0x2d0] sm:$0xff] %v1009_v30  ;;  %v676_v35 = vadd.f32 %v1295_v32, %v1627_v58  ;;  %v1007_v36 = vmax.f32 %v873_v31, 0.0  ;;  %v884_v37 = vadd.f32 %v1347_v33, %v1627_v58 }
 0x130   :  { %v667_v38 = vpop.f32.mrf.mxu0  ;;  %v875_v39 = vpop.f32.mrf.mxu1 }
 0x131   :  { %1055 = vst [vmem:[%s2032_s3 + $0x120] sm:$0xff] %v955_v34  ;;  %v958_v40 = vmax.f32 %v676_v35, 0.0  ;;  %1107 = vst [vmem:[%s2032_s3 + $0x2c0] sm:$0xff] %v1007_v36  ;;  %v668_v41 = vadd.f32 %v1627_v58, %v667_v38  ;;  %v1010_v42 = vmax.f32 %v884_v37, 0.0  ;;  %v876_v43 = vadd.f32 %v1627_v58, %v875_v39 }
 0x132   :  { %v1298_v44 = vpop.f32.mrf.mxu0  ;;  %v1350_v45 = vpop.f32.mrf.mxu1 }
 0x133   :  { %1058 = vst [vmem:[%s2032_s3 + $0x138] sm:$0xff] %v958_v40  ;;  %v956_v46 = vmax.f32 %v668_v41, 0.0  ;;  %1110 = vst [vmem:[%s2032_s3 + $0x2d8] sm:$0xff] %v1010_v42  ;;  %v689_v47 = vadd.f32 %v1298_v44, %v1627_v58  ;;  %v1008_v48 = vmax.f32 %v876_v43, 0.0  ;;  %v897_v49 = vadd.f32 %v1350_v45, %v1627_v58 }
 0x134   :  { %v680_v50 = vpop.f32.mrf.mxu0  ;;  %v888_v51 = vpop.f32.mrf.mxu1 }
 0x135   :  { %1056 = vst [vmem:[%s2032_s3 + $0x128] sm:$0xff] %v956_v46  ;;  %v961_v52 = vmax.f32 %v689_v47, 0.0  ;;  %1108 = vst [vmem:[%s2032_s3 + $0x2c8] sm:$0xff] %v1008_v48  ;;  %v681_v53 = vadd.f32 %v1627_v58, %v680_v50  ;;  %v1013_v54 = vmax.f32 %v897_v49, 0.0  ;;  %v889_v55 = vadd.f32 %v1627_v58, %v888_v51 }
 0x136   :  { %v1299_v56 = vpop.f32.mrf.mxu0  ;;  %v1351_v57 = vpop.f32.mrf.mxu1 }
 0x137   :  { %1061 = vst [vmem:[%s2032_s3 + $0x150] sm:$0xff] %v961_v52  ;;  %v959_v59 = vmax.f32 %v681_v53, 0.0  ;;  %1113 = vst [vmem:[%s2032_s3 + $0x2f0] sm:$0xff] %v1013_v54  ;;  %v692_v60 = vadd.f32 %v1299_v56, %v1627_v58  ;;  %v1011_v61 = vmax.f32 %v889_v55, 0.0  ;;  %v900_v62 = vadd.f32 %v1351_v57, %v1627_v58 }
 0x138   :  { %v683_v63 = vpop.f32.mrf.mxu0  ;;  %v891_v0 = vpop.f32.mrf.mxu1 }
 0x139   :  { %1059 = vst [vmem:[%s2032_s3 + $0x140] sm:$0xff] %v959_v59  ;;  %v962_v1 = vmax.f32 %v692_v60, 0.0  ;;  %1111 = vst [vmem:[%s2032_s3 + $0x2e0] sm:$0xff] %v1011_v61  ;;  %v684_v2 = vadd.f32 %v1627_v58, %v683_v63  ;;  %v1014_v3 = vmax.f32 %v900_v62, 0.0  ;;  %v892_v4 = vadd.f32 %v1627_v58, %v891_v0 }
 0x13a   :  { %v1302_v5 = vpop.f32.mrf.mxu0  ;;  %v1354_v6 = vpop.f32.mrf.mxu1 }
 0x13b   :  { %1062 = vst [vmem:[%s2032_s3 + $0x158] sm:$0xff] %v962_v1  ;;  %v960_v7 = vmax.f32 %v684_v2, 0.0  ;;  %1114 = vst [vmem:[%s2032_s3 + $0x2f8] sm:$0xff] %v1014_v3  ;;  %v705_v8 = vadd.f32 %v1302_v5, %v1627_v58  ;;  %v1012_v9 = vmax.f32 %v892_v4, 0.0  ;;  %v913_v10 = vadd.f32 %v1354_v6, %v1627_v58 }
 0x13c   :  { %v696_v11 = vpop.f32.mrf.mxu0  ;;  %v904_v12 = vpop.f32.mrf.mxu1 }
 0x13d   :  { %1060 = vst [vmem:[%s2032_s3 + $0x148] sm:$0xff] %v960_v7  ;;  %v965_v13 = vmax.f32 %v705_v8, 0.0  ;;  %1112 = vst [vmem:[%s2032_s3 + $0x2e8] sm:$0xff] %v1012_v9  ;;  %v697_v14 = vadd.f32 %v1627_v58, %v696_v11  ;;  %v1017_v15 = vmax.f32 %v913_v10, 0.0  ;;  %v905_v16 = vadd.f32 %v1627_v58, %v904_v12 }
 0x13e   :  { %v1303_v17 = vpop.f32.mrf.mxu0  ;;  %v1355_v18 = vpop.f32.mrf.mxu1 }
 0x13f   :  { %1065 = vst [vmem:[%s2032_s3 + $0x170] sm:$0xff] %v965_v13  ;;  %v963_v19 = vmax.f32 %v697_v14, 0.0  ;;  %1117 = vst [vmem:[%s2032_s3 + $0x310] sm:$0xff] %v1017_v15  ;;  %v708_v20 = vadd.f32 %v1303_v17, %v1627_v58  ;;  %v1015_v21 = vmax.f32 %v905_v16, 0.0  ;;  %v916_v22 = vadd.f32 %v1355_v18, %v1627_v58 }
 0x140   :  { %v699_v23 = vpop.f32.mrf.mxu0  ;;  %v907_v24 = vpop.f32.mrf.mxu1 }
 0x141   :  { %1063 = vst [vmem:[%s2032_s3 + $0x160] sm:$0xff] %v963_v19  ;;  %v966_v25 = vmax.f32 %v708_v20, 0.0  ;;  %1115 = vst [vmem:[%s2032_s3 + $0x300] sm:$0xff] %v1015_v21  ;;  %v700_v26 = vadd.f32 %v1627_v58, %v699_v23  ;;  %v1018_v27 = vmax.f32 %v916_v22, 0.0  ;;  %v908_v28 = vadd.f32 %v1627_v58, %v907_v24 }
 0x142   :  { %v1306_v29 = vpop.f32.mrf.mxu0 }
 0x143   :  { %1066 = vst [vmem:[%s2032_s3 + $0x178] sm:$0xff] %v966_v25  ;;  %v964_v30 = vmax.f32 %v700_v26, 0.0  ;;  %1118 = vst [vmem:[%s2032_s3 + $0x318] sm:$0xff] %v1018_v27  ;;  %v721_v31 = vadd.f32 %v1306_v29, %v1627_v58  ;;  %v1016_v32 = vmax.f32 %v908_v28, 0.0 }
 0x144   :  { %v712_v33 = vpop.f32.mrf.mxu0 }
 0x145   :  { %1064 = vst [vmem:[%s2032_s3 + $0x168] sm:$0xff] %v964_v30  ;;  %v969_v34 = vmax.f32 %v721_v31, 0.0  ;;  %1116 = vst [vmem:[%s2032_s3 + $0x308] sm:$0xff] %v1016_v32  ;;  %v713_v35 = vadd.f32 %v1627_v58, %v712_v33 }
 0x146   :  { %v1307_v36 = vpop.f32.mrf.mxu0 }
 0x147   :  { %1069 = vst [vmem:[%s2032_s3 + $0x190] sm:$0xff] %v969_v34  ;;  %v967_v37 = vmax.f32 %v713_v35, 0.0  ;;  %v724_v38 = vadd.f32 %v1307_v36, %v1627_v58 }
 0x148   :  { %v715_v39 = vpop.f32.mrf.mxu0 }
 0x149   :  { %1067 = vst [vmem:[%s2032_s3 + $0x180] sm:$0xff] %v967_v37  ;;  %v970_v40 = vmax.f32 %v724_v38, 0.0  ;;  %v716_v41 = vadd.f32 %v1627_v58, %v715_v39 }
 0x14b   :  { %1070 = vst [vmem:[%s2032_s3 + $0x198] sm:$0xff] %v970_v40  ;;  %v968_v42 = vmax.f32 %v716_v41, 0.0 }
 0x14d   :  { %1068 = vst [vmem:[%s2032_s3 + $0x188] sm:$0xff] %v968_v42 }

// kernel: forward.12
= control target key start
LH: loop header
LB: loop body
LE: loop exit
PB: predicated region body
PF: predicated region fallthrough
CT: control target
= control target key end

     0   :  { %s996_s1 = inlined_call_operand.vmem [shape: bf16[512,128], index: 1, kind: input, shape index: {}]   ;;  %s997_s0 = inlined_call_operand.vmem [shape: bf16[80,512], index: 0, kind: input, shape index: {}]   ;;  %s998_s2 = inlined_call_operand.vmem [shape: f32[1,128], index: 2, kind: input, shape index: {}]   ;;  %s999_s3 = inlined_call_operand.vmem [shape: f32[80,128], index: 3, kind: output, shape index: {}]  }
   0x1   :  { %v713_v0 = vld [vmem:[%s996_s1 + $0x78] sm:$0xff]   ;;  %v717_v4 = vld [vmem:[%s996_s1 + $0x70] sm:$0xff]   ;;  %v721_v8 = vld [vmem:[%s996_s1 + $0x68] sm:$0xff]  }
   0x2   :  { %v714_v1 = vld [vmem:[%s996_s1 + $0xf8] sm:$0xff]   ;;  %621 = vmatprep.subr.bf16.mxu0 %v713_v0  ;;  %v718_v5 = vld [vmem:[%s996_s1 + $0xf0] sm:$0xff]   ;;  %v722_v9 = vld [vmem:[%s996_s1 + $0xe8] sm:$0xff]  }
   0x3   :  { %v715_v2 = vld [vmem:[%s996_s1 + $0x38] sm:$0xff]   ;;  %667 = vmatprep.subr.bf16.mxu1 %v714_v1  ;;  %v719_v6 = vld [vmem:[%s996_s1 + $0x30] sm:$0xff]   ;;  %v723_v10 = vld [vmem:[%s996_s1 + $0x28] sm:$0xff]  }
   0x4   :  { %v716_v3 = vld [vmem:[%s996_s1 + $0xb8] sm:$0xff]   ;;  %622 = vmatpush3.bf16.msra.mxu0 %v715_v2  ;;  %v720_v7 = vld [vmem:[%s996_s1 + $0xb0] sm:$0xff]   ;;  %v724_v11 = vld [vmem:[%s996_s1 + $0xa8] sm:$0xff]  }
   0x5   :  { %668 = vmatpush3.bf16.msra.mxu1 %v716_v3  ;;  %623 = vmatprep.subr.bf16.mxu0 %v717_v4  ;;  %v725_v12 = vld [vmem:[%s996_s1 + $0x60] sm:$0xff]   ;;  %v729_v16 = vld [vmem:[%s996_s1 + $0x58] sm:$0xff]   ;;  %v733_v20 = vld [vmem:[%s996_s1 + $0x50] sm:$0xff]  }
   0x6   :  { %669 = vmatprep.subr.bf16.mxu1 %v718_v5  ;;  %v726_v13 = vld [vmem:[%s996_s1 + $0xe0] sm:$0xff]   ;;  %v730_v17 = vld [vmem:[%s996_s1 + $0xd8] sm:$0xff]   ;;  %v734_v21 = vld [vmem:[%s996_s1 + $0xd0] sm:$0xff]  }
   0x7   :  { %v727_v14 = vld [vmem:[%s996_s1 + $0x20] sm:$0xff]   ;;  %v731_v18 = vld [vmem:[%s996_s1 + $0x18] sm:$0xff]   ;;  %v735_v22 = vld [vmem:[%s996_s1 + $0x10] sm:$0xff]  }
   0x8   :  { %624 = vmatpush3.bf16.msra.mxu0 %v719_v6  ;;  %v728_v15 = vld [vmem:[%s996_s1 + $0xa0] sm:$0xff]   ;;  %v732_v19 = vld [vmem:[%s996_s1 + $0x98] sm:$0xff]   ;;  %v736_v23 = vld [vmem:[%s996_s1 + $0x90] sm:$0xff]  }
   0x9   :  { %670 = vmatpush3.bf16.msra.mxu1 %v720_v7  ;;  %625 = vmatprep.subr.bf16.mxu0 %v721_v8  ;;  %v737_v24 = vld [vmem:[%s996_s1 + $0x48] sm:$0xff]   ;;  %v741_v28 = vld [vmem:[%s996_s1 + $0x40] sm:$0xff]  }
   0xa   :  { %671 = vmatprep.subr.bf16.mxu1 %v722_v9  ;;  %v738_v25 = vld [vmem:[%s996_s1 + $0xc8] sm:$0xff]   ;;  %v742_v29 = vld [vmem:[%s996_s1 + $0xc0] sm:$0xff]  }
   0xb   :  { %v739_v26 = vld [vmem:[%s996_s1 + $0x8] sm:$0xff]   ;;  %v743_v30 = vld [vmem:[%s996_s1] sm:$0xff]  }
   0xc   :  { %626 = vmatpush3.bf16.msra.mxu0 %v723_v10  ;;  %v740_v27 = vld [vmem:[%s996_s1 + $0x88] sm:$0xff]   ;;  %v744_v31 = vld [vmem:[%s996_s1 + $0x80] sm:$0xff]  }
   0xd   :  { %672 = vmatpush3.bf16.msra.mxu1 %v724_v11  ;;  %627 = vmatprep.subr.bf16.mxu0 %v725_v12  ;;  %v745_v32 = vld [vmem:[%s997_s0] ss:$16 sps:$4 sm:$0xff]   ;;  %v747_v33 = vld [vmem:[%s997_s0 + $0x4] ss:$16 sps:$4 sm:$0xff]   ;;  %v748_v34 = vld [vmem:[%s997_s0 + $0x8] ss:$16 sps:$4 sm:$0xff]  }
   0xe   :  { %673 = vmatprep.subr.bf16.mxu1 %v726_v13  ;;  %v750_v35 = vld [vmem:[%s997_s0 + $0xc] ss:$16 sps:$4 sm:$0xff]   ;;  %430 = vmatprep.mubr.bf16.mxu0 %v747_v33  ;;  %v751_v36 = vld [vmem:[%s997_s0 + $0x24] ss:$16 sps:$4 sm:$0xff]   ;;  %v755_v38 = vld [vmem:[%s997_s0 + $0x20] ss:$16 sps:$4 sm:$0xff]  }
   0xf   :  { %503 = vmatprep.mubr.bf16.mxu1 %v750_v35  ;;  %v753_v37 = vld [vmem:[%s997_s0 + $0x2c] ss:$16 sps:$4 sm:$0xff]   ;;  %v756_v39 = vld [vmem:[%s997_s0 + $0x28] ss:$16 sps:$4 sm:$0xff]   ;;  %v757_v40 = vld [vmem:[%s997_s0 + $0x44] ss:$16 sps:$4 sm:$0xff]  }
  0x10   :  { %628 = vmatpush3.bf16.msra.mxu0 %v727_v14  ;;  %v759_v41 = vld [vmem:[%s997_s0 + $0x4c] ss:$16 sps:$4 sm:$0xff]   ;;  %v761_v42 = vld [vmem:[%s997_s0 + $0x40] ss:$16 sps:$4 sm:$0xff]   ;;  %v762_v43 = vld [vmem:[%s997_s0 + $0x48] ss:$16 sps:$4 sm:$0xff]  }
  0x11   :  { %674 = vmatpush3.bf16.msra.mxu1 %v728_v15  ;;  %629 = vmatprep.subr.bf16.mxu0 %v729_v16  ;;  %v763_v44 = vld [vmem:[%s997_s0 + $0x64] ss:$16 sps:$4 sm:$0xff]   ;;  %v765_v45 = vld [vmem:[%s997_s0 + $0x6c] ss:$16 sps:$4 sm:$0xff]   ;;  %v767_v46 = vld [vmem:[%s997_s0 + $0x60] ss:$16 sps:$4 sm:$0xff]  }
  0x12   :  { %675 = vmatprep.subr.bf16.mxu1 %v730_v17  ;;  %v768_v47 = vld [vmem:[%s997_s0 + $0x68] ss:$16 sps:$4 sm:$0xff]   ;;  %v769_v48 = vld [vmem:[%s997_s0 + $0x84] ss:$16 sps:$4 sm:$0xff]   ;;  %v771_v49 = vld [vmem:[%s997_s0 + $0x8c] ss:$16 sps:$4 sm:$0xff]  }
  0x13   :  { %v773_v50 = vld [vmem:[%s997_s0 + $0x80] ss:$16 sps:$4 sm:$0xff]   ;;  %v774_v51 = vld [vmem:[%s997_s0 + $0x88] ss:$16 sps:$4 sm:$0xff]  }
  0x14   :  { %630 = vmatpush3.bf16.msra.mxu0 %v731_v18  ;;  %v954_v54 = vld [vmem:[%s998_s2] ss:$0 sm:$0xff] }
  0x15   :  { %676 = vmatpush3.bf16.msra.mxu1 %v732_v19  ;;  %631 = vmatprep.subr.bf16.mxu0 %v733_v20 }
  0x16   :  { %677 = vmatprep.subr.bf16.mxu1 %v734_v21 }
  0x18   :  { %632 = vmatpush3.bf16.msra.mxu0 %v735_v22 }
  0x19   :  { %678 = vmatpush3.bf16.msra.mxu1 %v736_v23  ;;  %633 = vmatprep.subr.bf16.mxu0 %v737_v24 }
  0x1a   :  { %679 = vmatprep.subr.bf16.mxu1 %v738_v25 }
  0x1c   :  { %634 = vmatpush3.bf16.msra.mxu0 %v739_v26 }
  0x1d   :  { %680 = vmatpush3.bf16.msra.mxu1 %v740_v27  ;;  %635 = vmatprep.subr.bf16.mxu0 %v741_v28 }
  0x1e   :  { %681 = vmatprep.subr.bf16.mxu1 %v742_v29 }
  0x20   :  { %636 = vmatpush3.bf16.msra.mxu0 %v743_v30 }
  0x21   :  { %682 = vmatpush3.bf16.msra.mxu1 %v744_v31 }
  0x23   :  { %431 = vmatmul.mubr.bf16.vlgmr.msra.gmra.mxu0 %v745_v32 }
  0x24   :  { %504 = vmatmul.mubr.bf16.vlgmr.msra.gmra.mxu1 %v748_v34  ;;  %438 = vmatprep.mubr.bf16.mxu0 %v751_v36 }
  0x25   :  { %511 = vmatprep.mubr.bf16.mxu1 %v753_v37 }
  0x2b   :  { %439 = vmatmul.mubr.bf16.gmra.mxu0 %v755_v38 }
  0x2c   :  { %512 = vmatmul.mubr.bf16.gmra.mxu1 %v756_v39  ;;  %446 = vmatprep.mubr.bf16.mxu0 %v757_v40 }
  0x2d   :  { %519 = vmatprep.mubr.bf16.mxu1 %v759_v41 }
  0x33   :  { %447 = vmatmul.mubr.bf16.gmra.mxu0 %v761_v42 }
  0x34   :  { %520 = vmatmul.mubr.bf16.gmra.mxu1 %v762_v43  ;;  %454 = vmatprep.mubr.bf16.mxu0 %v763_v44 }
  0x35   :  { %527 = vmatprep.mubr.bf16.mxu1 %v765_v45 }
  0x3b   :  { %455 = vmatmul.mubr.bf16.gmra.mxu0 %v767_v46 }
  0x3c   :  { %528 = vmatmul.mubr.bf16.gmra.mxu1 %v768_v47  ;;  %462 = vmatprep.mubr.bf16.mxu0 %v769_v48 }
  0x3d   :  { %535 = vmatprep.mubr.bf16.mxu1 %v771_v49 }
  0x43   :  { %463 = vmatmul.mubr.bf16.gmra.mxu0 %v773_v50 }
  0x44   :  { %536 = vmatmul.mubr.bf16.gmra.mxu1 %v774_v51 }
  0xe3   :  { %v637_v52 = vpop.f32.mrf.mxu0 }
  0xe4   :  { %v683_v53 = vpop.f32.mrf.mxu1 }
  0xe5   :  { %v638_v55 = vpop.f32.mrf.mxu0 }
  0xe6   :  { %v639_v56 = vadd.f32 %v638_v55, %v637_v52  ;;  %v684_v57 = vpop.f32.mrf.mxu1 }
  0xe7   :  { %v640_v58 = vpop.f32.mrf.mxu0  ;;  %v685_v60 = vadd.f32 %v684_v57, %v683_v53 }
  0xe8   :  { %v433_v59 = vadd.f32 %v639_v56, %v954_v54  ;;  %v686_v61 = vpop.f32.mrf.mxu1 }
  0xe9   :  { %v641_v62 = vpop.f32.mrf.mxu0 }
  0xea   :  { %v506_v63 = vadd.f32 %v685_v60, %v433_v59  ;;  %v642_v0 = vadd.f32 %v641_v62, %v640_v58  ;;  %v687_v1 = vpop.f32.mrf.mxu1 }
  0xeb   :  { %v643_v2 = vpop.f32.mrf.mxu0  ;;  %v688_v5 = vadd.f32 %v687_v1, %v686_v61 }
  0xec   :  { %v544_v3 = vmax.f32 %v506_v63, 0.0  ;;  %v436_v4 = vadd.f32 %v642_v0, %v954_v54  ;;  %v689_v6 = vpop.f32.mrf.mxu1 }
  0xed   :  { %v644_v7 = vpop.f32.mrf.mxu0 }
  0xee   :  { %554 = vst [vmem:[%s999_s3] sm:$0xff] %v544_v3  ;;  %v509_v8 = vadd.f32 %v688_v5, %v436_v4  ;;  %v645_v9 = vadd.f32 %v644_v7, %v643_v2  ;;  %v690_v10 = vpop.f32.mrf.mxu1 }
  0xef   :  { %v646_v11 = vpop.f32.mrf.mxu0  ;;  %v691_v14 = vadd.f32 %v690_v10, %v689_v6 }
  0xf0   :  { %v545_v12 = vmax.f32 %v509_v8, 0.0  ;;  %v441_v13 = vadd.f32 %v645_v9, %v954_v54  ;;  %v692_v15 = vpop.f32.mrf.mxu1 }
  0xf1   :  { %v647_v16 = vpop.f32.mrf.mxu0 }
  0xf2   :  { %555 = vst [vmem:[%s999_s3 + $0x8] sm:$0xff] %v545_v12  ;;  %v514_v17 = vadd.f32 %v691_v14, %v441_v13  ;;  %v648_v18 = vadd.f32 %v647_v16, %v646_v11  ;;  %v693_v19 = vpop.f32.mrf.mxu1 }
  0xf3   :  { %v649_v20 = vpop.f32.mrf.mxu0  ;;  %v694_v23 = vadd.f32 %v693_v19, %v692_v15 }
  0xf4   :  { %v546_v21 = vmax.f32 %v514_v17, 0.0  ;;  %v444_v22 = vadd.f32 %v648_v18, %v954_v54  ;;  %v695_v24 = vpop.f32.mrf.mxu1 }
  0xf5   :  { %v650_v25 = vpop.f32.mrf.mxu0 }
  0xf6   :  { %556 = vst [vmem:[%s999_s3 + $0x10] sm:$0xff] %v546_v21  ;;  %v517_v26 = vadd.f32 %v694_v23, %v444_v22  ;;  %v651_v27 = vadd.f32 %v650_v25, %v649_v20  ;;  %v696_v28 = vpop.f32.mrf.mxu1 }
  0xf7   :  { %v652_v29 = vpop.f32.mrf.mxu0  ;;  %v697_v32 = vadd.f32 %v696_v28, %v695_v24 }
  0xf8   :  { %v547_v30 = vmax.f32 %v517_v26, 0.0  ;;  %v449_v31 = vadd.f32 %v651_v27, %v954_v54  ;;  %v698_v33 = vpop.f32.mrf.mxu1 }
  0xf9   :  { %v653_v34 = vpop.f32.mrf.mxu0 }
  0xfa   :  { %557 = vst [vmem:[%s999_s3 + $0x18] sm:$0xff] %v547_v30  ;;  %v522_v35 = vadd.f32 %v697_v32, %v449_v31  ;;  %v654_v36 = vadd.f32 %v653_v34, %v652_v29  ;;  %v699_v37 = vpop.f32.mrf.mxu1 }
  0xfb   :  { %v655_v38 = vpop.f32.mrf.mxu0  ;;  %v700_v41 = vadd.f32 %v699_v37, %v698_v33 }
  0xfc   :  { %v548_v39 = vmax.f32 %v522_v35, 0.0  ;;  %v452_v40 = vadd.f32 %v654_v36, %v954_v54  ;;  %v701_v42 = vpop.f32.mrf.mxu1 }
  0xfd   :  { %v656_v43 = vpop.f32.mrf.mxu0 }
  0xfe   :  { %558 = vst [vmem:[%s999_s3 + $0x20] sm:$0xff] %v548_v39  ;;  %v525_v44 = vadd.f32 %v700_v41, %v452_v40  ;;  %v657_v45 = vadd.f32 %v656_v43, %v655_v38  ;;  %v702_v46 = vpop.f32.mrf.mxu1 }
  0xff   :  { %v658_v47 = vpop.f32.mrf.mxu0  ;;  %v703_v50 = vadd.f32 %v702_v46, %v701_v42 }
 0x100   :  { %v549_v48 = vmax.f32 %v525_v44, 0.0  ;;  %v457_v49 = vadd.f32 %v657_v45, %v954_v54  ;;  %v704_v51 = vpop.f32.mrf.mxu1 }
 0x101   :  { %v659_v52 = vpop.f32.mrf.mxu0 }
 0x102   :  { %559 = vst [vmem:[%s999_s3 + $0x28] sm:$0xff] %v549_v48  ;;  %v530_v53 = vadd.f32 %v703_v50, %v457_v49  ;;  %v660_v55 = vadd.f32 %v659_v52, %v658_v47  ;;  %v705_v56 = vpop.f32.mrf.mxu1 }
 0x103   :  { %v661_v57 = vpop.f32.mrf.mxu0  ;;  %v706_v60 = vadd.f32 %v705_v56, %v704_v51 }
 0x104   :  { %v550_v58 = vmax.f32 %v530_v53, 0.0  ;;  %v460_v59 = vadd.f32 %v660_v55, %v954_v54  ;;  %v707_v61 = vpop.f32.mrf.mxu1 }
 0x105   :  { %v662_v62 = vpop.f32.mrf.mxu0 }
 0x106   :  { %560 = vst [vmem:[%s999_s3 + $0x30] sm:$0xff] %v550_v58  ;;  %v533_v63 = vadd.f32 %v706_v60, %v460_v59  ;;  %v663_v0 = vadd.f32 %v662_v62, %v661_v57  ;;  %v708_v1 = vpop.f32.mrf.mxu1 }
 0x107   :  { %v664_v2 = vpop.f32.mrf.mxu0  ;;  %v709_v5 = vadd.f32 %v708_v1, %v707_v61 }
 0x108   :  { %v551_v3 = vmax.f32 %v533_v63, 0.0  ;;  %v465_v4 = vadd.f32 %v663_v0, %v954_v54  ;;  %v710_v6 = vpop.f32.mrf.mxu1 }
 0x109   :  { %v665_v7 = vpop.f32.mrf.mxu0 }
 0x10a   :  { %561 = vst [vmem:[%s999_s3 + $0x38] sm:$0xff] %v551_v3  ;;  %v538_v8 = vadd.f32 %v709_v5, %v465_v4  ;;  %v666_v9 = vadd.f32 %v665_v7, %v664_v2  ;;  %v711_v10 = vpop.f32.mrf.mxu1 }
 0x10b   :  { %v712_v13 = vadd.f32 %v711_v10, %v710_v6 }
 0x10c   :  { %v552_v11 = vmax.f32 %v538_v8, 0.0  ;;  %v468_v12 = vadd.f32 %v666_v9, %v954_v54 }
 0x10e   :  { %562 = vst [vmem:[%s999_s3 + $0x40] sm:$0xff] %v552_v11  ;;  %v541_v14 = vadd.f32 %v712_v13, %v468_v12 }
 0x110   :  { %v553_v15 = vmax.f32 %v541_v14, 0.0 }
 0x112   :  { %563 = vst [vmem:[%s999_s3 + $0x48] sm:$0xff] %v553_v15 }

// kernel: forward.13
= control target key start
LH: loop header
LB: loop body
LE: loop exit
PB: predicated region body
PF: predicated region fallthrough
CT: control target
= control target key end

     0   :  { %v122_v39 = vmov 0   ;;  %s312_s0 = inlined_call_operand.vmem [shape: f32[6,2,3,256], index: 0, kind: input, shape index: {}]   ;;  %s313_s1 = inlined_call_operand.vmem [shape: f32[6,3,128], index: 1, kind: output, shape index: {0}]   ;;  %s314_s2 = inlined_call_operand.vmem [shape: s32[6,3,128], index: 2, kind: output, shape index: {1}]  }
   0x1   :  { %v10_v0 = vld [vmem:[%s312_s0] sm:$0x7]  ;;  %v16_v1 = vld [vmem:[%s312_s0 + $0x4] sm:$0x7]  ;;  %v147_v2 = vld [vmem:[%s312_s0 + $0x8] sm:$0x7] }
   0x2   :  { %vm22_vm0 = vcmp.gt.f32.partialorder %v16_v1, %v10_v0  ;;  %v152_v3 = vld [vmem:[%s312_s0 + $0x10] sm:$0x7]  ;;  %v17_v4 = vld [vmem:[%s312_s0 + $0x14] sm:$0x7]  ;;  %v161_v6 = vld [vmem:[%s312_s0 + $0xc] sm:$0x7] }
   0x3   :  { %v28_v5 = vsel %vm22_vm0, %v16_v1, %v10_v0  ;;  %vm23_vm1 = vcmp.gt.f32.partialorder %v17_v4, %v152_v3  ;;  %v110_v7 = vld [vmem:[%s312_s0 + $0x18] sm:$0x7]  ;;  %v170_v8 = vld [vmem:[%s312_s0 + $0x20] sm:$0x7]  ;;  %v116_v10 = vld [vmem:[%s312_s0 + $0x1c] sm:$0x7] }
   0x4   :  { %vm47_vm2 = vcmp.gt.f32.partialorder %v147_v2, %v28_v5  ;;  %v29_v9 = vsel %vm23_vm1, %v17_v4, %v152_v3  ;;  %v18_v11 = vld [vmem:[%s312_s0 + $0x24] sm:$0x7]  ;;  %v185_v12 = vld [vmem:[%s312_s0 + $0x28] sm:$0x7]  ;;  %v13_v14 = vld [vmem:[%s312_s0 + $0x30] sm:$0x7] }
   0x5   :  { %v53_v13 = vsel %vm47_vm2, %v147_v2, %v28_v5  ;;  %vm48_vm3 = vcmp.gt.f32.partialorder %v110_v7, %v29_v9  ;;  %vm24_vm4 = vcmp.gt.f32.partialorder %v18_v11, %v170_v8  ;;  %v19_v15 = vld [vmem:[%s312_s0 + $0x34] sm:$0x7]  ;;  %v112_v16 = vld [vmem:[%s312_s0 + $0x38] sm:$0x7]  ;;  %v117_v19 = vld [vmem:[%s312_s0 + $0x2c] sm:$0x7] }
   0x6   :  { %vm71_vm5 = vcmp.gt.f32.partialorder %v161_v6, %v53_v13  ;;  %v54_v17 = vsel %vm48_vm3, %v110_v7, %v29_v9  ;;  %v30_v18 = vsel %vm24_vm4, %v18_v11, %v170_v8  ;;  %vm25_vm6 = vcmp.gt.f32.partialorder %v19_v15, %v13_v14  ;;  %v14_v20 = vld [vmem:[%s312_s0 + $0x40] sm:$0x7]  ;;  %v20_v21 = vld [vmem:[%s312_s0 + $0x44] sm:$0x7]  ;;  %v118_v24 = vld [vmem:[%s312_s0 + $0x3c] sm:$0x7] }
   0x7   :  { %v77_v22 = vsel %vm71_vm5, %v161_v6, %v53_v13  ;;  %vm72_vm7 = vcmp.gt.f32.partialorder %v116_v10, %v54_v17  ;;  %vm49_vm8 = vcmp.gt.f32.partialorder %v185_v12, %v30_v18  ;;  %v31_v23 = vsel %vm25_vm6, %v19_v15, %v13_v14  ;;  %v113_v25 = vld [vmem:[%s312_s0 + $0x48] sm:$0x7]  ;;  %v15_v26 = vld [vmem:[%s312_s0 + $0x50] sm:$0x7]  ;;  %v21_v29 = vld [vmem:[%s312_s0 + $0x54] sm:$0x7] }
   0x8   :  { %89 = vst [vmem:[%s313_s1] sm:$0x7] %v77_v22  ;;  %v78_v27 = vsel %vm72_vm7, %v116_v10, %v54_v17  ;;  %v55_v28 = vsel %vm49_vm8, %v185_v12, %v30_v18  ;;  %vm50_vm9 = vcmp.gt.f32.partialorder %v112_v16, %v31_v23  ;;  %vm26_vm10 = vcmp.gt.f32.partialorder %v20_v21, %v14_v20  ;;  %v114_v30 = vld [vmem:[%s312_s0 + $0x58] sm:$0x7]  ;;  %v119_v33 = vld [vmem:[%s312_s0 + $0x4c] sm:$0x7] }
   0x9   :  { %90 = vst [vmem:[%s313_s1 + $0x4] sm:$0x7] %v78_v27  ;;  %vm315_vm11 = vcmp.gt.f32.partialorder %v117_v19, %v55_v28  ;;  %v56_v31 = vsel %vm50_vm9, %v112_v16, %v31_v23  ;;  %v32_v32 = vsel %vm26_vm10, %v20_v21, %v14_v20  ;;  %vm27_vm12 = vcmp.gt.f32.partialorder %v21_v29, %v15_v26  ;;  %v120_v36 = vld [vmem:[%s312_s0 + $0x5c] sm:$0x7] }
   0xa   :  { %v79_v34 = vsel %vm315_vm11, %v117_v19, %v55_v28  ;;  %vm74_vm13 = vcmp.gt.f32.partialorder %v118_v24, %v56_v31  ;;  %vm316_vm14 = vcmp.gt.f32.partialorder %v113_v25, %v32_v32  ;;  %v33_v35 = vsel %vm27_vm12, %v21_v29, %v15_v26 }
   0xb   :  { %91 = vst [vmem:[%s313_s1 + $0x8] sm:$0x7] %v79_v34  ;;  %v80_v37 = vsel %vm74_vm13, %v118_v24, %v56_v31  ;;  %v57_v38 = vsel %vm316_vm14, %v113_v25, %v32_v32  ;;  %vm52_vm15 = vcmp.gt.f32.partialorder %v114_v30, %v33_v35  ;;  %v34_v40 = vsel %vm22_vm0, 1, %v122_v39 }
   0xc   :  { %92 = vst [vmem:[%s313_s1 + $0xc] sm:$0x7] %v80_v37  ;;  %vm75_vm11 = vcmp.gt.f32.partialorder %v119_v33, %v57_v38  ;;  %v58_v41 = vsel %vm52_vm15, %v114_v30, %v33_v35  ;;  %v59_v42 = vsel %vm47_vm2, 2, %v34_v40  ;;  %v35_v43 = vsel %vm23_vm1, 1, %v122_v39 }
   0xd   :  { %v81_v44 = vsel %vm75_vm11, %v119_v33, %v57_v38  ;;  %vm76_vm14 = vcmp.gt.f32.partialorder %v120_v36, %v58_v41  ;;  %v83_v45 = vsel %vm71_vm5, 3, %v59_v42  ;;  %v60_v46 = vsel %vm48_vm3, 2, %v35_v43 }
   0xe   :  { %93 = vst [vmem:[%s313_s1 + $0x10] sm:$0x7] %v81_v44  ;;  %v82_v47 = vsel %vm76_vm14, %v120_v36, %v58_v41  ;;  %95 = vst [vmem:[%s314_s2] sm:$0x7] %v83_v45  ;;  %v84_v48 = vsel %vm72_vm7, 3, %v60_v46  ;;  %v36_v49 = vsel %vm24_vm4, 1, %v122_v39  ;;  %v37_v50 = vsel %vm25_vm6, 1, %v122_v39 }
   0xf   :  { %94 = vst [vmem:[%s313_s1 + $0x14] sm:$0x7] %v82_v47  ;;  %96 = vst [vmem:[%s314_s2 + $0x4] sm:$0x7] %v84_v48  ;;  %v61_v51 = vsel %vm49_vm8, 2, %v36_v49  ;;  %v62_v52 = vsel %vm50_vm9, 2, %v37_v50  ;;  %vm317_vm0 = vcmp.gt.f32.partialorder %v117_v19, %v55_v28  ;;  %vm318_vm1 = vcmp.gt.f32.partialorder %v113_v25, %v32_v32 }
  0x10   :  { %v38_v53 = vsel %vm26_vm10, 1, %v122_v39  ;;  %v39_v54 = vsel %vm27_vm12, 1, %v122_v39  ;;  %v85_v55 = vsel %vm317_vm0, 3, %v61_v51  ;;  %v86_v56 = vsel %vm74_vm13, 3, %v62_v52 }
  0x11   :  { %v63_v57 = vsel %vm318_vm1, 2, %v38_v53  ;;  %v64_v58 = vsel %vm52_vm15, 2, %v39_v54  ;;  %97 = vst [vmem:[%s314_s2 + $0x8] sm:$0x7] %v85_v55  ;;  %98 = vst [vmem:[%s314_s2 + $0xc] sm:$0x7] %v86_v56 }
  0x12   :  { %v87_v59 = vsel %vm75_vm11, 3, %v63_v57  ;;  %v88_v60 = vsel %vm76_vm14, 3, %v64_v58 }
  0x13   :  { %99 = vst [vmem:[%s314_s2 + $0x10] sm:$0x7] %v87_v59  ;;  %100 = vst [vmem:[%s314_s2 + $0x14] sm:$0x7] %v88_v60 }

// kernel: forward.16
= control target key start
LH: loop header
LB: loop body
LE: loop exit
PB: predicated region body
PF: predicated region fallthrough
CT: control target
= control target key end

     0   :  { %s291_s0 = inlined_call_operand.vmem [shape: f32[6,3,128], index: 0, kind: input, shape index: {}]   ;;  %s292_s1 = inlined_call_operand.vmem [shape: s32[6,3,128], index: 1, kind: input, shape index: {}]   ;;  %s293_s2 = inlined_call_operand.vmem [shape: f32[6,2,3,256], index: 2, kind: output, shape index: {}]  }
   0x1   :  { %v130_v0 = vld [vmem:[%s291_s0] sm:$0x7]  ;;  %v140_v2 = vld [vmem:[%s291_s0 + $0x4] sm:$0x7]  ;;  %v151_v4 = vld [vmem:[%s291_s0 + $0x8] sm:$0x7] }
   0x2   :  { %v135_v1 = vld [vmem:[%s292_s1] sm:$0x7]  ;;  %v146_v3 = vld [vmem:[%s292_s1 + $0x4] sm:$0x7]  ;;  %v159_v6 = vld [vmem:[%s292_s1 + $0x8] sm:$0x7] }
   0x3   :  { %vm23_vm0 = vcmp.eq.s32.totalorder %v135_v1, 0  ;;  %vm41_vm1 = vcmp.eq.s32.totalorder %v135_v1, 1  ;;  %vm24_vm2 = vcmp.eq.s32.totalorder %v146_v3, 0  ;;  %v164_v7 = vld [vmem:[%s291_s0 + $0xc] sm:$0x7]  ;;  %vm25_vm3 = vcmp.eq.s32.totalorder %v159_v6, 0 }
   0x4   :  { %v29_v5 = vsel %vm23_vm0, %v130_v0, 0.0  ;;  %v30_v8 = vsel %vm24_vm2, %v140_v2, 0.0  ;;  %v174_v9 = vld [vmem:[%s292_s1 + $0xc] sm:$0x7]  ;;  %v179_v10 = vld [vmem:[%s291_s0 + $0x10] sm:$0x7] }
   0x5   :  { %35 = vst [vmem:[%s293_s2] sm:$0x7] %v29_v5  ;;  %36 = vst [vmem:[%s293_s2 + $0x10] sm:$0x7] %v30_v8  ;;  %v31_v11 = vsel %vm25_vm3, %v151_v4, 0.0  ;;  %vm26_vm4 = vcmp.eq.s32.totalorder %v174_v9, 0  ;;  %v47_v16 = vsel %vm41_vm1, %v130_v0, 0.0 }
   0x6   :  { %v21_v12 = vld [vmem:[%s292_s1 + $0x10] sm:$0x7]  ;;  %v16_v13 = vld [vmem:[%s291_s0 + $0x14] sm:$0x7]  ;;  %37 = vst [vmem:[%s293_s2 + $0x20] sm:$0x7] %v31_v11 }
   0x7   :  { %v32_v14 = vsel %vm26_vm4, %v164_v7, 0.0  ;;  %vm27_vm5 = vcmp.eq.s32.totalorder %v21_v12, 0  ;;  %v22_v15 = vld [vmem:[%s292_s1 + $0x14] sm:$0x7]  ;;  %vm42_vm6 = vcmp.eq.s32.totalorder %v146_v3, 1  ;;  %vm43_vm8 = vcmp.eq.s32.totalorder %v159_v6, 1 }
   0x8   :  { %38 = vst [vmem:[%s293_s2 + $0x30] sm:$0x7] %v32_v14  ;;  %v33_v17 = vsel %vm27_vm5, %v179_v10, 0.0  ;;  %vm28_vm7 = vcmp.eq.s32.totalorder %v22_v15, 0  ;;  %53 = vst [vmem:[%s293_s2 + $0x4] sm:$0x7] %v47_v16 }
   0x9   :  { %v48_v18 = vsel %vm42_vm6, %v140_v2, 0.0  ;;  %39 = vst [vmem:[%s293_s2 + $0x40] sm:$0x7] %v33_v17  ;;  %v34_v19 = vsel %vm28_vm7, %v16_v13, 0.0  ;;  %v49_v20 = vsel %vm43_vm8, %v151_v4, 0.0  ;;  %vm44_vm9 = vcmp.eq.s32.totalorder %v174_v9, 1 }
   0xa   :  { %54 = vst [vmem:[%s293_s2 + $0x14] sm:$0x7] %v48_v18  ;;  %vm45_vm10 = vcmp.eq.s32.totalorder %v21_v12, 1  ;;  %40 = vst [vmem:[%s293_s2 + $0x50] sm:$0x7] %v34_v19  ;;  %v50_v21 = vsel %vm44_vm9, %v164_v7, 0.0 }
   0xb   :  { %55 = vst [vmem:[%s293_s2 + $0x24] sm:$0x7] %v49_v20  ;;  %v51_v22 = vsel %vm45_vm10, %v179_v10, 0.0  ;;  %vm46_vm11 = vcmp.eq.s32.totalorder %v22_v15, 1  ;;  %vm59_vm12 = vcmp.eq.s32.totalorder %v135_v1, 2  ;;  %vm60_vm13 = vcmp.eq.s32.totalorder %v146_v3, 2 }
   0xc   :  { %56 = vst [vmem:[%s293_s2 + $0x34] sm:$0x7] %v50_v21  ;;  %57 = vst [vmem:[%s293_s2 + $0x44] sm:$0x7] %v51_v22  ;;  %v52_v23 = vsel %vm46_vm11, %v16_v13, 0.0  ;;  %v65_v24 = vsel %vm59_vm12, %v130_v0, 0.0 }
   0xd   :  { %vm61_vm14 = vcmp.eq.s32.totalorder %v159_v6, 2  ;;  %58 = vst [vmem:[%s293_s2 + $0x54] sm:$0x7] %v52_v23  ;;  %100 = vst [vmem:[%s293_s2 + $0x8] sm:$0x7] %v65_v24  ;;  %v66_v25 = vsel %vm60_vm13, %v140_v2, 0.0 }
   0xe   :  { %v67_v26 = vsel %vm61_vm14, %v151_v4, 0.0  ;;  %vm62_vm15 = vcmp.eq.s32.totalorder %v174_v9, 2  ;;  %vm63_vm0 = vcmp.eq.s32.totalorder %v21_v12, 2  ;;  %101 = vst [vmem:[%s293_s2 + $0x18] sm:$0x7] %v66_v25  ;;  %vm64_vm1 = vcmp.eq.s32.totalorder %v22_v15, 2 }
   0xf   :  { %102 = vst [vmem:[%s293_s2 + $0x28] sm:$0x7] %v67_v26  ;;  %v68_v27 = vsel %vm62_vm15, %v164_v7, 0.0  ;;  %v69_v28 = vsel %vm63_vm0, %v179_v10, 0.0  ;;  %vm78_vm2 = vcmp.eq.s32.totalorder %v135_v1, 3  ;;  %v70_v29 = vsel %vm64_vm1, %v16_v13, 0.0 }
  0x10   :  { %103 = vst [vmem:[%s293_s2 + $0x38] sm:$0x7] %v68_v27  ;;  %104 = vst [vmem:[%s293_s2 + $0x48] sm:$0x7] %v69_v28  ;;  %v84_v30 = vsel %vm78_vm2, %v130_v0, 0.0  ;;  %vm79_vm3 = vcmp.eq.s32.totalorder %v146_v3, 3 }
  0x11   :  { %vm80_vm4 = vcmp.eq.s32.totalorder %v159_v6, 3  ;;  %105 = vst [vmem:[%s293_s2 + $0x58] sm:$0x7] %v70_v29  ;;  %106 = vst [vmem:[%s293_s2 + $0xc] sm:$0x7] %v84_v30  ;;  %v85_v31 = vsel %vm79_vm3, %v140_v2, 0.0 }
  0x12   :  { %v86_v32 = vsel %vm80_vm4, %v151_v4, 0.0  ;;  %vm81_vm5 = vcmp.eq.s32.totalorder %v174_v9, 3  ;;  %vm82_vm6 = vcmp.eq.s32.totalorder %v21_v12, 3  ;;  %107 = vst [vmem:[%s293_s2 + $0x1c] sm:$0x7] %v85_v31  ;;  %vm83_vm7 = vcmp.eq.s32.totalorder %v22_v15, 3 }
  0x13   :  { %108 = vst [vmem:[%s293_s2 + $0x2c] sm:$0x7] %v86_v32  ;;  %v87_v33 = vsel %vm81_vm5, %v164_v7, 0.0  ;;  %v88_v34 = vsel %vm82_vm6, %v179_v10, 0.0  ;;  %v89_v35 = vsel %vm83_vm7, %v16_v13, 0.0 }
  0x14   :  { %109 = vst [vmem:[%s293_s2 + $0x3c] sm:$0x7] %v87_v33  ;;  %110 = vst [vmem:[%s293_s2 + $0x4c] sm:$0x7] %v88_v34 }
  0x15   :  { %111 = vst [vmem:[%s293_s2 + $0x5c] sm:$0x7] %v89_v35 }

// kernel: forward.14
= control target key start
LH: loop header
LB: loop body
LE: loop exit
PB: predicated region body
PF: predicated region fallthrough
CT: control target
= control target key end

     0   :  { %v433_v1 = vmov 0.0   ;;  %vm434_vm0 = vmmov 0   ;;  %s545_s1 = inlined_call_operand.vmem [shape: bf16[384,128], index: 1, kind: input, shape index: {}]   ;;  %s546_s0 = inlined_call_operand.vmem [shape: bf16[16,384], index: 0, kind: input, shape index: {}]   ;;  %s547_s2 = inlined_call_operand.vmem [shape: f32[1,128], index: 2, kind: input, shape index: {}]   ;;  %s548_s3 = inlined_call_operand.vmem [shape: f32[16,128], index: 3, kind: output, shape index: {}]  }
   0x1   :  { %v405_v0 = vld [vmem:[%s545_s1 + $0x78] sm:$0xff]   ;;  %383 = vmatprep.subr.bf16.mxu1 %v433_v1  ;;  %399 = vmatprep.mubr.msk.bf16.mxu1 %vm434_vm0, %v433_v1  ;;  %v408_v4 = vld [vmem:[%s545_s1 + $0x70] sm:$0xff]   ;;  %v411_v7 = vld [vmem:[%s545_s1 + $0x68] sm:$0xff]  }
   0x2   :  { %v406_v2 = vld [vmem:[%s545_s1 + $0x38] sm:$0xff]   ;;  %352 = vmatprep.subr.bf16.mxu0 %v405_v0  ;;  %v409_v5 = vld [vmem:[%s545_s1 + $0x30] sm:$0xff]   ;;  %v412_v8 = vld [vmem:[%s545_s1 + $0x28] sm:$0xff]  }
   0x3   :  { %v407_v3 = vld [vmem:[%s545_s1 + $0xb8] sm:$0xff]   ;;  %353 = vmatpush3.bf16.msra.mxu0 %v406_v2  ;;  %v410_v6 = vld [vmem:[%s545_s1 + $0xb0] sm:$0xff]   ;;  %v413_v9 = vld [vmem:[%s545_s1 + $0xa8] sm:$0xff]  }
   0x4   :  { %384 = vmatpush3.bf16.msra.mxu1 %v407_v3  ;;  %354 = vmatprep.subr.bf16.mxu0 %v408_v4  ;;  %v414_v10 = vld [vmem:[%s545_s1 + $0x60] sm:$0xff]   ;;  %v417_v13 = vld [vmem:[%s545_s1 + $0x58] sm:$0xff]   ;;  %v420_v16 = vld [vmem:[%s545_s1 + $0x50] sm:$0xff]  }
   0x5   :  { %385 = vmatprep.subr.bf16.mxu1 %v433_v1  ;;  %v415_v11 = vld [vmem:[%s545_s1 + $0x20] sm:$0xff]   ;;  %v418_v14 = vld [vmem:[%s545_s1 + $0x18] sm:$0xff]   ;;  %v421_v17 = vld [vmem:[%s545_s1 + $0x10] sm:$0xff]  }
   0x6   :  { %v416_v12 = vld [vmem:[%s545_s1 + $0xa0] sm:$0xff]   ;;  %v419_v15 = vld [vmem:[%s545_s1 + $0x98] sm:$0xff]   ;;  %v422_v18 = vld [vmem:[%s545_s1 + $0x90] sm:$0xff]  }
   0x7   :  { %355 = vmatpush3.bf16.msra.mxu0 %v409_v5  ;;  %v423_v19 = vld [vmem:[%s545_s1 + $0x48] sm:$0xff]   ;;  %v426_v22 = vld [vmem:[%s545_s1 + $0x40] sm:$0xff]  }
   0x8   :  { %386 = vmatpush3.bf16.msra.mxu1 %v410_v6  ;;  %356 = vmatprep.subr.bf16.mxu0 %v411_v7  ;;  %v424_v20 = vld [vmem:[%s545_s1 + $0x8] sm:$0xff]   ;;  %v431_v23 = vld [vmem:[%s546_s0 + $0x4] ss:$12 sps:$4 sm:$0xff]   ;;  %v324_v30 = vld [vmem:[%s547_s2] ss:$0 sm:$0xff] }
   0x9   :  { %387 = vmatprep.subr.bf16.mxu1 %v433_v1  ;;  %v425_v21 = vld [vmem:[%s545_s1 + $0x88] sm:$0xff]   ;;  %v427_v24 = vld [vmem:[%s545_s1] sm:$0xff]   ;;  %266 = vmatprep.mubr.bf16.mxu0 %v431_v23 }
   0xa   :  { %v428_v25 = vld [vmem:[%s545_s1 + $0x80] sm:$0xff]   ;;  %v432_v27 = vld [vmem:[%s546_s0 + $0x8] ss:$12 sps:$4 sm:$0xff]  }
   0xb   :  { %357 = vmatpush3.bf16.msra.mxu0 %v412_v8  ;;  %v429_v26 = vld [vmem:[%s546_s0] ss:$12 sps:$4 sm:$0xff]  }
   0xc   :  { %388 = vmatpush3.bf16.msra.mxu1 %v413_v9  ;;  %358 = vmatprep.subr.bf16.mxu0 %v414_v10 }
   0xd   :  { %389 = vmatprep.subr.bf16.mxu1 %v433_v1 }
   0xf   :  { %359 = vmatpush3.bf16.msra.mxu0 %v415_v11 }
  0x10   :  { %390 = vmatpush3.bf16.msra.mxu1 %v416_v12  ;;  %360 = vmatprep.subr.bf16.mxu0 %v417_v13 }
  0x11   :  { %391 = vmatprep.subr.bf16.mxu1 %v433_v1 }
  0x13   :  { %361 = vmatpush3.bf16.msra.mxu0 %v418_v14 }
  0x14   :  { %392 = vmatpush3.bf16.msra.mxu1 %v419_v15  ;;  %362 = vmatprep.subr.bf16.mxu0 %v420_v16 }
  0x15   :  { %393 = vmatprep.subr.bf16.mxu1 %v433_v1 }
  0x17   :  { %363 = vmatpush3.bf16.msra.mxu0 %v421_v17 }
  0x18   :  { %394 = vmatpush3.bf16.msra.mxu1 %v422_v18  ;;  %364 = vmatprep.subr.bf16.mxu0 %v423_v19 }
  0x19   :  { %395 = vmatprep.subr.bf16.mxu1 %v433_v1 }
  0x1b   :  { %365 = vmatpush3.bf16.msra.mxu0 %v424_v20 }
  0x1c   :  { %396 = vmatpush3.bf16.msra.mxu1 %v425_v21  ;;  %366 = vmatprep.subr.bf16.mxu0 %v426_v22 }
  0x1d   :  { %397 = vmatprep.subr.bf16.mxu1 %v433_v1 }
  0x1f   :  { %367 = vmatpush3.bf16.msra.mxu0 %v427_v24 }
  0x20   :  { %398 = vmatpush3.bf16.msra.mxu1 %v428_v25 }
  0x22   :  { %267 = vmatmul.mubr.bf16.vlgmr.msra.gmra.mxu0 %v429_v26 }
  0x23   :  { %400 = vmatmul.mubr.bf16.vlgmr.msra.gmra.mxu1 %v432_v27 }
  0xe2   :  { %v368_v28 = vpop.f32.mrf.mxu0 }
  0xe3   :  { %v309_v29 = vpop.f32.mrf.mxu1 }
  0xe4   :  { %v369_v31 = vpop.f32.mrf.mxu0 }
  0xe5   :  { %v370_v32 = vadd.f32 %v369_v31, %v368_v28  ;;  %v401_v33 = vpop.f32.mrf.mxu1 }
  0xe6   :  { %v371_v34 = vpop.f32.mrf.mxu0 }
  0xe7   :  { %v269_v35 = vadd.f32 %v370_v32, %v324_v30  ;;  %v312_v36 = vpop.f32.mrf.mxu1 }
  0xe8   :  { %v372_v37 = vpop.f32.mrf.mxu0 }
  0xe9   :  { %v310_v38 = vadd.f32 %v309_v29, %v269_v35  ;;  %v373_v39 = vadd.f32 %v372_v37, %v371_v34  ;;  %v402_v40 = vpop.f32.mrf.mxu1 }
  0xeb   :  { %v316_v41 = vmax.f32 %v310_v38, 0.0  ;;  %v272_v42 = vadd.f32 %v373_v39, %v324_v30 }
  0xed   :  { %318 = vst [vmem:[%s548_s3] sm:$0xff] %v316_v41  ;;  %v313_v43 = vadd.f32 %v312_v36, %v272_v42 }
  0xef   :  { %v317_v44 = vmax.f32 %v313_v43, 0.0 }
  0xf1   :  { %319 = vst [vmem:[%s548_s3 + $0x8] sm:$0xff] %v317_v44 }

// kernel: forward.15
= control target key start
LH: loop header
LB: loop body
LE: loop exit
PB: predicated region body
PF: predicated region fallthrough
CT: control target
= control target key end

     0   :  { %v984_v1 = vmov 0   ;;  %vm986_vm0 = vmmov 0   ;;  %s1307_s1 = inlined_call_operand.vmem [shape: bf16[128,1152], index: 1, kind: input, shape index: {}]   ;;  %s1308_s0 = inlined_call_operand.vmem [shape: bf16[16,128], index: 0, kind: input, shape index: {}]   ;;  %s1309_s2 = inlined_call_operand.vmem [shape: f32[1,1152], index: 2, kind: input, shape index: {}]   ;;  %s1310_s3 = inlined_call_operand.vmem [shape: f32[16,1152], index: 3, kind: output, shape index: {}]  }
   0x1   :  { %v879_v0 = vld [vmem:[%s1307_s1 + $0x1fc] ss:$36 sps:$4 sm:$0xff]   ;;  %552 = vmatprep.mubr.bf16.mxu0 %v984_v1  ;;  %595 = vmatprep.mubr.bf16.mxu1 %v984_v1  ;;  %v882_v3 = vld [vmem:[%s1307_s1 + $0x1b4] ss:$36 sps:$4 sm:$0xff]   ;;  %v885_v5 = vld [vmem:[%s1307_s1 + $0x16c] ss:$36 sps:$4 sm:$0xff]  }
   0x2   :  { %v881_v2 = vld [vmem:[%s1307_s1 + $0x1f8] ss:$36 sps:$4 sm:$0xff]   ;;  %520 = vmatprep.subr.bf16.mxu0 %v879_v0  ;;  %v884_v4 = vld [vmem:[%s1307_s1 + $0x1b0] ss:$36 sps:$4 sm:$0xff]   ;;  %v887_v6 = vld [vmem:[%s1307_s1 + $0x168] ss:$36 sps:$4 sm:$0xff]  }
   0x3   :  { %521 = vmatpush1.bf16.msra.mxu0 %v881_v2  ;;  %v888_v7 = vld [vmem:[%s1307_s1 + $0x124] ss:$36 sps:$4 sm:$0xff]   ;;  %v891_v11 = vld [vmem:[%s1307_s1 + $0xdc] ss:$36 sps:$4 sm:$0xff]   ;;  %v910_v15 = vld [vmem:[%s1307_s1 + $0x174] ss:$36 sps:$4 sm:$0xff]  }
   0x4   :  { %522 = vmatprep.subr.bf16.mxu0 %v882_v3  ;;  %v899_v8 = vld [vmem:[%s1307_s1 + $0x204] ss:$36 sps:$4 sm:$0xff]   ;;  %v905_v12 = vld [vmem:[%s1307_s1 + $0x1bc] ss:$36 sps:$4 sm:$0xff]   ;;  %v894_v16 = vld [vmem:[%s1307_s1 + $0x94] ss:$36 sps:$4 sm:$0xff]  }
   0x5   :  { %v902_v9 = vld [vmem:[%s1307_s1 + $0x200] ss:$36 sps:$4 sm:$0xff]   ;;  %563 = vmatprep.subr.bf16.mxu1 %v899_v8  ;;  %v908_v13 = vld [vmem:[%s1307_s1 + $0x1b8] ss:$36 sps:$4 sm:$0xff]   ;;  %v915_v17 = vld [vmem:[%s1307_s1 + $0x170] ss:$36 sps:$4 sm:$0xff]  }
   0x6   :  { %v890_v10 = vld [vmem:[%s1307_s1 + $0x120] ss:$36 sps:$4 sm:$0xff]   ;;  %564 = vmatpush1.bf16.msra.mxu1 %v902_v9  ;;  %v893_v14 = vld [vmem:[%s1307_s1 + $0xd8] ss:$36 sps:$4 sm:$0xff]   ;;  %v916_v18 = vld [vmem:[%s1307_s1 + $0x12c] ss:$36 sps:$4 sm:$0xff]  }
   0x7   :  { %523 = vmatpush1.bf16.msra.mxu0 %v884_v4  ;;  %565 = vmatprep.subr.bf16.mxu1 %v905_v12  ;;  %v896_v19 = vld [vmem:[%s1307_s1 + $0x90] ss:$36 sps:$4 sm:$0xff]   ;;  %v921_v21 = vld [vmem:[%s1307_s1 + $0x128] ss:$36 sps:$4 sm:$0xff]   ;;  %v927_v25 = vld [vmem:[%s1307_s1 + $0xe0] ss:$36 sps:$4 sm:$0xff]  }
   0x8   :  { %524 = vmatprep.subr.bf16.mxu0 %v885_v5  ;;  %v897_v20 = vld [vmem:[%s1307_s1 + $0x4c] ss:$36 sps:$4 sm:$0xff]   ;;  %v922_v22 = vld [vmem:[%s1307_s1 + $0xe4] ss:$36 sps:$4 sm:$0xff]   ;;  %v928_v26 = vld [vmem:[%s1307_s1 + $0x9c] ss:$36 sps:$4 sm:$0xff]  }
   0x9   :  { %v901_v23 = vld [vmem:[%s1307_s1 + $0x48] ss:$36 sps:$4 sm:$0xff]   ;;  %v907_v27 = vld [vmem:[%s1307_s1] ss:$36 sps:$4 sm:$0xff]   ;;  %v933_v29 = vld [vmem:[%s1307_s1 + $0x98] ss:$36 sps:$4 sm:$0xff]  }
   0xa   :  { %566 = vmatpush1.bf16.msra.mxu1 %v908_v13  ;;  %v903_v24 = vld [vmem:[%s1307_s1 + $0x4] ss:$36 sps:$4 sm:$0xff]   ;;  %v914_v28 = vld [vmem:[%s1307_s1 + $0x20c] ss:$36 sps:$4 sm:$0xff]   ;;  %v934_v30 = vld [vmem:[%s1307_s1 + $0x54] ss:$36 sps:$4 sm:$0xff]  }
   0xb   :  { %525 = vmatpush1.bf16.msra.mxu0 %v887_v6  ;;  %567 = vmatprep.subr.bf16.mxu1 %v910_v15  ;;  %v1102_v31 = vld [vmem:[%s1308_s0] sm:$0xff]   ;;  %v912_v32 = vld [vmem:[%s1307_s1 + $0x208] ss:$36 sps:$4 sm:$0xff]   ;;  %v939_v34 = vld [vmem:[%s1307_s1 + $0x50] ss:$36 sps:$4 sm:$0xff]   ;;  %v985_v0 = vmov 0.0  }
   0xc   :  { %526 = vmatprep.subr.bf16.mxu0 %v888_v7  ;;  %v920_v33 = vld [vmem:[%s1307_s1 + $0x1c4] ss:$36 sps:$4 sm:$0xff]   ;;  %v940_v35 = vld [vmem:[%s1307_s1 + $0xc] ss:$36 sps:$4 sm:$0xff]   ;;  %v926_v37 = vld [vmem:[%s1307_s1 + $0x17c] ss:$36 sps:$4 sm:$0xff]  }
   0xd   :  { %v918_v36 = vld [vmem:[%s1307_s1 + $0x1c0] ss:$36 sps:$4 sm:$0xff]   ;;  %v945_v38 = vld [vmem:[%s1307_s1 + $0x8] ss:$36 sps:$4 sm:$0xff]   ;;  %v951_v39 = vld [vmem:[%s1307_s1 + $0x214] ss:$36 sps:$4 sm:$0xff]  }
   0xe   :  { %568 = vmatpush1.bf16.msra.mxu1 %v915_v17  ;;  %v924_v40 = vld [vmem:[%s1307_s1 + $0x178] ss:$36 sps:$4 sm:$0xff]   ;;  %v949_v42 = vld [vmem:[%s1307_s1 + $0x210] ss:$36 sps:$4 sm:$0xff]   ;;  %v955_v46 = vld [vmem:[%s1307_s1 + $0x1c8] ss:$36 sps:$4 sm:$0xff]  }
   0xf   :  { %527 = vmatpush1.bf16.msra.mxu0 %v890_v10  ;;  %569 = vmatprep.subr.bf16.mxu1 %v916_v18  ;;  %v932_v41 = vld [vmem:[%s1307_s1 + $0x134] ss:$36 sps:$4 sm:$0xff]   ;;  %v957_v43 = vld [vmem:[%s1307_s1 + $0x1cc] ss:$36 sps:$4 sm:$0xff]   ;;  %v960_v47 = vld [vmem:[%s1307_s1 + $0x184] ss:$36 sps:$4 sm:$0xff]  }
  0x10   :  { %528 = vmatprep.subr.bf16.mxu0 %v891_v11  ;;  %v930_v44 = vld [vmem:[%s1307_s1 + $0x130] ss:$36 sps:$4 sm:$0xff]   ;;  %v936_v48 = vld [vmem:[%s1307_s1 + $0xe8] ss:$36 sps:$4 sm:$0xff]   ;;  %v958_v50 = vld [vmem:[%s1307_s1 + $0x180] ss:$36 sps:$4 sm:$0xff]   ;;  %v101_v11 = vlaneseq }
  0x11   :  { %v938_v45 = vld [vmem:[%s1307_s1 + $0xec] ss:$36 sps:$4 sm:$0xff]   ;;  %v944_v49 = vld [vmem:[%s1307_s1 + $0xa4] ss:$36 sps:$4 sm:$0xff]   ;;  %v964_v51 = vld [vmem:[%s1307_s1 + $0x13c] ss:$36 sps:$4 sm:$0xff]  }
  0x12   :  { %570 = vmatpush1.bf16.msra.mxu1 %v921_v21  ;;  %v942_v52 = vld [vmem:[%s1307_s1 + $0xa0] ss:$36 sps:$4 sm:$0xff]   ;;  %v962_v54 = vld [vmem:[%s1307_s1 + $0x138] ss:$36 sps:$4 sm:$0xff]   ;;  %v966_v58 = vld [vmem:[%s1307_s1 + $0xf0] ss:$36 sps:$4 sm:$0xff]  }
  0x13   :  { %529 = vmatpush1.bf16.msra.mxu0 %v893_v14  ;;  %571 = vmatprep.subr.bf16.mxu1 %v922_v22  ;;  %v948_v53 = vld [vmem:[%s1307_s1 + $0x5c] ss:$36 sps:$4 sm:$0xff]   ;;  %v968_v55 = vld [vmem:[%s1307_s1 + $0xf4] ss:$36 sps:$4 sm:$0xff]   ;;  %v972_v59 = vld [vmem:[%s1307_s1 + $0xac] ss:$36 sps:$4 sm:$0xff]  }
  0x14   :  { %530 = vmatprep.subr.bf16.mxu0 %v894_v16  ;;  %v946_v56 = vld [vmem:[%s1307_s1 + $0x58] ss:$36 sps:$4 sm:$0xff]   ;;  %v952_v60 = vld [vmem:[%s1307_s1 + $0x10] ss:$36 sps:$4 sm:$0xff]   ;;  %v970_v61 = vld [vmem:[%s1307_s1 + $0xa8] ss:$36 sps:$4 sm:$0xff]  }
  0x15   :  { %v954_v57 = vld [vmem:[%s1307_s1 + $0x14] ss:$36 sps:$4 sm:$0xff]   ;;  %v976_v62 = vld [vmem:[%s1307_s1 + $0x64] ss:$36 sps:$4 sm:$0xff]   ;;  %v980_v2 = vld [vmem:[%s1307_s1 + $0x1c] ss:$36 sps:$4 sm:$0xff]  }
  0x16   :  { %572 = vmatpush1.bf16.msra.mxu1 %v927_v25  ;;  %v961_v63 = vld [vmem:[%s1307_s1 + $0x218] ss:$36 sps:$4 sm:$0xff]   ;;  %v965_v3 = vld [vmem:[%s1307_s1 + $0x1d0] ss:$36 sps:$4 sm:$0xff]   ;;  %v969_v5 = vld [vmem:[%s1307_s1 + $0x188] ss:$36 sps:$4 sm:$0xff]  }
  0x17   :  { %531 = vmatpush1.bf16.msra.mxu0 %v896_v19  ;;  %573 = vmatprep.subr.bf16.mxu1 %v928_v26  ;;  %v978_v4 = vld [vmem:[%s1307_s1 + $0x18] ss:$36 sps:$4 sm:$0xff]   ;;  %v973_v6 = vld [vmem:[%s1307_s1 + $0x140] ss:$36 sps:$4 sm:$0xff]   ;;  %v981_v8 = vld [vmem:[%s1307_s1 + $0xb0] ss:$36 sps:$4 sm:$0xff]  }
  0x18   :  { %532 = vmatprep.subr.bf16.mxu0 %v897_v20  ;;  %v977_v7 = vld [vmem:[%s1307_s1 + $0xf8] ss:$36 sps:$4 sm:$0xff]   ;;  %v982_v9 = vld [vmem:[%s1307_s1 + $0x68] ss:$36 sps:$4 sm:$0xff]   ;;  %v983_v10 = vld [vmem:[%s1307_s1 + $0x20] ss:$36 sps:$4 sm:$0xff]  }
  0x19   :  { %v1237_v12 = vshrl.u32 %v101_v11, 7  ;;  %v97_v14 = vld [vmem:[%s1309_s2] sm:$0xff] }
  0x1a   :  { %574 = vmatpush1.bf16.msra.mxu1 %v933_v29 }
  0x1b   :  { %533 = vmatpush1.bf16.msra.mxu0 %v901_v23  ;;  %575 = vmatprep.subr.bf16.mxu1 %v934_v30  ;;  %v103_v13 = vsub.s32 0, %v1237_v12  ;;  %v107_v15 = vsub.s32 1, %v1237_v12  ;;  %v111_v21 = vsub.s32 2, %v1237_v12  ;;  %v115_v25 = vsub.s32 3, %v1237_v12 }
  0x1c   :  { %534 = vmatprep.subr.bf16.mxu0 %v903_v24 }
  0x1d   :  { %v104_v16 = vrot.slane %v97_v14, %v103_v13  ;;  %v108_v17 = vrot.slane %v97_v14, %v107_v15  ;;  %v112_v29 = vrot.slane %v97_v14, %v111_v21 }
  0x1e   :  { %576 = vmatpush1.bf16.msra.mxu1 %v939_v34 }
  0x1f   :  { %535 = vmatpush1.bf16.msra.mxu0 %v907_v27  ;;  %577 = vmatprep.subr.bf16.mxu1 %v940_v35 }
  0x20   :  { %606 = vmatprep.subr.bf16.mxu0 %v914_v28 }
  0x22   :  { %553 = vmatmul.mubr.bf16.vlgmr.msra.gmra.mxu0 %v1102_v31  ;;  %578 = vmatpush1.bf16.msra.mxu1 %v945_v38 }
  0x23   :  { %607 = vmatpush1.bf16.msra.mxu0 %v912_v32  ;;  %638 = vmatprep.mubr.bf16.mxu0 %v984_v1  ;;  %v116_v32 = vrot.slane %v97_v14, %v115_v25 }
  0x24   :  { %608 = vmatprep.subr.bf16.mxu0 %v920_v33  ;;  %649 = vmatprep.subr.bf16.mxu1 %v951_v39 }
  0x25   :  { %596 = vmatmul.mubr.bf16.vlgmr.msra.gmra.mxu1 %v1102_v31 }
  0x26   :  { %650 = vmatpush1.bf16.msra.mxu1 %v949_v42  ;;  %681 = vmatprep.mubr.bf16.mxu1 %v984_v1  ;;  %v974_v1 = vld [vmem:[%s1307_s1 + $0x60] ss:$36 sps:$4 sm:$0xff]  }
  0x27   :  { %609 = vmatpush1.bf16.msra.mxu0 %v918_v36  ;;  %651 = vmatprep.subr.bf16.mxu1 %v957_v43 }
  0x28   :  { %610 = vmatprep.subr.bf16.mxu0 %v926_v37 }
  0x2a   :  { %652 = vmatpush1.bf16.msra.mxu1 %v955_v46  ;;  %v119_v46 = vsub.s32 4, %v1237_v12 }
  0x2b   :  { %611 = vmatpush1.bf16.msra.mxu0 %v924_v40  ;;  %653 = vmatprep.subr.bf16.mxu1 %v960_v47  ;;  %v123_v47 = vsub.s32 5, %v1237_v12 }
  0x2c   :  { %612 = vmatprep.subr.bf16.mxu0 %v932_v41 }
  0x2e   :  { %654 = vmatpush1.bf16.msra.mxu1 %v958_v50 }
  0x2f   :  { %613 = vmatpush1.bf16.msra.mxu0 %v930_v44  ;;  %655 = vmatprep.subr.bf16.mxu1 %v964_v51 }
  0x30   :  { %614 = vmatprep.subr.bf16.mxu0 %v938_v45 }
  0x32   :  { %656 = vmatpush1.bf16.msra.mxu1 %v962_v54 }
  0x33   :  { %615 = vmatpush1.bf16.msra.mxu0 %v936_v48  ;;  %657 = vmatprep.subr.bf16.mxu1 %v968_v55  ;;  %v120_v48 = vrot.slane %v97_v14, %v119_v46 }
  0x34   :  { %616 = vmatprep.subr.bf16.mxu0 %v944_v49  ;;  %v124_v49 = vrot.slane %v97_v14, %v123_v47 }
  0x36   :  { %658 = vmatpush1.bf16.msra.mxu1 %v966_v58 }
  0x37   :  { %617 = vmatpush1.bf16.msra.mxu0 %v942_v52  ;;  %659 = vmatprep.subr.bf16.mxu1 %v972_v59 }
  0x38   :  { %618 = vmatprep.subr.bf16.mxu0 %v948_v53  ;;  %v127_v53 = vsub.s32 6, %v1237_v12 }
  0x3a   :  { %660 = vmatpush1.bf16.msra.mxu1 %v970_v61  ;;  %v128_v61 = vrot.slane %v97_v14, %v127_v53 }
  0x3b   :  { %619 = vmatpush1.bf16.msra.mxu0 %v946_v56  ;;  %661 = vmatprep.subr.bf16.mxu1 %v976_v62 }
  0x3c   :  { %620 = vmatprep.subr.bf16.mxu0 %v954_v57  ;;  %v131_v57 = vsub.s32 7, %v1237_v12 }
  0x3e   :  { %662 = vmatpush1.bf16.msra.mxu1 %v974_v1 }
  0x3f   :  { %621 = vmatpush1.bf16.msra.mxu0 %v952_v60  ;;  %663 = vmatprep.subr.bf16.mxu1 %v980_v2 }
  0x40   :  { %856 = vmatprep.subr.bf16.mxu0 %v985_v0 }
  0x42   :  { %639 = vmatmul.mubr.bf16.vlgmr.msra.gmra.mxu0 %v1102_v31  ;;  %664 = vmatpush1.bf16.msra.mxu1 %v978_v4 }
  0x43   :  { %857 = vmatpush3.bf16.msra.mxu0 %v961_v63  ;;  %872 = vmatprep.mubr.msk.bf16.mxu0 %vm986_vm0, %v985_v0 }
  0x44   :  { %858 = vmatprep.subr.bf16.mxu0 %v985_v0 }
  0x45   :  { %682 = vmatmul.mubr.bf16.vlgmr.msra.gmra.mxu1 %v1102_v31 }
  0x47   :  { %859 = vmatpush3.bf16.msra.mxu0 %v965_v3 }
  0x48   :  { %860 = vmatprep.subr.bf16.mxu0 %v985_v0 }
  0x4b   :  { %861 = vmatpush3.bf16.msra.mxu0 %v969_v5 }
  0x4c   :  { %862 = vmatprep.subr.bf16.mxu0 %v985_v0 }
  0x4f   :  { %863 = vmatpush3.bf16.msra.mxu0 %v973_v6 }
  0x50   :  { %864 = vmatprep.subr.bf16.mxu0 %v985_v0 }
  0x53   :  { %865 = vmatpush3.bf16.msra.mxu0 %v977_v7 }
  0x54   :  { %866 = vmatprep.subr.bf16.mxu0 %v985_v0 }
  0x57   :  { %867 = vmatpush3.bf16.msra.mxu0 %v981_v8 }
  0x58   :  { %868 = vmatprep.subr.bf16.mxu0 %v985_v0 }
  0x5b   :  { %869 = vmatpush3.bf16.msra.mxu0 %v982_v9 }
  0x5c   :  { %870 = vmatprep.subr.bf16.mxu0 %v985_v0  ;;  %v132_v0 = vrot.slane %v97_v14, %v131_v57  ;;  %v773_v14 = vld [vmem:[%s1309_s2 + $0x8] ss:$0 sm:$0xff] }
  0x5f   :  { %871 = vmatpush3.bf16.msra.mxu0 %v983_v10 }
  0x62   :  { %873 = vmatmul.mubr.bf16.vlgmr.msra.gmra.mxu0 %v1102_v31 }
  0xe2   :  { %v554_v18 = vpop.f32.mrf.mxu0 }
  0xe3   :  { %v555_v19 = vadd.f32 %v554_v18, %v104_v16 }
  0xe4   :  { %v556_v20 = vpop.f32.mrf.mxu0 }
  0xe5   :  { %v733_v22 = vmax.f32 %v555_v19, 0.0  ;;  %v557_v23 = vadd.f32 %v556_v20, %v108_v17  ;;  %v597_v34 = vpop.f32.mrf.mxu1 }
  0xe6   :  { %v558_v24 = vpop.f32.mrf.mxu0  ;;  %v598_v35 = vadd.f32 %v597_v34, %v112_v29 }
  0xe7   :  { %751 = vst [vmem:[%s1310_s3] sm:$0xff] %v733_v22  ;;  %v734_v26 = vmax.f32 %v557_v23, 0.0  ;;  %v559_v27 = vadd.f32 %v558_v24, %v104_v16  ;;  %v599_v36 = vpop.f32.mrf.mxu1 }
  0xe8   :  { %v560_v28 = vpop.f32.mrf.mxu0  ;;  %v735_v37 = vmax.f32 %v598_v35, 0.0  ;;  %v600_v38 = vadd.f32 %v599_v36, %v116_v32 }
  0xe9   :  { %752 = vst [vmem:[%s1310_s3 + $0x8] sm:$0xff] %v734_v26  ;;  %v742_v30 = vmax.f32 %v559_v27, 0.0  ;;  %v561_v31 = vadd.f32 %v560_v28, %v108_v17  ;;  %v601_v39 = vpop.f32.mrf.mxu1 }
  0xea   :  { %753 = vst [vmem:[%s1310_s3 + $0x10] sm:$0xff] %v735_v37  ;;  %v736_v40 = vmax.f32 %v600_v38, 0.0  ;;  %v602_v41 = vadd.f32 %v601_v39, %v112_v29 }
  0xeb   :  { %760 = vst [vmem:[%s1310_s3 + $0x48] sm:$0xff] %v742_v30  ;;  %v743_v33 = vmax.f32 %v561_v31, 0.0  ;;  %v603_v42 = vpop.f32.mrf.mxu1 }
  0xec   :  { %754 = vst [vmem:[%s1310_s3 + $0x18] sm:$0xff] %v736_v40  ;;  %v744_v43 = vmax.f32 %v602_v41, 0.0  ;;  %v604_v44 = vadd.f32 %v603_v42, %v116_v32 }
  0xed   :  { %761 = vst [vmem:[%s1310_s3 + $0x50] sm:$0xff] %v743_v33 }
  0xee   :  { %762 = vst [vmem:[%s1310_s3 + $0x58] sm:$0xff] %v744_v43  ;;  %v745_v45 = vmax.f32 %v604_v44, 0.0 }
  0xf0   :  { %763 = vst [vmem:[%s1310_s3 + $0x60] sm:$0xff] %v745_v45 }
 0x102   :  { %v640_v50 = vpop.f32.mrf.mxu0 }
 0x103   :  { %v641_v51 = vadd.f32 %v640_v50, %v120_v48 }
 0x104   :  { %v642_v52 = vpop.f32.mrf.mxu0 }
 0x105   :  { %v737_v54 = vmax.f32 %v641_v51, 0.0  ;;  %v643_v55 = vadd.f32 %v642_v52, %v124_v49  ;;  %v683_v2 = vpop.f32.mrf.mxu1 }
 0x106   :  { %v644_v56 = vpop.f32.mrf.mxu0  ;;  %v684_v3 = vadd.f32 %v683_v2, %v128_v61 }
 0x107   :  { %755 = vst [vmem:[%s1310_s3 + $0x20] sm:$0xff] %v737_v54  ;;  %v738_v58 = vmax.f32 %v643_v55, 0.0  ;;  %v645_v59 = vadd.f32 %v644_v56, %v120_v48  ;;  %v685_v4 = vpop.f32.mrf.mxu1 }
 0x108   :  { %v646_v60 = vpop.f32.mrf.mxu0  ;;  %v739_v5 = vmax.f32 %v684_v3, 0.0  ;;  %v686_v6 = vadd.f32 %v685_v4, %v132_v0 }
 0x109   :  { %756 = vst [vmem:[%s1310_s3 + $0x28] sm:$0xff] %v738_v58  ;;  %v746_v62 = vmax.f32 %v645_v59, 0.0  ;;  %v647_v63 = vadd.f32 %v646_v60, %v124_v49  ;;  %v687_v7 = vpop.f32.mrf.mxu1 }
 0x10a   :  { %757 = vst [vmem:[%s1310_s3 + $0x30] sm:$0xff] %v739_v5  ;;  %v740_v8 = vmax.f32 %v686_v6, 0.0  ;;  %v688_v9 = vadd.f32 %v687_v7, %v128_v61 }
 0x10b   :  { %764 = vst [vmem:[%s1310_s3 + $0x68] sm:$0xff] %v746_v62  ;;  %v747_v1 = vmax.f32 %v647_v63, 0.0  ;;  %v689_v10 = vpop.f32.mrf.mxu1 }
 0x10c   :  { %758 = vst [vmem:[%s1310_s3 + $0x38] sm:$0xff] %v740_v8  ;;  %v748_v11 = vmax.f32 %v688_v9, 0.0  ;;  %v690_v12 = vadd.f32 %v689_v10, %v132_v0 }
 0x10d   :  { %765 = vst [vmem:[%s1310_s3 + $0x70] sm:$0xff] %v747_v1 }
 0x10e   :  { %766 = vst [vmem:[%s1310_s3 + $0x78] sm:$0xff] %v748_v11  ;;  %v749_v13 = vmax.f32 %v690_v12, 0.0 }
 0x110   :  { %767 = vst [vmem:[%s1310_s3 + $0x80] sm:$0xff] %v749_v13 }
 0x122   :  { %v726_v15 = vpop.f32.mrf.mxu0 }
 0x123   :  { %v727_v16 = vadd.f32 %v773_v14, %v726_v15 }
 0x124   :  { %v874_v17 = vpop.f32.mrf.mxu0 }
 0x125   :  { %v741_v18 = vmax.f32 %v727_v16, 0.0 }
 0x126   :  { %v729_v19 = vpop.f32.mrf.mxu0 }
 0x127   :  { %759 = vst [vmem:[%s1310_s3 + $0x40] sm:$0xff] %v741_v18  ;;  %v730_v20 = vadd.f32 %v773_v14, %v729_v19 }
 0x128   :  { %v875_v21 = vpop.f32.mrf.mxu0 }
 0x129   :  { %v750_v22 = vmax.f32 %v730_v20, 0.0 }
 0x12b   :  { %768 = vst [vmem:[%s1310_s3 + $0x88] sm:$0xff] %v750_v22 }

// kernel: forward.17
= control target key start
LH: loop header
LB: loop body
LE: loop exit
PB: predicated region body
PF: predicated region fallthrough
CT: control target
= control target key end

     0   :  { %v2353_v36 = vmov 0.0   ;;  %vm2354_vm0 = vmmov 0   ;;  %s3037_s1 = inlined_call_operand.vmem [shape: bf16[896,128], index: 1, kind: input, shape index: {}]   ;;  %s3038_s0 = inlined_call_operand.vmem [shape: bf16[208,896], index: 0, kind: input, shape index: {}]   ;;  %s3039_s2 = inlined_call_operand.vmem [shape: f32[1,128], index: 2, kind: input, shape index: {}]   ;;  %s3040_s3 = inlined_call_operand.vmem [shape: f32[208,128], index: 3, kind: output, shape index: {}]  }
   0x1   :  { %v2167_v0 = vld [vmem:[%s3037_s1 + $0x78] sm:$0xff]   ;;  %v2171_v4 = vld [vmem:[%s3037_s1 + $0x70] sm:$0xff]   ;;  %v2175_v8 = vld [vmem:[%s3037_s1 + $0x68] sm:$0xff]  }
   0x2   :  { %v2168_v1 = vld [vmem:[%s3037_s1 + $0x38] sm:$0xff]   ;;  %1794 = vmatprep.subr.bf16.mxu0 %v2167_v0  ;;  %v2172_v5 = vld [vmem:[%s3037_s1 + $0x30] sm:$0xff]   ;;  %v2176_v9 = vld [vmem:[%s3037_s1 + $0x28] sm:$0xff]  }
   0x3   :  { %v2169_v2 = vld [vmem:[%s3037_s1 + $0xf8] sm:$0xff]   ;;  %1795 = vmatpush3.bf16.msra.mxu0 %v2168_v1  ;;  %v2173_v6 = vld [vmem:[%s3037_s1 + $0xf0] sm:$0xff]   ;;  %v2177_v10 = vld [vmem:[%s3037_s1 + $0xe8] sm:$0xff]  }
   0x4   :  { %v2170_v3 = vld [vmem:[%s3037_s1 + $0xb8] sm:$0xff]   ;;  %1888 = vmatprep.subr.bf16.mxu1 %v2169_v2  ;;  %1796 = vmatprep.subr.bf16.mxu0 %v2171_v4  ;;  %v2174_v7 = vld [vmem:[%s3037_s1 + $0xb0] sm:$0xff]   ;;  %v2178_v11 = vld [vmem:[%s3037_s1 + $0xa8] sm:$0xff]  }
   0x5   :  { %1889 = vmatpush3.bf16.msra.mxu1 %v2170_v3  ;;  %v2179_v12 = vld [vmem:[%s3037_s1 + $0x60] sm:$0xff]   ;;  %v2183_v16 = vld [vmem:[%s3037_s1 + $0x58] sm:$0xff]   ;;  %v2187_v20 = vld [vmem:[%s3037_s1 + $0x50] sm:$0xff]  }
   0x6   :  { %1890 = vmatprep.subr.bf16.mxu1 %v2173_v6  ;;  %v2180_v13 = vld [vmem:[%s3037_s1 + $0x20] sm:$0xff]   ;;  %v2184_v17 = vld [vmem:[%s3037_s1 + $0x18] sm:$0xff]   ;;  %v2188_v21 = vld [vmem:[%s3037_s1 + $0x10] sm:$0xff]  }
   0x7   :  { %1797 = vmatpush3.bf16.msra.mxu0 %v2172_v5  ;;  %v2181_v14 = vld [vmem:[%s3037_s1 + $0xe0] sm:$0xff]   ;;  %v2185_v18 = vld [vmem:[%s3037_s1 + $0xd8] sm:$0xff]   ;;  %v2189_v22 = vld [vmem:[%s3037_s1 + $0xd0] sm:$0xff]  }
   0x8   :  { %1798 = vmatprep.subr.bf16.mxu0 %v2175_v8  ;;  %v2182_v15 = vld [vmem:[%s3037_s1 + $0xa0] sm:$0xff]   ;;  %v2186_v19 = vld [vmem:[%s3037_s1 + $0x98] sm:$0xff]   ;;  %v2190_v23 = vld [vmem:[%s3037_s1 + $0x90] sm:$0xff]  }
   0x9   :  { %1891 = vmatpush3.bf16.msra.mxu1 %v2174_v7  ;;  %v2191_v24 = vld [vmem:[%s3037_s1 + $0x48] sm:$0xff]   ;;  %v2195_v28 = vld [vmem:[%s3037_s1 + $0x40] sm:$0xff]   ;;  %v2205_v37 = vld [vmem:[%s3037_s1 + $0x178] sm:$0xff]  }
   0xa   :  { %1892 = vmatprep.subr.bf16.mxu1 %v2177_v10  ;;  %v2192_v25 = vld [vmem:[%s3037_s1 + $0x8] sm:$0xff]   ;;  %v2196_v29 = vld [vmem:[%s3037_s1] sm:$0xff]   ;;  %v2206_v38 = vld [vmem:[%s3037_s1 + $0x138] sm:$0xff]  }
   0xb   :  { %1799 = vmatpush3.bf16.msra.mxu0 %v2176_v9  ;;  %v2193_v26 = vld [vmem:[%s3037_s1 + $0xc8] sm:$0xff]   ;;  %v2197_v30 = vld [vmem:[%s3037_s1 + $0xc0] sm:$0xff]   ;;  %v2207_v39 = vld [vmem:[%s3038_s0 + $0x3c] ss:$28 sps:$4 sm:$0xff]  }
   0xc   :  { %1800 = vmatprep.subr.bf16.mxu0 %v2179_v12  ;;  %v2194_v27 = vld [vmem:[%s3037_s1 + $0x88] sm:$0xff]   ;;  %v2198_v31 = vld [vmem:[%s3037_s1 + $0x80] sm:$0xff]   ;;  %v2209_v40 = vld [vmem:[%s3037_s1 + $0x1b8] sm:$0xff]  }
   0xd   :  { %1893 = vmatpush3.bf16.msra.mxu1 %v2178_v11  ;;  %v2199_v32 = vld [vmem:[%s3038_s0] ss:$28 sps:$4 sm:$0xff]   ;;  %v2202_v34 = vld [vmem:[%s3038_s0 + $0x8] ss:$28 sps:$4 sm:$0xff]   ;;  %v2210_v41 = vld [vmem:[%s3038_s0 + $0x38] ss:$28 sps:$4 sm:$0xff]  }
   0xe   :  { %1894 = vmatprep.subr.bf16.mxu1 %v2181_v14  ;;  %v2201_v33 = vld [vmem:[%s3038_s0 + $0x4] ss:$28 sps:$4 sm:$0xff]   ;;  %v2204_v35 = vld [vmem:[%s3038_s0 + $0xc] ss:$28 sps:$4 sm:$0xff]   ;;  %v2214_v44 = vld [vmem:[%s3037_s1 + $0x170] sm:$0xff]  }
   0xf   :  { %1801 = vmatpush3.bf16.msra.mxu0 %v2180_v13  ;;  %1074 = vmatprep.mubr.bf16.mxu0 %v2201_v33  ;;  %v2211_v42 = vld [vmem:[%s3038_s0 + $0x44] ss:$28 sps:$4 sm:$0xff]   ;;  %v2215_v45 = vld [vmem:[%s3037_s1 + $0x130] sm:$0xff]   ;;  %v2219_v47 = vld [vmem:[%s3038_s0 + $0x7c] ss:$28 sps:$4 sm:$0xff]  }
  0x10   :  { %1802 = vmatprep.subr.bf16.mxu0 %v2183_v16  ;;  %1211 = vmatprep.mubr.bf16.mxu1 %v2204_v35  ;;  %v2213_v43 = vld [vmem:[%s3038_s0 + $0x40] ss:$28 sps:$4 sm:$0xff]   ;;  %v2216_v46 = vld [vmem:[%s3038_s0 + $0x74] ss:$28 sps:$4 sm:$0xff]   ;;  %v2223_v51 = vld [vmem:[%s3038_s0 + $0xac] ss:$28 sps:$4 sm:$0xff]  }
  0x11   :  { %1895 = vmatpush3.bf16.msra.mxu1 %v2182_v15  ;;  %v2222_v48 = vld [vmem:[%s3037_s1 + $0x1b0] sm:$0xff]   ;;  %v2229_v53 = vld [vmem:[%s3037_s1 + $0x168] sm:$0xff]   ;;  %v2240_v58 = vld [vmem:[%s3037_s1 + $0x160] sm:$0xff]  }
  0x12   :  { %1896 = vmatprep.subr.bf16.mxu1 %v2185_v18  ;;  %v2218_v49 = vld [vmem:[%s3038_s0 + $0x70] ss:$28 sps:$4 sm:$0xff]   ;;  %v2221_v50 = vld [vmem:[%s3038_s0 + $0x78] ss:$28 sps:$4 sm:$0xff]   ;;  %v2225_v56 = vld [vmem:[%s3038_s0 + $0xa8] ss:$28 sps:$4 sm:$0xff]  }
  0x13   :  { %1803 = vmatpush3.bf16.msra.mxu0 %v2184_v17  ;;  %v2226_v52 = vld [vmem:[%s3038_s0 + $0xb4] ss:$28 sps:$4 sm:$0xff]   ;;  %v2230_v54 = vld [vmem:[%s3037_s1 + $0x128] sm:$0xff]   ;;  %v2231_v59 = vld [vmem:[%s3038_s0 + $0xe4] ss:$28 sps:$4 sm:$0xff]  }
  0x14   :  { %1804 = vmatprep.subr.bf16.mxu0 %v2187_v20  ;;  %v2237_v55 = vld [vmem:[%s3037_s1 + $0x1a8] sm:$0xff]   ;;  %v2244_v61 = vld [vmem:[%s3037_s1 + $0x120] sm:$0xff]   ;;  %v2253_v0 = vld [vmem:[%s3037_s1 + $0x158] sm:$0xff]  }
  0x15   :  { %1897 = vmatpush3.bf16.msra.mxu1 %v2186_v19  ;;  %v2228_v57 = vld [vmem:[%s3038_s0 + $0xb0] ss:$28 sps:$4 sm:$0xff]   ;;  %v2246_v62 = vld [vmem:[%s3037_s1 + $0x1a0] sm:$0xff]   ;;  %v2254_v1 = vld [vmem:[%s3037_s1 + $0x118] sm:$0xff]  }
  0x16   :  { %1898 = vmatprep.subr.bf16.mxu1 %v2189_v22  ;;  %v2234_v60 = vld [vmem:[%s3038_s0 + $0xec] ss:$28 sps:$4 sm:$0xff]   ;;  %v2233_v63 = vld [vmem:[%s3038_s0 + $0xe0] ss:$28 sps:$4 sm:$0xff]   ;;  %v2241_v6 = vld [vmem:[%s3038_s0 + $0x118] ss:$28 sps:$4 sm:$0xff]  }
  0x17   :  { %1805 = vmatpush3.bf16.msra.mxu0 %v2188_v21  ;;  %v2236_v2 = vld [vmem:[%s3038_s0 + $0xe8] ss:$28 sps:$4 sm:$0xff]   ;;  %v2238_v3 = vld [vmem:[%s3038_s0 + $0x11c] ss:$28 sps:$4 sm:$0xff]   ;;  %v2268_v8 = vld [vmem:[%s3037_s1 + $0x150] sm:$0xff]  }
  0x18   :  { %1806 = vmatprep.subr.bf16.mxu0 %v2191_v24  ;;  %v2242_v4 = vld [vmem:[%s3038_s0 + $0x124] ss:$28 sps:$4 sm:$0xff]   ;;  %v2261_v5 = vld [vmem:[%s3037_s1 + $0x198] sm:$0xff]   ;;  %v2269_v9 = vld [vmem:[%s3037_s1 + $0x110] sm:$0xff]  }
  0x19   :  { %1899 = vmatpush3.bf16.msra.mxu1 %v2190_v23  ;;  %v2245_v7 = vld [vmem:[%s3038_s0 + $0x120] ss:$28 sps:$4 sm:$0xff]   ;;  %v2247_v10 = vld [vmem:[%s3038_s0 + $0x154] ss:$28 sps:$4 sm:$0xff]   ;;  %v2277_v13 = vld [vmem:[%s3037_s1 + $0x148] sm:$0xff]  }
  0x1a   :  { %1900 = vmatprep.subr.bf16.mxu1 %v2193_v26  ;;  %v2250_v11 = vld [vmem:[%s3038_s0 + $0x15c] ss:$28 sps:$4 sm:$0xff]   ;;  %v2275_v12 = vld [vmem:[%s3037_s1 + $0x190] sm:$0xff]   ;;  %v2280_v16 = vld [vmem:[%s3037_s1 + $0x108] sm:$0xff]  }
  0x1b   :  { %1807 = vmatpush3.bf16.msra.mxu0 %v2192_v25  ;;  %v2249_v14 = vld [vmem:[%s3038_s0 + $0x150] ss:$28 sps:$4 sm:$0xff]   ;;  %v2252_v15 = vld [vmem:[%s3038_s0 + $0x158] ss:$28 sps:$4 sm:$0xff]   ;;  %v2292_v20 = vld [vmem:[%s3037_s1 + $0x140] sm:$0xff]  }
  0x1c   :  { %1808 = vmatprep.subr.bf16.mxu0 %v2195_v28  ;;  %v2255_v17 = vld [vmem:[%s3038_s0 + $0x18c] ss:$28 sps:$4 sm:$0xff]   ;;  %v2258_v18 = vld [vmem:[%s3038_s0 + $0x194] ss:$28 sps:$4 sm:$0xff]   ;;  %v2293_v21 = vld [vmem:[%s3037_s1 + $0x100] sm:$0xff]  }
  0x1d   :  { %1901 = vmatpush3.bf16.msra.mxu1 %v2194_v27  ;;  %v2285_v19 = vld [vmem:[%s3037_s1 + $0x188] sm:$0xff]   ;;  %v2262_v24 = vld [vmem:[%s3038_s0 + $0x1c4] ss:$28 sps:$4 sm:$0xff]   ;;  %v2278_v33 = vld [vmem:[%s3038_s0 + $0x234] ss:$28 sps:$4 sm:$0xff]  }
  0x1e   :  { %1902 = vmatprep.subr.bf16.mxu1 %v2197_v30  ;;  %v2257_v22 = vld [vmem:[%s3038_s0 + $0x188] ss:$28 sps:$4 sm:$0xff]   ;;  %v2260_v23 = vld [vmem:[%s3038_s0 + $0x190] ss:$28 sps:$4 sm:$0xff]   ;;  %v2264_v27 = vld [vmem:[%s3038_s0 + $0x1c0] ss:$28 sps:$4 sm:$0xff]  }
  0x1f   :  { %1809 = vmatpush3.bf16.msra.mxu0 %v2196_v29  ;;  %v2265_v25 = vld [vmem:[%s3038_s0 + $0x1cc] ss:$28 sps:$4 sm:$0xff]   ;;  %v2300_v26 = vld [vmem:[%s3037_s1 + $0x180] sm:$0xff]   ;;  %v2270_v29 = vld [vmem:[%s3038_s0 + $0x1fc] ss:$28 sps:$4 sm:$0xff]  }
  0x20   :  { %1982 = vmatprep.subr.bf16.mxu0 %v2205_v37  ;;  %v2267_v28 = vld [vmem:[%s3038_s0 + $0x1c8] ss:$28 sps:$4 sm:$0xff]   ;;  %v2281_v35 = vld [vmem:[%s3038_s0 + $0x230] ss:$28 sps:$4 sm:$0xff]   ;;  %v2284_v37 = vld [vmem:[%s3038_s0 + $0x238] ss:$28 sps:$4 sm:$0xff]  }
  0x21   :  { %1903 = vmatpush3.bf16.msra.mxu1 %v2198_v31  ;;  %v2273_v30 = vld [vmem:[%s3038_s0 + $0x204] ss:$28 sps:$4 sm:$0xff]   ;;  %v2272_v31 = vld [vmem:[%s3038_s0 + $0x1f8] ss:$28 sps:$4 sm:$0xff]  }
  0x22   :  { %2097 = vmatprep.subr.bf16.mxu1 %v2353_v36  ;;  %1075 = vmatmul.mubr.bf16.vlgmr.msra.gmra.mxu0 %v2199_v32  ;;  %v2276_v32 = vld [vmem:[%s3038_s0 + $0x200] ss:$28 sps:$4 sm:$0xff]  }
  0x23   :  { %1983 = vmatpush3.bf16.msra.mxu0 %v2206_v38  ;;  %1082 = vmatprep.mubr.bf16.mxu0 %v2207_v39  ;;  %v2286_v38 = vld [vmem:[%s3038_s0 + $0x26c] ss:$28 sps:$4 sm:$0xff]   ;;  %v2289_v39 = vld [vmem:[%s3038_s0 + $0x274] ss:$28 sps:$4 sm:$0xff]  }
  0x24   :  { %1212 = vmatmul.mubr.bf16.vlgmr.msra.gmra.mxu1 %v2202_v34  ;;  %1984 = vmatprep.subr.bf16.mxu0 %v2214_v44  ;;  %v2282_v34 = vld [vmem:[%s3038_s0 + $0x23c] ss:$28 sps:$4 sm:$0xff]  }
  0x25   :  { %2098 = vmatpush3.bf16.msra.mxu1 %v2209_v40  ;;  %1219 = vmatprep.mubr.bf16.mxu1 %v2211_v42  ;;  %v2288_v40 = vld [vmem:[%s3038_s0 + $0x268] ss:$28 sps:$4 sm:$0xff]   ;;  %v2296_v44 = vld [vmem:[%s3038_s0 + $0x2a0] ss:$28 sps:$4 sm:$0xff]  }
  0x26   :  { %2099 = vmatprep.subr.bf16.mxu1 %v2353_v36  ;;  %v2294_v42 = vld [vmem:[%s3038_s0 + $0x2a4] ss:$28 sps:$4 sm:$0xff]  }
  0x27   :  { %1985 = vmatpush3.bf16.msra.mxu0 %v2215_v45  ;;  %v2299_v45 = vld [vmem:[%s3038_s0 + $0x2a8] ss:$28 sps:$4 sm:$0xff]  }
  0x28   :  { %1986 = vmatprep.subr.bf16.mxu0 %v2229_v53  ;;  %v2311_v53 = vld [vmem:[%s3038_s0 + $0x80] ss:$28 sps:$4 sm:$0xff]  }
  0x29   :  { %2100 = vmatpush3.bf16.msra.mxu1 %v2222_v48  ;;  %v2304_v48 = vld [vmem:[%s3038_s0 + $0x18] ss:$28 sps:$4 sm:$0xff]  }
  0x2a   :  { %1083 = vmatmul.mubr.bf16.gmra.mxu0 %v2210_v41  ;;  %2101 = vmatprep.subr.bf16.mxu1 %v2353_v36  ;;  %v2291_v41 = vld [vmem:[%s3038_s0 + $0x270] ss:$28 sps:$4 sm:$0xff]  }
  0x2b   :  { %1090 = vmatprep.mubr.bf16.mxu0 %v2216_v46  ;;  %1987 = vmatpush3.bf16.msra.mxu0 %v2230_v54  ;;  %v2303_v46 = vld [vmem:[%s3038_s0 + $0x14] ss:$28 sps:$4 sm:$0xff]   ;;  %v2312_v54 = vld [vmem:[%s3038_s0 + $0x88] ss:$28 sps:$4 sm:$0xff]  }
  0x2c   :  { %1220 = vmatmul.mubr.bf16.gmra.mxu1 %v2213_v43  ;;  %1988 = vmatprep.subr.bf16.mxu0 %v2240_v58  ;;  %v2297_v43 = vld [vmem:[%s3038_s0 + $0x2ac] ss:$28 sps:$4 sm:$0xff]   ;;  %v2317_v58 = vld [vmem:[%s3038_s0 + $0xf4] ss:$28 sps:$4 sm:$0xff]  }
  0x2d   :  { %1227 = vmatprep.mubr.bf16.mxu1 %v2219_v47  ;;  %2102 = vmatpush3.bf16.msra.mxu1 %v2237_v55  ;;  %v2301_v47 = vld [vmem:[%s3038_s0 + $0x10] ss:$28 sps:$4 sm:$0xff]   ;;  %v2313_v55 = vld [vmem:[%s3038_s0 + $0xbc] ss:$28 sps:$4 sm:$0xff]  }
  0x2e   :  { %2103 = vmatprep.subr.bf16.mxu1 %v2353_v36 }
  0x2f   :  { %1989 = vmatpush3.bf16.msra.mxu0 %v2244_v61  ;;  %v2321_v61 = vld [vmem:[%s3038_s0 + $0x12c] ss:$28 sps:$4 sm:$0xff]  }
  0x30   :  { %1990 = vmatprep.subr.bf16.mxu0 %v2253_v0  ;;  %v2325_v0 = vld [vmem:[%s3038_s0 + $0x164] ss:$28 sps:$4 sm:$0xff]  }
  0x31   :  { %2104 = vmatpush3.bf16.msra.mxu1 %v2246_v62  ;;  %v2323_v62 = vld [vmem:[%s3038_s0 + $0x128] ss:$28 sps:$4 sm:$0xff]  }
  0x32   :  { %1091 = vmatmul.mubr.bf16.gmra.mxu0 %v2218_v49  ;;  %2105 = vmatprep.subr.bf16.mxu1 %v2353_v36  ;;  %v2305_v49 = vld [vmem:[%s3038_s0 + $0x4c] ss:$28 sps:$4 sm:$0xff]  }
  0x33   :  { %1098 = vmatprep.mubr.bf16.mxu0 %v2223_v51  ;;  %1991 = vmatpush3.bf16.msra.mxu0 %v2254_v1  ;;  %v2308_v51 = vld [vmem:[%s3038_s0 + $0x50] ss:$28 sps:$4 sm:$0xff]   ;;  %v2327_v1 = vld [vmem:[%s3038_s0 + $0x160] ss:$28 sps:$4 sm:$0xff]  }
  0x34   :  { %1228 = vmatmul.mubr.bf16.gmra.mxu1 %v2221_v50  ;;  %1992 = vmatprep.subr.bf16.mxu0 %v2268_v8  ;;  %v2307_v50 = vld [vmem:[%s3038_s0 + $0x48] ss:$28 sps:$4 sm:$0xff]   ;;  %v2336_v8 = vld [vmem:[%s3038_s0 + $0x1d8] ss:$28 sps:$4 sm:$0xff]  }
  0x35   :  { %1235 = vmatprep.mubr.bf16.mxu1 %v2226_v52  ;;  %2106 = vmatpush3.bf16.msra.mxu1 %v2261_v5  ;;  %v2309_v52 = vld [vmem:[%s3038_s0 + $0x84] ss:$28 sps:$4 sm:$0xff]  }
  0x36   :  { %2107 = vmatprep.subr.bf16.mxu1 %v2353_v36  ;;  %v2332_v5 = vld [vmem:[%s3038_s0 + $0x1a0] ss:$28 sps:$4 sm:$0xff]  }
  0x37   :  { %1993 = vmatpush3.bf16.msra.mxu0 %v2269_v9  ;;  %v2337_v9 = vld [vmem:[%s3038_s0 + $0x20c] ss:$28 sps:$4 sm:$0xff]  }
  0x38   :  { %1994 = vmatprep.subr.bf16.mxu0 %v2277_v13  ;;  %v2343_v13 = vld [vmem:[%s3038_s0 + $0x240] ss:$28 sps:$4 sm:$0xff]  }
  0x39   :  { %2108 = vmatpush3.bf16.msra.mxu1 %v2275_v12  ;;  %v2341_v12 = vld [vmem:[%s3038_s0 + $0x244] ss:$28 sps:$4 sm:$0xff]  }
  0x3a   :  { %1099 = vmatmul.mubr.bf16.gmra.mxu0 %v2225_v56  ;;  %2109 = vmatprep.subr.bf16.mxu1 %v2353_v36  ;;  %v2315_v56 = vld [vmem:[%s3038_s0 + $0xb8] ss:$28 sps:$4 sm:$0xff]  }
  0x3b   :  { %1106 = vmatprep.mubr.bf16.mxu0 %v2231_v59  ;;  %1995 = vmatpush3.bf16.msra.mxu0 %v2280_v16  ;;  %v2319_v59 = vld [vmem:[%s3038_s0 + $0xf0] ss:$28 sps:$4 sm:$0xff]   ;;  %v2347_v16 = vld [vmem:[%s3038_s0 + $0x278] ss:$28 sps:$4 sm:$0xff]  }
  0x3c   :  { %1236 = vmatmul.mubr.bf16.gmra.mxu1 %v2228_v57  ;;  %1996 = vmatprep.subr.bf16.mxu0 %v2292_v20  ;;  %v2316_v57 = vld [vmem:[%s3038_s0 + $0xc0] ss:$28 sps:$4 sm:$0xff]  }
  0x3d   :  { %1243 = vmatprep.mubr.bf16.mxu1 %v2234_v60  ;;  %2110 = vmatpush3.bf16.msra.mxu1 %v2285_v19  ;;  %v2320_v60 = vld [vmem:[%s3038_s0 + $0xf8] ss:$28 sps:$4 sm:$0xff]  }
  0x3e   :  { %2111 = vmatprep.subr.bf16.mxu1 %v2353_v36 }
  0x3f   :  { %1997 = vmatpush3.bf16.msra.mxu0 %v2293_v21  ;;  %v2845_v21 = vld [vmem:[%s3039_s2] ss:$0 sm:$0xff] }
  0x41   :  { %2112 = vmatpush3.bf16.msra.mxu1 %v2300_v26 }
  0x42   :  { %1107 = vmatmul.mubr.bf16.gmra.mxu0 %v2233_v63  ;;  %v2324_v63 = vld [vmem:[%s3038_s0 + $0x130] ss:$28 sps:$4 sm:$0xff]  }
  0x43   :  { %1114 = vmatprep.mubr.bf16.mxu0 %v2238_v3  ;;  %v2329_v3 = vld [vmem:[%s3038_s0 + $0x19c] ss:$28 sps:$4 sm:$0xff]  }
  0x44   :  { %1244 = vmatmul.mubr.bf16.gmra.mxu1 %v2236_v2  ;;  %v2328_v2 = vld [vmem:[%s3038_s0 + $0x168] ss:$28 sps:$4 sm:$0xff]  }
  0x45   :  { %1251 = vmatprep.mubr.bf16.mxu1 %v2242_v4  ;;  %v2331_v4 = vld [vmem:[%s3038_s0 + $0x198] ss:$28 sps:$4 sm:$0xff]  }
  0x4a   :  { %1115 = vmatmul.mubr.bf16.gmra.mxu0 %v2241_v6  ;;  %v2333_v6 = vld [vmem:[%s3038_s0 + $0x1d4] ss:$28 sps:$4 sm:$0xff]  }
  0x4b   :  { %1122 = vmatprep.mubr.bf16.mxu0 %v2247_v10  ;;  %v2339_v10 = vld [vmem:[%s3038_s0 + $0x208] ss:$28 sps:$4 sm:$0xff]  }
  0x4c   :  { %1252 = vmatmul.mubr.bf16.gmra.mxu1 %v2245_v7  ;;  %v2335_v7 = vld [vmem:[%s3038_s0 + $0x1d0] ss:$28 sps:$4 sm:$0xff]  }
  0x4d   :  { %1259 = vmatprep.mubr.bf16.mxu1 %v2250_v11  ;;  %v2340_v11 = vld [vmem:[%s3038_s0 + $0x210] ss:$28 sps:$4 sm:$0xff]  }
  0x52   :  { %1123 = vmatmul.mubr.bf16.gmra.mxu0 %v2249_v14  ;;  %v2344_v14 = vld [vmem:[%s3038_s0 + $0x248] ss:$28 sps:$4 sm:$0xff]  }
  0x53   :  { %1130 = vmatprep.mubr.bf16.mxu0 %v2255_v17  ;;  %v2348_v17 = vld [vmem:[%s3038_s0 + $0x280] ss:$28 sps:$4 sm:$0xff]  }
  0x54   :  { %1260 = vmatmul.mubr.bf16.gmra.mxu1 %v2252_v15  ;;  %v2345_v15 = vld [vmem:[%s3038_s0 + $0x27c] ss:$28 sps:$4 sm:$0xff]  }
  0x55   :  { %1267 = vmatprep.mubr.bf16.mxu1 %v2258_v18  ;;  %v2349_v18 = vld [vmem:[%s3038_s0 + $0x2b4] ss:$28 sps:$4 sm:$0xff]  }
  0x5a   :  { %1131 = vmatmul.mubr.bf16.gmra.mxu0 %v2257_v22 }
  0x5b   :  { %1138 = vmatprep.mubr.bf16.mxu0 %v2262_v24 }
  0x5c   :  { %1268 = vmatmul.mubr.bf16.gmra.mxu1 %v2260_v23 }
  0x5d   :  { %1275 = vmatprep.mubr.bf16.mxu1 %v2265_v25 }
  0x62   :  { %1139 = vmatmul.mubr.bf16.gmra.mxu0 %v2264_v27  ;;  %v2351_v27 = vld [vmem:[%s3038_s0 + $0x2b0] ss:$28 sps:$4 sm:$0xff]  }
  0x63   :  { %1146 = vmatprep.mubr.bf16.mxu0 %v2270_v29 }
  0x64   :  { %1276 = vmatmul.mubr.bf16.gmra.mxu1 %v2267_v28 }
  0x65   :  { %1283 = vmatprep.mubr.bf16.mxu1 %v2273_v30  ;;  %v2352_v30 = vld [vmem:[%s3038_s0 + $0x2b8] ss:$28 sps:$4 sm:$0xff]  }
  0x6a   :  { %1147 = vmatmul.mubr.bf16.gmra.mxu0 %v2272_v31 }
  0x6b   :  { %1154 = vmatprep.mubr.bf16.mxu0 %v2278_v33 }
  0x6c   :  { %1284 = vmatmul.mubr.bf16.gmra.mxu1 %v2276_v32 }
  0x6d   :  { %1291 = vmatprep.mubr.bf16.mxu1 %v2282_v34 }
  0x72   :  { %1155 = vmatmul.mubr.bf16.gmra.mxu0 %v2281_v35 }
  0x73   :  { %1162 = vmatprep.mubr.bf16.mxu0 %v2286_v38 }
  0x74   :  { %1292 = vmatmul.mubr.bf16.gmra.mxu1 %v2284_v37 }
  0x75   :  { %1299 = vmatprep.mubr.bf16.mxu1 %v2289_v39 }
  0x7a   :  { %1163 = vmatmul.mubr.bf16.gmra.mxu0 %v2288_v40 }
  0x7b   :  { %1170 = vmatprep.mubr.bf16.mxu0 %v2294_v42 }
  0x7c   :  { %1300 = vmatmul.mubr.bf16.gmra.mxu1 %v2291_v41 }
  0x7d   :  { %1307 = vmatprep.mubr.bf16.mxu1 %v2297_v43 }
  0x82   :  { %1171 = vmatmul.mubr.bf16.gmra.mxu0 %v2296_v44 }
  0x83   :  { %1348 = vmatprep.mubr.bf16.mxu0 %v2303_v46 }
  0x84   :  { %1308 = vmatmul.mubr.bf16.gmra.mxu1 %v2299_v45 }
  0x85   :  { %2113 = vmatprep.mubr.msk.bf16.mxu1 %vm2354_vm0, %v2353_v36 }
  0x8a   :  { %1349 = vmatmul.mubr.bf16.vlgmr.msra.gmra.mxu0 %v2301_v47 }
  0x8b   :  { %1356 = vmatprep.mubr.bf16.mxu0 %v2305_v49 }
  0x8c   :  { %2114 = vmatmul.mubr.bf16.vlgmr.msra.gmra.mxu1 %v2304_v48 }
  0x8d   :  { %2117 = vmatprep.mubr.msk.bf16.mxu1 %vm2354_vm0, %v2353_v36 }
  0x92   :  { %1357 = vmatmul.mubr.bf16.gmra.mxu0 %v2307_v50 }
  0x93   :  { %1364 = vmatprep.mubr.bf16.mxu0 %v2309_v52 }
  0x94   :  { %2118 = vmatmul.mubr.bf16.gmra.mxu1 %v2308_v51 }
  0x95   :  { %2121 = vmatprep.mubr.msk.bf16.mxu1 %vm2354_vm0, %v2353_v36 }
  0x9a   :  { %1365 = vmatmul.mubr.bf16.gmra.mxu0 %v2311_v53 }
  0x9b   :  { %1372 = vmatprep.mubr.bf16.mxu0 %v2313_v55 }
  0x9c   :  { %2122 = vmatmul.mubr.bf16.gmra.mxu1 %v2312_v54 }
  0x9d   :  { %2125 = vmatprep.mubr.msk.bf16.mxu1 %vm2354_vm0, %v2353_v36 }
  0xa2   :  { %1373 = vmatmul.mubr.bf16.gmra.mxu0 %v2315_v56 }
  0xa3   :  { %1380 = vmatprep.mubr.bf16.mxu0 %v2317_v58 }
  0xa4   :  { %2126 = vmatmul.mubr.bf16.gmra.mxu1 %v2316_v57 }
  0xa5   :  { %2129 = vmatprep.mubr.msk.bf16.mxu1 %vm2354_vm0, %v2353_v36 }
  0xaa   :  { %1381 = vmatmul.mubr.bf16.gmra.mxu0 %v2319_v59 }
  0xab   :  { %1388 = vmatprep.mubr.bf16.mxu0 %v2321_v61 }
  0xac   :  { %2130 = vmatmul.mubr.bf16.gmra.mxu1 %v2320_v60 }
  0xad   :  { %2133 = vmatprep.mubr.msk.bf16.mxu1 %vm2354_vm0, %v2353_v36 }
  0xb2   :  { %1389 = vmatmul.mubr.bf16.gmra.mxu0 %v2323_v62 }
  0xb3   :  { %1396 = vmatprep.mubr.bf16.mxu0 %v2325_v0 }
  0xb4   :  { %2134 = vmatmul.mubr.bf16.gmra.mxu1 %v2324_v63 }
  0xb5   :  { %2137 = vmatprep.mubr.msk.bf16.mxu1 %vm2354_vm0, %v2353_v36 }
  0xba   :  { %1397 = vmatmul.mubr.bf16.gmra.mxu0 %v2327_v1 }
  0xbb   :  { %1404 = vmatprep.mubr.bf16.mxu0 %v2329_v3 }
  0xbc   :  { %2138 = vmatmul.mubr.bf16.gmra.mxu1 %v2328_v2 }
  0xbd   :  { %2141 = vmatprep.mubr.msk.bf16.mxu1 %vm2354_vm0, %v2353_v36 }
  0xc2   :  { %1405 = vmatmul.mubr.bf16.gmra.mxu0 %v2331_v4 }
  0xc3   :  { %1412 = vmatprep.mubr.bf16.mxu0 %v2333_v6 }
  0xc4   :  { %2142 = vmatmul.mubr.bf16.gmra.mxu1 %v2332_v5 }
  0xc5   :  { %2145 = vmatprep.mubr.msk.bf16.mxu1 %vm2354_vm0, %v2353_v36 }
  0xca   :  { %1413 = vmatmul.mubr.bf16.gmra.mxu0 %v2335_v7 }
  0xcb   :  { %1420 = vmatprep.mubr.bf16.mxu0 %v2337_v9 }
  0xcc   :  { %2146 = vmatmul.mubr.bf16.gmra.mxu1 %v2336_v8 }
  0xcd   :  { %2149 = vmatprep.mubr.msk.bf16.mxu1 %vm2354_vm0, %v2353_v36 }
  0xd2   :  { %1421 = vmatmul.mubr.bf16.gmra.mxu0 %v2339_v10 }
  0xd3   :  { %1428 = vmatprep.mubr.bf16.mxu0 %v2341_v12 }
  0xd4   :  { %2150 = vmatmul.mubr.bf16.gmra.mxu1 %v2340_v11 }
  0xd5   :  { %2153 = vmatprep.mubr.msk.bf16.mxu1 %vm2354_vm0, %v2353_v36 }
  0xda   :  { %1429 = vmatmul.mubr.bf16.gmra.mxu0 %v2343_v13 }
  0xdb   :  { %1436 = vmatprep.mubr.bf16.mxu0 %v2345_v15 }
  0xdc   :  { %2154 = vmatmul.mubr.bf16.gmra.mxu1 %v2344_v14 }
  0xdd   :  { %2157 = vmatprep.mubr.msk.bf16.mxu1 %vm2354_vm0, %v2353_v36 }
  0xe2   :  { %v1810_v19 = vpop.f32.mrf.mxu0  ;;  %1437 = vmatmul.mubr.bf16.gmra.mxu0 %v2347_v16 }
  0xe3   :  { %1444 = vmatprep.mubr.bf16.mxu0 %v2349_v18 }
  0xe4   :  { %v1904_v20 = vpop.f32.mrf.mxu1  ;;  %2158 = vmatmul.mubr.bf16.gmra.mxu1 %v2348_v17  ;;  %v1811_v22 = vpop.f32.mrf.mxu0 }
  0xe5   :  { %2161 = vmatprep.mubr.msk.bf16.mxu1 %vm2354_vm0, %v2353_v36  ;;  %v1812_v23 = vadd.f32 %v1811_v22, %v1810_v19 }
  0xe6   :  { %v1905_v24 = vpop.f32.mrf.mxu1  ;;  %v1813_v26 = vpop.f32.mrf.mxu0 }
  0xe7   :  { %v1906_v25 = vadd.f32 %v1905_v24, %v1904_v20  ;;  %v1077_v28 = vadd.f32 %v1812_v23, %v2845_v21 }
  0xe8   :  { %v1907_v29 = vpop.f32.mrf.mxu1  ;;  %v1814_v31 = vpop.f32.mrf.mxu0 }
  0xe9   :  { %v2856_v32 = vadd.f32 %v1906_v25, %v1077_v28  ;;  %v1815_v33 = vadd.f32 %v1814_v31, %v1813_v26 }
  0xea   :  { %v1908_v36 = vpop.f32.mrf.mxu1  ;;  %v1816_v35 = vpop.f32.mrf.mxu0  ;;  %1445 = vmatmul.mubr.bf16.gmra.mxu0 %v2351_v27 }
  0xeb   :  { %v1909_v34 = vadd.f32 %v1908_v36, %v1907_v29  ;;  %v1080_v37 = vadd.f32 %v1815_v33, %v2845_v21 }
  0xec   :  { %v1910_v38 = vpop.f32.mrf.mxu1  ;;  %2162 = vmatmul.mubr.bf16.gmra.mxu1 %v2352_v30  ;;  %v1817_v39 = vpop.f32.mrf.mxu0 }
  0xed   :  { %v2859_v40 = vadd.f32 %v1909_v34, %v1080_v37  ;;  %v1818_v41 = vadd.f32 %v1817_v39, %v1816_v35 }
  0xee   :  { %v1911_v42 = vpop.f32.mrf.mxu1  ;;  %v1819_v44 = vpop.f32.mrf.mxu0 }
  0xef   :  { %v1912_v43 = vadd.f32 %v1911_v42, %v1910_v38  ;;  %v1085_v45 = vadd.f32 %v1818_v41, %v2845_v21 }
  0xf0   :  { %v1913_v46 = vpop.f32.mrf.mxu1  ;;  %v1820_v47 = vpop.f32.mrf.mxu0 }
  0xf1   :  { %v2862_v48 = vadd.f32 %v1912_v43, %v1085_v45  ;;  %v1821_v49 = vadd.f32 %v1820_v47, %v1819_v44 }
  0xf2   :  { %v1914_v50 = vpop.f32.mrf.mxu1  ;;  %v1822_v52 = vpop.f32.mrf.mxu0 }
  0xf3   :  { %v1915_v51 = vadd.f32 %v1914_v50, %v1913_v46  ;;  %v1088_v53 = vadd.f32 %v1821_v49, %v2845_v21 }
  0xf4   :  { %v1916_v54 = vpop.f32.mrf.mxu1  ;;  %v1823_v55 = vpop.f32.mrf.mxu0 }
  0xf5   :  { %v2865_v56 = vadd.f32 %v1915_v51, %v1088_v53  ;;  %v1824_v57 = vadd.f32 %v1823_v55, %v1822_v52 }
  0xf6   :  { %v1917_v58 = vpop.f32.mrf.mxu1  ;;  %v1825_v60 = vpop.f32.mrf.mxu0 }
  0xf7   :  { %v1918_v59 = vadd.f32 %v1917_v58, %v1916_v54  ;;  %v1093_v61 = vadd.f32 %v1824_v57, %v2845_v21 }
  0xf8   :  { %v1919_v62 = vpop.f32.mrf.mxu1  ;;  %v1826_v63 = vpop.f32.mrf.mxu0 }
  0xf9   :  { %v2868_v0 = vadd.f32 %v1918_v59, %v1093_v61  ;;  %v1827_v1 = vadd.f32 %v1826_v63, %v1825_v60 }
  0xfa   :  { %v1920_v2 = vpop.f32.mrf.mxu1  ;;  %v1828_v4 = vpop.f32.mrf.mxu0 }
  0xfb   :  { %v1921_v3 = vadd.f32 %v1920_v2, %v1919_v62  ;;  %v1096_v5 = vadd.f32 %v1827_v1, %v2845_v21 }
  0xfc   :  { %v1922_v6 = vpop.f32.mrf.mxu1  ;;  %v1829_v7 = vpop.f32.mrf.mxu0 }
  0xfd   :  { %v2871_v8 = vadd.f32 %v1921_v3, %v1096_v5  ;;  %v1830_v9 = vadd.f32 %v1829_v7, %v1828_v4 }
  0xfe   :  { %v1923_v10 = vpop.f32.mrf.mxu1  ;;  %v1831_v12 = vpop.f32.mrf.mxu0 }
  0xff   :  { %v1924_v11 = vadd.f32 %v1923_v10, %v1922_v6  ;;  %v1101_v13 = vadd.f32 %v1830_v9, %v2845_v21 }
 0x100   :  { %v1925_v14 = vpop.f32.mrf.mxu1  ;;  %v1832_v15 = vpop.f32.mrf.mxu0 }
 0x101   :  { %v2874_v16 = vadd.f32 %v1924_v11, %v1101_v13  ;;  %v1833_v17 = vadd.f32 %v1832_v15, %v1831_v12 }
 0x102   :  { %v1926_v18 = vpop.f32.mrf.mxu1  ;;  %v1834_v20 = vpop.f32.mrf.mxu0 }
 0x103   :  { %v1927_v19 = vadd.f32 %v1926_v18, %v1925_v14  ;;  %v1104_v22 = vadd.f32 %v1833_v17, %v2845_v21 }
 0x104   :  { %v1928_v23 = vpop.f32.mrf.mxu1  ;;  %v1835_v24 = vpop.f32.mrf.mxu0 }
 0x105   :  { %v2877_v25 = vadd.f32 %v1927_v19, %v1104_v22  ;;  %v1836_v26 = vadd.f32 %v1835_v24, %v1834_v20 }
 0x106   :  { %v1929_v27 = vpop.f32.mrf.mxu1  ;;  %v1837_v29 = vpop.f32.mrf.mxu0 }
 0x107   :  { %v1930_v28 = vadd.f32 %v1929_v27, %v1928_v23  ;;  %v1109_v30 = vadd.f32 %v1836_v26, %v2845_v21 }
 0x108   :  { %v1931_v31 = vpop.f32.mrf.mxu1  ;;  %v1838_v33 = vpop.f32.mrf.mxu0 }
 0x109   :  { %v2880_v36 = vadd.f32 %v1930_v28, %v1109_v30  ;;  %v1839_v34 = vadd.f32 %v1838_v33, %v1837_v29 }
 0x10a   :  { %v1932_v35 = vpop.f32.mrf.mxu1  ;;  %v1840_v38 = vpop.f32.mrf.mxu0 }
 0x10b   :  { %v1933_v37 = vadd.f32 %v1932_v35, %v1931_v31  ;;  %v1112_v39 = vadd.f32 %v1839_v34, %v2845_v21 }
 0x10c   :  { %v1934_v41 = vpop.f32.mrf.mxu1  ;;  %v1841_v42 = vpop.f32.mrf.mxu0 }
 0x10d   :  { %v2883_v43 = vadd.f32 %v1933_v37, %v1112_v39  ;;  %v1842_v44 = vadd.f32 %v1841_v42, %v1840_v38 }
 0x10e   :  { %v1935_v45 = vpop.f32.mrf.mxu1  ;;  %v1843_v47 = vpop.f32.mrf.mxu0 }
 0x10f   :  { %v1936_v46 = vadd.f32 %v1935_v45, %v1934_v41  ;;  %v1117_v49 = vadd.f32 %v1842_v44, %v2845_v21 }
 0x110   :  { %v1937_v50 = vpop.f32.mrf.mxu1  ;;  %v1844_v51 = vpop.f32.mrf.mxu0 }
 0x111   :  { %v2886_v52 = vadd.f32 %v1936_v46, %v1117_v49  ;;  %v1845_v53 = vadd.f32 %v1844_v51, %v1843_v47 }
 0x112   :  { %v1938_v54 = vpop.f32.mrf.mxu1  ;;  %v1846_v57 = vpop.f32.mrf.mxu0 }
 0x113   :  { %v1939_v55 = vadd.f32 %v1938_v54, %v1937_v50  ;;  %v1120_v58 = vadd.f32 %v1845_v53, %v2845_v21 }
 0x114   :  { %v1940_v59 = vpop.f32.mrf.mxu1  ;;  %v1847_v60 = vpop.f32.mrf.mxu0 }
 0x115   :  { %v2889_v61 = vadd.f32 %v1939_v55, %v1120_v58  ;;  %v1848_v62 = vadd.f32 %v1847_v60, %v1846_v57 }
 0x116   :  { %v1941_v63 = vpop.f32.mrf.mxu1  ;;  %v1849_v2 = vpop.f32.mrf.mxu0 }
 0x117   :  { %v1942_v1 = vadd.f32 %v1941_v63, %v1940_v59  ;;  %v1125_v3 = vadd.f32 %v1848_v62, %v2845_v21 }
 0x118   :  { %v1943_v4 = vpop.f32.mrf.mxu1  ;;  %v1850_v5 = vpop.f32.mrf.mxu0 }
 0x119   :  { %v2892_v6 = vadd.f32 %v1942_v1, %v1125_v3  ;;  %v1851_v7 = vadd.f32 %v1850_v5, %v1849_v2 }
 0x11a   :  { %v1944_v9 = vpop.f32.mrf.mxu1  ;;  %v1852_v11 = vpop.f32.mrf.mxu0 }
 0x11b   :  { %v1945_v10 = vadd.f32 %v1944_v9, %v1943_v4  ;;  %v1128_v12 = vadd.f32 %v1851_v7, %v2845_v21 }
 0x11c   :  { %v1946_v13 = vpop.f32.mrf.mxu1  ;;  %v1853_v14 = vpop.f32.mrf.mxu0 }
 0x11d   :  { %v2895_v15 = vadd.f32 %v1945_v10, %v1128_v12  ;;  %v1854_v17 = vadd.f32 %v1853_v14, %v1852_v11 }
 0x11e   :  { %v1947_v18 = vpop.f32.mrf.mxu1  ;;  %v1855_v20 = vpop.f32.mrf.mxu0 }
 0x11f   :  { %v1948_v19 = vadd.f32 %v1947_v18, %v1946_v13  ;;  %v1133_v22 = vadd.f32 %v1854_v17, %v2845_v21 }
 0x120   :  { %v1949_v23 = vpop.f32.mrf.mxu1  ;;  %v1856_v24 = vpop.f32.mrf.mxu0 }
 0x121   :  { %v2898_v26 = vadd.f32 %v1948_v19, %v1133_v22  ;;  %v1857_v27 = vadd.f32 %v1856_v24, %v1855_v20 }
 0x122   :  { %v1950_v28 = vpop.f32.mrf.mxu1  ;;  %v1858_v30 = vpop.f32.mrf.mxu0 }
 0x123   :  { %v1951_v29 = vadd.f32 %v1950_v28, %v1949_v23  ;;  %v1136_v31 = vadd.f32 %v1857_v27, %v2845_v21 }
 0x124   :  { %v1952_v33 = vpop.f32.mrf.mxu1  ;;  %v1859_v34 = vpop.f32.mrf.mxu0 }
 0x125   :  { %v2901_v35 = vadd.f32 %v1951_v29, %v1136_v31  ;;  %v1860_v37 = vadd.f32 %v1859_v34, %v1858_v30 }
 0x126   :  { %v1953_v38 = vpop.f32.mrf.mxu1  ;;  %v1861_v41 = vpop.f32.mrf.mxu0 }
 0x127   :  { %v1954_v39 = vadd.f32 %v1953_v38, %v1952_v33  ;;  %v1141_v42 = vadd.f32 %v1860_v37, %v2845_v21 }
 0x128   :  { %v1955_v44 = vpop.f32.mrf.mxu1  ;;  %v1862_v45 = vpop.f32.mrf.mxu0 }
 0x129   :  { %v2904_v46 = vadd.f32 %v1954_v39, %v1141_v42  ;;  %v1863_v47 = vadd.f32 %v1862_v45, %v1861_v41 }
 0x12a   :  { %v1956_v49 = vpop.f32.mrf.mxu1  ;;  %v1864_v51 = vpop.f32.mrf.mxu0 }
 0x12b   :  { %v1957_v50 = vadd.f32 %v1956_v49, %v1955_v44  ;;  %v1144_v53 = vadd.f32 %v1863_v47, %v2845_v21 }
 0x12c   :  { %v1958_v54 = vpop.f32.mrf.mxu1  ;;  %v1865_v55 = vpop.f32.mrf.mxu0 }
 0x12d   :  { %v2907_v57 = vadd.f32 %v1957_v50, %v1144_v53  ;;  %v1866_v58 = vadd.f32 %v1865_v55, %v1864_v51 }
 0x12e   :  { %v1959_v59 = vpop.f32.mrf.mxu1  ;;  %v1867_v62 = vpop.f32.mrf.mxu0 }
 0x12f   :  { %v1960_v60 = vadd.f32 %v1959_v59, %v1958_v54  ;;  %v1149_v63 = vadd.f32 %v1866_v58, %v2845_v21 }
 0x130   :  { %v1961_v1 = vpop.f32.mrf.mxu1  ;;  %v1868_v2 = vpop.f32.mrf.mxu0 }
 0x131   :  { %v2910_v3 = vadd.f32 %v1960_v60, %v1149_v63  ;;  %v1869_v4 = vadd.f32 %v1868_v2, %v1867_v62 }
 0x132   :  { %v1962_v5 = vpop.f32.mrf.mxu1  ;;  %v1870_v9 = vpop.f32.mrf.mxu0 }
 0x133   :  { %v1963_v7 = vadd.f32 %v1962_v5, %v1961_v1  ;;  %v1152_v10 = vadd.f32 %v1869_v4, %v2845_v21 }
 0x134   :  { %v1964_v11 = vpop.f32.mrf.mxu1  ;;  %v1871_v12 = vpop.f32.mrf.mxu0 }
 0x135   :  { %v2913_v13 = vadd.f32 %v1963_v7, %v1152_v10  ;;  %v1872_v14 = vadd.f32 %v1871_v12, %v1870_v9 }
 0x136   :  { %v1965_v17 = vpop.f32.mrf.mxu1  ;;  %v1873_v19 = vpop.f32.mrf.mxu0 }
 0x137   :  { %v1966_v18 = vadd.f32 %v1965_v17, %v1964_v11  ;;  %v1157_v20 = vadd.f32 %v1872_v14, %v2845_v21 }
 0x138   :  { %v1967_v22 = vpop.f32.mrf.mxu1  ;;  %v1874_v23 = vpop.f32.mrf.mxu0 }
 0x139   :  { %v2916_v24 = vadd.f32 %v1966_v18, %v1157_v20  ;;  %v1875_v27 = vadd.f32 %v1874_v23, %v1873_v19 }
 0x13a   :  { %v1968_v28 = vpop.f32.mrf.mxu1  ;;  %v1876_v30 = vpop.f32.mrf.mxu0 }
 0x13b   :  { %v1969_v29 = vadd.f32 %v1968_v28, %v1967_v22  ;;  %v1160_v31 = vadd.f32 %v1875_v27, %v2845_v21 }
 0x13c   :  { %v1970_v33 = vpop.f32.mrf.mxu1  ;;  %v1877_v34 = vpop.f32.mrf.mxu0 }
 0x13d   :  { %v2919_v37 = vadd.f32 %v1969_v29, %v1160_v31  ;;  %v1878_v38 = vadd.f32 %v1877_v34, %v1876_v30 }
 0x13e   :  { %v1971_v39 = vpop.f32.mrf.mxu1  ;;  %v1879_v42 = vpop.f32.mrf.mxu0 }
 0x13f   :  { %v1972_v41 = vadd.f32 %v1971_v39, %v1970_v33  ;;  %v1165_v44 = vadd.f32 %v1878_v38, %v2845_v21 }
 0x140   :  { %v1973_v45 = vpop.f32.mrf.mxu1  ;;  %v1880_v47 = vpop.f32.mrf.mxu0 }
 0x141   :  { %v2922_v49 = vadd.f32 %v1972_v41, %v1165_v44  ;;  %v1881_v50 = vadd.f32 %v1880_v47, %v1879_v42 }
 0x142   :  { %v1974_v51 = vpop.f32.mrf.mxu1  ;;  %v1882_v54 = vpop.f32.mrf.mxu0 }
 0x143   :  { %v1975_v53 = vadd.f32 %v1974_v51, %v1973_v45  ;;  %v1168_v55 = vadd.f32 %v1881_v50, %v2845_v21 }
 0x144   :  { %v1976_v58 = vpop.f32.mrf.mxu1  ;;  %v1883_v59 = vpop.f32.mrf.mxu0 }
 0x145   :  { %v2925_v60 = vadd.f32 %v1975_v53, %v1168_v55  ;;  %v1884_v62 = vadd.f32 %v1883_v59, %v1882_v54 }
 0x146   :  { %v1977_v63 = vpop.f32.mrf.mxu1  ;;  %v1885_v2 = vpop.f32.mrf.mxu0 }
 0x147   :  { %v1978_v1 = vadd.f32 %v1977_v63, %v1976_v58  ;;  %v1173_v4 = vadd.f32 %v1884_v62, %v2845_v21 }
 0x148   :  { %v1979_v5 = vpop.f32.mrf.mxu1  ;;  %v1886_v7 = vpop.f32.mrf.mxu0 }
 0x149   :  { %v2928_v9 = vadd.f32 %v1978_v1, %v1173_v4  ;;  %v1887_v10 = vadd.f32 %v1886_v7, %v1885_v2 }
 0x14a   :  { %v1980_v11 = vpop.f32.mrf.mxu1  ;;  %v1998_v14 = vpop.f32.mrf.mxu0 }
 0x14b   :  { %v1981_v12 = vadd.f32 %v1980_v11, %v1979_v5  ;;  %v1176_v17 = vadd.f32 %v1887_v10, %v2845_v21 }
 0x14c   :  { %v1487_v18 = vpop.f32.mrf.mxu1  ;;  %v1999_v19 = vpop.f32.mrf.mxu0 }
 0x14d   :  { %v2931_v20 = vadd.f32 %v1981_v12, %v1176_v17  ;;  %v2000_v22 = vadd.f32 %v1999_v19, %v1998_v14 }
 0x14e   :  { %v2115_v23 = vpop.f32.mrf.mxu1  ;;  %v2001_v27 = vpop.f32.mrf.mxu0 }
 0x14f   :  { %v1351_v28 = vadd.f32 %v2000_v22, %v2856_v32 }
 0x150   :  { %v1490_v29 = vpop.f32.mrf.mxu1  ;;  %v2002_v30 = vpop.f32.mrf.mxu0 }
 0x151   :  { %v1488_v31 = vadd.f32 %v1487_v18, %v1351_v28  ;;  %v2003_v33 = vadd.f32 %v2002_v30, %v2001_v27 }
 0x152   :  { %v2116_v34 = vpop.f32.mrf.mxu1  ;;  %v2004_v38 = vpop.f32.mrf.mxu0 }
 0x153   :  { %v1590_v39 = vmax.f32 %v1488_v31, 0.0  ;;  %v1354_v41 = vadd.f32 %v2003_v33, %v2859_v40 }
 0x154   :  { %v1495_v42 = vpop.f32.mrf.mxu1  ;;  %v2005_v21 = vpop.f32.mrf.mxu0 }
 0x155   :  { %1616 = vst [vmem:[%s3040_s3] sm:$0xff] %v1590_v39  ;;  %v1491_v44 = vadd.f32 %v1490_v29, %v1354_v41  ;;  %v2006_v45 = vadd.f32 %v2005_v21, %v2004_v38 }
 0x156   :  { %v2119_v47 = vpop.f32.mrf.mxu1  ;;  %v2007_v50 = vpop.f32.mrf.mxu0 }
 0x157   :  { %v1591_v32 = vmax.f32 %v1491_v44, 0.0  ;;  %v1359_v51 = vadd.f32 %v2006_v45, %v2862_v48 }
 0x158   :  { %v1498_v53 = vpop.f32.mrf.mxu1  ;;  %v2008_v54 = vpop.f32.mrf.mxu0 }
 0x159   :  { %1617 = vst [vmem:[%s3040_s3 + $0x8] sm:$0xff] %v1591_v32  ;;  %v1496_v40 = vadd.f32 %v1495_v42, %v1359_v51  ;;  %v2009_v55 = vadd.f32 %v2008_v54, %v2007_v50 }
 0x15a   :  { %v2120_v58 = vpop.f32.mrf.mxu1  ;;  %v2010_v59 = vpop.f32.mrf.mxu0 }
 0x15b   :  { %v1592_v62 = vmax.f32 %v1496_v40, 0.0  ;;  %v1362_v63 = vadd.f32 %v2009_v55, %v2865_v56 }
 0x15c   :  { %v1503_v1 = vpop.f32.mrf.mxu1  ;;  %v2011_v2 = vpop.f32.mrf.mxu0 }
 0x15d   :  { %1618 = vst [vmem:[%s3040_s3 + $0x10] sm:$0xff] %v1592_v62  ;;  %v1499_v48 = vadd.f32 %v1498_v53, %v1362_v63  ;;  %v2012_v4 = vadd.f32 %v2011_v2, %v2010_v59 }
 0x15e   :  { %v2123_v5 = vpop.f32.mrf.mxu1  ;;  %v2013_v7 = vpop.f32.mrf.mxu0 }
 0x15f   :  { %v1593_v10 = vmax.f32 %v1499_v48, 0.0  ;;  %v1367_v11 = vadd.f32 %v2012_v4, %v2868_v0 }
 0x160   :  { %v1506_v12 = vpop.f32.mrf.mxu1  ;;  %v2014_v14 = vpop.f32.mrf.mxu0 }
 0x161   :  { %1619 = vst [vmem:[%s3040_s3 + $0x18] sm:$0xff] %v1593_v10  ;;  %v1504_v56 = vadd.f32 %v1503_v1, %v1367_v11  ;;  %v2015_v17 = vadd.f32 %v2014_v14, %v2013_v7 }
 0x162   :  { %v2124_v18 = vpop.f32.mrf.mxu1  ;;  %v2016_v19 = vpop.f32.mrf.mxu0 }
 0x163   :  { %v1594_v22 = vmax.f32 %v1504_v56, 0.0  ;;  %v1370_v23 = vadd.f32 %v2015_v17, %v2871_v8 }
 0x164   :  { %v1511_v27 = vpop.f32.mrf.mxu1  ;;  %v2017_v28 = vpop.f32.mrf.mxu0 }
 0x165   :  { %1620 = vst [vmem:[%s3040_s3 + $0x20] sm:$0xff] %v1594_v22  ;;  %v1507_v0 = vadd.f32 %v1506_v12, %v1370_v23  ;;  %v2018_v29 = vadd.f32 %v2017_v28, %v2016_v19 }
 0x166   :  { %v2127_v30 = vpop.f32.mrf.mxu1  ;;  %v2019_v31 = vpop.f32.mrf.mxu0 }
 0x167   :  { %v1595_v33 = vmax.f32 %v1507_v0, 0.0  ;;  %v1375_v34 = vadd.f32 %v2018_v29, %v2874_v16 }
 0x168   :  { %v1514_v38 = vpop.f32.mrf.mxu1  ;;  %v2020_v39 = vpop.f32.mrf.mxu0 }
 0x169   :  { %1621 = vst [vmem:[%s3040_s3 + $0x28] sm:$0xff] %v1595_v33  ;;  %v1512_v8 = vadd.f32 %v1511_v27, %v1375_v34  ;;  %v2021_v41 = vadd.f32 %v2020_v39, %v2019_v31 }
 0x16a   :  { %v2128_v42 = vpop.f32.mrf.mxu1  ;;  %v2022_v21 = vpop.f32.mrf.mxu0 }
 0x16b   :  { %v1596_v44 = vmax.f32 %v1512_v8, 0.0  ;;  %v1378_v45 = vadd.f32 %v2021_v41, %v2877_v25 }
 0x16c   :  { %v1519_v47 = vpop.f32.mrf.mxu1  ;;  %v2023_v50 = vpop.f32.mrf.mxu0 }
 0x16d   :  { %1622 = vst [vmem:[%s3040_s3 + $0x30] sm:$0xff] %v1596_v44  ;;  %v1515_v16 = vadd.f32 %v1514_v38, %v1378_v45  ;;  %v2024_v32 = vadd.f32 %v2023_v50, %v2022_v21 }
 0x16e   :  { %v2131_v51 = vpop.f32.mrf.mxu1  ;;  %v2025_v53 = vpop.f32.mrf.mxu0 }
 0x16f   :  { %v1597_v54 = vmax.f32 %v1515_v16, 0.0  ;;  %v1383_v40 = vadd.f32 %v2024_v32, %v2880_v36 }
 0x170   :  { %v1522_v55 = vpop.f32.mrf.mxu1  ;;  %v2026_v58 = vpop.f32.mrf.mxu0 }
 0x171   :  { %1623 = vst [vmem:[%s3040_s3 + $0x38] sm:$0xff] %v1597_v54  ;;  %v1520_v25 = vadd.f32 %v1519_v47, %v1383_v40  ;;  %v2027_v59 = vadd.f32 %v2026_v58, %v2025_v53 }
 0x172   :  { %v2132_v62 = vpop.f32.mrf.mxu1  ;;  %v2028_v63 = vpop.f32.mrf.mxu0 }
 0x173   :  { %v1598_v1 = vmax.f32 %v1520_v25, 0.0  ;;  %v1386_v2 = vadd.f32 %v2027_v59, %v2883_v43 }
 0x174   :  { %v1527_v48 = vpop.f32.mrf.mxu1  ;;  %v2029_v4 = vpop.f32.mrf.mxu0 }
 0x175   :  { %1624 = vst [vmem:[%s3040_s3 + $0x40] sm:$0xff] %v1598_v1  ;;  %v1523_v36 = vadd.f32 %v1522_v55, %v1386_v2  ;;  %v2030_v5 = vadd.f32 %v2029_v4, %v2028_v63 }
 0x176   :  { %v2135_v7 = vpop.f32.mrf.mxu1  ;;  %v2031_v10 = vpop.f32.mrf.mxu0 }
 0x177   :  { %v1599_v11 = vmax.f32 %v1523_v36, 0.0  ;;  %v1391_v12 = vadd.f32 %v2030_v5, %v2886_v52 }
 0x178   :  { %v1530_v14 = vpop.f32.mrf.mxu1  ;;  %v2032_v56 = vpop.f32.mrf.mxu0 }
 0x179   :  { %1625 = vst [vmem:[%s3040_s3 + $0x48] sm:$0xff] %v1599_v11  ;;  %v1528_v43 = vadd.f32 %v1527_v48, %v1391_v12  ;;  %v2033_v17 = vadd.f32 %v2032_v56, %v2031_v10 }
 0x17a   :  { %v2136_v18 = vpop.f32.mrf.mxu1  ;;  %v2034_v19 = vpop.f32.mrf.mxu0 }
 0x17b   :  { %v1600_v22 = vmax.f32 %v1528_v43, 0.0  ;;  %v1394_v23 = vadd.f32 %v2033_v17, %v2889_v61 }
 0x17c   :  { %v1535_v27 = vpop.f32.mrf.mxu1  ;;  %v2035_v28 = vpop.f32.mrf.mxu0 }
 0x17d   :  { %1626 = vst [vmem:[%s3040_s3 + $0x50] sm:$0xff] %v1600_v22  ;;  %v1531_v52 = vadd.f32 %v1530_v14, %v1394_v23  ;;  %v2036_v0 = vadd.f32 %v2035_v28, %v2034_v19 }
 0x17e   :  { %v2139_v29 = vpop.f32.mrf.mxu1  ;;  %v2037_v30 = vpop.f32.mrf.mxu0 }
 0x17f   :  { %v1601_v31 = vmax.f32 %v1531_v52, 0.0  ;;  %v1399_v33 = vadd.f32 %v2036_v0, %v2892_v6 }
 0x180   :  { %v1538_v34 = vpop.f32.mrf.mxu1  ;;  %v2038_v38 = vpop.f32.mrf.mxu0 }
 0x181   :  { %1627 = vst [vmem:[%s3040_s3 + $0x58] sm:$0xff] %v1601_v31  ;;  %v1536_v61 = vadd.f32 %v1535_v27, %v1399_v33  ;;  %v2039_v39 = vadd.f32 %v2038_v38, %v2037_v30 }
 0x182   :  { %v2140_v8 = vpop.f32.mrf.mxu1  ;;  %v2040_v41 = vpop.f32.mrf.mxu0 }
 0x183   :  { %v1602_v42 = vmax.f32 %v1536_v61, 0.0  ;;  %v1402_v21 = vadd.f32 %v2039_v39, %v2895_v15 }
 0x184   :  { %v1543_v44 = vpop.f32.mrf.mxu1  ;;  %v2041_v45 = vpop.f32.mrf.mxu0 }
 0x185   :  { %1628 = vst [vmem:[%s3040_s3 + $0x60] sm:$0xff] %v1602_v42  ;;  %v1539_v6 = vadd.f32 %v1538_v34, %v1402_v21  ;;  %v2042_v47 = vadd.f32 %v2041_v45, %v2040_v41 }
 0x186   :  { %v2143_v50 = vpop.f32.mrf.mxu1  ;;  %v2043_v16 = vpop.f32.mrf.mxu0 }
 0x187   :  { %v1603_v32 = vmax.f32 %v1539_v6, 0.0  ;;  %v1407_v51 = vadd.f32 %v2042_v47, %v2898_v26 }
 0x188   :  { %v1546_v53 = vpop.f32.mrf.mxu1  ;;  %v2044_v54 = vpop.f32.mrf.mxu0 }
 0x189   :  { %1629 = vst [vmem:[%s3040_s3 + $0x68] sm:$0xff] %v1603_v32  ;;  %v1544_v15 = vadd.f32 %v1543_v44, %v1407_v51  ;;  %v2045_v40 = vadd.f32 %v2044_v54, %v2043_v16 }
 0x18a   :  { %v2144_v55 = vpop.f32.mrf.mxu1  ;;  %v2046_v58 = vpop.f32.mrf.mxu0 }
 0x18b   :  { %v1604_v25 = vmax.f32 %v1544_v15, 0.0  ;;  %v1410_v59 = vadd.f32 %v2045_v40, %v2901_v35 }
 0x18c   :  { %v1551_v62 = vpop.f32.mrf.mxu1  ;;  %v2047_v63 = vpop.f32.mrf.mxu0 }
 0x18d   :  { %1630 = vst [vmem:[%s3040_s3 + $0x70] sm:$0xff] %v1604_v25  ;;  %v1547_v26 = vadd.f32 %v1546_v53, %v1410_v59  ;;  %v2048_v1 = vadd.f32 %v2047_v63, %v2046_v58 }
 0x18e   :  { %v2147_v2 = vpop.f32.mrf.mxu1  ;;  %v2049_v48 = vpop.f32.mrf.mxu0 }
 0x18f   :  { %v1605_v4 = vmax.f32 %v1547_v26, 0.0  ;;  %v1415_v36 = vadd.f32 %v2048_v1, %v2904_v46 }
 0x190   :  { %v1554_v5 = vpop.f32.mrf.mxu1  ;;  %v2050_v7 = vpop.f32.mrf.mxu0 }
 0x191   :  { %1631 = vst [vmem:[%s3040_s3 + $0x78] sm:$0xff] %v1605_v4  ;;  %v1552_v35 = vadd.f32 %v1551_v62, %v1415_v36  ;;  %v2051_v10 = vadd.f32 %v2050_v7, %v2049_v48 }
 0x192   :  { %v2148_v11 = vpop.f32.mrf.mxu1  ;;  %v2052_v12 = vpop.f32.mrf.mxu0 }
 0x193   :  { %v1606_v14 = vmax.f32 %v1552_v35, 0.0  ;;  %v1418_v56 = vadd.f32 %v2051_v10, %v2907_v57 }
 0x194   :  { %v1559_v43 = vpop.f32.mrf.mxu1  ;;  %v2053_v17 = vpop.f32.mrf.mxu0 }
 0x195   :  { %1632 = vst [vmem:[%s3040_s3 + $0x80] sm:$0xff] %v1606_v14  ;;  %v1555_v46 = vadd.f32 %v1554_v5, %v1418_v56  ;;  %v2054_v18 = vadd.f32 %v2053_v17, %v2052_v12 }
 0x196   :  { %v2151_v19 = vpop.f32.mrf.mxu1  ;;  %v2055_v22 = vpop.f32.mrf.mxu0 }
 0x197   :  { %v1607_v23 = vmax.f32 %v1555_v46, 0.0  ;;  %v1423_v27 = vadd.f32 %v2054_v18, %v2910_v3 }
 0x198   :  { %v1562_v28 = vpop.f32.mrf.mxu1  ;;  %v2056_v52 = vpop.f32.mrf.mxu0 }
 0x199   :  { %1633 = vst [vmem:[%s3040_s3 + $0x88] sm:$0xff] %v1607_v23  ;;  %v1560_v57 = vadd.f32 %v1559_v43, %v1423_v27  ;;  %v2057_v0 = vadd.f32 %v2056_v52, %v2055_v22 }
 0x19a   :  { %v2152_v29 = vpop.f32.mrf.mxu1  ;;  %v2058_v30 = vpop.f32.mrf.mxu0 }
 0x19b   :  { %v1608_v31 = vmax.f32 %v1560_v57, 0.0  ;;  %v1426_v33 = vadd.f32 %v2057_v0, %v2913_v13 }
 0x19c   :  { %v1567_v34 = vpop.f32.mrf.mxu1  ;;  %v2059_v38 = vpop.f32.mrf.mxu0 }
 0x19d   :  { %1634 = vst [vmem:[%s3040_s3 + $0x90] sm:$0xff] %v1608_v31  ;;  %v1563_v3 = vadd.f32 %v1562_v28, %v1426_v33  ;;  %v2060_v61 = vadd.f32 %v2059_v38, %v2058_v30 }
 0x19e   :  { %v2155_v39 = vpop.f32.mrf.mxu1  ;;  %v2061_v8 = vpop.f32.mrf.mxu0 }
 0x19f   :  { %v1609_v41 = vmax.f32 %v1563_v3, 0.0  ;;  %v1431_v42 = vadd.f32 %v2060_v61, %v2916_v24 }
 0x1a0   :  { %v1570_v21 = vpop.f32.mrf.mxu1  ;;  %v2062_v44 = vpop.f32.mrf.mxu0 }
 0x1a1   :  { %1635 = vst [vmem:[%s3040_s3 + $0x98] sm:$0xff] %v1609_v41  ;;  %v1568_v13 = vadd.f32 %v1567_v34, %v1431_v42  ;;  %v2063_v45 = vadd.f32 %v2062_v44, %v2061_v8 }
 0x1a2   :  { %v2156_v6 = vpop.f32.mrf.mxu1  ;;  %v2064_v47 = vpop.f32.mrf.mxu0 }
 0x1a3   :  { %v1610_v50 = vmax.f32 %v1568_v13, 0.0  ;;  %v1434_v16 = vadd.f32 %v2063_v45, %v2919_v37 }
 0x1a4   :  { %v1575_v32 = vpop.f32.mrf.mxu1  ;;  %v2065_v51 = vpop.f32.mrf.mxu0 }
 0x1a5   :  { %1636 = vst [vmem:[%s3040_s3 + $0xa0] sm:$0xff] %v1610_v50  ;;  %v1571_v24 = vadd.f32 %v1570_v21, %v1434_v16  ;;  %v2066_v53 = vadd.f32 %v2065_v51, %v2064_v47 }
 0x1a6   :  { %v2159_v54 = vpop.f32.mrf.mxu1  ;;  %v2067_v15 = vpop.f32.mrf.mxu0 }
 0x1a7   :  { %v1611_v40 = vmax.f32 %v1571_v24, 0.0  ;;  %v1439_v55 = vadd.f32 %v2066_v53, %v2922_v49 }
 0x1a8   :  { %v1578_v58 = vpop.f32.mrf.mxu1  ;;  %v2068_v25 = vpop.f32.mrf.mxu0 }
 0x1a9   :  { %1637 = vst [vmem:[%s3040_s3 + $0xa8] sm:$0xff] %v1611_v40  ;;  %v1576_v37 = vadd.f32 %v1575_v32, %v1439_v55  ;;  %v2069_v59 = vadd.f32 %v2068_v25, %v2067_v15 }
 0x1aa   :  { %v2160_v62 = vpop.f32.mrf.mxu1  ;;  %v2070_v63 = vpop.f32.mrf.mxu0 }
 0x1ab   :  { %v1612_v26 = vmax.f32 %v1576_v37, 0.0  ;;  %v1442_v1 = vadd.f32 %v2069_v59, %v2925_v60 }
 0x1ac   :  { %v1583_v2 = vpop.f32.mrf.mxu1  ;;  %v2071_v48 = vpop.f32.mrf.mxu0 }
 0x1ad   :  { %1638 = vst [vmem:[%s3040_s3 + $0xb0] sm:$0xff] %v1612_v26  ;;  %v1579_v49 = vadd.f32 %v1578_v58, %v1442_v1  ;;  %v2072_v4 = vadd.f32 %v2071_v48, %v2070_v63 }
 0x1ae   :  { %v2163_v36 = vpop.f32.mrf.mxu1  ;;  %v2073_v5 = vpop.f32.mrf.mxu0 }
 0x1af   :  { %v1613_v7 = vmax.f32 %v1579_v49, 0.0  ;;  %v1447_v35 = vadd.f32 %v2072_v4, %v2928_v9 }
 0x1b0   :  { %v1586_v10 = vpop.f32.mrf.mxu1  ;;  %v2074_v11 = vpop.f32.mrf.mxu0 }
 0x1b1   :  { %1639 = vst [vmem:[%s3040_s3 + $0xb8] sm:$0xff] %v1613_v7  ;;  %v1584_v60 = vadd.f32 %v1583_v2, %v1447_v35  ;;  %v2075_v12 = vadd.f32 %v2074_v11, %v2073_v5 }
 0x1b2   :  { %v2164_v14 = vpop.f32.mrf.mxu1 }
 0x1b3   :  { %v1614_v56 = vmax.f32 %v1584_v60, 0.0  ;;  %v1450_v43 = vadd.f32 %v2075_v12, %v2931_v20 }
 0x1b5   :  { %1640 = vst [vmem:[%s3040_s3 + $0xc0] sm:$0xff] %v1614_v56  ;;  %v1587_v17 = vadd.f32 %v1586_v10, %v1450_v43 }
 0x1b7   :  { %v1615_v46 = vmax.f32 %v1587_v17, 0.0 }
 0x1b9   :  { %1641 = vst [vmem:[%s3040_s3 + $0xc8] sm:$0xff] %v1615_v46 }

// kernel: forward.18
= control target key start
LH: loop header
LB: loop body
LE: loop exit
PB: predicated region body
PF: predicated region fallthrough
CT: control target
= control target key end

     0   :  { %s1873_s0 = inlined_call_operand.vmem [shape: f32[20,10,128], index: 0, kind: input, shape index: {}]   ;;  %s1874_s1 = inlined_call_operand.vmem [shape: s32[20,10,128], index: 1, kind: input, shape index: {}]   ;;  %s1875_s2 = inlined_call_operand.vmem [shape: f32[20,2,10,256], index: 2, kind: output, shape index: {}]  }
   0x1   :  { %v674_v0 = vld [vmem:[%s1873_s0] sm:$0xff]  ;;  %v684_v2 = vld [vmem:[%s1873_s0 + $0x8] sm:$0x3]  ;;  %v695_v4 = vld [vmem:[%s1873_s0 + $0x10] sm:$0xff] }
   0x2   :  { %1943 = vst [vmem:[#allocation2_spill] sm:$0xff] %v674_v0  ;;  %v679_v1 = vld [vmem:[%s1874_s1] sm:$0xff]  ;;  %v690_v3 = vld [vmem:[%s1874_s1 + $0x8] sm:$0x3]  ;;  %v700_v5 = vld [vmem:[%s1874_s1 + $0x10] sm:$0xff] }
   0x3   :  { %vm91_vm0 = vcmp.eq.s32.totalorder %v679_v1, 0  ;;  %vm92_vm1 = vcmp.eq.s32.totalorder %v690_v3, 0  ;;  %vm93_vm2 = vcmp.eq.s32.totalorder %v700_v5, 0  ;;  %v708_v7 = vld [vmem:[%s1873_s0 + $0x18] sm:$0x3]  ;;  %v713_v8 = vld [vmem:[%s1873_s0 + $0x20] sm:$0xff] }
   0x4   :  { %v131_v6 = vsel %vm91_vm0, %v674_v0, 0.0  ;;  %v132_v9 = vsel %vm92_vm1, %v684_v2, 0.0  ;;  %v133_v10 = vsel %vm93_vm2, %v695_v4, 0.0  ;;  %v723_v11 = vld [vmem:[%s1874_s1 + $0x18] sm:$0x3]  ;;  %v728_v12 = vld [vmem:[%s1874_s1 + $0x20] sm:$0xff] }
   0x5   :  { %171 = vst [vmem:[%s1875_s2] sm:$0xff] %v131_v6  ;;  %v733_v13 = vld [vmem:[%s1873_s0 + $0x30] sm:$0xff]  ;;  %172 = vst [vmem:[%s1875_s2 + $0x10] sm:$0x3] %v132_v9  ;;  %vm94_vm3 = vcmp.eq.s32.totalorder %v723_v11, 0  ;;  %vm95_vm4 = vcmp.eq.s32.totalorder %v728_v12, 0  ;;  %v782_v22 = vld [vmem:[%s1873_s0 + $0x40] sm:$0xff] }
   0x6   :  { %173 = vst [vmem:[%s1875_s2 + $0x40] sm:$0xff] %v133_v10  ;;  %v746_v14 = vld [vmem:[%s1873_s0 + $0x28] sm:$0x3]  ;;  %v134_v16 = vsel %vm94_vm3, %v708_v7, 0.0  ;;  %v135_v17 = vsel %vm95_vm4, %v713_v8, 0.0  ;;  %v759_v18 = vld [vmem:[%s1874_s1 + $0x30] sm:$0xff] }
   0x7   :  { %v751_v15 = vld [vmem:[%s1874_s1 + $0x28] sm:$0x3]  ;;  %v764_v19 = vld [vmem:[%s1873_s0 + $0x38] sm:$0x3]  ;;  %174 = vst [vmem:[%s1875_s2 + $0x50] sm:$0x3] %v134_v16 }
   0x8   :  { %vm96_vm5 = vcmp.eq.s32.totalorder %v751_v15, 0  ;;  %175 = vst [vmem:[%s1875_s2 + $0x80] sm:$0xff] %v135_v17  ;;  %vm97_vm6 = vcmp.eq.s32.totalorder %v759_v18, 0  ;;  %v777_v21 = vld [vmem:[%s1874_s1 + $0x38] sm:$0x3]  ;;  %v787_v23 = vld [vmem:[%s1874_s1 + $0x40] sm:$0xff] }
   0x9   :  { %v136_v20 = vsel %vm96_vm5, %v746_v14, 0.0  ;;  %v137_v24 = vsel %vm97_vm6, %v733_v13, 0.0  ;;  %vm98_vm7 = vcmp.eq.s32.totalorder %v777_v21, 0  ;;  %vm99_vm8 = vcmp.eq.s32.totalorder %v787_v23, 0  ;;  %v798_v25 = vld [vmem:[%s1873_s0 + $0x48] sm:$0x3] }
   0xa   :  { %176 = vst [vmem:[%s1875_s2 + $0x90] sm:$0x3] %v136_v20  ;;  %v803_v26 = vld [vmem:[%s1873_s0 + $0x50] sm:$0xff]  ;;  %177 = vst [vmem:[%s1875_s2 + $0xc0] sm:$0xff] %v137_v24  ;;  %v138_v27 = vsel %vm98_vm7, %v764_v19, 0.0  ;;  %v139_v28 = vsel %vm99_vm8, %v782_v22, 0.0 }
   0xb   :  { %v813_v29 = vld [vmem:[%s1874_s1 + $0x48] sm:$0x3]  ;;  %v818_v30 = vld [vmem:[%s1874_s1 + $0x50] sm:$0xff]  ;;  %v823_v31 = vld [vmem:[%s1873_s0 + $0x60] sm:$0xff]  ;;  %178 = vst [vmem:[%s1875_s2 + $0xd0] sm:$0x3] %v138_v27 }
   0xc   :  { %179 = vst [vmem:[%s1875_s2 + $0x100] sm:$0xff] %v139_v28  ;;  %vm100_vm9 = vcmp.eq.s32.totalorder %v813_v29, 0  ;;  %vm101_vm10 = vcmp.eq.s32.totalorder %v818_v30, 0  ;;  %v836_v32 = vld [vmem:[%s1873_s0 + $0x58] sm:$0x3]  ;;  %v849_v36 = vld [vmem:[%s1874_s1 + $0x60] sm:$0xff] }
   0xd   :  { %v841_v33 = vld [vmem:[%s1874_s1 + $0x58] sm:$0x3]  ;;  %v140_v34 = vsel %vm100_vm9, %v798_v25, 0.0  ;;  %v141_v35 = vsel %vm101_vm10, %v803_v26, 0.0  ;;  %v854_v37 = vld [vmem:[%s1873_s0 + $0x68] sm:$0x3] }
   0xe   :  { %vm102_vm11 = vcmp.eq.s32.totalorder %v841_v33, 0  ;;  %180 = vst [vmem:[%s1875_s2 + $0x110] sm:$0x3] %v140_v34  ;;  %181 = vst [vmem:[%s1875_s2 + $0x140] sm:$0xff] %v141_v35  ;;  %vm103_vm12 = vcmp.eq.s32.totalorder %v849_v36, 0  ;;  %v872_v40 = vld [vmem:[%s1873_s0 + $0x70] sm:$0xff] }
   0xf   :  { %v142_v38 = vsel %vm102_vm11, %v836_v32, 0.0  ;;  %v867_v39 = vld [vmem:[%s1874_s1 + $0x68] sm:$0x3]  ;;  %v877_v41 = vld [vmem:[%s1874_s1 + $0x70] sm:$0xff]  ;;  %v143_v42 = vsel %vm103_vm12, %v823_v31, 0.0  ;;  %v893_v44 = vld [vmem:[%s1873_s0 + $0x80] sm:$0xff] }
  0x10   :  { %182 = vst [vmem:[%s1875_s2 + $0x150] sm:$0x3] %v142_v38  ;;  %vm104_vm13 = vcmp.eq.s32.totalorder %v867_v39, 0  ;;  %vm105_vm14 = vcmp.eq.s32.totalorder %v877_v41, 0  ;;  %v888_v43 = vld [vmem:[%s1873_s0 + $0x78] sm:$0x3] }
  0x11   :  { %183 = vst [vmem:[%s1875_s2 + $0x180] sm:$0xff] %v143_v42  ;;  %v144_v45 = vsel %vm104_vm13, %v854_v37, 0.0  ;;  %v145_v46 = vsel %vm105_vm14, %v872_v40, 0.0  ;;  %v903_v47 = vld [vmem:[%s1874_s1 + $0x78] sm:$0x3]  ;;  %v908_v48 = vld [vmem:[%s1874_s1 + $0x80] sm:$0xff] }
  0x12   :  { %v913_v49 = vld [vmem:[%s1873_s0 + $0x90] sm:$0xff]  ;;  %184 = vst [vmem:[%s1875_s2 + $0x190] sm:$0x3] %v144_v45  ;;  %185 = vst [vmem:[%s1875_s2 + $0x1c0] sm:$0xff] %v145_v46  ;;  %vm106_vm15 = vcmp.eq.s32.totalorder %v903_v47, 0  ;;  %vm107_vm0 = vcmp.eq.s32.totalorder %v908_v48, 0 }
  0x13   :  { %v926_v50 = vld [vmem:[%s1873_s0 + $0x88] sm:$0x3]  ;;  %v146_v52 = vsel %vm106_vm15, %v888_v43, 0.0  ;;  %v147_v53 = vsel %vm107_vm0, %v893_v44, 0.0  ;;  %v939_v54 = vld [vmem:[%s1874_s1 + $0x90] sm:$0xff]  ;;  %v962_v58 = vld [vmem:[%s1873_s0 + $0xa0] sm:$0xff] }
  0x14   :  { %v931_v51 = vld [vmem:[%s1874_s1 + $0x88] sm:$0x3]  ;;  %v944_v55 = vld [vmem:[%s1873_s0 + $0x98] sm:$0x3]  ;;  %186 = vst [vmem:[%s1875_s2 + $0x1d0] sm:$0x3] %v146_v52 }
  0x15   :  { %vm108_vm1 = vcmp.eq.s32.totalorder %v931_v51, 0  ;;  %187 = vst [vmem:[%s1875_s2 + $0x200] sm:$0xff] %v147_v53  ;;  %vm109_vm2 = vcmp.eq.s32.totalorder %v939_v54, 0  ;;  %v957_v57 = vld [vmem:[%s1874_s1 + $0x98] sm:$0x3]  ;;  %1944 = vst [vmem:[#allocation3_spill] sm:$0xff] %v962_v58 }
  0x16   :  { %v148_v56 = vsel %vm108_vm1, %v926_v50, 0.0  ;;  %v967_v59 = vld [vmem:[%s1874_s1 + $0xa0] sm:$0xff]  ;;  %v149_v60 = vsel %vm109_vm2, %v913_v49, 0.0  ;;  %vm110_vm3 = vcmp.eq.s32.totalorder %v957_v57, 0  ;;  %v978_v61 = vld [vmem:[%s1873_s0 + $0xa8] sm:$0x3] }
  0x17   :  { %188 = vst [vmem:[%s1875_s2 + $0x210] sm:$0x3] %v148_v56  ;;  %vm111_vm4 = vcmp.eq.s32.totalorder %v967_v59, 0  ;;  %1945 = vst [vmem:[#allocation4_spill] sm:$0xff] %v978_v61  ;;  %v983_v62 = vld [vmem:[%s1873_s0 + $0xb0] sm:$0xff]  ;;  %v150_v63 = vsel %vm110_vm3, %v944_v55, 0.0 }
  0x18   :  { %1946 = vst [vmem:[#allocation5_spill] sm:$0xff] %v983_v62  ;;  %189 = vst [vmem:[%s1875_s2 + $0x240] sm:$0xff] %v149_v60  ;;  %v151_v6 = vsel %vm111_vm4, %v962_v58, 0.0  ;;  %v993_v9 = vld [vmem:[%s1874_s1 + $0xa8] sm:$0x3]  ;;  %v998_v10 = vld [vmem:[%s1874_s1 + $0xb0] sm:$0xff] }
  0x19   :  { %1947 = vst [vmem:[#allocation6_spill] sm:$0xff] %v993_v9  ;;  %1948 = vst [vmem:[#allocation7_spill] sm:$0xff] %v998_v10  ;;  %v1003_v16 = vld [vmem:[%s1873_s0 + $0xc0] sm:$0xff]  ;;  %vm112_vm5 = vcmp.eq.s32.totalorder %v993_v9, 0  ;;  %vm113_vm6 = vcmp.eq.s32.totalorder %v998_v10, 0  ;;  %v1052_v42 = vld [vmem:[%s1873_s0 + $0xd0] sm:$0xff] }
  0x1a   :  { %1949 = vst [vmem:[#allocation8_spill] sm:$0xff] %v1003_v16  ;;  %190 = vst [vmem:[%s1875_s2 + $0x250] sm:$0x3] %v150_v63  ;;  %v1016_v17 = vld [vmem:[%s1873_s0 + $0xb8] sm:$0x3]  ;;  %v152_v24 = vsel %vm112_vm5, %v978_v61, 0.0 }
  0x1b   :  { %191 = vst [vmem:[%s1875_s2 + $0x280] sm:$0xff] %v151_v6  ;;  %1950 = vst [vmem:[#allocation9_spill] sm:$0xff] %v1016_v17  ;;  %v1021_v20 = vld [vmem:[%s1874_s1 + $0xb8] sm:$0x3]  ;;  %v153_v27 = vsel %vm113_vm6, %v983_v62, 0.0  ;;  %v1029_v28 = vld [vmem:[%s1874_s1 + $0xc0] sm:$0xff] }
  0x1c   :  { %1951 = vst [vmem:[#allocation10_spill] sm:$0xff] %v1021_v20  ;;  %vm114_vm7 = vcmp.eq.s32.totalorder %v1021_v20, 0  ;;  %1952 = vst [vmem:[#allocation11_spill] sm:$0xff] %v1029_v28  ;;  %v1034_v34 = vld [vmem:[%s1873_s0 + $0xc8] sm:$0x3]  ;;  %vm115_vm8 = vcmp.eq.s32.totalorder %v1029_v28, 0 }
  0x1d   :  { %1953 = vst [vmem:[#allocation12_spill] sm:$0xff] %v1034_v34  ;;  %192 = vst [vmem:[%s1875_s2 + $0x290] sm:$0x3] %v152_v24  ;;  %v154_v35 = vsel %vm114_vm7, %v1016_v17, 0.0  ;;  %v1047_v38 = vld [vmem:[%s1874_s1 + $0xc8] sm:$0x3] }
  0x1e   :  { %193 = vst [vmem:[%s1875_s2 + $0x2c0] sm:$0xff] %v153_v27  ;;  %1954 = vst [vmem:[#allocation13_spill] sm:$0xff] %v1047_v38  ;;  %v1057_v45 = vld [vmem:[%s1874_s1 + $0xd0] sm:$0xff]  ;;  %vm211_vm9 = vcmp.eq.s32.totalorder %v679_v1, 1  ;;  %v155_v46 = vsel %vm115_vm8, %v1003_v16, 0.0  ;;  %vm116_vm10 = vcmp.eq.s32.totalorder %v1047_v38, 0 }
  0x1f   :  { %1955 = vst [vmem:[#allocation14_spill] sm:$0xff] %v1052_v42  ;;  %1956 = vst [vmem:[#allocation15_spill] sm:$0xff] %v1057_v45  ;;  %vm117_vm11 = vcmp.eq.s32.totalorder %v1057_v45, 0  ;;  %v1069_v52 = vld [vmem:[%s1873_s0 + $0xd8] sm:$0x3]  ;;  %v1074_v53 = vld [vmem:[%s1873_s0 + $0xe0] sm:$0xff] }
  0x20   :  { %194 = vst [vmem:[%s1875_s2 + $0x2d0] sm:$0x3] %v154_v35  ;;  %1957 = vst [vmem:[#allocation16_spill] sm:$0xff] %v1069_v52  ;;  %v156_v56 = vsel %vm116_vm10, %v1034_v34, 0.0  ;;  %v157_v60 = vsel %vm117_vm11, %v1052_v42, 0.0  ;;  %v1089_v6 = vld [vmem:[%s1874_s1 + $0xe0] sm:$0xff] }
  0x21   :  { %1958 = vst [vmem:[#allocation17_spill] sm:$0xff] %v1074_v53  ;;  %195 = vst [vmem:[%s1875_s2 + $0x300] sm:$0xff] %v155_v46  ;;  %v1084_v63 = vld [vmem:[%s1874_s1 + $0xd8] sm:$0x3]  ;;  %v1094_v24 = vld [vmem:[%s1873_s0 + $0xf0] sm:$0xff]  ;;  %vm119_vm13 = vcmp.eq.s32.totalorder %v1089_v6, 0 }
  0x22   :  { %1959 = vst [vmem:[#allocation18_spill] sm:$0xff] %v1084_v63  ;;  %1960 = vst [vmem:[#allocation19_spill] sm:$0xff] %v1089_v6  ;;  %vm118_vm12 = vcmp.eq.s32.totalorder %v1084_v63, 0  ;;  %v1107_v27 = vld [vmem:[%s1873_s0 + $0xe8] sm:$0x3]  ;;  %v1184_v42 = vld [vmem:[%s1873_s0 + $0x120] sm:$0xff] }
  0x23   :  { %1961 = vst [vmem:[#allocation20_spill] sm:$0xff] %v1094_v24  ;;  %196 = vst [vmem:[%s1875_s2 + $0x310] sm:$0x3] %v156_v56  ;;  %v1112_v35 = vld [vmem:[%s1874_s1 + $0xe8] sm:$0x3]  ;;  %v158_v46 = vsel %vm118_vm12, %v1069_v52, 0.0 }
  0x24   :  { %197 = vst [vmem:[%s1875_s2 + $0x340] sm:$0xff] %v157_v60  ;;  %1962 = vst [vmem:[#allocation21_spill] sm:$0xff] %v1107_v27  ;;  %v159_v56 = vsel %vm119_vm13, %v1074_v53, 0.0  ;;  %vm120_vm14 = vcmp.eq.s32.totalorder %v1112_v35, 0  ;;  %v1120_v60 = vld [vmem:[%s1874_s1 + $0xf0] sm:$0xff]  ;;  %v1143_v52 = vld [vmem:[%s1873_s0 + $0x100] sm:$0xff] }
  0x25   :  { %1963 = vst [vmem:[#allocation22_spill] sm:$0xff] %v1112_v35  ;;  %1964 = vst [vmem:[#allocation23_spill] sm:$0xff] %v1120_v60  ;;  %v1125_v6 = vld [vmem:[%s1873_s0 + $0xf8] sm:$0x3]  ;;  %v160_v53 = vsel %vm120_vm14, %v1107_v27, 0.0  ;;  %vm121_vm15 = vcmp.eq.s32.totalorder %v1120_v60, 0 }
  0x26   :  { %1965 = vst [vmem:[#allocation24_spill] sm:$0xff] %v1125_v6  ;;  %198 = vst [vmem:[%s1875_s2 + $0x350] sm:$0x3] %v158_v46  ;;  %v1138_v35 = vld [vmem:[%s1874_s1 + $0xf8] sm:$0x3]  ;;  %v1148_v46 = vld [vmem:[%s1874_s1 + $0x100] sm:$0xff] }
  0x27   :  { %199 = vst [vmem:[%s1875_s2 + $0x380] sm:$0xff] %v159_v56  ;;  %1966 = vst [vmem:[#allocation25_spill] sm:$0xff] %v1138_v35  ;;  %v161_v56 = vsel %vm121_vm15, %v1094_v24, 0.0  ;;  %vm122_vm0 = vcmp.eq.s32.totalorder %v1138_v35, 0  ;;  %vm123_vm1 = vcmp.eq.s32.totalorder %v1148_v46, 0  ;;  %v1164_v27 = vld [vmem:[%s1873_s0 + $0x110] sm:$0xff] }
  0x28   :  { %1967 = vst [vmem:[#allocation26_spill] sm:$0xff] %v1143_v52  ;;  %1968 = vst [vmem:[#allocation27_spill] sm:$0xff] %v1148_v46  ;;  %v1159_v60 = vld [vmem:[%s1873_s0 + $0x108] sm:$0x3]  ;;  %v163_v24 = vsel %vm123_vm1, %v1143_v52, 0.0  ;;  %v1179_v35 = vld [vmem:[%s1874_s1 + $0x110] sm:$0xff] }
  0x29   :  { %200 = vst [vmem:[%s1875_s2 + $0x390] sm:$0x3] %v160_v53  ;;  %1969 = vst [vmem:[#allocation28_spill] sm:$0xff] %v1159_v60  ;;  %v162_v53 = vsel %vm122_vm0, %v1125_v6, 0.0  ;;  %v1174_v46 = vld [vmem:[%s1874_s1 + $0x108] sm:$0x3] }
  0x2a   :  { %1970 = vst [vmem:[#allocation29_spill] sm:$0xff] %v1164_v27  ;;  %201 = vst [vmem:[%s1875_s2 + $0x3c0] sm:$0xff] %v161_v56  ;;  %vm124_vm2 = vcmp.eq.s32.totalorder %v1174_v46, 0  ;;  %vm125_vm3 = vcmp.eq.s32.totalorder %v1179_v35, 0  ;;  %v1197_v56 = vld [vmem:[%s1873_s0 + $0x118] sm:$0x3] }
  0x2b   :  { %1971 = vst [vmem:[#allocation30_spill] sm:$0xff] %v1174_v46  ;;  %1972 = vst [vmem:[#allocation31_spill] sm:$0xff] %v1179_v35  ;;  %v1202_v52 = vld [vmem:[%s1874_s1 + $0x118] sm:$0x3]  ;;  %v165_v6 = vsel %vm125_vm3, %v1164_v27, 0.0  ;;  %vm212_vm8 = vcmp.eq.s32.totalorder %v690_v3, 1 }
  0x2c   :  { %1973 = vst [vmem:[#allocation32_spill] sm:$0xff] %v1184_v42  ;;  %202 = vst [vmem:[%s1875_s2 + $0x3d0] sm:$0x3] %v162_v53  ;;  %v164_v53 = vsel %vm124_vm2, %v1159_v60, 0.0  ;;  %vm126_vm4 = vcmp.eq.s32.totalorder %v1202_v52, 0  ;;  %v1233_v60 = vld [vmem:[%s1873_s0 + $0x130] sm:$0xff] }
  0x2d   :  { %203 = vst [vmem:[%s1875_s2 + $0x400] sm:$0xff] %v163_v24  ;;  %1974 = vst [vmem:[#allocation33_spill] sm:$0xff] %v1197_v56  ;;  %v1210_v24 = vld [vmem:[%s1874_s1 + $0x120] sm:$0xff]  ;;  %v1215_v35 = vld [vmem:[%s1873_s0 + $0x128] sm:$0x3]  ;;  %v166_v27 = vsel %vm126_vm4, %v1197_v56, 0.0 }
  0x2e   :  { %1975 = vst [vmem:[#allocation34_spill] sm:$0xff] %v1202_v52  ;;  %1976 = vst [vmem:[#allocation35_spill] sm:$0xff] %v1210_v24  ;;  %vm127_vm5 = vcmp.eq.s32.totalorder %v1210_v24, 0  ;;  %v1228_v52 = vld [vmem:[%s1874_s1 + $0x128] sm:$0x3]  ;;  %v251_v56 = vsel %vm211_vm9, %v674_v0, 0.0 }
  0x2f   :  { %204 = vst [vmem:[%s1875_s2 + $0x410] sm:$0x3] %v164_v53  ;;  %205 = vst [vmem:[%s1875_s2 + $0x440] sm:$0xff] %v165_v6  ;;  %v1238_v53 = vld [vmem:[%s1874_s1 + $0x130] sm:$0xff]  ;;  %v167_v6 = vsel %vm127_vm5, %v1184_v42, 0.0  ;;  %vm128_vm6 = vcmp.eq.s32.totalorder %v1228_v52, 0 }
  0x30   :  { %1977 = vst [vmem:[#allocation36_spill] sm:$0xff] %v1238_v53  ;;  %206 = vst [vmem:[%s1875_s2 + $0x450] sm:$0x3] %v166_v27  ;;  %vm129_vm7 = vcmp.eq.s32.totalorder %v1238_v53, 0  ;;  %v1249_v24 = vld [vmem:[%s1873_s0 + $0x138] sm:$0x3] }
  0x31   :  { %207 = vst [vmem:[%s1875_s2 + $0x480] sm:$0xff] %v167_v6  ;;  %v168_v27 = vsel %vm128_vm6, %v1215_v35, 0.0  ;;  %v169_v42 = vsel %vm129_vm7, %v1233_v60, 0.0  ;;  %v1262_v53 = vld [vmem:[%s1874_s1 + $0x138] sm:$0x3]  ;;  %291 = vst [vmem:[%s1875_s2 + $0x8] sm:$0xff] %v251_v56 }
  0x32   :  { %1978 = vst [vmem:[#allocation37_spill] sm:$0xff] %v1262_v53  ;;  %vm213_vm9 = vcmp.eq.s32.totalorder %v700_v5, 1  ;;  %208 = vst [vmem:[%s1875_s2 + $0x490] sm:$0x3] %v168_v27  ;;  %vm130_vm10 = vcmp.eq.s32.totalorder %v1262_v53, 0  ;;  %v252_v6 = vsel %vm212_vm8, %v684_v2, 0.0 }
  0x33   :  { %209 = vst [vmem:[%s1875_s2 + $0x4c0] sm:$0xff] %v169_v42  ;;  %v253_v0 = vsel %vm213_vm9, %v695_v4, 0.0  ;;  %vm214_vm11 = vcmp.eq.s32.totalorder %v723_v11, 1  ;;  %v170_v56 = vsel %vm130_vm10, %v1249_v24, 0.0  ;;  %292 = vst [vmem:[%s1875_s2 + $0x18] sm:$0x3] %v252_v6 }
  0x34   :  { %293 = vst [vmem:[%s1875_s2 + $0x48] sm:$0xff] %v253_v0  ;;  %v254_v42 = vsel %vm214_vm11, %v708_v7, 0.0  ;;  %vm215_vm12 = vcmp.eq.s32.totalorder %v728_v12, 1  ;;  %vm216_vm13 = vcmp.eq.s32.totalorder %v751_v15, 1  ;;  %210 = vst [vmem:[%s1875_s2 + $0x4d0] sm:$0x3] %v170_v56 }
  0x35   :  { %294 = vst [vmem:[%s1875_s2 + $0x58] sm:$0x3] %v254_v42  ;;  %v255_v27 = vsel %vm215_vm12, %v713_v8, 0.0  ;;  %v256_v6 = vsel %vm216_vm13, %v746_v14, 0.0  ;;  %vm217_vm14 = vcmp.eq.s32.totalorder %v759_v18, 1  ;;  %vm218_vm15 = vcmp.eq.s32.totalorder %v777_v21, 1 }
  0x36   :  { %295 = vst [vmem:[%s1875_s2 + $0x88] sm:$0xff] %v255_v27  ;;  %296 = vst [vmem:[%s1875_s2 + $0x98] sm:$0x3] %v256_v6  ;;  %v257_v0 = vsel %vm217_vm14, %v733_v13, 0.0  ;;  %v258_v56 = vsel %vm218_vm15, %v764_v19, 0.0  ;;  %vm219_vm0 = vcmp.eq.s32.totalorder %v787_v23, 1 }
  0x37   :  { %vm220_vm1 = vcmp.eq.s32.totalorder %v813_v29, 1  ;;  %297 = vst [vmem:[%s1875_s2 + $0xc8] sm:$0xff] %v257_v0  ;;  %298 = vst [vmem:[%s1875_s2 + $0xd8] sm:$0x3] %v258_v56  ;;  %v259_v42 = vsel %vm219_vm0, %v782_v22, 0.0  ;;  %vm221_vm2 = vcmp.eq.s32.totalorder %v818_v30, 1 }
  0x38   :  { %v260_v27 = vsel %vm220_vm1, %v798_v25, 0.0  ;;  %vm222_vm3 = vcmp.eq.s32.totalorder %v841_v33, 1  ;;  %299 = vst [vmem:[%s1875_s2 + $0x108] sm:$0xff] %v259_v42  ;;  %v261_v6 = vsel %vm221_vm2, %v803_v26, 0.0  ;;  %vm223_vm4 = vcmp.eq.s32.totalorder %v849_v36, 1 }
  0x39   :  { %300 = vst [vmem:[%s1875_s2 + $0x118] sm:$0x3] %v260_v27  ;;  %v262_v0 = vsel %vm222_vm3, %v836_v32, 0.0  ;;  %vm224_vm5 = vcmp.eq.s32.totalorder %v867_v39, 1  ;;  %301 = vst [vmem:[%s1875_s2 + $0x148] sm:$0xff] %v261_v6  ;;  %v263_v56 = vsel %vm223_vm4, %v823_v31, 0.0 }
  0x3a   :  { %302 = vst [vmem:[%s1875_s2 + $0x158] sm:$0x3] %v262_v0  ;;  %v264_v42 = vsel %vm224_vm5, %v854_v37, 0.0  ;;  %vm225_vm6 = vcmp.eq.s32.totalorder %v877_v41, 1  ;;  %vm226_vm7 = vcmp.eq.s32.totalorder %v903_v47, 1  ;;  %303 = vst [vmem:[%s1875_s2 + $0x188] sm:$0xff] %v263_v56 }
  0x3b   :  { %304 = vst [vmem:[%s1875_s2 + $0x198] sm:$0x3] %v264_v42  ;;  %v265_v27 = vsel %vm225_vm6, %v872_v40, 0.0  ;;  %v266_v6 = vsel %vm226_vm7, %v888_v43, 0.0  ;;  %vm227_vm8 = vcmp.eq.s32.totalorder %v908_v48, 1  ;;  %vm228_vm9 = vcmp.eq.s32.totalorder %v931_v51, 1 }
  0x3c   :  { %305 = vst [vmem:[%s1875_s2 + $0x1c8] sm:$0xff] %v265_v27  ;;  %306 = vst [vmem:[%s1875_s2 + $0x1d8] sm:$0x3] %v266_v6  ;;  %v267_v0 = vsel %vm227_vm8, %v893_v44, 0.0  ;;  %v268_v56 = vsel %vm228_vm9, %v926_v50, 0.0  ;;  %vm229_vm10 = vcmp.eq.s32.totalorder %v939_v54, 1 }
  0x3d   :  { %vm230_vm11 = vcmp.eq.s32.totalorder %v957_v57, 1  ;;  %307 = vst [vmem:[%s1875_s2 + $0x208] sm:$0xff] %v267_v0  ;;  %308 = vst [vmem:[%s1875_s2 + $0x218] sm:$0x3] %v268_v56  ;;  %v269_v42 = vsel %vm229_vm10, %v913_v49, 0.0  ;;  %vm231_vm12 = vcmp.eq.s32.totalorder %v967_v59, 1 }
  0x3e   :  { %v270_v27 = vsel %vm230_vm11, %v944_v55, 0.0  ;;  %vm232_vm13 = vcmp.eq.s32.totalorder %v993_v9, 1  ;;  %309 = vst [vmem:[%s1875_s2 + $0x248] sm:$0xff] %v269_v42  ;;  %v271_v6 = vsel %vm231_vm12, %v962_v58, 0.0  ;;  %vm233_vm14 = vcmp.eq.s32.totalorder %v998_v10, 1 }
  0x3f   :  { %310 = vst [vmem:[%s1875_s2 + $0x258] sm:$0x3] %v270_v27  ;;  %v272_v0 = vsel %vm232_vm13, %v978_v61, 0.0  ;;  %vm234_vm15 = vcmp.eq.s32.totalorder %v1021_v20, 1  ;;  %311 = vst [vmem:[%s1875_s2 + $0x288] sm:$0xff] %v271_v6  ;;  %v273_v56 = vsel %vm233_vm14, %v983_v62, 0.0 }
  0x40   :  { %312 = vst [vmem:[%s1875_s2 + $0x298] sm:$0x3] %v272_v0  ;;  %v274_v42 = vsel %vm234_vm15, %v1016_v17, 0.0  ;;  %vm235_vm0 = vcmp.eq.s32.totalorder %v1029_v28, 1  ;;  %vm236_vm1 = vcmp.eq.s32.totalorder %v1047_v38, 1  ;;  %313 = vst [vmem:[%s1875_s2 + $0x2c8] sm:$0xff] %v273_v56 }
  0x41   :  { %314 = vst [vmem:[%s1875_s2 + $0x2d8] sm:$0x3] %v274_v42  ;;  %v275_v27 = vsel %vm235_vm0, %v1003_v16, 0.0  ;;  %v276_v6 = vsel %vm236_vm1, %v1034_v34, 0.0  ;;  %vm237_vm2 = vcmp.eq.s32.totalorder %v1057_v45, 1  ;;  %vm238_vm3 = vcmp.eq.s32.totalorder %v1084_v63, 1 }
  0x42   :  { %315 = vst [vmem:[%s1875_s2 + $0x308] sm:$0xff] %v275_v27  ;;  %316 = vst [vmem:[%s1875_s2 + $0x318] sm:$0x3] %v276_v6  ;;  %v1979_v0 = vld [vmem:[#allocation14_spill] sm:$0xff]  ;;  %v1980_v38 = vld [vmem:[#allocation16_spill] sm:$0xff]  ;;  %vm244_vm9 = vcmp.eq.s32.totalorder %v1174_v46, 1 }
  0x43   :  { %v277_v56 = vsel %vm237_vm2, %v1979_v0, 0.0  ;;  %v278_v42 = vsel %vm238_vm3, %v1980_v38, 0.0  ;;  %v1981_v28 = vld [vmem:[#allocation19_spill] sm:$0xff]  ;;  %v1982_v16 = vld [vmem:[#allocation22_spill] sm:$0xff]  ;;  %v1983_v27 = vld [vmem:[#allocation17_spill] sm:$0xff]  ;;  %vm248_vm13 = vcmp.eq.s32.totalorder %v1228_v52, 1 }
  0x44   :  { %vm239_vm4 = vcmp.eq.s32.totalorder %v1981_v28, 1  ;;  %vm240_vm5 = vcmp.eq.s32.totalorder %v1982_v16, 1  ;;  %317 = vst [vmem:[%s1875_s2 + $0x348] sm:$0xff] %v277_v56  ;;  %318 = vst [vmem:[%s1875_s2 + $0x358] sm:$0x3] %v278_v42  ;;  %v1984_v45 = vld [vmem:[#allocation21_spill] sm:$0xff] }
  0x45   :  { %v279_v63 = vsel %vm239_vm4, %v1983_v27, 0.0  ;;  %v280_v6 = vsel %vm240_vm5, %v1984_v45, 0.0  ;;  %v1985_v34 = vld [vmem:[#allocation23_spill] sm:$0xff]  ;;  %v1986_v0 = vld [vmem:[#allocation25_spill] sm:$0xff]  ;;  %v1987_v56 = vld [vmem:[#allocation20_spill] sm:$0xff]  ;;  %vm250_vm15 = vcmp.eq.s32.totalorder %v1262_v53, 1 }
  0x46   :  { %vm241_vm6 = vcmp.eq.s32.totalorder %v1985_v34, 1  ;;  %vm242_vm7 = vcmp.eq.s32.totalorder %v1986_v0, 1  ;;  %319 = vst [vmem:[%s1875_s2 + $0x388] sm:$0xff] %v279_v63  ;;  %320 = vst [vmem:[%s1875_s2 + $0x398] sm:$0x3] %v280_v6  ;;  %v1988_v28 = vld [vmem:[#allocation24_spill] sm:$0xff] }
  0x47   :  { %v281_v16 = vsel %vm241_vm6, %v1987_v56, 0.0  ;;  %v282_v42 = vsel %vm242_vm7, %v1988_v28, 0.0  ;;  %v1989_v38 = vld [vmem:[#allocation27_spill] sm:$0xff]  ;;  %v1990_v63 = vld [vmem:[#allocation26_spill] sm:$0xff]  ;;  %v1991_v34 = vld [vmem:[#allocation28_spill] sm:$0xff]  ;;  %vm331_vm0 = vcmp.eq.s32.totalorder %v679_v1, 2 }
  0x48   :  { %vm243_vm8 = vcmp.eq.s32.totalorder %v1989_v38, 1  ;;  %321 = vst [vmem:[%s1875_s2 + $0x3c8] sm:$0xff] %v281_v16  ;;  %322 = vst [vmem:[%s1875_s2 + $0x3d8] sm:$0x3] %v282_v42  ;;  %v284_v6 = vsel %vm244_vm9, %v1991_v34, 0.0  ;;  %v1992_v45 = vld [vmem:[#allocation31_spill] sm:$0xff] }
  0x49   :  { %v283_v0 = vsel %vm243_vm8, %v1990_v63, 0.0  ;;  %vm245_vm10 = vcmp.eq.s32.totalorder %v1992_v45, 1  ;;  %v1993_v56 = vld [vmem:[#allocation34_spill] sm:$0xff]  ;;  %324 = vst [vmem:[%s1875_s2 + $0x418] sm:$0x3] %v284_v6  ;;  %v1994_v16 = vld [vmem:[#allocation29_spill] sm:$0xff] }
  0x4a   :  { %vm246_vm11 = vcmp.eq.s32.totalorder %v1993_v56, 1  ;;  %323 = vst [vmem:[%s1875_s2 + $0x408] sm:$0xff] %v283_v0  ;;  %v285_v46 = vsel %vm245_vm10, %v1994_v16, 0.0  ;;  %v1995_v38 = vld [vmem:[#allocation33_spill] sm:$0xff]  ;;  %v1996_v28 = vld [vmem:[#allocation35_spill] sm:$0xff]  ;;  %v1997_v0 = vld [vmem:[#allocation32_spill] sm:$0xff] }
  0x4b   :  { %v286_v42 = vsel %vm246_vm11, %v1995_v38, 0.0  ;;  %vm247_vm12 = vcmp.eq.s32.totalorder %v1996_v28, 1  ;;  %325 = vst [vmem:[%s1875_s2 + $0x448] sm:$0xff] %v285_v46  ;;  %v288_v6 = vsel %vm248_vm13, %v1215_v35, 0.0  ;;  %v1998_v45 = vld [vmem:[#allocation36_spill] sm:$0xff]  ;;  %vm332_vm1 = vcmp.eq.s32.totalorder %v690_v3, 2 }
  0x4c   :  { %326 = vst [vmem:[%s1875_s2 + $0x458] sm:$0x3] %v286_v42  ;;  %v287_v56 = vsel %vm247_vm12, %v1997_v0, 0.0  ;;  %vm249_vm14 = vcmp.eq.s32.totalorder %v1998_v45, 1  ;;  %328 = vst [vmem:[%s1875_s2 + $0x498] sm:$0x3] %v288_v6 }
  0x4d   :  { %327 = vst [vmem:[%s1875_s2 + $0x488] sm:$0xff] %v287_v56  ;;  %v289_v46 = vsel %vm249_vm14, %v1233_v60, 0.0  ;;  %v290_v42 = vsel %vm250_vm15, %v1249_v24, 0.0  ;;  %v1999_v56 = vld [vmem:[#allocation2_spill] sm:$0xff]  ;;  %v372_v6 = vsel %vm332_vm1, %v684_v2, 0.0  ;;  %vm333_vm2 = vcmp.eq.s32.totalorder %v700_v5, 2 }
  0x4e   :  { %329 = vst [vmem:[%s1875_s2 + $0x4c8] sm:$0xff] %v289_v46  ;;  %330 = vst [vmem:[%s1875_s2 + $0x4d8] sm:$0x3] %v290_v42  ;;  %v371_v53 = vsel %vm331_vm0, %v1999_v56, 0.0  ;;  %vm334_vm3 = vcmp.eq.s32.totalorder %v723_v11, 2  ;;  %v373_v46 = vsel %vm333_vm2, %v695_v4, 0.0 }
  0x4f   :  { %576 = vst [vmem:[%s1875_s2 + $0x20] sm:$0xff] %v371_v53  ;;  %577 = vst [vmem:[%s1875_s2 + $0x30] sm:$0x3] %v372_v6  ;;  %v374_v42 = vsel %vm334_vm3, %v708_v7, 0.0  ;;  %vm335_vm4 = vcmp.eq.s32.totalorder %v728_v12, 2  ;;  %vm336_vm5 = vcmp.eq.s32.totalorder %v751_v15, 2 }
  0x50   :  { %578 = vst [vmem:[%s1875_s2 + $0x60] sm:$0xff] %v373_v46  ;;  %579 = vst [vmem:[%s1875_s2 + $0x70] sm:$0x3] %v374_v42  ;;  %v375_v53 = vsel %vm335_vm4, %v713_v8, 0.0  ;;  %v376_v6 = vsel %vm336_vm5, %v746_v14, 0.0  ;;  %vm337_vm6 = vcmp.eq.s32.totalorder %v759_v18, 2 }
  0x51   :  { %vm338_vm7 = vcmp.eq.s32.totalorder %v777_v21, 2  ;;  %580 = vst [vmem:[%s1875_s2 + $0xa0] sm:$0xff] %v375_v53  ;;  %581 = vst [vmem:[%s1875_s2 + $0xb0] sm:$0x3] %v376_v6  ;;  %v377_v46 = vsel %vm337_vm6, %v733_v13, 0.0  ;;  %vm339_vm8 = vcmp.eq.s32.totalorder %v787_v23, 2 }
  0x52   :  { %v378_v42 = vsel %vm338_vm7, %v764_v19, 0.0  ;;  %vm340_vm9 = vcmp.eq.s32.totalorder %v813_v29, 2  ;;  %582 = vst [vmem:[%s1875_s2 + $0xe0] sm:$0xff] %v377_v46  ;;  %v379_v53 = vsel %vm339_vm8, %v782_v22, 0.0  ;;  %vm341_vm10 = vcmp.eq.s32.totalorder %v818_v30, 2 }
  0x53   :  { %583 = vst [vmem:[%s1875_s2 + $0xf0] sm:$0x3] %v378_v42  ;;  %v380_v6 = vsel %vm340_vm9, %v798_v25, 0.0  ;;  %vm342_vm11 = vcmp.eq.s32.totalorder %v841_v33, 2  ;;  %584 = vst [vmem:[%s1875_s2 + $0x120] sm:$0xff] %v379_v53  ;;  %v381_v46 = vsel %vm341_vm10, %v803_v26, 0.0 }
  0x54   :  { %585 = vst [vmem:[%s1875_s2 + $0x130] sm:$0x3] %v380_v6  ;;  %v382_v42 = vsel %vm342_vm11, %v836_v32, 0.0  ;;  %vm343_vm12 = vcmp.eq.s32.totalorder %v849_v36, 2  ;;  %vm344_vm13 = vcmp.eq.s32.totalorder %v867_v39, 2  ;;  %586 = vst [vmem:[%s1875_s2 + $0x160] sm:$0xff] %v381_v46 }
  0x55   :  { %587 = vst [vmem:[%s1875_s2 + $0x170] sm:$0x3] %v382_v42  ;;  %v383_v53 = vsel %vm343_vm12, %v823_v31, 0.0  ;;  %v384_v6 = vsel %vm344_vm13, %v854_v37, 0.0  ;;  %vm345_vm14 = vcmp.eq.s32.totalorder %v877_v41, 2  ;;  %vm346_vm15 = vcmp.eq.s32.totalorder %v903_v47, 2 }
  0x56   :  { %588 = vst [vmem:[%s1875_s2 + $0x1a0] sm:$0xff] %v383_v53  ;;  %589 = vst [vmem:[%s1875_s2 + $0x1b0] sm:$0x3] %v384_v6  ;;  %v385_v46 = vsel %vm345_vm14, %v872_v40, 0.0  ;;  %v386_v42 = vsel %vm346_vm15, %v888_v43, 0.0  ;;  %vm347_vm0 = vcmp.eq.s32.totalorder %v908_v48, 2 }
  0x57   :  { %vm348_vm1 = vcmp.eq.s32.totalorder %v931_v51, 2  ;;  %590 = vst [vmem:[%s1875_s2 + $0x1e0] sm:$0xff] %v385_v46  ;;  %591 = vst [vmem:[%s1875_s2 + $0x1f0] sm:$0x3] %v386_v42  ;;  %v387_v53 = vsel %vm347_vm0, %v893_v44, 0.0  ;;  %vm349_vm2 = vcmp.eq.s32.totalorder %v939_v54, 2 }
  0x58   :  { %v388_v6 = vsel %vm348_vm1, %v926_v50, 0.0  ;;  %vm350_vm3 = vcmp.eq.s32.totalorder %v957_v57, 2  ;;  %592 = vst [vmem:[%s1875_s2 + $0x220] sm:$0xff] %v387_v53  ;;  %v389_v46 = vsel %vm349_vm2, %v913_v49, 0.0  ;;  %vm351_vm4 = vcmp.eq.s32.totalorder %v967_v59, 2 }
  0x59   :  { %593 = vst [vmem:[%s1875_s2 + $0x230] sm:$0x3] %v388_v6  ;;  %v390_v42 = vsel %vm350_vm3, %v944_v55, 0.0  ;;  %vm352_vm5 = vcmp.eq.s32.totalorder %v993_v9, 2  ;;  %594 = vst [vmem:[%s1875_s2 + $0x260] sm:$0xff] %v389_v46  ;;  %v391_v53 = vsel %vm351_vm4, %v962_v58, 0.0 }
  0x5a   :  { %595 = vst [vmem:[%s1875_s2 + $0x270] sm:$0x3] %v390_v42  ;;  %v392_v6 = vsel %vm352_vm5, %v978_v61, 0.0  ;;  %vm353_vm6 = vcmp.eq.s32.totalorder %v998_v10, 2  ;;  %vm354_vm7 = vcmp.eq.s32.totalorder %v1021_v20, 2  ;;  %596 = vst [vmem:[%s1875_s2 + $0x2a0] sm:$0xff] %v391_v53 }
  0x5b   :  { %597 = vst [vmem:[%s1875_s2 + $0x2b0] sm:$0x3] %v392_v6  ;;  %v393_v46 = vsel %vm353_vm6, %v983_v62, 0.0  ;;  %v394_v42 = vsel %vm354_vm7, %v1016_v17, 0.0  ;;  %v2000_v9 = vld [vmem:[#allocation11_spill] sm:$0xff]  ;;  %v2001_v58 = vld [vmem:[#allocation13_spill] sm:$0xff] }
  0x5c   :  { %vm355_vm8 = vcmp.eq.s32.totalorder %v2000_v9, 2  ;;  %vm356_vm9 = vcmp.eq.s32.totalorder %v2001_v58, 2  ;;  %598 = vst [vmem:[%s1875_s2 + $0x2e0] sm:$0xff] %v393_v46  ;;  %599 = vst [vmem:[%s1875_s2 + $0x2f0] sm:$0x3] %v394_v42  ;;  %v2002_v53 = vld [vmem:[#allocation8_spill] sm:$0xff] }
  0x5d   :  { %v395_v20 = vsel %vm355_vm8, %v2002_v53, 0.0  ;;  %v2003_v10 = vld [vmem:[#allocation12_spill] sm:$0xff]  ;;  %v2004_v61 = vld [vmem:[#allocation15_spill] sm:$0xff]  ;;  %v2005_v62 = vld [vmem:[#allocation18_spill] sm:$0xff]  ;;  %vm367_vm4 = vcmp.eq.s32.totalorder %v1996_v28, 2  ;;  %vm368_vm5 = vcmp.eq.s32.totalorder %v1228_v52, 2 }
  0x5e   :  { %v396_v6 = vsel %vm356_vm9, %v2003_v10, 0.0  ;;  %vm357_vm10 = vcmp.eq.s32.totalorder %v2004_v61, 2  ;;  %vm358_vm11 = vcmp.eq.s32.totalorder %v2005_v62, 2  ;;  %600 = vst [vmem:[%s1875_s2 + $0x320] sm:$0xff] %v395_v20  ;;  %v2006_v46 = vld [vmem:[#allocation14_spill] sm:$0xff]  ;;  %v2007_v9 = vld [vmem:[#allocation16_spill] sm:$0xff] }
  0x5f   :  { %601 = vst [vmem:[%s1875_s2 + $0x330] sm:$0x3] %v396_v6  ;;  %v397_v58 = vsel %vm357_vm10, %v2006_v46, 0.0  ;;  %v398_v42 = vsel %vm358_vm11, %v2007_v9, 0.0  ;;  %v2008_v17 = vld [vmem:[#allocation19_spill] sm:$0xff]  ;;  %v2009_v53 = vld [vmem:[#allocation22_spill] sm:$0xff] }
  0x60   :  { %vm359_vm12 = vcmp.eq.s32.totalorder %v2008_v17, 2  ;;  %vm360_vm13 = vcmp.eq.s32.totalorder %v2009_v53, 2  ;;  %602 = vst [vmem:[%s1875_s2 + $0x360] sm:$0xff] %v397_v58  ;;  %603 = vst [vmem:[%s1875_s2 + $0x370] sm:$0x3] %v398_v42  ;;  %v2010_v62 = vld [vmem:[#allocation21_spill] sm:$0xff] }
  0x61   :  { %v399_v20 = vsel %vm359_vm12, %v1983_v27, 0.0  ;;  %v400_v6 = vsel %vm360_vm13, %v2010_v62, 0.0  ;;  %v2011_v61 = vld [vmem:[#allocation23_spill] sm:$0xff]  ;;  %v2012_v46 = vld [vmem:[#allocation25_spill] sm:$0xff]  ;;  %v2013_v58 = vld [vmem:[#allocation20_spill] sm:$0xff]  ;;  %vm369_vm6 = vcmp.eq.s32.totalorder %v1998_v45, 2 }
  0x62   :  { %vm361_vm14 = vcmp.eq.s32.totalorder %v2011_v61, 2  ;;  %vm362_vm15 = vcmp.eq.s32.totalorder %v2012_v46, 2  ;;  %604 = vst [vmem:[%s1875_s2 + $0x3a0] sm:$0xff] %v399_v20  ;;  %605 = vst [vmem:[%s1875_s2 + $0x3b0] sm:$0x3] %v400_v6  ;;  %v2014_v17 = vld [vmem:[#allocation24_spill] sm:$0xff] }
  0x63   :  { %v401_v53 = vsel %vm361_vm14, %v2013_v58, 0.0  ;;  %v402_v42 = vsel %vm362_vm15, %v2014_v17, 0.0  ;;  %v2015_v9 = vld [vmem:[#allocation27_spill] sm:$0xff]  ;;  %v2016_v27 = vld [vmem:[#allocation30_spill] sm:$0xff]  ;;  %vm452_vm8 = vcmp.eq.s32.totalorder %v679_v1, 3  ;;  %vm453_vm9 = vcmp.eq.s32.totalorder %v690_v3, 3 }
  0x64   :  { %vm363_vm0 = vcmp.eq.s32.totalorder %v2015_v9, 2  ;;  %vm364_vm1 = vcmp.eq.s32.totalorder %v2016_v27, 2  ;;  %606 = vst [vmem:[%s1875_s2 + $0x3e0] sm:$0xff] %v401_v53  ;;  %607 = vst [vmem:[%s1875_s2 + $0x3f0] sm:$0x3] %v402_v42  ;;  %v2017_v46 = vld [vmem:[#allocation31_spill] sm:$0xff] }
  0x65   :  { %v403_v20 = vsel %vm363_vm0, %v1990_v63, 0.0  ;;  %v404_v6 = vsel %vm364_vm1, %v1991_v34, 0.0  ;;  %vm365_vm2 = vcmp.eq.s32.totalorder %v2017_v46, 2  ;;  %v2018_v58 = vld [vmem:[#allocation34_spill] sm:$0xff]  ;;  %vm454_vm10 = vcmp.eq.s32.totalorder %v700_v5, 3 }
  0x66   :  { %vm366_vm3 = vcmp.eq.s32.totalorder %v2018_v58, 2  ;;  %608 = vst [vmem:[%s1875_s2 + $0x420] sm:$0xff] %v403_v20  ;;  %609 = vst [vmem:[%s1875_s2 + $0x430] sm:$0x3] %v404_v6  ;;  %v405_v53 = vsel %vm365_vm2, %v1994_v16, 0.0  ;;  %v407_v20 = vsel %vm367_vm4, %v1997_v0, 0.0 }
  0x67   :  { %v406_v42 = vsel %vm366_vm3, %v1995_v38, 0.0  ;;  %610 = vst [vmem:[%s1875_s2 + $0x460] sm:$0xff] %v405_v53  ;;  %v408_v6 = vsel %vm368_vm5, %v1215_v35, 0.0  ;;  %v2019_v16 = vld [vmem:[#allocation37_spill] sm:$0xff]  ;;  %612 = vst [vmem:[%s1875_s2 + $0x4a0] sm:$0xff] %v407_v20  ;;  %v409_v53 = vsel %vm369_vm6, %v1233_v60, 0.0 }
  0x68   :  { %611 = vst [vmem:[%s1875_s2 + $0x470] sm:$0x3] %v406_v42  ;;  %vm370_vm7 = vcmp.eq.s32.totalorder %v2019_v16, 2  ;;  %613 = vst [vmem:[%s1875_s2 + $0x4b0] sm:$0x3] %v408_v6  ;;  %v492_v20 = vsel %vm452_vm8, %v1999_v56, 0.0 }
  0x69   :  { %v410_v42 = vsel %vm370_vm7, %v1249_v24, 0.0  ;;  %614 = vst [vmem:[%s1875_s2 + $0x4e0] sm:$0xff] %v409_v53  ;;  %v493_v6 = vsel %vm453_vm9, %v684_v2, 0.0  ;;  %vm455_vm11 = vcmp.eq.s32.totalorder %v723_v11, 3  ;;  %616 = vst [vmem:[%s1875_s2 + $0x28] sm:$0xff] %v492_v20  ;;  %v494_v1 = vsel %vm454_vm10, %v695_v4, 0.0 }
  0x6a   :  { %615 = vst [vmem:[%s1875_s2 + $0x4f0] sm:$0x3] %v410_v42  ;;  %617 = vst [vmem:[%s1875_s2 + $0x38] sm:$0x3] %v493_v6  ;;  %v495_v3 = vsel %vm455_vm11, %v708_v7, 0.0  ;;  %vm456_vm12 = vcmp.eq.s32.totalorder %v728_v12, 3 }
  0x6b   :  { %vm457_vm13 = vcmp.eq.s32.totalorder %v751_v15, 3  ;;  %618 = vst [vmem:[%s1875_s2 + $0x68] sm:$0xff] %v494_v1  ;;  %619 = vst [vmem:[%s1875_s2 + $0x78] sm:$0x3] %v495_v3  ;;  %v496_v2 = vsel %vm456_vm12, %v713_v8, 0.0  ;;  %vm458_vm14 = vcmp.eq.s32.totalorder %v759_v18, 3 }
  0x6c   :  { %v497_v5 = vsel %vm457_vm13, %v746_v14, 0.0  ;;  %vm459_vm15 = vcmp.eq.s32.totalorder %v777_v21, 3  ;;  %620 = vst [vmem:[%s1875_s2 + $0xa8] sm:$0xff] %v496_v2  ;;  %v498_v4 = vsel %vm458_vm14, %v733_v13, 0.0  ;;  %vm460_vm0 = vcmp.eq.s32.totalorder %v787_v23, 3  ;;  %v2034_v56 = vld [vmem:[#allocation19_spill] sm:$0xff] }
  0x6d   :  { %621 = vst [vmem:[%s1875_s2 + $0xb8] sm:$0x3] %v497_v5  ;;  %v499_v7 = vsel %vm459_vm15, %v764_v19, 0.0  ;;  %vm461_vm1 = vcmp.eq.s32.totalorder %v813_v29, 3  ;;  %622 = vst [vmem:[%s1875_s2 + $0xe8] sm:$0xff] %v498_v4  ;;  %v500_v8 = vsel %vm460_vm0, %v782_v22, 0.0 }
  0x6e   :  { %623 = vst [vmem:[%s1875_s2 + $0xf8] sm:$0x3] %v499_v7  ;;  %v501_v11 = vsel %vm461_vm1, %v798_v25, 0.0  ;;  %vm462_vm2 = vcmp.eq.s32.totalorder %v818_v30, 3  ;;  %vm463_vm3 = vcmp.eq.s32.totalorder %v841_v33, 3  ;;  %624 = vst [vmem:[%s1875_s2 + $0x128] sm:$0xff] %v500_v8 }
  0x6f   :  { %625 = vst [vmem:[%s1875_s2 + $0x138] sm:$0x3] %v501_v11  ;;  %v502_v12 = vsel %vm462_vm2, %v803_v26, 0.0  ;;  %v503_v13 = vsel %vm463_vm3, %v836_v32, 0.0  ;;  %vm464_vm4 = vcmp.eq.s32.totalorder %v849_v36, 3  ;;  %vm465_vm5 = vcmp.eq.s32.totalorder %v867_v39, 3 }
  0x70   :  { %626 = vst [vmem:[%s1875_s2 + $0x168] sm:$0xff] %v502_v12  ;;  %627 = vst [vmem:[%s1875_s2 + $0x178] sm:$0x3] %v503_v13  ;;  %v504_v14 = vsel %vm464_vm4, %v823_v31, 0.0  ;;  %v505_v15 = vsel %vm465_vm5, %v854_v37, 0.0  ;;  %vm466_vm6 = vcmp.eq.s32.totalorder %v877_v41, 3 }
  0x71   :  { %vm467_vm7 = vcmp.eq.s32.totalorder %v903_v47, 3  ;;  %628 = vst [vmem:[%s1875_s2 + $0x1a8] sm:$0xff] %v504_v14  ;;  %629 = vst [vmem:[%s1875_s2 + $0x1b8] sm:$0x3] %v505_v15  ;;  %v506_v18 = vsel %vm466_vm6, %v872_v40, 0.0  ;;  %vm468_vm8 = vcmp.eq.s32.totalorder %v908_v48, 3 }
  0x72   :  { %v507_v19 = vsel %vm467_vm7, %v888_v43, 0.0  ;;  %vm469_vm9 = vcmp.eq.s32.totalorder %v931_v51, 3  ;;  %630 = vst [vmem:[%s1875_s2 + $0x1e8] sm:$0xff] %v506_v18  ;;  %v508_v21 = vsel %vm468_vm8, %v893_v44, 0.0  ;;  %vm470_vm10 = vcmp.eq.s32.totalorder %v939_v54, 3  ;;  %v2020_v26 = vld [vmem:[#allocation6_spill] sm:$0xff] }
  0x73   :  { %631 = vst [vmem:[%s1875_s2 + $0x1f8] sm:$0x3] %v507_v19  ;;  %v509_v22 = vsel %vm469_vm9, %v926_v50, 0.0  ;;  %vm471_vm11 = vcmp.eq.s32.totalorder %v957_v57, 3  ;;  %632 = vst [vmem:[%s1875_s2 + $0x228] sm:$0xff] %v508_v21  ;;  %v510_v23 = vsel %vm470_vm10, %v913_v49, 0.0 }
  0x74   :  { %633 = vst [vmem:[%s1875_s2 + $0x238] sm:$0x3] %v509_v22  ;;  %v511_v25 = vsel %vm471_vm11, %v944_v55, 0.0  ;;  %vm472_vm12 = vcmp.eq.s32.totalorder %v967_v59, 3  ;;  %vm473_vm13 = vcmp.eq.s32.totalorder %v2020_v26, 3  ;;  %634 = vst [vmem:[%s1875_s2 + $0x268] sm:$0xff] %v510_v23 }
  0x75   :  { %635 = vst [vmem:[%s1875_s2 + $0x278] sm:$0x3] %v511_v25  ;;  %v2021_v29 = vld [vmem:[#allocation3_spill] sm:$0xff]  ;;  %v2022_v31 = vld [vmem:[#allocation4_spill] sm:$0xff]  ;;  %v2024_v36 = vld [vmem:[#allocation10_spill] sm:$0xff]  ;;  %vm480_vm4 = vcmp.eq.s32.totalorder %v2034_v56, 3 }
  0x76   :  { %v512_v30 = vsel %vm472_vm12, %v2021_v29, 0.0  ;;  %v513_v32 = vsel %vm473_vm13, %v2022_v31, 0.0  ;;  %v2023_v33 = vld [vmem:[#allocation7_spill] sm:$0xff]  ;;  %vm475_vm15 = vcmp.eq.s32.totalorder %v2024_v36, 3  ;;  %v2025_v37 = vld [vmem:[#allocation5_spill] sm:$0xff]  ;;  %v2029_v47 = vld [vmem:[#allocation8_spill] sm:$0xff] }
  0x77   :  { %vm474_vm14 = vcmp.eq.s32.totalorder %v2023_v33, 3  ;;  %636 = vst [vmem:[%s1875_s2 + $0x2a8] sm:$0xff] %v512_v30  ;;  %637 = vst [vmem:[%s1875_s2 + $0x2b8] sm:$0x3] %v513_v32  ;;  %v2026_v40 = vld [vmem:[#allocation9_spill] sm:$0xff]  ;;  %v2027_v43 = vld [vmem:[#allocation11_spill] sm:$0xff] }
  0x78   :  { %v514_v39 = vsel %vm474_vm14, %v2025_v37, 0.0  ;;  %v515_v41 = vsel %vm475_vm15, %v2026_v40, 0.0  ;;  %vm476_vm0 = vcmp.eq.s32.totalorder %v2027_v43, 3  ;;  %v2028_v44 = vld [vmem:[#allocation13_spill] sm:$0xff]  ;;  %v2030_v50 = vld [vmem:[#allocation15_spill] sm:$0xff]  ;;  %v2031_v51 = vld [vmem:[#allocation18_spill] sm:$0xff] }
  0x79   :  { %vm477_vm1 = vcmp.eq.s32.totalorder %v2028_v44, 3  ;;  %638 = vst [vmem:[%s1875_s2 + $0x2e8] sm:$0xff] %v514_v39  ;;  %639 = vst [vmem:[%s1875_s2 + $0x2f8] sm:$0x3] %v515_v41  ;;  %v516_v48 = vsel %vm476_vm0, %v2029_v47, 0.0  ;;  %vm478_vm2 = vcmp.eq.s32.totalorder %v2030_v50, 3 }
  0x7a   :  { %v517_v49 = vsel %vm477_vm1, %v2003_v10, 0.0  ;;  %vm479_vm3 = vcmp.eq.s32.totalorder %v2031_v51, 3  ;;  %640 = vst [vmem:[%s1875_s2 + $0x328] sm:$0xff] %v516_v48  ;;  %v2032_v54 = vld [vmem:[#allocation14_spill] sm:$0xff]  ;;  %v2033_v57 = vld [vmem:[#allocation16_spill] sm:$0xff]  ;;  %v2036_v10 = vld [vmem:[#allocation17_spill] sm:$0xff] }
  0x7b   :  { %641 = vst [vmem:[%s1875_s2 + $0x338] sm:$0x3] %v517_v49  ;;  %v518_v55 = vsel %vm478_vm2, %v2032_v54, 0.0  ;;  %v519_v59 = vsel %vm479_vm3, %v2033_v57, 0.0  ;;  %v2035_v53 = vld [vmem:[#allocation22_spill] sm:$0xff]  ;;  %v520_v42 = vsel %vm480_vm4, %v2036_v10, 0.0 }
  0x7c   :  { %vm481_vm5 = vcmp.eq.s32.totalorder %v2035_v53, 3  ;;  %642 = vst [vmem:[%s1875_s2 + $0x368] sm:$0xff] %v518_v55  ;;  %643 = vst [vmem:[%s1875_s2 + $0x378] sm:$0x3] %v519_v59  ;;  %vm482_vm6 = vcmp.eq.s32.totalorder %v2011_v61, 3  ;;  %v2037_v6 = vld [vmem:[#allocation25_spill] sm:$0xff] }
  0x7d   :  { %v521_v20 = vsel %vm481_vm5, %v2010_v62, 0.0  ;;  %vm483_vm7 = vcmp.eq.s32.totalorder %v2037_v6, 3  ;;  %644 = vst [vmem:[%s1875_s2 + $0x3a8] sm:$0xff] %v520_v42  ;;  %v2038_v1 = vld [vmem:[#allocation20_spill] sm:$0xff]  ;;  %vm484_vm8 = vcmp.eq.s32.totalorder %v2015_v9, 3  ;;  %vm485_vm9 = vcmp.eq.s32.totalorder %v2016_v27, 3 }
  0x7e   :  { %645 = vst [vmem:[%s1875_s2 + $0x3b8] sm:$0x3] %v521_v20  ;;  %v522_v3 = vsel %vm482_vm6, %v2038_v1, 0.0  ;;  %v523_v2 = vsel %vm483_vm7, %v2014_v17, 0.0  ;;  %v524_v61 = vsel %vm484_vm8, %v1990_v63, 0.0  ;;  %v525_v62 = vsel %vm485_vm9, %v1991_v34, 0.0 }
  0x7f   :  { %646 = vst [vmem:[%s1875_s2 + $0x3e8] sm:$0xff] %v522_v3  ;;  %647 = vst [vmem:[%s1875_s2 + $0x3f8] sm:$0x3] %v523_v2  ;;  %vm486_vm10 = vcmp.eq.s32.totalorder %v2017_v46, 3  ;;  %vm487_vm11 = vcmp.eq.s32.totalorder %v2018_v58, 3  ;;  %v2039_v9 = vld [vmem:[#allocation29_spill] sm:$0xff] }
  0x80   :  { %648 = vst [vmem:[%s1875_s2 + $0x428] sm:$0xff] %v524_v61  ;;  %649 = vst [vmem:[%s1875_s2 + $0x438] sm:$0x3] %v525_v62  ;;  %v526_v17 = vsel %vm486_vm10, %v2039_v9, 0.0  ;;  %v527_v27 = vsel %vm487_vm11, %v1995_v38, 0.0  ;;  %vm488_vm12 = vcmp.eq.s32.totalorder %v1996_v28, 3 }
  0x81   :  { %vm489_vm13 = vcmp.eq.s32.totalorder %v1228_v52, 3  ;;  %650 = vst [vmem:[%s1875_s2 + $0x468] sm:$0xff] %v526_v17  ;;  %651 = vst [vmem:[%s1875_s2 + $0x478] sm:$0x3] %v527_v27  ;;  %v528_v34 = vsel %vm488_vm12, %v1997_v0, 0.0  ;;  %vm490_vm14 = vcmp.eq.s32.totalorder %v1998_v45, 3 }
  0x82   :  { %v529_v63 = vsel %vm489_vm13, %v1215_v35, 0.0  ;;  %vm491_vm15 = vcmp.eq.s32.totalorder %v2019_v16, 3  ;;  %652 = vst [vmem:[%s1875_s2 + $0x4a8] sm:$0xff] %v528_v34  ;;  %v530_v28 = vsel %vm490_vm14, %v1233_v60, 0.0 }
  0x83   :  { %653 = vst [vmem:[%s1875_s2 + $0x4b8] sm:$0x3] %v529_v63  ;;  %v531_v38 = vsel %vm491_vm15, %v1249_v24, 0.0  ;;  %654 = vst [vmem:[%s1875_s2 + $0x4e8] sm:$0xff] %v530_v28 }
  0x84   :  { %655 = vst [vmem:[%s1875_s2 + $0x4f8] sm:$0x3] %v531_v38 }

// kernel: forward.19
= control target key start
LH: loop header
LB: loop body
LE: loop exit
PB: predicated region body
PF: predicated region fallthrough
CT: control target
= control target key end

     0   :  { %v2868_v0 = vmov 0   ;;  %s3922_s1 = inlined_call_operand.vmem [shape: bf16[256,128], index: 1, kind: input, shape index: {}]   ;;  %s3923_s0 = inlined_call_operand.vmem [shape: bf16[1072,256], index: 0, kind: input, shape index: {}]   ;;  %s3924_s2 = inlined_call_operand.vmem [shape: f32[1,128], index: 2, kind: input, shape index: {}]   ;;  %s3925_s3 = inlined_call_operand.vmem [shape: f32[1072,128], index: 3, kind: output, shape index: {}]  }
   0x1   :  { %954 = vmatprep.subr.bf16.mxu0 %v2868_v0  ;;  %v2381_v1 = vld [vmem:[%s3922_s1 + $0x38] sm:$0xff]   ;;  %2348 = vmatprep.subr.bf16.mxu1 %v2868_v0  ;;  %v2382_v2 = vld [vmem:[%s3922_s1 + $0x30] sm:$0xff]   ;;  %v2383_v3 = vld [vmem:[%s3922_s1 + $0x28] sm:$0xff]  }
   0x2   :  { %955 = vmatpush1.bf16.msra.mxu0 %v2381_v1  ;;  %2364 = vmatpush1.bf16.msra.mxu1 %v2381_v1  ;;  %v2384_v4 = vld [vmem:[%s3922_s1 + $0x20] sm:$0xff]   ;;  %v2385_v5 = vld [vmem:[%s3922_s1 + $0x18] sm:$0xff]   ;;  %v2386_v7 = vld [vmem:[%s3922_s1 + $0x10] sm:$0xff]  }
   0x3   :  { %956 = vmatprep.subr.bf16.mxu0 %v2868_v0  ;;  %2349 = vmatprep.subr.bf16.mxu1 %v2868_v0  ;;  %v2399_v6 = vld [vmem:[%s3923_s0 + $0x4] ss:$8 sps:$4 sm:$0xff]   ;;  %v2389_v11 = vld [vmem:[%s3922_s1 + $0x78] sm:$0xff]   ;;  %v2390_v12 = vld [vmem:[%s3922_s1 + $0x70] sm:$0xff]  }
   0x4   :  { %v2402_v8 = vld [vmem:[%s3923_s0 + $0x224] ss:$8 sps:$4 sm:$0xff]   ;;  %986 = vmatprep.mubr.bf16.mxu0 %v2399_v6  ;;  %v2393_v15 = vld [vmem:[%s3922_s1 + $0x58] sm:$0xff]   ;;  %v2394_v16 = vld [vmem:[%s3922_s1 + $0x50] sm:$0xff]  }
   0x5   :  { %1258 = vmatprep.mubr.bf16.mxu1 %v2402_v8  ;;  %v2387_v9 = vld [vmem:[%s3922_s1 + $0x8] sm:$0xff]   ;;  %v2388_v10 = vld [vmem:[%s3922_s1] sm:$0xff]   ;;  %v2403_v21 = vld [vmem:[%s3923_s0 + $0x14] ss:$8 sps:$4 sm:$0xff]  }
   0x6   :  { %957 = vmatpush1.bf16.msra.mxu0 %v2382_v2  ;;  %2365 = vmatpush1.bf16.msra.mxu1 %v2382_v2  ;;  %v2391_v13 = vld [vmem:[%s3922_s1 + $0x68] sm:$0xff]   ;;  %v2392_v14 = vld [vmem:[%s3922_s1 + $0x60] sm:$0xff]   ;;  %v2406_v22 = vld [vmem:[%s3923_s0 + $0x234] ss:$8 sps:$4 sm:$0xff]  }
   0x7   :  { %958 = vmatprep.subr.bf16.mxu0 %v2868_v0  ;;  %2350 = vmatprep.subr.bf16.mxu1 %v2868_v0  ;;  %v2395_v17 = vld [vmem:[%s3922_s1 + $0x48] sm:$0xff]   ;;  %v2396_v18 = vld [vmem:[%s3922_s1 + $0x40] sm:$0xff]   ;;  %v2405_v23 = vld [vmem:[%s3923_s0 + $0x10] ss:$8 sps:$4 sm:$0xff]  }
   0x8   :  { %v2397_v19 = vld [vmem:[%s3923_s0] ss:$8 sps:$4 sm:$0xff]   ;;  %v2408_v24 = vld [vmem:[%s3923_s0 + $0x230] ss:$8 sps:$4 sm:$0xff]   ;;  %v2409_v25 = vld [vmem:[%s3923_s0 + $0x24] ss:$8 sps:$4 sm:$0xff]  }
   0x9   :  { %v2400_v20 = vld [vmem:[%s3923_s0 + $0x220] ss:$8 sps:$4 sm:$0xff]   ;;  %v2412_v26 = vld [vmem:[%s3923_s0 + $0x244] ss:$8 sps:$4 sm:$0xff]   ;;  %v2415_v29 = vld [vmem:[%s3923_s0 + $0x34] ss:$8 sps:$4 sm:$0xff]  }
   0xa   :  { %959 = vmatpush1.bf16.msra.mxu0 %v2383_v3  ;;  %2366 = vmatpush1.bf16.msra.mxu1 %v2383_v3  ;;  %v2411_v27 = vld [vmem:[%s3923_s0 + $0x20] ss:$8 sps:$4 sm:$0xff]   ;;  %v2418_v30 = vld [vmem:[%s3923_s0 + $0x254] ss:$8 sps:$4 sm:$0xff]   ;;  %v2417_v31 = vld [vmem:[%s3923_s0 + $0x30] ss:$8 sps:$4 sm:$0xff]  }
   0xb   :  { %960 = vmatprep.subr.bf16.mxu0 %v2868_v0  ;;  %2351 = vmatprep.subr.bf16.mxu1 %v2868_v0  ;;  %v2414_v28 = vld [vmem:[%s3923_s0 + $0x240] ss:$8 sps:$4 sm:$0xff]   ;;  %v2420_v32 = vld [vmem:[%s3923_s0 + $0x250] ss:$8 sps:$4 sm:$0xff]   ;;  %v2421_v33 = vld [vmem:[%s3923_s0 + $0x44] ss:$8 sps:$4 sm:$0xff]  }
   0xc   :  { %v2424_v34 = vld [vmem:[%s3923_s0 + $0x264] ss:$8 sps:$4 sm:$0xff]   ;;  %v2423_v35 = vld [vmem:[%s3923_s0 + $0x40] ss:$8 sps:$4 sm:$0xff]   ;;  %v2427_v37 = vld [vmem:[%s3923_s0 + $0x54] ss:$8 sps:$4 sm:$0xff]  }
   0xd   :  { %v2426_v36 = vld [vmem:[%s3923_s0 + $0x260] ss:$8 sps:$4 sm:$0xff]   ;;  %v2430_v38 = vld [vmem:[%s3923_s0 + $0x274] ss:$8 sps:$4 sm:$0xff]   ;;  %v2429_v39 = vld [vmem:[%s3923_s0 + $0x50] ss:$8 sps:$4 sm:$0xff]  }
   0xe   :  { %961 = vmatpush1.bf16.msra.mxu0 %v2384_v4  ;;  %2367 = vmatpush1.bf16.msra.mxu1 %v2384_v4  ;;  %v2432_v40 = vld [vmem:[%s3923_s0 + $0x270] ss:$8 sps:$4 sm:$0xff]   ;;  %v2433_v41 = vld [vmem:[%s3923_s0 + $0x64] ss:$8 sps:$4 sm:$0xff]   ;;  %v2435_v43 = vld [vmem:[%s3923_s0 + $0x60] ss:$8 sps:$4 sm:$0xff]  }
   0xf   :  { %962 = vmatprep.subr.bf16.mxu0 %v2868_v0  ;;  %2352 = vmatprep.subr.bf16.mxu1 %v2868_v0  ;;  %v2436_v42 = vld [vmem:[%s3923_s0 + $0x284] ss:$8 sps:$4 sm:$0xff]   ;;  %v2438_v44 = vld [vmem:[%s3923_s0 + $0x280] ss:$8 sps:$4 sm:$0xff]   ;;  %v2439_v45 = vld [vmem:[%s3923_s0 + $0x74] ss:$8 sps:$4 sm:$0xff]  }
  0x10   :  { %v2442_v46 = vld [vmem:[%s3923_s0 + $0x294] ss:$8 sps:$4 sm:$0xff]   ;;  %v2441_v47 = vld [vmem:[%s3923_s0 + $0x70] ss:$8 sps:$4 sm:$0xff]   ;;  %v2445_v49 = vld [vmem:[%s3923_s0 + $0x84] ss:$8 sps:$4 sm:$0xff]  }
  0x11   :  { %v2444_v48 = vld [vmem:[%s3923_s0 + $0x290] ss:$8 sps:$4 sm:$0xff]   ;;  %v2448_v50 = vld [vmem:[%s3923_s0 + $0x2a4] ss:$8 sps:$4 sm:$0xff]   ;;  %v2447_v51 = vld [vmem:[%s3923_s0 + $0x80] ss:$8 sps:$4 sm:$0xff]  }
  0x12   :  { %963 = vmatpush1.bf16.msra.mxu0 %v2385_v5  ;;  %2368 = vmatpush1.bf16.msra.mxu1 %v2385_v5  ;;  %v2450_v52 = vld [vmem:[%s3923_s0 + $0x2a0] ss:$8 sps:$4 sm:$0xff]   ;;  %v2451_v53 = vld [vmem:[%s3923_s0 + $0x94] ss:$8 sps:$4 sm:$0xff]   ;;  %v2453_v55 = vld [vmem:[%s3923_s0 + $0x90] ss:$8 sps:$4 sm:$0xff]  }
  0x13   :  { %964 = vmatprep.subr.bf16.mxu0 %v2868_v0  ;;  %2353 = vmatprep.subr.bf16.mxu1 %v2868_v0  ;;  %v2454_v54 = vld [vmem:[%s3923_s0 + $0x2b4] ss:$8 sps:$4 sm:$0xff]   ;;  %v2456_v56 = vld [vmem:[%s3923_s0 + $0x2b0] ss:$8 sps:$4 sm:$0xff]   ;;  %v2457_v57 = vld [vmem:[%s3923_s0 + $0xa4] ss:$8 sps:$4 sm:$0xff]  }
  0x14   :  { %v2460_v58 = vld [vmem:[%s3923_s0 + $0x2c4] ss:$8 sps:$4 sm:$0xff]   ;;  %v2459_v59 = vld [vmem:[%s3923_s0 + $0xa0] ss:$8 sps:$4 sm:$0xff]   ;;  %v2463_v61 = vld [vmem:[%s3923_s0 + $0xb4] ss:$8 sps:$4 sm:$0xff]  }
  0x15   :  { %v2462_v60 = vld [vmem:[%s3923_s0 + $0x2c0] ss:$8 sps:$4 sm:$0xff]   ;;  %v2466_v62 = vld [vmem:[%s3923_s0 + $0x2d4] ss:$8 sps:$4 sm:$0xff]   ;;  %v2465_v63 = vld [vmem:[%s3923_s0 + $0xb0] ss:$8 sps:$4 sm:$0xff]  }
  0x16   :  { %965 = vmatpush1.bf16.msra.mxu0 %v2386_v7  ;;  %2369 = vmatpush1.bf16.msra.mxu1 %v2386_v7  ;;  %v2469_v1 = vld [vmem:[%s3923_s0 + $0xc4] ss:$8 sps:$4 sm:$0xff]   ;;  %v2471_v3 = vld [vmem:[%s3923_s0 + $0xc0] ss:$8 sps:$4 sm:$0xff]   ;;  %v2475_v5 = vld [vmem:[%s3923_s0 + $0xd4] ss:$8 sps:$4 sm:$0xff]  }
  0x17   :  { %966 = vmatprep.subr.bf16.mxu0 %v2868_v0  ;;  %2354 = vmatprep.subr.bf16.mxu1 %v2868_v0  ;;  %v2472_v2 = vld [vmem:[%s3923_s0 + $0x2e4] ss:$8 sps:$4 sm:$0xff]   ;;  %v2474_v4 = vld [vmem:[%s3923_s0 + $0x2e0] ss:$8 sps:$4 sm:$0xff]   ;;  %v2478_v6 = vld [vmem:[%s3923_s0 + $0x2f4] ss:$8 sps:$4 sm:$0xff]  }
  0x18   :  { %v2477_v7 = vld [vmem:[%s3923_s0 + $0xd0] ss:$8 sps:$4 sm:$0xff]  }
  0x19   :  { %v2480_v8 = vld [vmem:[%s3923_s0 + $0x2f0] ss:$8 sps:$4 sm:$0xff]  }
  0x1a   :  { %967 = vmatpush1.bf16.msra.mxu0 %v2387_v9  ;;  %2370 = vmatpush1.bf16.msra.mxu1 %v2387_v9  ;;  %v2481_v9 = vld [vmem:[%s3923_s0 + $0xe4] ss:$8 sps:$4 sm:$0xff]  }
  0x1b   :  { %968 = vmatprep.subr.bf16.mxu0 %v2868_v0  ;;  %2355 = vmatprep.subr.bf16.mxu1 %v2868_v0 }
  0x1e   :  { %969 = vmatpush1.bf16.msra.mxu0 %v2388_v10  ;;  %2371 = vmatpush1.bf16.msra.mxu1 %v2388_v10  ;;  %v2484_v10 = vld [vmem:[%s3923_s0 + $0x304] ss:$8 sps:$4 sm:$0xff]  }
  0x1f   :  { %970 = vmatprep.subr.bf16.mxu0 %v2868_v0  ;;  %2356 = vmatprep.subr.bf16.mxu1 %v2868_v0 }
  0x22   :  { %971 = vmatpush2.bf16.msra.mxu0 %v2389_v11  ;;  %2372 = vmatpush2.bf16.msra.mxu1 %v2389_v11  ;;  %v2483_v11 = vld [vmem:[%s3923_s0 + $0xe0] ss:$8 sps:$4 sm:$0xff]  }
  0x23   :  { %972 = vmatprep.subr.bf16.mxu0 %v2868_v0  ;;  %2357 = vmatprep.subr.bf16.mxu1 %v2868_v0 }
  0x26   :  { %973 = vmatpush2.bf16.msra.mxu0 %v2390_v12  ;;  %2373 = vmatpush2.bf16.msra.mxu1 %v2390_v12  ;;  %v2486_v12 = vld [vmem:[%s3923_s0 + $0x300] ss:$8 sps:$4 sm:$0xff]  }
  0x27   :  { %974 = vmatprep.subr.bf16.mxu0 %v2868_v0  ;;  %2358 = vmatprep.subr.bf16.mxu1 %v2868_v0 }
  0x2a   :  { %975 = vmatpush2.bf16.msra.mxu0 %v2391_v13  ;;  %2374 = vmatpush2.bf16.msra.mxu1 %v2391_v13  ;;  %v2487_v13 = vld [vmem:[%s3923_s0 + $0xf4] ss:$8 sps:$4 sm:$0xff]  }
  0x2b   :  { %976 = vmatprep.subr.bf16.mxu0 %v2868_v0  ;;  %2359 = vmatprep.subr.bf16.mxu1 %v2868_v0 }
  0x2e   :  { %977 = vmatpush2.bf16.msra.mxu0 %v2392_v14  ;;  %2375 = vmatpush2.bf16.msra.mxu1 %v2392_v14  ;;  %v2490_v14 = vld [vmem:[%s3923_s0 + $0x314] ss:$8 sps:$4 sm:$0xff]  }
  0x2f   :  { %978 = vmatprep.subr.bf16.mxu0 %v2868_v0  ;;  %2360 = vmatprep.subr.bf16.mxu1 %v2868_v0 }
  0x32   :  { %979 = vmatpush2.bf16.msra.mxu0 %v2393_v15  ;;  %2376 = vmatpush2.bf16.msra.mxu1 %v2393_v15  ;;  %v2489_v15 = vld [vmem:[%s3923_s0 + $0xf0] ss:$8 sps:$4 sm:$0xff]  }
  0x33   :  { %980 = vmatprep.subr.bf16.mxu0 %v2868_v0  ;;  %2361 = vmatprep.subr.bf16.mxu1 %v2868_v0 }
  0x36   :  { %981 = vmatpush2.bf16.msra.mxu0 %v2394_v16  ;;  %2377 = vmatpush2.bf16.msra.mxu1 %v2394_v16  ;;  %v2492_v16 = vld [vmem:[%s3923_s0 + $0x310] ss:$8 sps:$4 sm:$0xff]  }
  0x37   :  { %982 = vmatprep.subr.bf16.mxu0 %v2868_v0  ;;  %2362 = vmatprep.subr.bf16.mxu1 %v2868_v0 }
  0x3a   :  { %983 = vmatpush2.bf16.msra.mxu0 %v2395_v17  ;;  %2378 = vmatpush2.bf16.msra.mxu1 %v2395_v17  ;;  %v2493_v17 = vld [vmem:[%s3923_s0 + $0x104] ss:$8 sps:$4 sm:$0xff]  }
  0x3b   :  { %984 = vmatprep.subr.bf16.mxu0 %v2868_v0  ;;  %2363 = vmatprep.subr.bf16.mxu1 %v2868_v0  ;;  %v2468_v0 = vld [vmem:[%s3923_s0 + $0x2d0] ss:$8 sps:$4 sm:$0xff]  }
  0x3e   :  { %985 = vmatpush2.bf16.msra.mxu0 %v2396_v18  ;;  %2379 = vmatpush2.bf16.msra.mxu1 %v2396_v18  ;;  %v2496_v18 = vld [vmem:[%s3923_s0 + $0x324] ss:$8 sps:$4 sm:$0xff]  }
  0x41   :  { %987 = vmatmul.mubr.bf16.vlgmr.msra.gmra.mxu0 %v2397_v19  ;;  %1259 = vmatmul.mubr.bf16.vlgmr.msra.gmra.mxu1 %v2400_v20  ;;  %v2495_v19 = vld [vmem:[%s3923_s0 + $0x100] ss:$8 sps:$4 sm:$0xff]  }
  0x42   :  { %994 = vmatprep.mubr.bf16.mxu0 %v2403_v21  ;;  %1266 = vmatprep.mubr.bf16.mxu1 %v2406_v22  ;;  %v2498_v20 = vld [vmem:[%s3923_s0 + $0x320] ss:$8 sps:$4 sm:$0xff]   ;;  %v2499_v21 = vld [vmem:[%s3923_s0 + $0x114] ss:$8 sps:$4 sm:$0xff]  }
  0x43   :  { %v2502_v22 = vld [vmem:[%s3923_s0 + $0x334] ss:$8 sps:$4 sm:$0xff]  }
  0x49   :  { %995 = vmatmul.mubr.bf16.gmra.mxu0 %v2405_v23  ;;  %1267 = vmatmul.mubr.bf16.gmra.mxu1 %v2408_v24  ;;  %v2501_v23 = vld [vmem:[%s3923_s0 + $0x110] ss:$8 sps:$4 sm:$0xff]  }
  0x4a   :  { %1002 = vmatprep.mubr.bf16.mxu0 %v2409_v25  ;;  %1274 = vmatprep.mubr.bf16.mxu1 %v2412_v26  ;;  %v2504_v24 = vld [vmem:[%s3923_s0 + $0x330] ss:$8 sps:$4 sm:$0xff]   ;;  %v2505_v25 = vld [vmem:[%s3923_s0 + $0x124] ss:$8 sps:$4 sm:$0xff]  }
  0x4b   :  { %v2508_v26 = vld [vmem:[%s3923_s0 + $0x344] ss:$8 sps:$4 sm:$0xff]  }
  0x51   :  { %1003 = vmatmul.mubr.bf16.gmra.mxu0 %v2411_v27  ;;  %1275 = vmatmul.mubr.bf16.gmra.mxu1 %v2414_v28  ;;  %v2507_v27 = vld [vmem:[%s3923_s0 + $0x120] ss:$8 sps:$4 sm:$0xff]  }
  0x52   :  { %1010 = vmatprep.mubr.bf16.mxu0 %v2415_v29  ;;  %1282 = vmatprep.mubr.bf16.mxu1 %v2418_v30  ;;  %v2510_v28 = vld [vmem:[%s3923_s0 + $0x340] ss:$8 sps:$4 sm:$0xff]   ;;  %v2511_v29 = vld [vmem:[%s3923_s0 + $0x134] ss:$8 sps:$4 sm:$0xff]  }
  0x53   :  { %v2514_v30 = vld [vmem:[%s3923_s0 + $0x354] ss:$8 sps:$4 sm:$0xff]  }
  0x59   :  { %1011 = vmatmul.mubr.bf16.gmra.mxu0 %v2417_v31  ;;  %1283 = vmatmul.mubr.bf16.gmra.mxu1 %v2420_v32  ;;  %v2513_v31 = vld [vmem:[%s3923_s0 + $0x130] ss:$8 sps:$4 sm:$0xff]  }
  0x5a   :  { %1018 = vmatprep.mubr.bf16.mxu0 %v2421_v33  ;;  %1290 = vmatprep.mubr.bf16.mxu1 %v2424_v34  ;;  %v2516_v32 = vld [vmem:[%s3923_s0 + $0x350] ss:$8 sps:$4 sm:$0xff]   ;;  %v2517_v33 = vld [vmem:[%s3923_s0 + $0x144] ss:$8 sps:$4 sm:$0xff]  }
  0x5b   :  { %v2520_v34 = vld [vmem:[%s3923_s0 + $0x364] ss:$8 sps:$4 sm:$0xff]  }
  0x61   :  { %1019 = vmatmul.mubr.bf16.gmra.mxu0 %v2423_v35  ;;  %1291 = vmatmul.mubr.bf16.gmra.mxu1 %v2426_v36  ;;  %v2519_v35 = vld [vmem:[%s3923_s0 + $0x140] ss:$8 sps:$4 sm:$0xff]  }
  0x62   :  { %1026 = vmatprep.mubr.bf16.mxu0 %v2427_v37  ;;  %1298 = vmatprep.mubr.bf16.mxu1 %v2430_v38  ;;  %v2522_v36 = vld [vmem:[%s3923_s0 + $0x360] ss:$8 sps:$4 sm:$0xff]   ;;  %v2523_v37 = vld [vmem:[%s3923_s0 + $0x154] ss:$8 sps:$4 sm:$0xff]  }
  0x63   :  { %v2526_v38 = vld [vmem:[%s3923_s0 + $0x374] ss:$8 sps:$4 sm:$0xff]  }
  0x69   :  { %1027 = vmatmul.mubr.bf16.gmra.mxu0 %v2429_v39  ;;  %1299 = vmatmul.mubr.bf16.gmra.mxu1 %v2432_v40  ;;  %v2525_v39 = vld [vmem:[%s3923_s0 + $0x150] ss:$8 sps:$4 sm:$0xff]  }
  0x6a   :  { %1034 = vmatprep.mubr.bf16.mxu0 %v2433_v41  ;;  %1306 = vmatprep.mubr.bf16.mxu1 %v2436_v42  ;;  %v2528_v40 = vld [vmem:[%s3923_s0 + $0x370] ss:$8 sps:$4 sm:$0xff]   ;;  %v2529_v41 = vld [vmem:[%s3923_s0 + $0x164] ss:$8 sps:$4 sm:$0xff]  }
  0x6b   :  { %v2532_v42 = vld [vmem:[%s3923_s0 + $0x384] ss:$8 sps:$4 sm:$0xff]  }
  0x71   :  { %1035 = vmatmul.mubr.bf16.gmra.mxu0 %v2435_v43  ;;  %1307 = vmatmul.mubr.bf16.gmra.mxu1 %v2438_v44  ;;  %v2531_v43 = vld [vmem:[%s3923_s0 + $0x160] ss:$8 sps:$4 sm:$0xff]  }
  0x72   :  { %1042 = vmatprep.mubr.bf16.mxu0 %v2439_v45  ;;  %1314 = vmatprep.mubr.bf16.mxu1 %v2442_v46  ;;  %v2534_v44 = vld [vmem:[%s3923_s0 + $0x380] ss:$8 sps:$4 sm:$0xff]   ;;  %v2535_v45 = vld [vmem:[%s3923_s0 + $0x174] ss:$8 sps:$4 sm:$0xff]  }
  0x73   :  { %v2538_v46 = vld [vmem:[%s3923_s0 + $0x394] ss:$8 sps:$4 sm:$0xff]  }
  0x79   :  { %1043 = vmatmul.mubr.bf16.gmra.mxu0 %v2441_v47  ;;  %1315 = vmatmul.mubr.bf16.gmra.mxu1 %v2444_v48  ;;  %v2537_v47 = vld [vmem:[%s3923_s0 + $0x170] ss:$8 sps:$4 sm:$0xff]  }
  0x7a   :  { %1050 = vmatprep.mubr.bf16.mxu0 %v2445_v49  ;;  %1322 = vmatprep.mubr.bf16.mxu1 %v2448_v50  ;;  %v2540_v48 = vld [vmem:[%s3923_s0 + $0x390] ss:$8 sps:$4 sm:$0xff]   ;;  %v2541_v49 = vld [vmem:[%s3923_s0 + $0x184] ss:$8 sps:$4 sm:$0xff]  }
  0x7b   :  { %v2544_v50 = vld [vmem:[%s3923_s0 + $0x3a4] ss:$8 sps:$4 sm:$0xff]  }
  0x81   :  { %1051 = vmatmul.mubr.bf16.gmra.mxu0 %v2447_v51  ;;  %1323 = vmatmul.mubr.bf16.gmra.mxu1 %v2450_v52  ;;  %v2543_v51 = vld [vmem:[%s3923_s0 + $0x180] ss:$8 sps:$4 sm:$0xff]  }
  0x82   :  { %1058 = vmatprep.mubr.bf16.mxu0 %v2451_v53  ;;  %1330 = vmatprep.mubr.bf16.mxu1 %v2454_v54  ;;  %v2546_v52 = vld [vmem:[%s3923_s0 + $0x3a0] ss:$8 sps:$4 sm:$0xff]   ;;  %v2547_v53 = vld [vmem:[%s3923_s0 + $0x194] ss:$8 sps:$4 sm:$0xff]  }
  0x83   :  { %v2550_v54 = vld [vmem:[%s3923_s0 + $0x3b4] ss:$8 sps:$4 sm:$0xff]  }
  0x89   :  { %1059 = vmatmul.mubr.bf16.gmra.mxu0 %v2453_v55  ;;  %1331 = vmatmul.mubr.bf16.gmra.mxu1 %v2456_v56  ;;  %v3278_v55 = vld [vmem:[%s3924_s2] ss:$0 sm:$0xff] }
  0x8a   :  { %1066 = vmatprep.mubr.bf16.mxu0 %v2457_v57  ;;  %1338 = vmatprep.mubr.bf16.mxu1 %v2460_v58 }
  0x91   :  { %1067 = vmatmul.mubr.bf16.gmra.mxu0 %v2459_v59  ;;  %1339 = vmatmul.mubr.bf16.gmra.mxu1 %v2462_v60 }
  0x92   :  { %1074 = vmatprep.mubr.bf16.mxu0 %v2463_v61  ;;  %1346 = vmatprep.mubr.bf16.mxu1 %v2466_v62 }
  0x99   :  { %1075 = vmatmul.mubr.bf16.gmra.mxu0 %v2465_v63  ;;  %1347 = vmatmul.mubr.bf16.gmra.mxu1 %v2468_v0 }
  0x9a   :  { %1082 = vmatprep.mubr.bf16.mxu0 %v2469_v1  ;;  %1354 = vmatprep.mubr.bf16.mxu1 %v2472_v2  ;;  %v2549_v2 = vld [vmem:[%s3923_s0 + $0x190] ss:$8 sps:$4 sm:$0xff]  }
  0xa1   :  { %1083 = vmatmul.mubr.bf16.gmra.mxu0 %v2471_v3  ;;  %1355 = vmatmul.mubr.bf16.gmra.mxu1 %v2474_v4  ;;  %v2552_v3 = vld [vmem:[%s3923_s0 + $0x3b0] ss:$8 sps:$4 sm:$0xff]  }
  0xa2   :  { %1090 = vmatprep.mubr.bf16.mxu0 %v2475_v5  ;;  %1362 = vmatprep.mubr.bf16.mxu1 %v2478_v6  ;;  %v2553_v6 = vld [vmem:[%s3923_s0 + $0x1a4] ss:$8 sps:$4 sm:$0xff]  }
  0xa9   :  { %1091 = vmatmul.mubr.bf16.gmra.mxu0 %v2477_v7  ;;  %1363 = vmatmul.mubr.bf16.gmra.mxu1 %v2480_v8  ;;  %v2556_v7 = vld [vmem:[%s3923_s0 + $0x3c4] ss:$8 sps:$4 sm:$0xff]  }
  0xaa   :  { %1098 = vmatprep.mubr.bf16.mxu0 %v2481_v9  ;;  %1370 = vmatprep.mubr.bf16.mxu1 %v2484_v10 }
  0xb1   :  { %1099 = vmatmul.mubr.bf16.gmra.mxu0 %v2483_v11  ;;  %1371 = vmatmul.mubr.bf16.gmra.mxu1 %v2486_v12 }
  0xb2   :  { %1106 = vmatprep.mubr.bf16.mxu0 %v2487_v13  ;;  %1378 = vmatprep.mubr.bf16.mxu1 %v2490_v14 }
  0xb9   :  { %1107 = vmatmul.mubr.bf16.gmra.mxu0 %v2489_v15  ;;  %1379 = vmatmul.mubr.bf16.gmra.mxu1 %v2492_v16 }
  0xba   :  { %1114 = vmatprep.mubr.bf16.mxu0 %v2493_v17  ;;  %1386 = vmatprep.mubr.bf16.mxu1 %v2496_v18 }
  0xc1   :  { %1115 = vmatmul.mubr.bf16.gmra.mxu0 %v2495_v19  ;;  %1387 = vmatmul.mubr.bf16.gmra.mxu1 %v2498_v20 }
  0xc2   :  { %1122 = vmatprep.mubr.bf16.mxu0 %v2499_v21  ;;  %1394 = vmatprep.mubr.bf16.mxu1 %v2502_v22  ;;  %v2555_v22 = vld [vmem:[%s3923_s0 + $0x1a0] ss:$8 sps:$4 sm:$0xff]  }
  0xc9   :  { %1123 = vmatmul.mubr.bf16.gmra.mxu0 %v2501_v23  ;;  %1395 = vmatmul.mubr.bf16.gmra.mxu1 %v2504_v24  ;;  %v2558_v23 = vld [vmem:[%s3923_s0 + $0x3c0] ss:$8 sps:$4 sm:$0xff]  }
  0xca   :  { %1130 = vmatprep.mubr.bf16.mxu0 %v2505_v25  ;;  %1402 = vmatprep.mubr.bf16.mxu1 %v2508_v26  ;;  %v2559_v26 = vld [vmem:[%s3923_s0 + $0x1b4] ss:$8 sps:$4 sm:$0xff]  }
  0xd1   :  { %1131 = vmatmul.mubr.bf16.gmra.mxu0 %v2507_v27  ;;  %1403 = vmatmul.mubr.bf16.gmra.mxu1 %v2510_v28  ;;  %v2562_v27 = vld [vmem:[%s3923_s0 + $0x3d4] ss:$8 sps:$4 sm:$0xff]  }
  0xd2   :  { %1138 = vmatprep.mubr.bf16.mxu0 %v2511_v29  ;;  %1410 = vmatprep.mubr.bf16.mxu1 %v2514_v30 }
  0xd9   :  { %1139 = vmatmul.mubr.bf16.gmra.mxu0 %v2513_v31  ;;  %1411 = vmatmul.mubr.bf16.gmra.mxu1 %v2516_v32 }
  0xda   :  { %1146 = vmatprep.mubr.bf16.mxu0 %v2517_v33  ;;  %1418 = vmatprep.mubr.bf16.mxu1 %v2520_v34 }
  0xe1   :  { %1147 = vmatmul.mubr.bf16.gmra.mxu0 %v2519_v35  ;;  %1419 = vmatmul.mubr.bf16.gmra.mxu1 %v2522_v36 }
  0xe2   :  { %1154 = vmatprep.mubr.bf16.mxu0 %v2523_v37  ;;  %1426 = vmatprep.mubr.bf16.mxu1 %v2526_v38 }
  0xe9   :  { %1155 = vmatmul.mubr.bf16.gmra.mxu0 %v2525_v39  ;;  %1427 = vmatmul.mubr.bf16.gmra.mxu1 %v2528_v40 }
  0xea   :  { %1162 = vmatprep.mubr.bf16.mxu0 %v2529_v41  ;;  %1434 = vmatprep.mubr.bf16.mxu1 %v2532_v42 }
  0xf1   :  { %1163 = vmatmul.mubr.bf16.gmra.mxu0 %v2531_v43  ;;  %1435 = vmatmul.mubr.bf16.gmra.mxu1 %v2534_v44 }
  0xf2   :  { %1170 = vmatprep.mubr.bf16.mxu0 %v2535_v45  ;;  %1442 = vmatprep.mubr.bf16.mxu1 %v2538_v46  ;;  %v2561_v46 = vld [vmem:[%s3923_s0 + $0x1b0] ss:$8 sps:$4 sm:$0xff]  }
  0xf9   :  { %1171 = vmatmul.mubr.bf16.gmra.mxu0 %v2537_v47  ;;  %1443 = vmatmul.mubr.bf16.gmra.mxu1 %v2540_v48  ;;  %v2564_v47 = vld [vmem:[%s3923_s0 + $0x3d0] ss:$8 sps:$4 sm:$0xff]  }
  0xfa   :  { %1178 = vmatprep.mubr.bf16.mxu0 %v2541_v49  ;;  %1450 = vmatprep.mubr.bf16.mxu1 %v2544_v50 }
 0x101   :  { %v988_v56 = vpop.f32.mrf.mxu0  ;;  %1179 = vmatmul.mubr.bf16.gmra.mxu0 %v2543_v51  ;;  %v1260_v57 = vpop.f32.mrf.mxu1  ;;  %1451 = vmatmul.mubr.bf16.gmra.mxu1 %v2546_v52  ;;  %v2567_v51 = vld [vmem:[%s3923_s0 + $0x1c4] ss:$8 sps:$4 sm:$0xff]  }
 0x102   :  { %v989_v58 = vadd.f32 %v3278_v55, %v988_v56  ;;  %v1261_v59 = vadd.f32 %v3278_v55, %v1260_v57  ;;  %1186 = vmatprep.mubr.bf16.mxu0 %v2547_v53  ;;  %1458 = vmatprep.mubr.bf16.mxu1 %v2550_v54  ;;  %v2570_v52 = vld [vmem:[%s3923_s0 + $0x3e4] ss:$8 sps:$4 sm:$0xff]  }
 0x103   :  { %v990_v60 = vpop.f32.mrf.mxu0  ;;  %v1262_v61 = vpop.f32.mrf.mxu1 }
 0x104   :  { %v1523_v62 = vmul.f32 0.5, %v989_v58  ;;  %v1591_v63 = vmul.f32 0.5, %v1261_v59 }
 0x105   :  { %v991_v0 = vpop.f32.mrf.mxu0  ;;  %v1263_v1 = vpop.f32.mrf.mxu1 }
 0x106   :  { %2598 = vtanh.f32 %v1523_v62  ;;  %v992_v4 = vadd.f32 %v3278_v55, %v991_v0  ;;  %v1264_v5 = vadd.f32 %v3278_v55, %v1263_v1 }
 0x107   :  { %2600 = vtanh.f32 %v1591_v63  ;;  %v993_v8 = vpop.f32.mrf.mxu0  ;;  %v1265_v9 = vpop.f32.mrf.mxu1 }
 0x108   :  { %v1524_v10 = vmul.f32 0.5, %v992_v4  ;;  %v1592_v11 = vmul.f32 0.5, %v1264_v5 }
 0x109   :  { %v996_v12 = vpop.f32.mrf.mxu0  ;;  %1187 = vmatmul.mubr.bf16.gmra.mxu0 %v2549_v2  ;;  %v1268_v13 = vpop.f32.mrf.mxu1  ;;  %1459 = vmatmul.mubr.bf16.gmra.mxu1 %v2552_v3 }
 0x10a   :  { %2602 = vtanh.f32 %v1524_v10  ;;  %v997_v14 = vadd.f32 %v3278_v55, %v996_v12  ;;  %v1269_v15 = vadd.f32 %v3278_v55, %v1268_v13  ;;  %1194 = vmatprep.mubr.bf16.mxu0 %v2553_v6  ;;  %1466 = vmatprep.mubr.bf16.mxu1 %v2556_v7 }
 0x10b   :  { %2604 = vtanh.f32 %v1592_v11  ;;  %v998_v16 = vpop.f32.mrf.mxu0  ;;  %v1270_v17 = vpop.f32.mrf.mxu1 }
 0x10c   :  { %v1525_v18 = vmul.f32 0.5, %v997_v14  ;;  %v1593_v19 = vmul.f32 0.5, %v1269_v15  ;;  %v2565_v15 = vld [vmem:[%s3923_s0 + $0x1c0] ss:$8 sps:$4 sm:$0xff]  }
 0x10d   :  { %v999_v20 = vpop.f32.mrf.mxu0  ;;  %v1271_v21 = vpop.f32.mrf.mxu1  ;;  %v2568_v16 = vld [vmem:[%s3923_s0 + $0x3e0] ss:$8 sps:$4 sm:$0xff]  }
 0x10e   :  { %2606 = vtanh.f32 %v1525_v18  ;;  %v1000_v24 = vadd.f32 %v3278_v55, %v999_v20  ;;  %v1272_v25 = vadd.f32 %v3278_v55, %v1271_v21  ;;  %v2573_v20 = vld [vmem:[%s3923_s0 + $0x1d4] ss:$8 sps:$4 sm:$0xff]  }
 0x10f   :  { %2608 = vtanh.f32 %v1593_v19  ;;  %v1001_v28 = vpop.f32.mrf.mxu0  ;;  %v1273_v29 = vpop.f32.mrf.mxu1  ;;  %v2576_v21 = vld [vmem:[%s3923_s0 + $0x3f4] ss:$8 sps:$4 sm:$0xff]  }
 0x110   :  { %v1526_v30 = vmul.f32 0.5, %v1000_v24  ;;  %v1594_v31 = vmul.f32 0.5, %v1272_v25 }
 0x111   :  { %v1004_v32 = vpop.f32.mrf.mxu0  ;;  %1195 = vmatmul.mubr.bf16.gmra.mxu0 %v2555_v22  ;;  %v1276_v33 = vpop.f32.mrf.mxu1  ;;  %1467 = vmatmul.mubr.bf16.gmra.mxu1 %v2558_v23 }
 0x112   :  { %2610 = vtanh.f32 %v1526_v30  ;;  %v1005_v34 = vadd.f32 %v3278_v55, %v1004_v32  ;;  %v1277_v35 = vadd.f32 %v3278_v55, %v1276_v33  ;;  %1202 = vmatprep.mubr.bf16.mxu0 %v2559_v26  ;;  %1474 = vmatprep.mubr.bf16.mxu1 %v2562_v27 }
 0x113   :  { %v2599_v36 = vpop.eup %2598  ;;  %2612 = vtanh.f32 %v1594_v31  ;;  %v1006_v37 = vpop.f32.mrf.mxu0 }
 0x114   :  { %v1278_v38 = vpop.f32.mrf.mxu1  ;;  %v2601_v39 = vpop.eup %2600  ;;  %v1791_v40 = vmul.f32 0.5, %v2599_v36  ;;  %v1527_v41 = vmul.f32 0.5, %v1005_v34  ;;  %v1595_v42 = vmul.f32 0.5, %v1277_v35 }
 0x115   :  { %v1859_v43 = vmul.f32 0.5, %v2601_v39  ;;  %v1007_v44 = vpop.f32.mrf.mxu0 }
 0x116   :  { %v1279_v45 = vpop.f32.mrf.mxu1  ;;  %v1925_v48 = vadd.f32 0.5, %v1791_v40  ;;  %2614 = vtanh.f32 %v1527_v41  ;;  %v1008_v49 = vadd.f32 %v3278_v55, %v1007_v44 }
 0x117   :  { %v1280_v50 = vadd.f32 %v3278_v55, %v1279_v45  ;;  %v2603_v53 = vpop.eup %2602  ;;  %v1993_v54 = vadd.f32 0.5, %v1859_v43  ;;  %2616 = vtanh.f32 %v1595_v42  ;;  %v1009_v56 = vpop.f32.mrf.mxu0 }
 0x118   :  { %v1281_v57 = vpop.f32.mrf.mxu1  ;;  %v2605_v58 = vpop.eup %2604  ;;  %2059 = vst [vmem:[%s3925_s3] sm:$0xff] %v1925_v48  ;;  %v1792_v59 = vmul.f32 0.5, %v2603_v53  ;;  %v1528_v60 = vmul.f32 0.5, %v1008_v49  ;;  %v2574_v48 = vld [vmem:[%s3923_s0 + $0x3f0] ss:$8 sps:$4 sm:$0xff]   ;;  %v2582_v53 = vld [vmem:[%s3923_s0 + $0x404] ss:$8 sps:$4 sm:$0xff]  }
 0x119   :  { %v1596_v61 = vmul.f32 0.5, %v1280_v50  ;;  %2127 = vst [vmem:[%s3925_s3 + $0x220] sm:$0xff] %v1993_v54  ;;  %v1860_v62 = vmul.f32 0.5, %v2605_v58  ;;  %v1012_v63 = vpop.f32.mrf.mxu0  ;;  %1203 = vmatmul.mubr.bf16.gmra.mxu0 %v2561_v46  ;;  %1475 = vmatmul.mubr.bf16.gmra.mxu1 %v2564_v47  ;;  %v2571_v47 = vld [vmem:[%s3923_s0 + $0x1d0] ss:$8 sps:$4 sm:$0xff]  }
 0x11a   :  { %v1284_v0 = vpop.f32.mrf.mxu1  ;;  %v1926_v1 = vadd.f32 0.5, %v1792_v59  ;;  %2618 = vtanh.f32 %v1528_v60  ;;  %v1013_v2 = vadd.f32 %v3278_v55, %v1012_v63  ;;  %1210 = vmatprep.mubr.bf16.mxu0 %v2567_v51  ;;  %1482 = vmatprep.mubr.bf16.mxu1 %v2570_v52  ;;  %v2579_v52 = vld [vmem:[%s3923_s0 + $0x1e4] ss:$8 sps:$4 sm:$0xff]  }
 0x11b   :  { %v1285_v3 = vadd.f32 %v3278_v55, %v1284_v0  ;;  %v2607_v4 = vpop.eup %2606  ;;  %v1994_v5 = vadd.f32 0.5, %v1860_v62  ;;  %2620 = vtanh.f32 %v1596_v61  ;;  %v1014_v6 = vpop.f32.mrf.mxu0 }
 0x11c   :  { %v1286_v7 = vpop.f32.mrf.mxu1  ;;  %v2609_v8 = vpop.eup %2608  ;;  %2060 = vst [vmem:[%s3925_s3 + $0x8] sm:$0xff] %v1926_v1  ;;  %v1793_v9 = vmul.f32 0.5, %v2607_v4  ;;  %v1529_v10 = vmul.f32 0.5, %v1013_v2 }
 0x11d   :  { %v1597_v11 = vmul.f32 0.5, %v1285_v3  ;;  %2128 = vst [vmem:[%s3925_s3 + $0x228] sm:$0xff] %v1994_v5  ;;  %v1861_v12 = vmul.f32 0.5, %v2609_v8  ;;  %v1015_v13 = vpop.f32.mrf.mxu0 }
 0x11e   :  { %v1287_v14 = vpop.f32.mrf.mxu1  ;;  %v1927_v17 = vadd.f32 0.5, %v1793_v9  ;;  %2622 = vtanh.f32 %v1529_v10  ;;  %v1016_v18 = vadd.f32 %v3278_v55, %v1015_v13 }
 0x11f   :  { %v1288_v19 = vadd.f32 %v3278_v55, %v1287_v14  ;;  %v2611_v22 = vpop.eup %2610  ;;  %v1995_v23 = vadd.f32 0.5, %v1861_v12  ;;  %2624 = vtanh.f32 %v1597_v11  ;;  %v1017_v24 = vpop.f32.mrf.mxu0 }
 0x120   :  { %v1289_v25 = vpop.f32.mrf.mxu1  ;;  %v2613_v26 = vpop.eup %2612  ;;  %2061 = vst [vmem:[%s3925_s3 + $0x10] sm:$0xff] %v1927_v17  ;;  %v1794_v27 = vmul.f32 0.5, %v2611_v22  ;;  %v1530_v28 = vmul.f32 0.5, %v1016_v18  ;;  %v2580_v17 = vld [vmem:[%s3923_s0 + $0x400] ss:$8 sps:$4 sm:$0xff]  }
 0x121   :  { %v1598_v29 = vmul.f32 0.5, %v1288_v19  ;;  %2129 = vst [vmem:[%s3925_s3 + $0x230] sm:$0xff] %v1995_v23  ;;  %v1862_v30 = vmul.f32 0.5, %v2613_v26  ;;  %v1020_v31 = vpop.f32.mrf.mxu0  ;;  %1211 = vmatmul.mubr.bf16.gmra.mxu0 %v2565_v15  ;;  %1483 = vmatmul.mubr.bf16.gmra.mxu1 %v2568_v16  ;;  %v2577_v16 = vld [vmem:[%s3923_s0 + $0x1e0] ss:$8 sps:$4 sm:$0xff]  }
 0x122   :  { %v1292_v32 = vpop.f32.mrf.mxu1  ;;  %v1928_v33 = vadd.f32 0.5, %v1794_v27  ;;  %2626 = vtanh.f32 %v1530_v28  ;;  %v1021_v34 = vadd.f32 %v3278_v55, %v1020_v31  ;;  %1218 = vmatprep.mubr.bf16.mxu0 %v2573_v20  ;;  %1490 = vmatprep.mubr.bf16.mxu1 %v2576_v21  ;;  %v2585_v21 = vld [vmem:[%s3923_s0 + $0x1f4] ss:$8 sps:$4 sm:$0xff]  }
 0x123   :  { %v1293_v35 = vadd.f32 %v3278_v55, %v1292_v32  ;;  %v2615_v36 = vpop.eup %2614  ;;  %v1996_v37 = vadd.f32 0.5, %v1862_v30  ;;  %2628 = vtanh.f32 %v1598_v29  ;;  %v1022_v38 = vpop.f32.mrf.mxu0  ;;  %v2588_v22 = vld [vmem:[%s3923_s0 + $0x414] ss:$8 sps:$4 sm:$0xff]  }
 0x124   :  { %v1294_v39 = vpop.f32.mrf.mxu1  ;;  %v2617_v40 = vpop.eup %2616  ;;  %2062 = vst [vmem:[%s3925_s3 + $0x18] sm:$0xff] %v1928_v33  ;;  %v1795_v41 = vmul.f32 0.5, %v2615_v36  ;;  %v1531_v42 = vmul.f32 0.5, %v1021_v34 }
 0x125   :  { %v1599_v43 = vmul.f32 0.5, %v1293_v35  ;;  %2130 = vst [vmem:[%s3925_s3 + $0x238] sm:$0xff] %v1996_v37  ;;  %v1863_v44 = vmul.f32 0.5, %v2617_v40  ;;  %v1023_v45 = vpop.f32.mrf.mxu0 }
 0x126   :  { %v1295_v46 = vpop.f32.mrf.mxu1  ;;  %v1929_v49 = vadd.f32 0.5, %v1795_v41  ;;  %2630 = vtanh.f32 %v1531_v42  ;;  %v1024_v50 = vadd.f32 %v3278_v55, %v1023_v45 }
 0x127   :  { %v1296_v51 = vadd.f32 %v3278_v55, %v1295_v46  ;;  %v2619_v54 = vpop.eup %2618  ;;  %v1997_v56 = vadd.f32 0.5, %v1863_v44  ;;  %2632 = vtanh.f32 %v1599_v43  ;;  %v1025_v57 = vpop.f32.mrf.mxu0 }
 0x128   :  { %v1297_v58 = vpop.f32.mrf.mxu1  ;;  %v2621_v59 = vpop.eup %2620  ;;  %2063 = vst [vmem:[%s3925_s3 + $0x20] sm:$0xff] %v1929_v49  ;;  %v1796_v60 = vmul.f32 0.5, %v2619_v54  ;;  %v1532_v61 = vmul.f32 0.5, %v1024_v50  ;;  %v2586_v49 = vld [vmem:[%s3923_s0 + $0x410] ss:$8 sps:$4 sm:$0xff]  }
 0x129   :  { %v1600_v62 = vmul.f32 0.5, %v1296_v51  ;;  %2131 = vst [vmem:[%s3925_s3 + $0x240] sm:$0xff] %v1997_v56  ;;  %v1864_v63 = vmul.f32 0.5, %v2621_v59  ;;  %v1028_v0 = vpop.f32.mrf.mxu0  ;;  %1219 = vmatmul.mubr.bf16.gmra.mxu0 %v2571_v47  ;;  %1491 = vmatmul.mubr.bf16.gmra.mxu1 %v2574_v48  ;;  %v2583_v48 = vld [vmem:[%s3923_s0 + $0x1f0] ss:$8 sps:$4 sm:$0xff]  }
 0x12a   :  { %v1300_v1 = vpop.f32.mrf.mxu1  ;;  %v1930_v2 = vadd.f32 0.5, %v1796_v60  ;;  %2634 = vtanh.f32 %v1532_v61  ;;  %v1029_v3 = vadd.f32 %v3278_v55, %v1028_v0  ;;  %1226 = vmatprep.mubr.bf16.mxu0 %v2579_v52  ;;  %1498 = vmatprep.mubr.bf16.mxu1 %v2582_v53  ;;  %v2591_v53 = vld [vmem:[%s3923_s0 + $0x204] ss:$8 sps:$4 sm:$0xff]  }
 0x12b   :  { %v1301_v4 = vadd.f32 %v3278_v55, %v1300_v1  ;;  %v2623_v5 = vpop.eup %2622  ;;  %v1998_v6 = vadd.f32 0.5, %v1864_v63  ;;  %2636 = vtanh.f32 %v1600_v62  ;;  %v1030_v7 = vpop.f32.mrf.mxu0  ;;  %v2594_v54 = vld [vmem:[%s3923_s0 + $0x424] ss:$8 sps:$4 sm:$0xff]  }
 0x12c   :  { %v1302_v8 = vpop.f32.mrf.mxu1  ;;  %v2625_v9 = vpop.eup %2624  ;;  %2064 = vst [vmem:[%s3925_s3 + $0x28] sm:$0xff] %v1930_v2  ;;  %v1797_v10 = vmul.f32 0.5, %v2623_v5  ;;  %v1533_v11 = vmul.f32 0.5, %v1029_v3 }
 0x12d   :  { %v1601_v12 = vmul.f32 0.5, %v1301_v4  ;;  %2132 = vst [vmem:[%s3925_s3 + $0x248] sm:$0xff] %v1998_v6  ;;  %v1865_v13 = vmul.f32 0.5, %v2625_v9  ;;  %v1031_v14 = vpop.f32.mrf.mxu0 }
 0x12e   :  { %v1303_v15 = vpop.f32.mrf.mxu1  ;;  %v1931_v18 = vadd.f32 0.5, %v1797_v10  ;;  %2638 = vtanh.f32 %v1533_v11  ;;  %v1032_v19 = vadd.f32 %v3278_v55, %v1031_v14 }
 0x12f   :  { %v1304_v20 = vadd.f32 %v3278_v55, %v1303_v15  ;;  %v2627_v23 = vpop.eup %2626  ;;  %v1999_v24 = vadd.f32 0.5, %v1865_v13  ;;  %2640 = vtanh.f32 %v1601_v12  ;;  %v1033_v25 = vpop.f32.mrf.mxu0 }
 0x130   :  { %v1305_v26 = vpop.f32.mrf.mxu1  ;;  %v2629_v27 = vpop.eup %2628  ;;  %2065 = vst [vmem:[%s3925_s3 + $0x30] sm:$0xff] %v1931_v18  ;;  %v1798_v28 = vmul.f32 0.5, %v2627_v23  ;;  %v1534_v29 = vmul.f32 0.5, %v1032_v19  ;;  %v2592_v18 = vld [vmem:[%s3923_s0 + $0x420] ss:$8 sps:$4 sm:$0xff]  }
 0x131   :  { %v1602_v30 = vmul.f32 0.5, %v1304_v20  ;;  %2133 = vst [vmem:[%s3925_s3 + $0x250] sm:$0xff] %v1999_v24  ;;  %v1866_v31 = vmul.f32 0.5, %v2629_v27  ;;  %v1036_v32 = vpop.f32.mrf.mxu0  ;;  %1227 = vmatmul.mubr.bf16.gmra.mxu0 %v2577_v16  ;;  %1499 = vmatmul.mubr.bf16.gmra.mxu1 %v2580_v17  ;;  %v2589_v17 = vld [vmem:[%s3923_s0 + $0x200] ss:$8 sps:$4 sm:$0xff]  }
 0x132   :  { %v1308_v33 = vpop.f32.mrf.mxu1  ;;  %v1932_v34 = vadd.f32 0.5, %v1798_v28  ;;  %2642 = vtanh.f32 %v1534_v29  ;;  %v1037_v35 = vadd.f32 %v3278_v55, %v1036_v32  ;;  %1234 = vmatprep.mubr.bf16.mxu0 %v2585_v21  ;;  %1506 = vmatprep.mubr.bf16.mxu1 %v2588_v22  ;;  %v2597_v22 = vld [vmem:[%s3923_s0 + $0x214] ss:$8 sps:$4 sm:$0xff]  }
 0x133   :  { %v1309_v36 = vadd.f32 %v3278_v55, %v1308_v33  ;;  %v2631_v37 = vpop.eup %2630  ;;  %v2000_v38 = vadd.f32 0.5, %v1866_v31  ;;  %2644 = vtanh.f32 %v1602_v30  ;;  %v1038_v39 = vpop.f32.mrf.mxu0 }
 0x134   :  { %v1310_v40 = vpop.f32.mrf.mxu1  ;;  %v2633_v41 = vpop.eup %2632  ;;  %2066 = vst [vmem:[%s3925_s3 + $0x38] sm:$0xff] %v1932_v34  ;;  %v1799_v42 = vmul.f32 0.5, %v2631_v37  ;;  %v1535_v43 = vmul.f32 0.5, %v1037_v35 }
 0x135   :  { %v1603_v44 = vmul.f32 0.5, %v1309_v36  ;;  %2134 = vst [vmem:[%s3925_s3 + $0x258] sm:$0xff] %v2000_v38  ;;  %v1867_v45 = vmul.f32 0.5, %v2633_v41  ;;  %v1039_v46 = vpop.f32.mrf.mxu0 }
 0x136   :  { %v1311_v47 = vpop.f32.mrf.mxu1  ;;  %v1933_v50 = vadd.f32 0.5, %v1799_v42  ;;  %2646 = vtanh.f32 %v1535_v43  ;;  %v1040_v51 = vadd.f32 %v3278_v55, %v1039_v46 }
 0x137   :  { %v1312_v52 = vadd.f32 %v3278_v55, %v1311_v47  ;;  %v2635_v56 = vpop.eup %2634  ;;  %v2001_v57 = vadd.f32 0.5, %v1867_v45  ;;  %2648 = vtanh.f32 %v1603_v44  ;;  %v1041_v58 = vpop.f32.mrf.mxu0 }
 0x138   :  { %v1313_v59 = vpop.f32.mrf.mxu1  ;;  %v2637_v60 = vpop.eup %2636  ;;  %2067 = vst [vmem:[%s3925_s3 + $0x40] sm:$0xff] %v1933_v50  ;;  %v1800_v61 = vmul.f32 0.5, %v2635_v56  ;;  %v1536_v62 = vmul.f32 0.5, %v1040_v51 }
 0x139   :  { %v1604_v63 = vmul.f32 0.5, %v1312_v52  ;;  %2135 = vst [vmem:[%s3925_s3 + $0x260] sm:$0xff] %v2001_v57  ;;  %v1868_v0 = vmul.f32 0.5, %v2637_v60  ;;  %v1044_v1 = vpop.f32.mrf.mxu0  ;;  %1235 = vmatmul.mubr.bf16.gmra.mxu0 %v2583_v48  ;;  %1507 = vmatmul.mubr.bf16.gmra.mxu1 %v2586_v49  ;;  %v2595_v48 = vld [vmem:[%s3923_s0 + $0x210] ss:$8 sps:$4 sm:$0xff]  }
 0x13a   :  { %v1316_v2 = vpop.f32.mrf.mxu1  ;;  %v1934_v3 = vadd.f32 0.5, %v1800_v61  ;;  %2650 = vtanh.f32 %v1536_v62  ;;  %v1045_v4 = vadd.f32 %v3278_v55, %v1044_v1  ;;  %1242 = vmatprep.mubr.bf16.mxu0 %v2591_v53  ;;  %1514 = vmatprep.mubr.bf16.mxu1 %v2594_v54 }
 0x13b   :  { %v1317_v5 = vadd.f32 %v3278_v55, %v1316_v2  ;;  %v2639_v6 = vpop.eup %2638  ;;  %v2002_v7 = vadd.f32 0.5, %v1868_v0  ;;  %2652 = vtanh.f32 %v1604_v63  ;;  %v1046_v8 = vpop.f32.mrf.mxu0 }
 0x13c   :  { %v1318_v9 = vpop.f32.mrf.mxu1  ;;  %v2641_v10 = vpop.eup %2640  ;;  %2068 = vst [vmem:[%s3925_s3 + $0x48] sm:$0xff] %v1934_v3  ;;  %v1801_v11 = vmul.f32 0.5, %v2639_v6  ;;  %v1537_v12 = vmul.f32 0.5, %v1045_v4 }
 0x13d   :  { %v1605_v13 = vmul.f32 0.5, %v1317_v5  ;;  %2136 = vst [vmem:[%s3925_s3 + $0x268] sm:$0xff] %v2002_v7  ;;  %v1869_v14 = vmul.f32 0.5, %v2641_v10  ;;  %v1047_v15 = vpop.f32.mrf.mxu0 }
 0x13e   :  { %v1319_v16 = vpop.f32.mrf.mxu1  ;;  %v1935_v19 = vadd.f32 0.5, %v1801_v11  ;;  %2654 = vtanh.f32 %v1537_v12  ;;  %v1048_v20 = vadd.f32 %v3278_v55, %v1047_v15 }
 0x13f   :  { %v1320_v21 = vadd.f32 %v3278_v55, %v1319_v16  ;;  %v2643_v23 = vpop.eup %2642  ;;  %v2003_v24 = vadd.f32 0.5, %v1869_v14  ;;  %2656 = vtanh.f32 %v1605_v13  ;;  %v1049_v25 = vpop.f32.mrf.mxu0 }
 0x140   :  { %v1321_v26 = vpop.f32.mrf.mxu1  ;;  %v2645_v27 = vpop.eup %2644  ;;  %2069 = vst [vmem:[%s3925_s3 + $0x50] sm:$0xff] %v1935_v19  ;;  %v1802_v28 = vmul.f32 0.5, %v2643_v23  ;;  %v1538_v29 = vmul.f32 0.5, %v1048_v20 }
 0x141   :  { %v1606_v30 = vmul.f32 0.5, %v1320_v21  ;;  %2137 = vst [vmem:[%s3925_s3 + $0x270] sm:$0xff] %v2003_v24  ;;  %v1870_v31 = vmul.f32 0.5, %v2645_v27  ;;  %v1052_v32 = vpop.f32.mrf.mxu0  ;;  %1243 = vmatmul.mubr.bf16.gmra.mxu0 %v2589_v17  ;;  %1515 = vmatmul.mubr.bf16.gmra.mxu1 %v2592_v18 }
 0x142   :  { %v1324_v33 = vpop.f32.mrf.mxu1  ;;  %v1936_v34 = vadd.f32 0.5, %v1802_v28  ;;  %2658 = vtanh.f32 %v1538_v29  ;;  %v1053_v35 = vadd.f32 %v3278_v55, %v1052_v32  ;;  %1250 = vmatprep.mubr.bf16.mxu0 %v2597_v22 }
 0x143   :  { %v1325_v36 = vadd.f32 %v3278_v55, %v1324_v33  ;;  %v2647_v37 = vpop.eup %2646  ;;  %v2004_v38 = vadd.f32 0.5, %v1870_v31  ;;  %2660 = vtanh.f32 %v1606_v30  ;;  %v1054_v39 = vpop.f32.mrf.mxu0 }
 0x144   :  { %v1326_v40 = vpop.f32.mrf.mxu1  ;;  %v2649_v41 = vpop.eup %2648  ;;  %2070 = vst [vmem:[%s3925_s3 + $0x58] sm:$0xff] %v1936_v34  ;;  %v1803_v42 = vmul.f32 0.5, %v2647_v37  ;;  %v1539_v43 = vmul.f32 0.5, %v1053_v35 }
 0x145   :  { %v1607_v44 = vmul.f32 0.5, %v1325_v36  ;;  %2138 = vst [vmem:[%s3925_s3 + $0x278] sm:$0xff] %v2004_v38  ;;  %v1871_v45 = vmul.f32 0.5, %v2649_v41  ;;  %v1055_v46 = vpop.f32.mrf.mxu0 }
 0x146   :  { %v1327_v47 = vpop.f32.mrf.mxu1  ;;  %v1937_v49 = vadd.f32 0.5, %v1803_v42  ;;  %2662 = vtanh.f32 %v1539_v43  ;;  %v1056_v50 = vadd.f32 %v3278_v55, %v1055_v46 }
 0x147   :  { %v1328_v51 = vadd.f32 %v3278_v55, %v1327_v47  ;;  %v2651_v52 = vpop.eup %2650  ;;  %v2005_v53 = vadd.f32 0.5, %v1871_v45  ;;  %2664 = vtanh.f32 %v1607_v44  ;;  %v1057_v54 = vpop.f32.mrf.mxu0 }
 0x148   :  { %v1329_v56 = vpop.f32.mrf.mxu1  ;;  %v2653_v57 = vpop.eup %2652  ;;  %2071 = vst [vmem:[%s3925_s3 + $0x60] sm:$0xff] %v1937_v49  ;;  %v1804_v58 = vmul.f32 0.5, %v2651_v52  ;;  %v1540_v59 = vmul.f32 0.5, %v1056_v50 }
 0x149   :  { %v1608_v60 = vmul.f32 0.5, %v1328_v51  ;;  %2139 = vst [vmem:[%s3925_s3 + $0x280] sm:$0xff] %v2005_v53  ;;  %v1872_v61 = vmul.f32 0.5, %v2653_v57  ;;  %v1060_v62 = vpop.f32.mrf.mxu0  ;;  %1251 = vmatmul.mubr.bf16.gmra.mxu0 %v2595_v48 }
 0x14a   :  { %v1332_v63 = vpop.f32.mrf.mxu1  ;;  %v1938_v0 = vadd.f32 0.5, %v1804_v58  ;;  %2666 = vtanh.f32 %v1540_v59  ;;  %v1061_v1 = vadd.f32 %v3278_v55, %v1060_v62 }
 0x14b   :  { %v1333_v2 = vadd.f32 %v3278_v55, %v1332_v63  ;;  %v2655_v3 = vpop.eup %2654  ;;  %v2006_v4 = vadd.f32 0.5, %v1872_v61  ;;  %2668 = vtanh.f32 %v1608_v60  ;;  %v1062_v5 = vpop.f32.mrf.mxu0 }
 0x14c   :  { %v1334_v6 = vpop.f32.mrf.mxu1  ;;  %v2657_v7 = vpop.eup %2656  ;;  %2072 = vst [vmem:[%s3925_s3 + $0x68] sm:$0xff] %v1938_v0  ;;  %v1805_v8 = vmul.f32 0.5, %v2655_v3  ;;  %v1541_v9 = vmul.f32 0.5, %v1061_v1 }
 0x14d   :  { %v1609_v10 = vmul.f32 0.5, %v1333_v2  ;;  %2140 = vst [vmem:[%s3925_s3 + $0x288] sm:$0xff] %v2006_v4  ;;  %v1873_v11 = vmul.f32 0.5, %v2657_v7  ;;  %v1063_v12 = vpop.f32.mrf.mxu0 }
 0x14e   :  { %v1335_v13 = vpop.f32.mrf.mxu1  ;;  %v1939_v14 = vadd.f32 0.5, %v1805_v8  ;;  %2670 = vtanh.f32 %v1541_v9  ;;  %v1064_v15 = vadd.f32 %v3278_v55, %v1063_v12 }
 0x14f   :  { %v1336_v16 = vadd.f32 %v3278_v55, %v1335_v13  ;;  %v2659_v17 = vpop.eup %2658  ;;  %v2007_v18 = vadd.f32 0.5, %v1873_v11  ;;  %2672 = vtanh.f32 %v1609_v10  ;;  %v1065_v19 = vpop.f32.mrf.mxu0 }
 0x150   :  { %v1337_v20 = vpop.f32.mrf.mxu1  ;;  %v2661_v21 = vpop.eup %2660  ;;  %2073 = vst [vmem:[%s3925_s3 + $0x70] sm:$0xff] %v1939_v14  ;;  %v1806_v22 = vmul.f32 0.5, %v2659_v17  ;;  %v1542_v23 = vmul.f32 0.5, %v1064_v15 }
 0x151   :  { %v1610_v24 = vmul.f32 0.5, %v1336_v16  ;;  %2141 = vst [vmem:[%s3925_s3 + $0x290] sm:$0xff] %v2007_v18  ;;  %v1874_v25 = vmul.f32 0.5, %v2661_v21  ;;  %v1068_v26 = vpop.f32.mrf.mxu0 }
 0x152   :  { %v1340_v27 = vpop.f32.mrf.mxu1  ;;  %v1940_v28 = vadd.f32 0.5, %v1806_v22  ;;  %2674 = vtanh.f32 %v1542_v23  ;;  %v1069_v29 = vadd.f32 %v3278_v55, %v1068_v26 }
 0x153   :  { %v1341_v30 = vadd.f32 %v3278_v55, %v1340_v27  ;;  %v2663_v31 = vpop.eup %2662  ;;  %v2008_v32 = vadd.f32 0.5, %v1874_v25  ;;  %2676 = vtanh.f32 %v1610_v24  ;;  %v1070_v33 = vpop.f32.mrf.mxu0 }
 0x154   :  { %v1342_v34 = vpop.f32.mrf.mxu1  ;;  %v2665_v35 = vpop.eup %2664  ;;  %2074 = vst [vmem:[%s3925_s3 + $0x78] sm:$0xff] %v1940_v28  ;;  %v1807_v36 = vmul.f32 0.5, %v2663_v31  ;;  %v1543_v37 = vmul.f32 0.5, %v1069_v29 }
 0x155   :  { %v1611_v38 = vmul.f32 0.5, %v1341_v30  ;;  %2142 = vst [vmem:[%s3925_s3 + $0x298] sm:$0xff] %v2008_v32  ;;  %v1875_v39 = vmul.f32 0.5, %v2665_v35  ;;  %v1071_v40 = vpop.f32.mrf.mxu0 }
 0x156   :  { %v1343_v41 = vpop.f32.mrf.mxu1  ;;  %v1941_v42 = vadd.f32 0.5, %v1807_v36  ;;  %2678 = vtanh.f32 %v1543_v37  ;;  %v1072_v43 = vadd.f32 %v3278_v55, %v1071_v40 }
 0x157   :  { %v1344_v44 = vadd.f32 %v3278_v55, %v1343_v41  ;;  %v2667_v45 = vpop.eup %2666  ;;  %v2009_v46 = vadd.f32 0.5, %v1875_v39  ;;  %2680 = vtanh.f32 %v1611_v38  ;;  %v1073_v47 = vpop.f32.mrf.mxu0 }
 0x158   :  { %v1345_v48 = vpop.f32.mrf.mxu1  ;;  %v2669_v49 = vpop.eup %2668  ;;  %2075 = vst [vmem:[%s3925_s3 + $0x80] sm:$0xff] %v1941_v42  ;;  %v1808_v50 = vmul.f32 0.5, %v2667_v45  ;;  %v1544_v51 = vmul.f32 0.5, %v1072_v43 }
 0x159   :  { %v1612_v52 = vmul.f32 0.5, %v1344_v44  ;;  %2143 = vst [vmem:[%s3925_s3 + $0x2a0] sm:$0xff] %v2009_v46  ;;  %v1876_v53 = vmul.f32 0.5, %v2669_v49  ;;  %v1076_v54 = vpop.f32.mrf.mxu0 }
 0x15a   :  { %v1348_v56 = vpop.f32.mrf.mxu1  ;;  %v1942_v57 = vadd.f32 0.5, %v1808_v50  ;;  %2682 = vtanh.f32 %v1544_v51  ;;  %v1077_v58 = vadd.f32 %v3278_v55, %v1076_v54 }
 0x15b   :  { %v1349_v59 = vadd.f32 %v3278_v55, %v1348_v56  ;;  %v2671_v60 = vpop.eup %2670  ;;  %v2010_v61 = vadd.f32 0.5, %v1876_v53  ;;  %2684 = vtanh.f32 %v1612_v52  ;;  %v1078_v62 = vpop.f32.mrf.mxu0 }
 0x15c   :  { %v1350_v63 = vpop.f32.mrf.mxu1  ;;  %v2673_v0 = vpop.eup %2672  ;;  %2076 = vst [vmem:[%s3925_s3 + $0x88] sm:$0xff] %v1942_v57  ;;  %v1809_v1 = vmul.f32 0.5, %v2671_v60  ;;  %v1545_v2 = vmul.f32 0.5, %v1077_v58 }
 0x15d   :  { %v1613_v3 = vmul.f32 0.5, %v1349_v59  ;;  %2144 = vst [vmem:[%s3925_s3 + $0x2a8] sm:$0xff] %v2010_v61  ;;  %v1877_v4 = vmul.f32 0.5, %v2673_v0  ;;  %v1079_v5 = vpop.f32.mrf.mxu0  ;;  %v3565_v0 = vld [vmem:[%s3924_s2] ss:$0 sm:$0xff] }
 0x15e   :  { %v1351_v6 = vpop.f32.mrf.mxu1  ;;  %v1943_v7 = vadd.f32 0.5, %v1809_v1  ;;  %2686 = vtanh.f32 %v1545_v2  ;;  %v1080_v8 = vadd.f32 %v3278_v55, %v1079_v5 }
 0x15f   :  { %v1352_v9 = vadd.f32 %v3278_v55, %v1351_v6  ;;  %v2675_v10 = vpop.eup %2674  ;;  %v2011_v11 = vadd.f32 0.5, %v1877_v4  ;;  %2688 = vtanh.f32 %v1613_v3  ;;  %v1081_v12 = vpop.f32.mrf.mxu0 }
 0x160   :  { %v1353_v13 = vpop.f32.mrf.mxu1  ;;  %v2677_v14 = vpop.eup %2676  ;;  %2077 = vst [vmem:[%s3925_s3 + $0x90] sm:$0xff] %v1943_v7  ;;  %v1810_v15 = vmul.f32 0.5, %v2675_v10  ;;  %v1546_v16 = vmul.f32 0.5, %v1080_v8 }
 0x161   :  { %v1614_v17 = vmul.f32 0.5, %v1352_v9  ;;  %2145 = vst [vmem:[%s3925_s3 + $0x2b0] sm:$0xff] %v2011_v11  ;;  %v1878_v18 = vmul.f32 0.5, %v2677_v14  ;;  %v1084_v19 = vpop.f32.mrf.mxu0 }
 0x162   :  { %v1356_v20 = vpop.f32.mrf.mxu1  ;;  %v1944_v21 = vadd.f32 0.5, %v1810_v15  ;;  %2690 = vtanh.f32 %v1546_v16  ;;  %v1085_v22 = vadd.f32 %v3278_v55, %v1084_v19 }
 0x163   :  { %v1357_v23 = vadd.f32 %v3278_v55, %v1356_v20  ;;  %v2679_v24 = vpop.eup %2678  ;;  %v2012_v25 = vadd.f32 0.5, %v1878_v18  ;;  %2692 = vtanh.f32 %v1614_v17  ;;  %v1086_v26 = vpop.f32.mrf.mxu0 }
 0x164   :  { %v1358_v27 = vpop.f32.mrf.mxu1  ;;  %v2681_v28 = vpop.eup %2680  ;;  %2078 = vst [vmem:[%s3925_s3 + $0x98] sm:$0xff] %v1944_v21  ;;  %v1811_v29 = vmul.f32 0.5, %v2679_v24  ;;  %v1547_v30 = vmul.f32 0.5, %v1085_v22 }
 0x165   :  { %v1615_v31 = vmul.f32 0.5, %v1357_v23  ;;  %2146 = vst [vmem:[%s3925_s3 + $0x2b8] sm:$0xff] %v2012_v25  ;;  %v1879_v32 = vmul.f32 0.5, %v2681_v28  ;;  %v1087_v33 = vpop.f32.mrf.mxu0 }
 0x166   :  { %v1359_v34 = vpop.f32.mrf.mxu1  ;;  %v1945_v35 = vadd.f32 0.5, %v1811_v29  ;;  %2694 = vtanh.f32 %v1547_v30  ;;  %v1088_v36 = vadd.f32 %v3278_v55, %v1087_v33 }
 0x167   :  { %v1360_v37 = vadd.f32 %v3278_v55, %v1359_v34  ;;  %v2683_v38 = vpop.eup %2682  ;;  %v2013_v39 = vadd.f32 0.5, %v1879_v32  ;;  %2696 = vtanh.f32 %v1615_v31  ;;  %v1089_v40 = vpop.f32.mrf.mxu0 }
 0x168   :  { %v1361_v41 = vpop.f32.mrf.mxu1  ;;  %v2685_v42 = vpop.eup %2684  ;;  %2079 = vst [vmem:[%s3925_s3 + $0xa0] sm:$0xff] %v1945_v35  ;;  %v1812_v43 = vmul.f32 0.5, %v2683_v38  ;;  %v1548_v44 = vmul.f32 0.5, %v1088_v36 }
 0x169   :  { %v1616_v45 = vmul.f32 0.5, %v1360_v37  ;;  %2147 = vst [vmem:[%s3925_s3 + $0x2c0] sm:$0xff] %v2013_v39  ;;  %v1880_v46 = vmul.f32 0.5, %v2685_v42  ;;  %v1092_v47 = vpop.f32.mrf.mxu0 }
 0x16a   :  { %v1364_v48 = vpop.f32.mrf.mxu1  ;;  %v1946_v49 = vadd.f32 0.5, %v1812_v43  ;;  %2698 = vtanh.f32 %v1548_v44  ;;  %v1093_v50 = vadd.f32 %v3278_v55, %v1092_v47 }
 0x16b   :  { %v1365_v51 = vadd.f32 %v3278_v55, %v1364_v48  ;;  %v2687_v52 = vpop.eup %2686  ;;  %v2014_v53 = vadd.f32 0.5, %v1880_v46  ;;  %2700 = vtanh.f32 %v1616_v45  ;;  %v1094_v54 = vpop.f32.mrf.mxu0 }
 0x16c   :  { %v1366_v56 = vpop.f32.mrf.mxu1  ;;  %v2689_v57 = vpop.eup %2688  ;;  %2080 = vst [vmem:[%s3925_s3 + $0xa8] sm:$0xff] %v1946_v49  ;;  %v1813_v58 = vmul.f32 0.5, %v2687_v52  ;;  %v1549_v59 = vmul.f32 0.5, %v1093_v50 }
 0x16d   :  { %v1617_v60 = vmul.f32 0.5, %v1365_v51  ;;  %2148 = vst [vmem:[%s3925_s3 + $0x2c8] sm:$0xff] %v2014_v53  ;;  %v1881_v61 = vmul.f32 0.5, %v2689_v57  ;;  %v1095_v62 = vpop.f32.mrf.mxu0 }
 0x16e   :  { %v1367_v55 = vpop.f32.mrf.mxu1  ;;  %v1947_v63 = vadd.f32 0.5, %v1813_v58  ;;  %2702 = vtanh.f32 %v1549_v59  ;;  %v1096_v1 = vadd.f32 %v3565_v0, %v1095_v62 }
 0x16f   :  { %v1368_v2 = vadd.f32 %v3565_v0, %v1367_v55  ;;  %v2691_v3 = vpop.eup %2690  ;;  %v2015_v4 = vadd.f32 0.5, %v1881_v61  ;;  %2704 = vtanh.f32 %v1617_v60  ;;  %v1097_v5 = vpop.f32.mrf.mxu0 }
 0x170   :  { %v1369_v6 = vpop.f32.mrf.mxu1  ;;  %v2693_v7 = vpop.eup %2692  ;;  %2081 = vst [vmem:[%s3925_s3 + $0xb0] sm:$0xff] %v1947_v63  ;;  %v1814_v8 = vmul.f32 0.5, %v2691_v3  ;;  %v1550_v9 = vmul.f32 0.5, %v1096_v1 }
 0x171   :  { %v1618_v10 = vmul.f32 0.5, %v1368_v2  ;;  %2149 = vst [vmem:[%s3925_s3 + $0x2d0] sm:$0xff] %v2015_v4  ;;  %v1882_v11 = vmul.f32 0.5, %v2693_v7  ;;  %v1100_v12 = vpop.f32.mrf.mxu0 }
 0x172   :  { %v1372_v13 = vpop.f32.mrf.mxu1  ;;  %v1948_v14 = vadd.f32 0.5, %v1814_v8  ;;  %2706 = vtanh.f32 %v1550_v9  ;;  %v1101_v15 = vadd.f32 %v3565_v0, %v1100_v12 }
 0x173   :  { %v1373_v16 = vadd.f32 %v3565_v0, %v1372_v13  ;;  %v2695_v17 = vpop.eup %2694  ;;  %v2016_v18 = vadd.f32 0.5, %v1882_v11  ;;  %2708 = vtanh.f32 %v1618_v10  ;;  %v1102_v19 = vpop.f32.mrf.mxu0 }
 0x174   :  { %v1374_v20 = vpop.f32.mrf.mxu1  ;;  %v2697_v21 = vpop.eup %2696  ;;  %2082 = vst [vmem:[%s3925_s3 + $0xb8] sm:$0xff] %v1948_v14  ;;  %v1815_v22 = vmul.f32 0.5, %v2695_v17  ;;  %v1551_v23 = vmul.f32 0.5, %v1101_v15 }
 0x175   :  { %v1619_v24 = vmul.f32 0.5, %v1373_v16  ;;  %2150 = vst [vmem:[%s3925_s3 + $0x2d8] sm:$0xff] %v2016_v18  ;;  %v1883_v25 = vmul.f32 0.5, %v2697_v21  ;;  %v1103_v26 = vpop.f32.mrf.mxu0 }
 0x176   :  { %v1375_v27 = vpop.f32.mrf.mxu1  ;;  %v1949_v28 = vadd.f32 0.5, %v1815_v22  ;;  %2710 = vtanh.f32 %v1551_v23  ;;  %v1104_v29 = vadd.f32 %v3565_v0, %v1103_v26 }
 0x177   :  { %v1376_v30 = vadd.f32 %v3565_v0, %v1375_v27  ;;  %v2699_v31 = vpop.eup %2698  ;;  %v2017_v32 = vadd.f32 0.5, %v1883_v25  ;;  %2712 = vtanh.f32 %v1619_v24  ;;  %v1105_v33 = vpop.f32.mrf.mxu0 }
 0x178   :  { %v1377_v34 = vpop.f32.mrf.mxu1  ;;  %v2701_v35 = vpop.eup %2700  ;;  %2083 = vst [vmem:[%s3925_s3 + $0xc0] sm:$0xff] %v1949_v28  ;;  %v1816_v36 = vmul.f32 0.5, %v2699_v31  ;;  %v1552_v37 = vmul.f32 0.5, %v1104_v29 }
 0x179   :  { %v1620_v38 = vmul.f32 0.5, %v1376_v30  ;;  %2151 = vst [vmem:[%s3925_s3 + $0x2e0] sm:$0xff] %v2017_v32  ;;  %v1884_v39 = vmul.f32 0.5, %v2701_v35  ;;  %v1108_v40 = vpop.f32.mrf.mxu0 }
 0x17a   :  { %v1380_v41 = vpop.f32.mrf.mxu1  ;;  %v1950_v42 = vadd.f32 0.5, %v1816_v36  ;;  %2714 = vtanh.f32 %v1552_v37  ;;  %v1109_v43 = vadd.f32 %v3565_v0, %v1108_v40 }
 0x17b   :  { %v1381_v44 = vadd.f32 %v3565_v0, %v1380_v41  ;;  %v2703_v45 = vpop.eup %2702  ;;  %v2018_v46 = vadd.f32 0.5, %v1884_v39  ;;  %2716 = vtanh.f32 %v1620_v38  ;;  %v1110_v47 = vpop.f32.mrf.mxu0 }
 0x17c   :  { %v1382_v48 = vpop.f32.mrf.mxu1  ;;  %v2705_v49 = vpop.eup %2704  ;;  %2084 = vst [vmem:[%s3925_s3 + $0xc8] sm:$0xff] %v1950_v42  ;;  %v1817_v50 = vmul.f32 0.5, %v2703_v45  ;;  %v1553_v51 = vmul.f32 0.5, %v1109_v43 }
 0x17d   :  { %v1621_v52 = vmul.f32 0.5, %v1381_v44  ;;  %2152 = vst [vmem:[%s3925_s3 + $0x2e8] sm:$0xff] %v2018_v46  ;;  %v1885_v53 = vmul.f32 0.5, %v2705_v49  ;;  %v1111_v54 = vpop.f32.mrf.mxu0 }
 0x17e   :  { %v1383_v56 = vpop.f32.mrf.mxu1  ;;  %v1951_v57 = vadd.f32 0.5, %v1817_v50  ;;  %2718 = vtanh.f32 %v1553_v51  ;;  %v1112_v58 = vadd.f32 %v3565_v0, %v1111_v54 }
 0x17f   :  { %v1384_v59 = vadd.f32 %v3565_v0, %v1383_v56  ;;  %v2707_v60 = vpop.eup %2706  ;;  %v2019_v61 = vadd.f32 0.5, %v1885_v53  ;;  %2720 = vtanh.f32 %v1621_v52  ;;  %v1113_v62 = vpop.f32.mrf.mxu0 }
 0x180   :  { %v1385_v55 = vpop.f32.mrf.mxu1  ;;  %v2709_v63 = vpop.eup %2708  ;;  %2085 = vst [vmem:[%s3925_s3 + $0xd0] sm:$0xff] %v1951_v57  ;;  %v1818_v1 = vmul.f32 0.5, %v2707_v60  ;;  %v1554_v2 = vmul.f32 0.5, %v1112_v58 }
 0x181   :  { %v1622_v3 = vmul.f32 0.5, %v1384_v59  ;;  %2153 = vst [vmem:[%s3925_s3 + $0x2f0] sm:$0xff] %v2019_v61  ;;  %v1886_v4 = vmul.f32 0.5, %v2709_v63  ;;  %v1116_v5 = vpop.f32.mrf.mxu0 }
 0x182   :  { %v1388_v6 = vpop.f32.mrf.mxu1  ;;  %v1952_v7 = vadd.f32 0.5, %v1818_v1  ;;  %2722 = vtanh.f32 %v1554_v2  ;;  %v1117_v8 = vadd.f32 %v3565_v0, %v1116_v5 }
 0x183   :  { %v1389_v9 = vadd.f32 %v3565_v0, %v1388_v6  ;;  %v2711_v10 = vpop.eup %2710  ;;  %v2020_v11 = vadd.f32 0.5, %v1886_v4  ;;  %2724 = vtanh.f32 %v1622_v3  ;;  %v1118_v12 = vpop.f32.mrf.mxu0 }
 0x184   :  { %v1390_v13 = vpop.f32.mrf.mxu1  ;;  %v2713_v14 = vpop.eup %2712  ;;  %2086 = vst [vmem:[%s3925_s3 + $0xd8] sm:$0xff] %v1952_v7  ;;  %v1819_v15 = vmul.f32 0.5, %v2711_v10  ;;  %v1555_v16 = vmul.f32 0.5, %v1117_v8 }
 0x185   :  { %v1623_v17 = vmul.f32 0.5, %v1389_v9  ;;  %2154 = vst [vmem:[%s3925_s3 + $0x2f8] sm:$0xff] %v2020_v11  ;;  %v1887_v18 = vmul.f32 0.5, %v2713_v14  ;;  %v1119_v19 = vpop.f32.mrf.mxu0 }
 0x186   :  { %v1391_v20 = vpop.f32.mrf.mxu1  ;;  %v1953_v21 = vadd.f32 0.5, %v1819_v15  ;;  %2726 = vtanh.f32 %v1555_v16  ;;  %v1120_v22 = vadd.f32 %v3565_v0, %v1119_v19 }
 0x187   :  { %v1392_v23 = vadd.f32 %v3565_v0, %v1391_v20  ;;  %v2715_v24 = vpop.eup %2714  ;;  %v2021_v25 = vadd.f32 0.5, %v1887_v18  ;;  %2728 = vtanh.f32 %v1623_v17  ;;  %v1121_v26 = vpop.f32.mrf.mxu0 }
 0x188   :  { %v1393_v27 = vpop.f32.mrf.mxu1  ;;  %v2717_v28 = vpop.eup %2716  ;;  %2087 = vst [vmem:[%s3925_s3 + $0xe0] sm:$0xff] %v1953_v21  ;;  %v1820_v29 = vmul.f32 0.5, %v2715_v24  ;;  %v1556_v30 = vmul.f32 0.5, %v1120_v22 }
 0x189   :  { %v1624_v31 = vmul.f32 0.5, %v1392_v23  ;;  %2155 = vst [vmem:[%s3925_s3 + $0x300] sm:$0xff] %v2021_v25  ;;  %v1888_v32 = vmul.f32 0.5, %v2717_v28  ;;  %v1124_v33 = vpop.f32.mrf.mxu0 }
 0x18a   :  { %v1396_v34 = vpop.f32.mrf.mxu1  ;;  %v1954_v35 = vadd.f32 0.5, %v1820_v29  ;;  %2730 = vtanh.f32 %v1556_v30  ;;  %v1125_v36 = vadd.f32 %v3565_v0, %v1124_v33 }
 0x18b   :  { %v1397_v37 = vadd.f32 %v3565_v0, %v1396_v34  ;;  %v2719_v38 = vpop.eup %2718  ;;  %v2022_v39 = vadd.f32 0.5, %v1888_v32  ;;  %2732 = vtanh.f32 %v1624_v31  ;;  %v1126_v40 = vpop.f32.mrf.mxu0 }
 0x18c   :  { %v1398_v41 = vpop.f32.mrf.mxu1  ;;  %v2721_v42 = vpop.eup %2720  ;;  %2088 = vst [vmem:[%s3925_s3 + $0xe8] sm:$0xff] %v1954_v35  ;;  %v1821_v43 = vmul.f32 0.5, %v2719_v38  ;;  %v1557_v44 = vmul.f32 0.5, %v1125_v36 }
 0x18d   :  { %v1625_v45 = vmul.f32 0.5, %v1397_v37  ;;  %2156 = vst [vmem:[%s3925_s3 + $0x308] sm:$0xff] %v2022_v39  ;;  %v1889_v46 = vmul.f32 0.5, %v2721_v42  ;;  %v1127_v47 = vpop.f32.mrf.mxu0 }
 0x18e   :  { %v1399_v48 = vpop.f32.mrf.mxu1  ;;  %v1955_v49 = vadd.f32 0.5, %v1821_v43  ;;  %2734 = vtanh.f32 %v1557_v44  ;;  %v1128_v50 = vadd.f32 %v3565_v0, %v1127_v47 }
 0x18f   :  { %v1400_v51 = vadd.f32 %v3565_v0, %v1399_v48  ;;  %v2723_v52 = vpop.eup %2722  ;;  %v2023_v53 = vadd.f32 0.5, %v1889_v46  ;;  %2736 = vtanh.f32 %v1625_v45  ;;  %v1129_v54 = vpop.f32.mrf.mxu0 }
 0x190   :  { %v1401_v56 = vpop.f32.mrf.mxu1  ;;  %v2725_v57 = vpop.eup %2724  ;;  %2089 = vst [vmem:[%s3925_s3 + $0xf0] sm:$0xff] %v1955_v49  ;;  %v1822_v58 = vmul.f32 0.5, %v2723_v52  ;;  %v1558_v59 = vmul.f32 0.5, %v1128_v50 }
 0x191   :  { %v1626_v60 = vmul.f32 0.5, %v1400_v51  ;;  %2157 = vst [vmem:[%s3925_s3 + $0x310] sm:$0xff] %v2023_v53  ;;  %v1890_v61 = vmul.f32 0.5, %v2725_v57  ;;  %v1132_v62 = vpop.f32.mrf.mxu0 }
 0x192   :  { %v1404_v55 = vpop.f32.mrf.mxu1  ;;  %v1956_v63 = vadd.f32 0.5, %v1822_v58  ;;  %2738 = vtanh.f32 %v1558_v59  ;;  %v1133_v1 = vadd.f32 %v3565_v0, %v1132_v62 }
 0x193   :  { %v1405_v2 = vadd.f32 %v3565_v0, %v1404_v55  ;;  %v2727_v3 = vpop.eup %2726  ;;  %v2024_v4 = vadd.f32 0.5, %v1890_v61  ;;  %2740 = vtanh.f32 %v1626_v60  ;;  %v1134_v5 = vpop.f32.mrf.mxu0 }
 0x194   :  { %v1406_v6 = vpop.f32.mrf.mxu1  ;;  %v2729_v7 = vpop.eup %2728  ;;  %2090 = vst [vmem:[%s3925_s3 + $0xf8] sm:$0xff] %v1956_v63  ;;  %v1823_v8 = vmul.f32 0.5, %v2727_v3  ;;  %v1559_v9 = vmul.f32 0.5, %v1133_v1 }
 0x195   :  { %v1627_v10 = vmul.f32 0.5, %v1405_v2  ;;  %2158 = vst [vmem:[%s3925_s3 + $0x318] sm:$0xff] %v2024_v4  ;;  %v1891_v11 = vmul.f32 0.5, %v2729_v7  ;;  %v1135_v12 = vpop.f32.mrf.mxu0 }
 0x196   :  { %v1407_v13 = vpop.f32.mrf.mxu1  ;;  %v1957_v14 = vadd.f32 0.5, %v1823_v8  ;;  %2742 = vtanh.f32 %v1559_v9  ;;  %v1136_v15 = vadd.f32 %v3565_v0, %v1135_v12 }
 0x197   :  { %v1408_v16 = vadd.f32 %v3565_v0, %v1407_v13  ;;  %v2731_v17 = vpop.eup %2730  ;;  %v2025_v18 = vadd.f32 0.5, %v1891_v11  ;;  %2744 = vtanh.f32 %v1627_v10  ;;  %v1137_v19 = vpop.f32.mrf.mxu0 }
 0x198   :  { %v1409_v20 = vpop.f32.mrf.mxu1  ;;  %v2733_v21 = vpop.eup %2732  ;;  %2091 = vst [vmem:[%s3925_s3 + $0x100] sm:$0xff] %v1957_v14  ;;  %v1824_v22 = vmul.f32 0.5, %v2731_v17  ;;  %v1560_v23 = vmul.f32 0.5, %v1136_v15 }
 0x199   :  { %v1628_v24 = vmul.f32 0.5, %v1408_v16  ;;  %2159 = vst [vmem:[%s3925_s3 + $0x320] sm:$0xff] %v2025_v18  ;;  %v1892_v25 = vmul.f32 0.5, %v2733_v21  ;;  %v1140_v26 = vpop.f32.mrf.mxu0 }
 0x19a   :  { %v1412_v27 = vpop.f32.mrf.mxu1  ;;  %v1958_v28 = vadd.f32 0.5, %v1824_v22  ;;  %2746 = vtanh.f32 %v1560_v23  ;;  %v1141_v29 = vadd.f32 %v3565_v0, %v1140_v26 }
 0x19b   :  { %v1413_v30 = vadd.f32 %v3565_v0, %v1412_v27  ;;  %v2735_v31 = vpop.eup %2734  ;;  %v2026_v32 = vadd.f32 0.5, %v1892_v25  ;;  %2748 = vtanh.f32 %v1628_v24  ;;  %v1142_v33 = vpop.f32.mrf.mxu0 }
 0x19c   :  { %v1414_v34 = vpop.f32.mrf.mxu1  ;;  %v2737_v35 = vpop.eup %2736  ;;  %2092 = vst [vmem:[%s3925_s3 + $0x108] sm:$0xff] %v1958_v28  ;;  %v1825_v36 = vmul.f32 0.5, %v2735_v31  ;;  %v1561_v37 = vmul.f32 0.5, %v1141_v29 }
 0x19d   :  { %v1629_v38 = vmul.f32 0.5, %v1413_v30  ;;  %2160 = vst [vmem:[%s3925_s3 + $0x328] sm:$0xff] %v2026_v32  ;;  %v1893_v39 = vmul.f32 0.5, %v2737_v35  ;;  %v1143_v40 = vpop.f32.mrf.mxu0 }
 0x19e   :  { %v1415_v41 = vpop.f32.mrf.mxu1  ;;  %v1959_v42 = vadd.f32 0.5, %v1825_v36  ;;  %2750 = vtanh.f32 %v1561_v37  ;;  %v1144_v43 = vadd.f32 %v3565_v0, %v1143_v40 }
 0x19f   :  { %v1416_v44 = vadd.f32 %v3565_v0, %v1415_v41  ;;  %v2739_v45 = vpop.eup %2738  ;;  %v2027_v46 = vadd.f32 0.5, %v1893_v39  ;;  %2752 = vtanh.f32 %v1629_v38  ;;  %v1145_v47 = vpop.f32.mrf.mxu0 }
 0x1a0   :  { %v1417_v48 = vpop.f32.mrf.mxu1  ;;  %v2741_v49 = vpop.eup %2740  ;;  %2093 = vst [vmem:[%s3925_s3 + $0x110] sm:$0xff] %v1959_v42  ;;  %v1826_v50 = vmul.f32 0.5, %v2739_v45  ;;  %v1562_v51 = vmul.f32 0.5, %v1144_v43 }
 0x1a1   :  { %v1630_v52 = vmul.f32 0.5, %v1416_v44  ;;  %2161 = vst [vmem:[%s3925_s3 + $0x330] sm:$0xff] %v2027_v46  ;;  %v1894_v53 = vmul.f32 0.5, %v2741_v49  ;;  %v1148_v54 = vpop.f32.mrf.mxu0 }
 0x1a2   :  { %v1420_v56 = vpop.f32.mrf.mxu1  ;;  %v1960_v57 = vadd.f32 0.5, %v1826_v50  ;;  %2754 = vtanh.f32 %v1562_v51  ;;  %v1149_v58 = vadd.f32 %v3565_v0, %v1148_v54 }
 0x1a3   :  { %v1421_v59 = vadd.f32 %v3565_v0, %v1420_v56  ;;  %v2743_v60 = vpop.eup %2742  ;;  %v2028_v61 = vadd.f32 0.5, %v1894_v53  ;;  %2756 = vtanh.f32 %v1630_v52  ;;  %v1150_v62 = vpop.f32.mrf.mxu0 }
 0x1a4   :  { %v1422_v55 = vpop.f32.mrf.mxu1  ;;  %v2745_v63 = vpop.eup %2744  ;;  %2094 = vst [vmem:[%s3925_s3 + $0x118] sm:$0xff] %v1960_v57  ;;  %v1827_v1 = vmul.f32 0.5, %v2743_v60  ;;  %v1563_v2 = vmul.f32 0.5, %v1149_v58 }
 0x1a5   :  { %v1631_v3 = vmul.f32 0.5, %v1421_v59  ;;  %2162 = vst [vmem:[%s3925_s3 + $0x338] sm:$0xff] %v2028_v61  ;;  %v1895_v4 = vmul.f32 0.5, %v2745_v63  ;;  %v1151_v5 = vpop.f32.mrf.mxu0 }
 0x1a6   :  { %v1423_v6 = vpop.f32.mrf.mxu1  ;;  %v1961_v7 = vadd.f32 0.5, %v1827_v1  ;;  %2758 = vtanh.f32 %v1563_v2  ;;  %v1152_v8 = vadd.f32 %v3565_v0, %v1151_v5 }
 0x1a7   :  { %v1424_v9 = vadd.f32 %v3565_v0, %v1423_v6  ;;  %v2747_v10 = vpop.eup %2746  ;;  %v2029_v11 = vadd.f32 0.5, %v1895_v4  ;;  %2760 = vtanh.f32 %v1631_v3  ;;  %v1153_v12 = vpop.f32.mrf.mxu0 }
 0x1a8   :  { %v1425_v13 = vpop.f32.mrf.mxu1  ;;  %v2749_v14 = vpop.eup %2748  ;;  %2095 = vst [vmem:[%s3925_s3 + $0x120] sm:$0xff] %v1961_v7  ;;  %v1828_v15 = vmul.f32 0.5, %v2747_v10  ;;  %v1564_v16 = vmul.f32 0.5, %v1152_v8 }
 0x1a9   :  { %v1632_v17 = vmul.f32 0.5, %v1424_v9  ;;  %2163 = vst [vmem:[%s3925_s3 + $0x340] sm:$0xff] %v2029_v11  ;;  %v1896_v18 = vmul.f32 0.5, %v2749_v14  ;;  %v1156_v19 = vpop.f32.mrf.mxu0 }
 0x1aa   :  { %v1428_v20 = vpop.f32.mrf.mxu1  ;;  %v1962_v21 = vadd.f32 0.5, %v1828_v15  ;;  %2762 = vtanh.f32 %v1564_v16  ;;  %v1157_v22 = vadd.f32 %v3565_v0, %v1156_v19 }
 0x1ab   :  { %v1429_v23 = vadd.f32 %v3565_v0, %v1428_v20  ;;  %v2751_v24 = vpop.eup %2750  ;;  %v2030_v25 = vadd.f32 0.5, %v1896_v18  ;;  %2764 = vtanh.f32 %v1632_v17  ;;  %v1158_v26 = vpop.f32.mrf.mxu0 }
 0x1ac   :  { %v1430_v27 = vpop.f32.mrf.mxu1  ;;  %v2753_v28 = vpop.eup %2752  ;;  %2096 = vst [vmem:[%s3925_s3 + $0x128] sm:$0xff] %v1962_v21  ;;  %v1829_v29 = vmul.f32 0.5, %v2751_v24  ;;  %v1565_v30 = vmul.f32 0.5, %v1157_v22 }
 0x1ad   :  { %v1633_v31 = vmul.f32 0.5, %v1429_v23  ;;  %2164 = vst [vmem:[%s3925_s3 + $0x348] sm:$0xff] %v2030_v25  ;;  %v1897_v32 = vmul.f32 0.5, %v2753_v28  ;;  %v1159_v33 = vpop.f32.mrf.mxu0 }
 0x1ae   :  { %v1431_v34 = vpop.f32.mrf.mxu1  ;;  %v1963_v35 = vadd.f32 0.5, %v1829_v29  ;;  %2766 = vtanh.f32 %v1565_v30  ;;  %v1160_v36 = vadd.f32 %v3565_v0, %v1159_v33 }
 0x1af   :  { %v1432_v37 = vadd.f32 %v3565_v0, %v1431_v34  ;;  %v2755_v38 = vpop.eup %2754  ;;  %v2031_v39 = vadd.f32 0.5, %v1897_v32  ;;  %2768 = vtanh.f32 %v1633_v31  ;;  %v1161_v40 = vpop.f32.mrf.mxu0 }
 0x1b0   :  { %v1433_v41 = vpop.f32.mrf.mxu1  ;;  %v2757_v42 = vpop.eup %2756  ;;  %2097 = vst [vmem:[%s3925_s3 + $0x130] sm:$0xff] %v1963_v35  ;;  %v1830_v43 = vmul.f32 0.5, %v2755_v38  ;;  %v1566_v44 = vmul.f32 0.5, %v1160_v36 }
 0x1b1   :  { %v1634_v45 = vmul.f32 0.5, %v1432_v37  ;;  %2165 = vst [vmem:[%s3925_s3 + $0x350] sm:$0xff] %v2031_v39  ;;  %v1898_v46 = vmul.f32 0.5, %v2757_v42  ;;  %v1164_v47 = vpop.f32.mrf.mxu0 }
 0x1b2   :  { %v1436_v48 = vpop.f32.mrf.mxu1  ;;  %v1964_v49 = vadd.f32 0.5, %v1830_v43  ;;  %2770 = vtanh.f32 %v1566_v44  ;;  %v1165_v50 = vadd.f32 %v3565_v0, %v1164_v47 }
 0x1b3   :  { %v1437_v51 = vadd.f32 %v3565_v0, %v1436_v48  ;;  %v2759_v52 = vpop.eup %2758  ;;  %v2032_v53 = vadd.f32 0.5, %v1898_v46  ;;  %2772 = vtanh.f32 %v1634_v45  ;;  %v1166_v54 = vpop.f32.mrf.mxu0 }
 0x1b4   :  { %v1438_v56 = vpop.f32.mrf.mxu1  ;;  %v2761_v57 = vpop.eup %2760  ;;  %2098 = vst [vmem:[%s3925_s3 + $0x138] sm:$0xff] %v1964_v49  ;;  %v1831_v58 = vmul.f32 0.5, %v2759_v52  ;;  %v1567_v59 = vmul.f32 0.5, %v1165_v50 }
 0x1b5   :  { %v1635_v60 = vmul.f32 0.5, %v1437_v51  ;;  %2166 = vst [vmem:[%s3925_s3 + $0x358] sm:$0xff] %v2032_v53  ;;  %v1899_v61 = vmul.f32 0.5, %v2761_v57  ;;  %v1167_v62 = vpop.f32.mrf.mxu0 }
 0x1b6   :  { %v1439_v55 = vpop.f32.mrf.mxu1  ;;  %v1965_v63 = vadd.f32 0.5, %v1831_v58  ;;  %2774 = vtanh.f32 %v1567_v59  ;;  %v1168_v1 = vadd.f32 %v3565_v0, %v1167_v62 }
 0x1b7   :  { %v1440_v2 = vadd.f32 %v3565_v0, %v1439_v55  ;;  %v2763_v3 = vpop.eup %2762  ;;  %v2033_v4 = vadd.f32 0.5, %v1899_v61  ;;  %2776 = vtanh.f32 %v1635_v60  ;;  %v1169_v5 = vpop.f32.mrf.mxu0 }
 0x1b8   :  { %v1441_v6 = vpop.f32.mrf.mxu1  ;;  %v2765_v7 = vpop.eup %2764  ;;  %2099 = vst [vmem:[%s3925_s3 + $0x140] sm:$0xff] %v1965_v63  ;;  %v1832_v8 = vmul.f32 0.5, %v2763_v3  ;;  %v1568_v9 = vmul.f32 0.5, %v1168_v1 }
 0x1b9   :  { %v1636_v10 = vmul.f32 0.5, %v1440_v2  ;;  %2167 = vst [vmem:[%s3925_s3 + $0x360] sm:$0xff] %v2033_v4  ;;  %v1900_v11 = vmul.f32 0.5, %v2765_v7  ;;  %v1172_v12 = vpop.f32.mrf.mxu0 }
 0x1ba   :  { %v1444_v13 = vpop.f32.mrf.mxu1  ;;  %v1966_v14 = vadd.f32 0.5, %v1832_v8  ;;  %2778 = vtanh.f32 %v1568_v9  ;;  %v1173_v15 = vadd.f32 %v3565_v0, %v1172_v12 }
 0x1bb   :  { %v1445_v16 = vadd.f32 %v3565_v0, %v1444_v13  ;;  %v2767_v17 = vpop.eup %2766  ;;  %v2034_v18 = vadd.f32 0.5, %v1900_v11  ;;  %2780 = vtanh.f32 %v1636_v10  ;;  %v1174_v19 = vpop.f32.mrf.mxu0 }
 0x1bc   :  { %v1446_v20 = vpop.f32.mrf.mxu1  ;;  %v2769_v21 = vpop.eup %2768  ;;  %2100 = vst [vmem:[%s3925_s3 + $0x148] sm:$0xff] %v1966_v14  ;;  %v1833_v22 = vmul.f32 0.5, %v2767_v17  ;;  %v1569_v23 = vmul.f32 0.5, %v1173_v15 }
 0x1bd   :  { %v1637_v24 = vmul.f32 0.5, %v1445_v16  ;;  %2168 = vst [vmem:[%s3925_s3 + $0x368] sm:$0xff] %v2034_v18  ;;  %v1901_v25 = vmul.f32 0.5, %v2769_v21  ;;  %v1175_v26 = vpop.f32.mrf.mxu0 }
 0x1be   :  { %v1447_v27 = vpop.f32.mrf.mxu1  ;;  %v1967_v28 = vadd.f32 0.5, %v1833_v22  ;;  %2782 = vtanh.f32 %v1569_v23  ;;  %v1176_v29 = vadd.f32 %v3565_v0, %v1175_v26 }
 0x1bf   :  { %v1448_v30 = vadd.f32 %v3565_v0, %v1447_v27  ;;  %v2771_v31 = vpop.eup %2770  ;;  %v2035_v32 = vadd.f32 0.5, %v1901_v25  ;;  %2784 = vtanh.f32 %v1637_v24  ;;  %v1177_v33 = vpop.f32.mrf.mxu0 }
 0x1c0   :  { %v1449_v34 = vpop.f32.mrf.mxu1  ;;  %v2773_v35 = vpop.eup %2772  ;;  %2101 = vst [vmem:[%s3925_s3 + $0x150] sm:$0xff] %v1967_v28  ;;  %v1834_v36 = vmul.f32 0.5, %v2771_v31  ;;  %v1570_v37 = vmul.f32 0.5, %v1176_v29 }
 0x1c1   :  { %v1638_v38 = vmul.f32 0.5, %v1448_v30  ;;  %2169 = vst [vmem:[%s3925_s3 + $0x370] sm:$0xff] %v2035_v32  ;;  %v1902_v39 = vmul.f32 0.5, %v2773_v35  ;;  %v1180_v40 = vpop.f32.mrf.mxu0 }
 0x1c2   :  { %v1452_v41 = vpop.f32.mrf.mxu1  ;;  %v1968_v42 = vadd.f32 0.5, %v1834_v36  ;;  %2786 = vtanh.f32 %v1570_v37  ;;  %v1181_v43 = vadd.f32 %v3565_v0, %v1180_v40 }
 0x1c3   :  { %v1453_v44 = vadd.f32 %v3565_v0, %v1452_v41  ;;  %v2775_v45 = vpop.eup %2774  ;;  %v2036_v46 = vadd.f32 0.5, %v1902_v39  ;;  %2788 = vtanh.f32 %v1638_v38  ;;  %v1182_v47 = vpop.f32.mrf.mxu0 }
 0x1c4   :  { %v1454_v48 = vpop.f32.mrf.mxu1  ;;  %v2777_v49 = vpop.eup %2776  ;;  %2102 = vst [vmem:[%s3925_s3 + $0x158] sm:$0xff] %v1968_v42  ;;  %v1835_v50 = vmul.f32 0.5, %v2775_v45  ;;  %v1571_v51 = vmul.f32 0.5, %v1181_v43 }
 0x1c5   :  { %v1639_v52 = vmul.f32 0.5, %v1453_v44  ;;  %2170 = vst [vmem:[%s3925_s3 + $0x378] sm:$0xff] %v2036_v46  ;;  %v1903_v53 = vmul.f32 0.5, %v2777_v49  ;;  %v1183_v54 = vpop.f32.mrf.mxu0 }
 0x1c6   :  { %v1455_v56 = vpop.f32.mrf.mxu1  ;;  %v1969_v57 = vadd.f32 0.5, %v1835_v50  ;;  %2790 = vtanh.f32 %v1571_v51  ;;  %v1184_v58 = vadd.f32 %v3565_v0, %v1183_v54 }
 0x1c7   :  { %v1456_v59 = vadd.f32 %v3565_v0, %v1455_v56  ;;  %v2779_v60 = vpop.eup %2778  ;;  %v2037_v61 = vadd.f32 0.5, %v1903_v53  ;;  %2792 = vtanh.f32 %v1639_v52  ;;  %v1185_v62 = vpop.f32.mrf.mxu0 }
 0x1c8   :  { %v1457_v55 = vpop.f32.mrf.mxu1  ;;  %v2781_v63 = vpop.eup %2780  ;;  %2103 = vst [vmem:[%s3925_s3 + $0x160] sm:$0xff] %v1969_v57  ;;  %v1836_v1 = vmul.f32 0.5, %v2779_v60  ;;  %v1572_v2 = vmul.f32 0.5, %v1184_v58 }
 0x1c9   :  { %v1640_v3 = vmul.f32 0.5, %v1456_v59  ;;  %2171 = vst [vmem:[%s3925_s3 + $0x380] sm:$0xff] %v2037_v61  ;;  %v1904_v4 = vmul.f32 0.5, %v2781_v63  ;;  %v1188_v5 = vpop.f32.mrf.mxu0 }
 0x1ca   :  { %v1460_v6 = vpop.f32.mrf.mxu1  ;;  %v1970_v7 = vadd.f32 0.5, %v1836_v1  ;;  %2794 = vtanh.f32 %v1572_v2  ;;  %v1189_v8 = vadd.f32 %v3565_v0, %v1188_v5 }
 0x1cb   :  { %v1461_v9 = vadd.f32 %v3565_v0, %v1460_v6  ;;  %v2783_v10 = vpop.eup %2782  ;;  %v2038_v11 = vadd.f32 0.5, %v1904_v4  ;;  %2796 = vtanh.f32 %v1640_v3  ;;  %v1190_v12 = vpop.f32.mrf.mxu0 }
 0x1cc   :  { %v1462_v13 = vpop.f32.mrf.mxu1  ;;  %v2785_v14 = vpop.eup %2784  ;;  %2104 = vst [vmem:[%s3925_s3 + $0x168] sm:$0xff] %v1970_v7  ;;  %v1837_v15 = vmul.f32 0.5, %v2783_v10  ;;  %v1573_v16 = vmul.f32 0.5, %v1189_v8 }
 0x1cd   :  { %v1641_v17 = vmul.f32 0.5, %v1461_v9  ;;  %2172 = vst [vmem:[%s3925_s3 + $0x388] sm:$0xff] %v2038_v11  ;;  %v1905_v18 = vmul.f32 0.5, %v2785_v14  ;;  %v1191_v19 = vpop.f32.mrf.mxu0 }
 0x1ce   :  { %v1463_v20 = vpop.f32.mrf.mxu1  ;;  %v1971_v21 = vadd.f32 0.5, %v1837_v15  ;;  %2798 = vtanh.f32 %v1573_v16  ;;  %v1192_v22 = vadd.f32 %v3565_v0, %v1191_v19 }
 0x1cf   :  { %v1464_v23 = vadd.f32 %v3565_v0, %v1463_v20  ;;  %v2787_v24 = vpop.eup %2786  ;;  %v2039_v25 = vadd.f32 0.5, %v1905_v18  ;;  %2800 = vtanh.f32 %v1641_v17  ;;  %v1193_v26 = vpop.f32.mrf.mxu0 }
 0x1d0   :  { %v1465_v27 = vpop.f32.mrf.mxu1  ;;  %v2789_v28 = vpop.eup %2788  ;;  %2105 = vst [vmem:[%s3925_s3 + $0x170] sm:$0xff] %v1971_v21  ;;  %v1838_v29 = vmul.f32 0.5, %v2787_v24  ;;  %v1574_v30 = vmul.f32 0.5, %v1192_v22 }
 0x1d1   :  { %v1642_v31 = vmul.f32 0.5, %v1464_v23  ;;  %2173 = vst [vmem:[%s3925_s3 + $0x390] sm:$0xff] %v2039_v25  ;;  %v1906_v32 = vmul.f32 0.5, %v2789_v28  ;;  %v1196_v33 = vpop.f32.mrf.mxu0  ;;  %v3802_v28 = vld [vmem:[%s3924_s2] ss:$0 sm:$0xff] }
 0x1d2   :  { %v1468_v34 = vpop.f32.mrf.mxu1  ;;  %v1972_v35 = vadd.f32 0.5, %v1838_v29  ;;  %2802 = vtanh.f32 %v1574_v30  ;;  %v1197_v36 = vadd.f32 %v3565_v0, %v1196_v33 }
 0x1d3   :  { %v1469_v37 = vadd.f32 %v3565_v0, %v1468_v34  ;;  %v2791_v38 = vpop.eup %2790  ;;  %v2040_v39 = vadd.f32 0.5, %v1906_v32  ;;  %2804 = vtanh.f32 %v1642_v31  ;;  %v1198_v40 = vpop.f32.mrf.mxu0 }
 0x1d4   :  { %v1470_v41 = vpop.f32.mrf.mxu1  ;;  %v2793_v42 = vpop.eup %2792  ;;  %2106 = vst [vmem:[%s3925_s3 + $0x178] sm:$0xff] %v1972_v35  ;;  %v1839_v43 = vmul.f32 0.5, %v2791_v38  ;;  %v1575_v44 = vmul.f32 0.5, %v1197_v36 }
 0x1d5   :  { %v1643_v45 = vmul.f32 0.5, %v1469_v37  ;;  %2174 = vst [vmem:[%s3925_s3 + $0x398] sm:$0xff] %v2040_v39  ;;  %v1907_v46 = vmul.f32 0.5, %v2793_v42  ;;  %v1199_v47 = vpop.f32.mrf.mxu0 }
 0x1d6   :  { %v1471_v48 = vpop.f32.mrf.mxu1  ;;  %v1973_v49 = vadd.f32 0.5, %v1839_v43  ;;  %2806 = vtanh.f32 %v1575_v44  ;;  %v1200_v50 = vadd.f32 %v3565_v0, %v1199_v47 }
 0x1d7   :  { %v1472_v51 = vadd.f32 %v3565_v0, %v1471_v48  ;;  %v2795_v52 = vpop.eup %2794  ;;  %v2041_v53 = vadd.f32 0.5, %v1907_v46  ;;  %2808 = vtanh.f32 %v1643_v45  ;;  %v1201_v54 = vpop.f32.mrf.mxu0 }
 0x1d8   :  { %v1473_v56 = vpop.f32.mrf.mxu1  ;;  %v2797_v57 = vpop.eup %2796  ;;  %2107 = vst [vmem:[%s3925_s3 + $0x180] sm:$0xff] %v1973_v49  ;;  %v1840_v58 = vmul.f32 0.5, %v2795_v52  ;;  %v1576_v59 = vmul.f32 0.5, %v1200_v50 }
 0x1d9   :  { %v1644_v60 = vmul.f32 0.5, %v1472_v51  ;;  %2175 = vst [vmem:[%s3925_s3 + $0x3a0] sm:$0xff] %v2041_v53  ;;  %v1908_v61 = vmul.f32 0.5, %v2797_v57  ;;  %v1204_v62 = vpop.f32.mrf.mxu0 }
 0x1da   :  { %v1476_v55 = vpop.f32.mrf.mxu1  ;;  %v1974_v63 = vadd.f32 0.5, %v1840_v58  ;;  %2810 = vtanh.f32 %v1576_v59  ;;  %v1205_v1 = vadd.f32 %v3565_v0, %v1204_v62 }
 0x1db   :  { %v1477_v2 = vadd.f32 %v3565_v0, %v1476_v55  ;;  %v2799_v3 = vpop.eup %2798  ;;  %v2042_v4 = vadd.f32 0.5, %v1908_v61  ;;  %2812 = vtanh.f32 %v1644_v60  ;;  %v1206_v5 = vpop.f32.mrf.mxu0 }
 0x1dc   :  { %v1478_v6 = vpop.f32.mrf.mxu1  ;;  %v2801_v7 = vpop.eup %2800  ;;  %2108 = vst [vmem:[%s3925_s3 + $0x188] sm:$0xff] %v1974_v63  ;;  %v1841_v8 = vmul.f32 0.5, %v2799_v3  ;;  %v1577_v9 = vmul.f32 0.5, %v1205_v1 }
 0x1dd   :  { %v1645_v10 = vmul.f32 0.5, %v1477_v2  ;;  %2176 = vst [vmem:[%s3925_s3 + $0x3a8] sm:$0xff] %v2042_v4  ;;  %v1909_v11 = vmul.f32 0.5, %v2801_v7  ;;  %v1207_v12 = vpop.f32.mrf.mxu0 }
 0x1de   :  { %v1479_v13 = vpop.f32.mrf.mxu1  ;;  %v1975_v14 = vadd.f32 0.5, %v1841_v8  ;;  %2814 = vtanh.f32 %v1577_v9  ;;  %v1208_v15 = vadd.f32 %v3565_v0, %v1207_v12 }
 0x1df   :  { %v1480_v16 = vadd.f32 %v3565_v0, %v1479_v13  ;;  %v2803_v17 = vpop.eup %2802  ;;  %v2043_v18 = vadd.f32 0.5, %v1909_v11  ;;  %2816 = vtanh.f32 %v1645_v10  ;;  %v1209_v19 = vpop.f32.mrf.mxu0 }
 0x1e0   :  { %v1481_v20 = vpop.f32.mrf.mxu1  ;;  %v2805_v21 = vpop.eup %2804  ;;  %2109 = vst [vmem:[%s3925_s3 + $0x190] sm:$0xff] %v1975_v14  ;;  %v1842_v22 = vmul.f32 0.5, %v2803_v17  ;;  %v1578_v23 = vmul.f32 0.5, %v1208_v15 }
 0x1e1   :  { %v1646_v24 = vmul.f32 0.5, %v1480_v16  ;;  %2177 = vst [vmem:[%s3925_s3 + $0x3b0] sm:$0xff] %v2043_v18  ;;  %v1910_v25 = vmul.f32 0.5, %v2805_v21  ;;  %v1212_v26 = vpop.f32.mrf.mxu0 }
 0x1e2   :  { %v1484_v0 = vpop.f32.mrf.mxu1  ;;  %v1976_v27 = vadd.f32 0.5, %v1842_v22  ;;  %2818 = vtanh.f32 %v1578_v23  ;;  %v1213_v29 = vadd.f32 %v3802_v28, %v1212_v26 }
 0x1e3   :  { %v1485_v30 = vadd.f32 %v3802_v28, %v1484_v0  ;;  %v2807_v31 = vpop.eup %2806  ;;  %v2044_v32 = vadd.f32 0.5, %v1910_v25  ;;  %2820 = vtanh.f32 %v1646_v24  ;;  %v1214_v33 = vpop.f32.mrf.mxu0 }
 0x1e4   :  { %v1486_v34 = vpop.f32.mrf.mxu1  ;;  %v2809_v35 = vpop.eup %2808  ;;  %2110 = vst [vmem:[%s3925_s3 + $0x198] sm:$0xff] %v1976_v27  ;;  %v1843_v36 = vmul.f32 0.5, %v2807_v31  ;;  %v1579_v37 = vmul.f32 0.5, %v1213_v29 }
 0x1e5   :  { %v1647_v38 = vmul.f32 0.5, %v1485_v30  ;;  %2178 = vst [vmem:[%s3925_s3 + $0x3b8] sm:$0xff] %v2044_v32  ;;  %v1911_v39 = vmul.f32 0.5, %v2809_v35  ;;  %v1215_v40 = vpop.f32.mrf.mxu0 }
 0x1e6   :  { %v1487_v41 = vpop.f32.mrf.mxu1  ;;  %v1977_v42 = vadd.f32 0.5, %v1843_v36  ;;  %2822 = vtanh.f32 %v1579_v37  ;;  %v1216_v43 = vadd.f32 %v3802_v28, %v1215_v40 }
 0x1e7   :  { %v1488_v44 = vadd.f32 %v3802_v28, %v1487_v41  ;;  %v2811_v45 = vpop.eup %2810  ;;  %v2045_v46 = vadd.f32 0.5, %v1911_v39  ;;  %2824 = vtanh.f32 %v1647_v38  ;;  %v1217_v47 = vpop.f32.mrf.mxu0 }
 0x1e8   :  { %v1489_v48 = vpop.f32.mrf.mxu1  ;;  %v2813_v49 = vpop.eup %2812  ;;  %2111 = vst [vmem:[%s3925_s3 + $0x1a0] sm:$0xff] %v1977_v42  ;;  %v1844_v50 = vmul.f32 0.5, %v2811_v45  ;;  %v1580_v51 = vmul.f32 0.5, %v1216_v43 }
 0x1e9   :  { %v1648_v52 = vmul.f32 0.5, %v1488_v44  ;;  %2179 = vst [vmem:[%s3925_s3 + $0x3c0] sm:$0xff] %v2045_v46  ;;  %v1912_v53 = vmul.f32 0.5, %v2813_v49  ;;  %v1220_v54 = vpop.f32.mrf.mxu0 }
 0x1ea   :  { %v1492_v56 = vpop.f32.mrf.mxu1  ;;  %v1978_v57 = vadd.f32 0.5, %v1844_v50  ;;  %2826 = vtanh.f32 %v1580_v51  ;;  %v1221_v58 = vadd.f32 %v3802_v28, %v1220_v54 }
 0x1eb   :  { %v1493_v59 = vadd.f32 %v3802_v28, %v1492_v56  ;;  %v2815_v60 = vpop.eup %2814  ;;  %v2046_v61 = vadd.f32 0.5, %v1912_v53  ;;  %2828 = vtanh.f32 %v1648_v52  ;;  %v1222_v62 = vpop.f32.mrf.mxu0 }
 0x1ec   :  { %v1494_v55 = vpop.f32.mrf.mxu1  ;;  %v2817_v63 = vpop.eup %2816  ;;  %2112 = vst [vmem:[%s3925_s3 + $0x1a8] sm:$0xff] %v1978_v57  ;;  %v1845_v1 = vmul.f32 0.5, %v2815_v60  ;;  %v1581_v2 = vmul.f32 0.5, %v1221_v58 }
 0x1ed   :  { %v1649_v3 = vmul.f32 0.5, %v1493_v59  ;;  %2180 = vst [vmem:[%s3925_s3 + $0x3c8] sm:$0xff] %v2046_v61  ;;  %v1913_v4 = vmul.f32 0.5, %v2817_v63  ;;  %v1223_v5 = vpop.f32.mrf.mxu0 }
 0x1ee   :  { %v1495_v6 = vpop.f32.mrf.mxu1  ;;  %v1979_v7 = vadd.f32 0.5, %v1845_v1  ;;  %2830 = vtanh.f32 %v1581_v2  ;;  %v1224_v8 = vadd.f32 %v3802_v28, %v1223_v5 }
 0x1ef   :  { %v1496_v9 = vadd.f32 %v3802_v28, %v1495_v6  ;;  %v2819_v10 = vpop.eup %2818  ;;  %v2047_v11 = vadd.f32 0.5, %v1913_v4  ;;  %2832 = vtanh.f32 %v1649_v3  ;;  %v1225_v12 = vpop.f32.mrf.mxu0 }
 0x1f0   :  { %v1497_v13 = vpop.f32.mrf.mxu1  ;;  %v2821_v14 = vpop.eup %2820  ;;  %2113 = vst [vmem:[%s3925_s3 + $0x1b0] sm:$0xff] %v1979_v7  ;;  %v1846_v15 = vmul.f32 0.5, %v2819_v10  ;;  %v1582_v16 = vmul.f32 0.5, %v1224_v8 }
 0x1f1   :  { %v1650_v17 = vmul.f32 0.5, %v1496_v9  ;;  %2181 = vst [vmem:[%s3925_s3 + $0x3d0] sm:$0xff] %v2047_v11  ;;  %v1914_v18 = vmul.f32 0.5, %v2821_v14  ;;  %v1228_v19 = vpop.f32.mrf.mxu0 }
 0x1f2   :  { %v1500_v20 = vpop.f32.mrf.mxu1  ;;  %v1980_v21 = vadd.f32 0.5, %v1846_v15  ;;  %2834 = vtanh.f32 %v1582_v16  ;;  %v1229_v22 = vadd.f32 %v3802_v28, %v1228_v19 }
 0x1f3   :  { %v1501_v23 = vadd.f32 %v3802_v28, %v1500_v20  ;;  %v2823_v24 = vpop.eup %2822  ;;  %v2048_v25 = vadd.f32 0.5, %v1914_v18  ;;  %2836 = vtanh.f32 %v1650_v17  ;;  %v1230_v26 = vpop.f32.mrf.mxu0 }
 0x1f4   :  { %v1502_v0 = vpop.f32.mrf.mxu1  ;;  %v2825_v27 = vpop.eup %2824  ;;  %2114 = vst [vmem:[%s3925_s3 + $0x1b8] sm:$0xff] %v1980_v21  ;;  %v1847_v29 = vmul.f32 0.5, %v2823_v24  ;;  %v1583_v30 = vmul.f32 0.5, %v1229_v22 }
 0x1f5   :  { %v1651_v31 = vmul.f32 0.5, %v1501_v23  ;;  %2182 = vst [vmem:[%s3925_s3 + $0x3d8] sm:$0xff] %v2048_v25  ;;  %v1915_v32 = vmul.f32 0.5, %v2825_v27  ;;  %v1231_v33 = vpop.f32.mrf.mxu0 }
 0x1f6   :  { %v1503_v34 = vpop.f32.mrf.mxu1  ;;  %v1981_v35 = vadd.f32 0.5, %v1847_v29  ;;  %2838 = vtanh.f32 %v1583_v30  ;;  %v1232_v36 = vadd.f32 %v3802_v28, %v1231_v33 }
 0x1f7   :  { %v1504_v37 = vadd.f32 %v3802_v28, %v1503_v34  ;;  %v2827_v38 = vpop.eup %2826  ;;  %v2049_v39 = vadd.f32 0.5, %v1915_v32  ;;  %2840 = vtanh.f32 %v1651_v31  ;;  %v1233_v40 = vpop.f32.mrf.mxu0 }
 0x1f8   :  { %v1505_v41 = vpop.f32.mrf.mxu1  ;;  %v2829_v42 = vpop.eup %2828  ;;  %2115 = vst [vmem:[%s3925_s3 + $0x1c0] sm:$0xff] %v1981_v35  ;;  %v1848_v43 = vmul.f32 0.5, %v2827_v38  ;;  %v1584_v44 = vmul.f32 0.5, %v1232_v36 }
 0x1f9   :  { %v1652_v45 = vmul.f32 0.5, %v1504_v37  ;;  %2183 = vst [vmem:[%s3925_s3 + $0x3e0] sm:$0xff] %v2049_v39  ;;  %v1916_v46 = vmul.f32 0.5, %v2829_v42  ;;  %v1236_v47 = vpop.f32.mrf.mxu0 }
 0x1fa   :  { %v1508_v48 = vpop.f32.mrf.mxu1  ;;  %v1982_v49 = vadd.f32 0.5, %v1848_v43  ;;  %2842 = vtanh.f32 %v1584_v44  ;;  %v1237_v50 = vadd.f32 %v3802_v28, %v1236_v47 }
 0x1fb   :  { %v1509_v51 = vadd.f32 %v3802_v28, %v1508_v48  ;;  %v2831_v52 = vpop.eup %2830  ;;  %v2050_v53 = vadd.f32 0.5, %v1916_v46  ;;  %2844 = vtanh.f32 %v1652_v45  ;;  %v1238_v54 = vpop.f32.mrf.mxu0 }
 0x1fc   :  { %v1510_v56 = vpop.f32.mrf.mxu1  ;;  %v2833_v57 = vpop.eup %2832  ;;  %2116 = vst [vmem:[%s3925_s3 + $0x1c8] sm:$0xff] %v1982_v49  ;;  %v1849_v58 = vmul.f32 0.5, %v2831_v52  ;;  %v1585_v59 = vmul.f32 0.5, %v1237_v50 }
 0x1fd   :  { %v1653_v60 = vmul.f32 0.5, %v1509_v51  ;;  %2184 = vst [vmem:[%s3925_s3 + $0x3e8] sm:$0xff] %v2050_v53  ;;  %v1917_v61 = vmul.f32 0.5, %v2833_v57  ;;  %v1239_v62 = vpop.f32.mrf.mxu0 }
 0x1fe   :  { %v1511_v55 = vpop.f32.mrf.mxu1  ;;  %v1983_v63 = vadd.f32 0.5, %v1849_v58  ;;  %2846 = vtanh.f32 %v1585_v59  ;;  %v1240_v1 = vadd.f32 %v3802_v28, %v1239_v62 }
 0x1ff   :  { %v1512_v2 = vadd.f32 %v3802_v28, %v1511_v55  ;;  %v2835_v3 = vpop.eup %2834  ;;  %v2051_v4 = vadd.f32 0.5, %v1917_v61  ;;  %2848 = vtanh.f32 %v1653_v60  ;;  %v1241_v5 = vpop.f32.mrf.mxu0 }
 0x200   :  { %v1513_v6 = vpop.f32.mrf.mxu1  ;;  %v2837_v7 = vpop.eup %2836  ;;  %2117 = vst [vmem:[%s3925_s3 + $0x1d0] sm:$0xff] %v1983_v63  ;;  %v1850_v8 = vmul.f32 0.5, %v2835_v3  ;;  %v1586_v9 = vmul.f32 0.5, %v1240_v1 }
 0x201   :  { %v1654_v10 = vmul.f32 0.5, %v1512_v2  ;;  %2185 = vst [vmem:[%s3925_s3 + $0x3f0] sm:$0xff] %v2051_v4  ;;  %v1918_v11 = vmul.f32 0.5, %v2837_v7  ;;  %v1244_v12 = vpop.f32.mrf.mxu0 }
 0x202   :  { %v1516_v13 = vpop.f32.mrf.mxu1  ;;  %v1984_v14 = vadd.f32 0.5, %v1850_v8  ;;  %2850 = vtanh.f32 %v1586_v9  ;;  %v1245_v15 = vadd.f32 %v3802_v28, %v1244_v12 }
 0x203   :  { %v1517_v16 = vadd.f32 %v3802_v28, %v1516_v13  ;;  %v2839_v17 = vpop.eup %2838  ;;  %v2052_v18 = vadd.f32 0.5, %v1918_v11  ;;  %2852 = vtanh.f32 %v1654_v10  ;;  %v1246_v19 = vpop.f32.mrf.mxu0 }
 0x204   :  { %v1518_v20 = vpop.f32.mrf.mxu1  ;;  %v2841_v21 = vpop.eup %2840  ;;  %2118 = vst [vmem:[%s3925_s3 + $0x1d8] sm:$0xff] %v1984_v14  ;;  %v1851_v22 = vmul.f32 0.5, %v2839_v17  ;;  %v1587_v23 = vmul.f32 0.5, %v1245_v15 }
 0x205   :  { %v1655_v24 = vmul.f32 0.5, %v1517_v16  ;;  %2186 = vst [vmem:[%s3925_s3 + $0x3f8] sm:$0xff] %v2052_v18  ;;  %v1919_v25 = vmul.f32 0.5, %v2841_v21  ;;  %v1247_v26 = vpop.f32.mrf.mxu0 }
 0x206   :  { %v1519_v0 = vpop.f32.mrf.mxu1  ;;  %v1985_v27 = vadd.f32 0.5, %v1851_v22  ;;  %2854 = vtanh.f32 %v1587_v23  ;;  %v1248_v29 = vadd.f32 %v3802_v28, %v1247_v26 }
 0x207   :  { %v1520_v30 = vadd.f32 %v3802_v28, %v1519_v0  ;;  %v2843_v31 = vpop.eup %2842  ;;  %v2053_v32 = vadd.f32 0.5, %v1919_v25  ;;  %2856 = vtanh.f32 %v1655_v24  ;;  %v1249_v33 = vpop.f32.mrf.mxu0 }
 0x208   :  { %v1521_v34 = vpop.f32.mrf.mxu1  ;;  %v2845_v35 = vpop.eup %2844  ;;  %2119 = vst [vmem:[%s3925_s3 + $0x1e0] sm:$0xff] %v1985_v27  ;;  %v1852_v36 = vmul.f32 0.5, %v2843_v31  ;;  %v1588_v37 = vmul.f32 0.5, %v1248_v29 }
 0x209   :  { %v1656_v38 = vmul.f32 0.5, %v1520_v30  ;;  %2187 = vst [vmem:[%s3925_s3 + $0x400] sm:$0xff] %v2053_v32  ;;  %v1920_v39 = vmul.f32 0.5, %v2845_v35  ;;  %v1252_v40 = vpop.f32.mrf.mxu0 }
 0x20a   :  { %v1986_v41 = vadd.f32 0.5, %v1852_v36  ;;  %2858 = vtanh.f32 %v1588_v37  ;;  %v1253_v42 = vadd.f32 %v3802_v28, %v1252_v40 }
 0x20b   :  { %v2847_v43 = vpop.eup %2846  ;;  %v2054_v44 = vadd.f32 0.5, %v1920_v39  ;;  %2860 = vtanh.f32 %v1656_v38  ;;  %v1254_v45 = vpop.f32.mrf.mxu0 }
 0x20c   :  { %v2849_v46 = vpop.eup %2848  ;;  %2120 = vst [vmem:[%s3925_s3 + $0x1e8] sm:$0xff] %v1986_v41  ;;  %v1853_v47 = vmul.f32 0.5, %v2847_v43  ;;  %v1589_v48 = vmul.f32 0.5, %v1253_v42 }
 0x20d   :  { %2188 = vst [vmem:[%s3925_s3 + $0x408] sm:$0xff] %v2054_v44  ;;  %v1921_v49 = vmul.f32 0.5, %v2849_v46  ;;  %v1255_v50 = vpop.f32.mrf.mxu0 }
 0x20e   :  { %v1987_v51 = vadd.f32 0.5, %v1853_v47  ;;  %2862 = vtanh.f32 %v1589_v48  ;;  %v1256_v52 = vadd.f32 %v3802_v28, %v1255_v50 }
 0x20f   :  { %v2851_v53 = vpop.eup %2850  ;;  %v2055_v54 = vadd.f32 0.5, %v1921_v49  ;;  %v1257_v56 = vpop.f32.mrf.mxu0 }
 0x210   :  { %v2853_v57 = vpop.eup %2852  ;;  %2121 = vst [vmem:[%s3925_s3 + $0x1f0] sm:$0xff] %v1987_v51  ;;  %v1854_v58 = vmul.f32 0.5, %v2851_v53  ;;  %v1590_v59 = vmul.f32 0.5, %v1256_v52 }
 0x211   :  { %2189 = vst [vmem:[%s3925_s3 + $0x410] sm:$0xff] %v2055_v54  ;;  %v1922_v60 = vmul.f32 0.5, %v2853_v57 }
 0x212   :  { %v1988_v61 = vadd.f32 0.5, %v1854_v58  ;;  %2864 = vtanh.f32 %v1590_v59 }
 0x213   :  { %v2855_v62 = vpop.eup %2854  ;;  %v2056_v55 = vadd.f32 0.5, %v1922_v60 }
 0x214   :  { %v2857_v28 = vpop.eup %2856  ;;  %2122 = vst [vmem:[%s3925_s3 + $0x1f8] sm:$0xff] %v1988_v61  ;;  %v1855_v63 = vmul.f32 0.5, %v2855_v62 }
 0x215   :  { %2190 = vst [vmem:[%s3925_s3 + $0x418] sm:$0xff] %v2056_v55  ;;  %v1923_v1 = vmul.f32 0.5, %v2857_v28 }
 0x216   :  { %v1989_v2 = vadd.f32 0.5, %v1855_v63 }
 0x217   :  { %v2859_v3 = vpop.eup %2858  ;;  %v2057_v4 = vadd.f32 0.5, %v1923_v1 }
 0x218   :  { %v2861_v5 = vpop.eup %2860  ;;  %2123 = vst [vmem:[%s3925_s3 + $0x200] sm:$0xff] %v1989_v2  ;;  %v1856_v6 = vmul.f32 0.5, %v2859_v3 }
 0x219   :  { %2191 = vst [vmem:[%s3925_s3 + $0x420] sm:$0xff] %v2057_v4  ;;  %v1924_v7 = vmul.f32 0.5, %v2861_v5 }
 0x21a   :  { %v1990_v8 = vadd.f32 0.5, %v1856_v6 }
 0x21b   :  { %v2863_v9 = vpop.eup %2862  ;;  %v2058_v10 = vadd.f32 0.5, %v1924_v7 }
 0x21c   :  { %2124 = vst [vmem:[%s3925_s3 + $0x208] sm:$0xff] %v1990_v8  ;;  %v1857_v11 = vmul.f32 0.5, %v2863_v9 }
 0x21d   :  { %2192 = vst [vmem:[%s3925_s3 + $0x428] sm:$0xff] %v2058_v10 }
 0x21e   :  { %v1991_v12 = vadd.f32 0.5, %v1857_v11 }
 0x21f   :  { %v2865_v13 = vpop.eup %2864 }
 0x220   :  { %2125 = vst [vmem:[%s3925_s3 + $0x210] sm:$0xff] %v1991_v12  ;;  %v1858_v14 = vmul.f32 0.5, %v2865_v13 }
 0x222   :  { %v1992_v15 = vadd.f32 0.5, %v1858_v14 }
 0x224   :  { %2126 = vst [vmem:[%s3925_s3 + $0x218] sm:$0xff] %v1992_v15 }

</bundles_post_ra>
